<compile_context>
chip_gen: v5e
topology: v5e:2x2
jax: 0.10.0
libtpu: 0.0.40
codegen_flags: <defaults>
</compile_context>

<pallas_src>
import math
import numpy as np
import jax
import jax.numpy as jnp
from jax.experimental import pallas as pl
from jax.experimental.pallas import tpu as pltpu

EMBED_DIM = 256      # embed_dim of the module (default)
KV_DIM = 1280        # hard-coded time_emb feature dim in the module
NUM_HEADS = 4
HEAD_DIM = EMBED_DIM // NUM_HEADS
OUT_DIM = 256        # out_dim of the module (default)
LN_EPS = 1e-5


def _layernorm(x, g, b):
    mu = jnp.mean(x, axis=-1, keepdims=True)
    var = jnp.mean((x - mu) * (x - mu), axis=-1, keepdims=True)
    return (x - mu) * jax.lax.rsqrt(var + LN_EPS) * g + b


def location_encoder_kernel(
    loc_ref, time_ref,
    wq_ref, wkv_ref,                      # fused embed+in-proj weights, bf16: (E,E), (F,2E)
    bq_ref, bkv_ref,                      # in-proj biases, f32: (1,E), (1,2E)
    ow_ref, ob_ref,                       # out-proj weight bf16 (E,E) / bias f32 (1,E)
    g1_ref, b1_ref, g2_ref, b2_ref,       # LayerNorm params, f32, (1,E)
    ffw_ref, zw_ref,                      # ff weight bf16 (E,E), ff_zero weight bf16 (E,OUT)
    out_ref, zero_out_ref,
):
    f32 = jnp.float32
    bf16 = jnp.bfloat16
    BT, Lq, E = loc_ref.shape
    _, Lk, F = time_ref.shape
    M = BT * Lq

    loc = loc_ref[...].reshape(M, E)              # (M, E)     f32 (also the residual)
    tim = time_ref[...].reshape(BT * Lk, F)       # (BT*Lk, F) bf16 (cast outside the kernel)

    # Fused projections (q/k/v embeds folded into the MHA in-proj, scale folded into q).
    # One matmul for Q, ONE matmul for K|V together; bf16 inputs, f32 accumulation.
    qp = jnp.dot(loc.astype(bf16), wq_ref[...], preferred_element_type=f32) + bq_ref[...]
    kvp = jnp.dot(tim, wkv_ref[...], preferred_element_type=f32) + bkv_ref[...]
    kp = kvp[:, :E]                               # 256-lane split -> clean vreg boundary
    vp = kvp[:, E:]

    qp3 = qp.reshape(BT, Lq, E)
    kp3 = kp.reshape(BT, Lk, E)
    vp3 = vp.reshape(BT, Lk, E)

    # Per-head attention (unrolled over the 4 heads; each einsum is a single-batch-dim
    # MXU matmul).  Head outputs are lane-concatenated once so the out-projection runs
    # as a single full-width K=256 matmul instead of four K=64 ones.
    heads = []
    for h in range(NUM_HEADS):
        lo = h * HEAD_DIM
        hi = lo + HEAD_DIM
        qh = qp3[:, :, lo:hi].astype(bf16)        # scale already folded into wq/bq
        kh = kp3[:, :, lo:hi].astype(bf16)
        vh = vp3[:, :, lo:hi].astype(bf16)

        s = jnp.einsum("bqd,bkd->bqk", qh, kh, preferred_element_type=f32)
        s = s - jnp.max(s, axis=-1, keepdims=True)
        p = jnp.exp(s)                            # f32 softmax
        p = p * pl.reciprocal(jnp.sum(p, axis=-1, keepdims=True), approx=True)

        o = jnp.einsum("bqk,bkd->bqd", p.astype(bf16), vh, preferred_element_type=f32)
        heads.append(o.reshape(M, HEAD_DIM))

    o_cat = jnp.concatenate(heads, axis=-1).astype(bf16)               # (M, E)
    attn = jnp.dot(o_cat, ow_ref[...], preferred_element_type=f32) + ob_ref[...]

    # x = norm1(attn) + loc_emb ; x = norm2(ff(x)) + x   (elementwise math stays f32)
    x1 = _layernorm(attn, g1_ref[...], b1_ref[...]) + loc
    ffx = jnp.dot(x1.astype(bf16), ffw_ref[...], preferred_element_type=f32)
    x2 = _layernorm(ffx, g2_ref[...], b2_ref[...]) + x1

    out_ref[...] = x2.reshape(BT, Lq, E)
    zero_out_ref[...] = jnp.dot(x2.astype(bf16), zw_ref[...],
                                preferred_element_type=f32).reshape(BT, Lq, OUT_DIM)


def _dual_tensorcore():
    """True only on chips with 2 TensorCores (v7x); v5e/v6e have one TC per chip."""
    try:
        kind = jax.devices()[0].device_kind.lower()
    except Exception:
        return False
    return "v7" in kind


def _pick_bt(B, Lq, target_m, keep_two_steps):
    """Largest divisor of B with BT*Lq <= target_m.  Only on dual-TC chips do we insist on
    >=2 grid steps so the 'parallel' batch axis can be split across cores; on single-TC
    chips fewer steps / bigger M always wins (per-step overhead ~0.35 us)."""
    divisors = [d for d in range(1, B + 1) if B % d == 0]
    fits = [d for d in divisors if d * Lq <= target_m] or [1]
    bt = fits[-1]
    if keep_two_steps and B > 1 and B // bt < 2:
        smaller = [d for d in fits if B // d >= 2]
        if smaller:
            bt = smaller[-1]
    return bt


def prepare_params(p):
    """One-time (outside the per-call path): fold the bias-free q/k/v embeddings into the
    MHA in-projection, fold 1/sqrt(head_dim) into the query weight/bias, concatenate the
    K and V projections into a single (F, 2E) weight, pre-transpose everything to
    (in, out) layout, and cast matmul weights to bf16."""
    E = EMBED_DIM
    f32, bf16 = jnp.float32, jnp.bfloat16
    scale = 1.0 / math.sqrt(HEAD_DIM)

    iqw, ikw, ivw = jnp.split(p["in_proj_w"], 3, axis=0)
    iqb, ikb, ivb = jnp.split(p["in_proj_b"], 3, axis=0)

    wq = (p["wq"].T @ iqw.T) * scale                      # (E, E), scale folded (exact)
    bq = iqb * scale
    wk = p["wk"].T @ ikw.T                                # (F, E)
    wv = p["wv"].T @ ivw.T                                # (F, E)
    wkv = jnp.concatenate([wk, wv], axis=1)               # (F, 2E) fused K|V projection
    bkv = jnp.concatenate([ikb, ivb]).reshape(1, 2 * E)

    return {
        "wq": wq.astype(bf16),
        "wkv": wkv.astype(bf16),
        "bq": bq.reshape(1, E).astype(f32),
        "bkv": bkv.astype(f32),
        "ow": p["out_w"].T.astype(bf16),                  # plain (E, E)
        "ob": p["out_b"].reshape(1, E).astype(f32),
        "g1": p["g1"].reshape(1, E).astype(f32),
        "b1": p["b1"].reshape(1, E).astype(f32),
        "g2": p["g2"].reshape(1, E).astype(f32),
        "b2": p["b2"].reshape(1, E).astype(f32),
        "ffw": p["ff_w"].T.astype(bf16),                  # (E, E)
        "zw": p["ffz_w"].T.astype(bf16),                  # (E, OUT_DIM)
    }


def _const_spec(shape):
    zeros = (0,) * len(shape)
    return pl.BlockSpec(shape, lambda b: zeros)


def location_encoder(loc_emb, time_emb, pp, block_batch=None):
    B, Lq, E = loc_emb.shape
    _, Lk, F = time_emb.shape
    assert E == EMBED_DIM and F == KV_DIM

    dual = _dual_tensorcore()
    target_m = 512 if dual else 256
    BT = block_batch if block_batch is not None else _pick_bt(B, Lq, target_m, dual)
    assert B % BT == 0

    # Ship the largest activation (time_emb, F=1280) as bf16: the matmul consumes bf16
    # anyway, and this halves the dominant HBM->VMEM transfer.  loc_emb stays f32 because
    # it also feeds the f32 residual add.
    time_bf16 = time_emb.astype(jnp.bfloat16)

    weight_names = ["wq", "wkv", "bq", "bkv", "ow", "ob",
                    "g1", "b1", "g2", "b2", "ffw", "zw"]
    weights = [pp[n] for n in weight_names]

    in_specs = [
        pl.BlockSpec((BT, Lq, E), lambda b: (b, 0, 0)),
        pl.BlockSpec((BT, Lk, F), lambda b: (b, 0, 0)),
    ] + [_const_spec(w.shape) for w in weights]

    out_specs = [
        pl.BlockSpec((BT, Lq, E), lambda b: (b, 0, 0)),
        pl.BlockSpec((BT, Lq, OUT_DIM), lambda b: (b, 0, 0)),
    ]
    out_shape = [
        jax.ShapeDtypeStruct((B, Lq, E), jnp.float32),
        jax.ShapeDtypeStruct((B, Lq, OUT_DIM), jnp.float32),
    ]

    return pl.pallas_call(
        location_encoder_kernel,
        grid=(B // BT,),
        in_specs=in_specs,
        out_specs=out_specs,
        out_shape=out_shape,
        compiler_params=pltpu.CompilerParams(dimension_semantics=("parallel",)),
    )(loc_emb, time_bf16, *weights)


def init_params(key):
    """Deterministic synthetic parameters with the same shapes as the PyTorch module."""
    ks = jax.random.split(key, 8)
    s = 0.02
    return {
        "wq": s * jax.random.normal(ks[0], (EMBED_DIM, EMBED_DIM), jnp.float32),
        "wk": s * jax.random.normal(ks[1], (EMBED_DIM, KV_DIM), jnp.float32),
        "wv": s * jax.random.normal(ks[2], (EMBED_DIM, KV_DIM), jnp.float32),
        "in_proj_w": s * jax.random.normal(ks[3], (3 * EMBED_DIM, EMBED_DIM), jnp.float32),
        "in_proj_b": s * jax.random.normal(ks[4], (3 * EMBED_DIM,), jnp.float32),
        "out_w": s * jax.random.normal(ks[5], (EMBED_DIM, EMBED_DIM), jnp.float32),
        "out_b": s * jax.random.normal(ks[6], (EMBED_DIM,), jnp.float32),
        "ff_w": s * jax.random.normal(ks[7], (EMBED_DIM, EMBED_DIM), jnp.float32),
        "ffz_w": jnp.zeros((OUT_DIM, EMBED_DIM), jnp.float32),   # zero_module
        "g1": jnp.ones((EMBED_DIM,), jnp.float32),
        "b1": jnp.zeros((EMBED_DIM,), jnp.float32),
        "g2": jnp.ones((EMBED_DIM,), jnp.float32),
        "b2": jnp.zeros((EMBED_DIM,), jnp.float32),
    }


def reference(loc_emb, time_emb, p):
    """Pure-numpy float64 replica of the (unfused) PyTorch forward for correctness checking."""
    pn = {k: np.asarray(v, np.float64) for k, v in p.items()}
    loc = np.asarray(loc_emb, np.float64)
    tim = np.asarray(time_emb, np.float64)

    def LN(x, g, b):
        mu = x.mean(-1, keepdims=True)
        var = ((x - mu) ** 2).mean(-1, keepdims=True)
        return (x - mu) / np.sqrt(var + LN_EPS) * g + b

    q0 = loc @ pn["wq"].T
    k0 = tim @ pn["wk"].T
    v0 = tim @ pn["wv"].T

    Wqi, Wki, Wvi = np.split(pn["in_proj_w"], 3, axis=0)
    bqi, bki, bvi = np.split(pn["in_proj_b"], 3, axis=0)
    qp = q0 @ Wqi.T + bqi
    kp = k0 @ Wki.T + bki
    vp = v0 @ Wvi.T + bvi

    B, Lq, E = qp.shape
    Lk = kp.shape[1]
    qh = qp.reshape(B, Lq, NUM_HEADS, HEAD_DIM).transpose(0, 2, 1, 3)
    kh = kp.reshape(B, Lk, NUM_HEADS, HEAD_DIM).transpose(0, 2, 1, 3)
    vh = vp.reshape(B, Lk, NUM_HEADS, HEAD_DIM).transpose(0, 2, 1, 3)
    s = qh @ kh.transpose(0, 1, 3, 2) / math.sqrt(HEAD_DIM)
    s = s - s.max(-1, keepdims=True)
    pr = np.exp(s)
    pr = pr / pr.sum(-1, keepdims=True)
    o = (pr @ vh).transpose(0, 2, 1, 3).reshape(B, Lq, E)
    attn = o @ pn["out_w"].T + pn["out_b"]

    x1 = LN(attn, pn["g1"], pn["b1"]) + loc
    x2 = LN(x1 @ pn["ff_w"].T, pn["g2"], pn["b2"]) + x1
    return x2, x2 @ pn["ffz_w"].T


if __name__ == "__main__":
    B, Lq, Lk = 8, 8, 8
    key = jax.random.PRNGKey(0)
    k_loc, k_time, k_params = jax.random.split(key, 3)

    loc_emb = jax.random.normal(k_loc, (B, Lq, EMBED_DIM), jnp.float32)
    time_emb = jax.random.normal(k_time, (B, Lk, KV_DIM), jnp.float32)
    params = init_params(k_params)

    prepared = prepare_params(params)        # fold / fuse / transpose / cast once, not per call
    x, x_zero = location_encoder(loc_emb, time_emb, prepared)
    jax.block_until_ready((x, x_zero))

    # bf16 matmul inputs (incl. bf16 time_emb) + approx reciprocal vs the f64 unfused
    # reference -> slightly wider tolerance than a pure-f32 kernel would need.
    x_ref, x_zero_ref = reference(loc_emb, time_emb, params)
    assert np.allclose(np.asarray(x), x_ref, atol=3e-2, rtol=3e-2), "x mismatch"
    assert np.allclose(np.asarray(x_zero), x_zero_ref, atol=3e-2, rtol=3e-2), "x_zero mismatch"

    print("KERNEL_OK")
</pallas_src>

<mosaic_0001>
module attributes {stable_mosaic.version = 11 : i64} {
  func.func @location_encoder_kernel(%arg0: i32, %arg1: memref<8x8x256xf32, #tpu.memory_space<vmem>>, %arg2: memref<8x8x1280xbf16, #tpu.memory_space<vmem>>, %arg3: memref<256x256xbf16, #tpu.memory_space<vmem>>, %arg4: memref<1280x512xbf16, #tpu.memory_space<vmem>>, %arg5: memref<1x256xf32, #tpu.memory_space<vmem>>, %arg6: memref<1x512xf32, #tpu.memory_space<vmem>>, %arg7: memref<256x256xbf16, #tpu.memory_space<vmem>>, %arg8: memref<1x256xf32, #tpu.memory_space<vmem>>, %arg9: memref<1x256xf32, #tpu.memory_space<vmem>>, %arg10: memref<1x256xf32, #tpu.memory_space<vmem>>, %arg11: memref<1x256xf32, #tpu.memory_space<vmem>>, %arg12: memref<1x256xf32, #tpu.memory_space<vmem>>, %arg13: memref<256x256xbf16, #tpu.memory_space<vmem>>, %arg14: memref<256x256xbf16, #tpu.memory_space<vmem>>, %arg15: memref<8x8x256xf32, #tpu.memory_space<vmem>>, %arg16: memref<8x8x256xf32, #tpu.memory_space<vmem>>) attributes {dimension_semantics = [#tpu.dimension_semantics<parallel>], iteration_bounds = array<i64: 1>, scalar_prefetch = 0 : i64, scratch_operands = 0 : i64, tpu.core_type = #tpu.core_type<tc>, window_params = [{transform_indices = @transform_0, window_bounds = array<i64: 8, 8, 256>}, {transform_indices = @transform_1, window_bounds = array<i64: 8, 8, 1280>}, {pipeline_mode = #tpu.pipeline_mode<synchronous>, transform_indices = @transform_2, window_bounds = array<i64: 256, 256>}, {pipeline_mode = #tpu.pipeline_mode<synchronous>, transform_indices = @transform_3, window_bounds = array<i64: 1280, 512>}, {pipeline_mode = #tpu.pipeline_mode<synchronous>, transform_indices = @transform_4, window_bounds = array<i64: 1, 256>}, {pipeline_mode = #tpu.pipeline_mode<synchronous>, transform_indices = @transform_5, window_bounds = array<i64: 1, 512>}, {pipeline_mode = #tpu.pipeline_mode<synchronous>, transform_indices = @transform_6, window_bounds = array<i64: 256, 256>}, {pipeline_mode = #tpu.pipeline_mode<synchronous>, transform_indices = @transform_7, window_bounds = array<i64: 1, 256>}, {pipeline_mode = #tpu.pipeline_mode<synchronous>, transform_indices = @transform_8, window_bounds = array<i64: 1, 256>}, {pipeline_mode = #tpu.pipeline_mode<synchronous>, transform_indices = @transform_9, window_bounds = array<i64: 1, 256>}, {pipeline_mode = #tpu.pipeline_mode<synchronous>, transform_indices = @transform_10, window_bounds = array<i64: 1, 256>}, {pipeline_mode = #tpu.pipeline_mode<synchronous>, transform_indices = @transform_11, window_bounds = array<i64: 1, 256>}, {pipeline_mode = #tpu.pipeline_mode<synchronous>, transform_indices = @transform_12, window_bounds = array<i64: 256, 256>}, {pipeline_mode = #tpu.pipeline_mode<synchronous>, transform_indices = @transform_13, window_bounds = array<i64: 256, 256>}, {transform_indices = @transform_14, window_bounds = array<i64: 8, 8, 256>}, {transform_indices = @transform_15, window_bounds = array<i64: 8, 8, 256>}]} {
    %c0 = arith.constant 0 : index
    %c0_0 = arith.constant 0 : index
    %c0_1 = arith.constant 0 : index
    %0 = vector.load %arg1[%c0, %c0_0, %c0_1] : memref<8x8x256xf32, #tpu.memory_space<vmem>>, vector<8x8x256xf32>
    %1 = vector.shape_cast %0 : vector<8x8x256xf32> to vector<64x256xf32>
    %c0_2 = arith.constant 0 : index
    %c0_3 = arith.constant 0 : index
    %c0_4 = arith.constant 0 : index
    %2 = vector.load %arg2[%c0_2, %c0_3, %c0_4] : memref<8x8x1280xbf16, #tpu.memory_space<vmem>>, vector<8x8x1280xbf16>
    %3 = vector.shape_cast %2 : vector<8x8x1280xbf16> to vector<64x1280xbf16>
    %4 = arith.truncf %1 : vector<64x256xf32> to vector<64x256xbf16>
    %c0_5 = arith.constant 0 : index
    %c0_6 = arith.constant 0 : index
    %5 = vector.load %arg3[%c0_5, %c0_6] : memref<256x256xbf16, #tpu.memory_space<vmem>>, vector<256x256xbf16>
    %cst = arith.constant dense<0.000000e+00> : vector<64x256xf32>
    %6 = tpu.matmul %4, %5, %cst {dimension_numbers = #tpu.dot_dimension_numbers<[1], [0], [0], [1], [0, 0, 1, 1], [], []>} : vector<64x256xbf16>, vector<256x256xbf16>, vector<64x256xf32> -> vector<64x256xf32>
    %c0_7 = arith.constant 0 : index
    %c0_8 = arith.constant 0 : index
    %7 = vector.load %arg5[%c0_7, %c0_8] : memref<1x256xf32, #tpu.memory_space<vmem>>, vector<1x256xf32>
    %8 = vector.broadcast %7 : vector<1x256xf32> to vector<64x256xf32>
    %9 = arith.addf %6, %8 : vector<64x256xf32>
    %c0_9 = arith.constant 0 : index
    %c0_10 = arith.constant 0 : index
    %10 = vector.load %arg4[%c0_9, %c0_10] : memref<1280x512xbf16, #tpu.memory_space<vmem>>, vector<1280x512xbf16>
    %cst_11 = arith.constant dense<0.000000e+00> : vector<64x512xf32>
    %11 = tpu.matmul %3, %10, %cst_11 {dimension_numbers = #tpu.dot_dimension_numbers<[1], [0], [0], [1], [0, 0, 1, 1], [], []>} : vector<64x1280xbf16>, vector<1280x512xbf16>, vector<64x512xf32> -> vector<64x512xf32>
    %c0_12 = arith.constant 0 : index
    %c0_13 = arith.constant 0 : index
    %12 = vector.load %arg6[%c0_12, %c0_13] : memref<1x512xf32, #tpu.memory_space<vmem>>, vector<1x512xf32>
    %13 = vector.broadcast %12 : vector<1x512xf32> to vector<64x512xf32>
    %14 = arith.addf %11, %13 : vector<64x512xf32>
    %15 = vector.extract_strided_slice %14 {offsets = [0, 0], sizes = [64, 256], strides = [1, 1]} : vector<64x512xf32> to vector<64x256xf32>
    %16 = vector.extract_strided_slice %14 {offsets = [0, 256], sizes = [64, 256], strides = [1, 1]} : vector<64x512xf32> to vector<64x256xf32>
    %17 = vector.shape_cast %9 : vector<64x256xf32> to vector<8x8x256xf32>
    %18 = vector.shape_cast %15 : vector<64x256xf32> to vector<8x8x256xf32>
    %19 = vector.shape_cast %16 : vector<64x256xf32> to vector<8x8x256xf32>
    %20 = vector.extract_strided_slice %17 {offsets = [0, 0, 0], sizes = [8, 8, 64], strides = [1, 1, 1]} : vector<8x8x256xf32> to vector<8x8x64xf32>
    %21 = arith.truncf %20 : vector<8x8x64xf32> to vector<8x8x64xbf16>
    %22 = vector.extract_strided_slice %18 {offsets = [0, 0, 0], sizes = [8, 8, 64], strides = [1, 1, 1]} : vector<8x8x256xf32> to vector<8x8x64xf32>
    %23 = arith.truncf %22 : vector<8x8x64xf32> to vector<8x8x64xbf16>
    %24 = vector.extract_strided_slice %19 {offsets = [0, 0, 0], sizes = [8, 8, 64], strides = [1, 1, 1]} : vector<8x8x256xf32> to vector<8x8x64xf32>
    %25 = arith.truncf %24 : vector<8x8x64xf32> to vector<8x8x64xbf16>
    "tpu.trace_start"() <{level = 10 : i32, message = "bqd,bkd->bqk"}> : () -> ()
    %cst_14 = arith.constant dense<0.000000e+00> : vector<8x8x8xf32>
    %26 = tpu.matmul %21, %23, %cst_14 {dimension_numbers = #tpu.dot_dimension_numbers<[2], [2], [1], [1], [0, 0, 0, 1, 1, 1], [0], [0]>} : vector<8x8x64xbf16>, vector<8x8x64xbf16>, vector<8x8x8xf32> -> vector<8x8x8xf32>
    "tpu.trace_stop"() : () -> ()
    %cst_15 = arith.constant dense<0xFF800000> : vector<8x8xf32>
    %27 = vector.multi_reduction <maximumf>, %26, %cst_15 [2] : vector<8x8x8xf32> to vector<8x8xf32>
    %28 = vector.shape_cast %27 : vector<8x8xf32> to vector<8x8x1xf32>
    %29 = vector.broadcast %28 : vector<8x8x1xf32> to vector<8x8x8xf32>
    %30 = arith.subf %26, %29 : vector<8x8x8xf32>
    %31 = math.exp %30 : vector<8x8x8xf32>
    %cst_16 = arith.constant dense<0.000000e+00> : vector<8x8xf32>
    %32 = vector.multi_reduction <add>, %31, %cst_16 [2] : vector<8x8x8xf32> to vector<8x8xf32>
    %33 = vector.shape_cast %32 : vector<8x8xf32> to vector<8x8x1xf32>
    %34 = tpu.reciprocal %33 {approx = true} : vector<8x8x1xf32> -> vector<8x8x1xf32>
    %35 = vector.broadcast %34 : vector<8x8x1xf32> to vector<8x8x8xf32>
    %36 = arith.mulf %31, %35 : vector<8x8x8xf32>
    %37 = arith.truncf %36 : vector<8x8x8xf32> to vector<8x8x8xbf16>
    "tpu.trace_start"() <{level = 10 : i32, message = "bqk,bkd->bqd"}> : () -> ()
    %cst_17 = arith.constant dense<0.000000e+00> : vector<8x8x64xf32>
    %38 = tpu.matmul %37, %25, %cst_17 {dimension_numbers = #tpu.dot_dimension_numbers<[2], [1], [1], [2], [0, 0, 0, 1, 1, 2], [0], [0]>} : vector<8x8x8xbf16>, vector<8x8x64xbf16>, vector<8x8x64xf32> -> vector<8x8x64xf32>
    "tpu.trace_stop"() : () -> ()
    %39 = vector.shape_cast %38 : vector<8x8x64xf32> to vector<64x64xf32>
    %40 = vector.extract_strided_slice %17 {offsets = [0, 0, 64], sizes = [8, 8, 64], strides = [1, 1, 1]} : vector<8x8x256xf32> to vector<8x8x64xf32>
    %41 = arith.truncf %40 : vector<8x8x64xf32> to vector<8x8x64xbf16>
    %42 = vector.extract_strided_slice %18 {offsets = [0, 0, 64], sizes = [8, 8, 64], strides = [1, 1, 1]} : vector<8x8x256xf32> to vector<8x8x64xf32>
    %43 = arith.truncf %42 : vector<8x8x64xf32> to vector<8x8x64xbf16>
    %44 = vector.extract_strided_slice %19 {offsets = [0, 0, 64], sizes = [8, 8, 64], strides = [1, 1, 1]} : vector<8x8x256xf32> to vector<8x8x64xf32>
    %45 = arith.truncf %44 : vector<8x8x64xf32> to vector<8x8x64xbf16>
    "tpu.trace_start"() <{level = 10 : i32, message = "bqd,bkd->bqk"}> : () -> ()
    %cst_18 = arith.constant dense<0.000000e+00> : vector<8x8x8xf32>
    %46 = tpu.matmul %41, %43, %cst_18 {dimension_numbers = #tpu.dot_dimension_numbers<[2], [2], [1], [1], [0, 0, 0, 1, 1, 1], [0], [0]>} : vector<8x8x64xbf16>, vector<8x8x64xbf16>, vector<8x8x8xf32> -> vector<8x8x8xf32>
    "tpu.trace_stop"() : () -> ()
    %cst_19 = arith.constant dense<0xFF800000> : vector<8x8xf32>
    %47 = vector.multi_reduction <maximumf>, %46, %cst_19 [2] : vector<8x8x8xf32> to vector<8x8xf32>
    %48 = vector.shape_cast %47 : vector<8x8xf32> to vector<8x8x1xf32>
    %49 = vector.broadcast %48 : vector<8x8x1xf32> to vector<8x8x8xf32>
    %50 = arith.subf %46, %49 : vector<8x8x8xf32>
    %51 = math.exp %50 : vector<8x8x8xf32>
    %cst_20 = arith.constant dense<0.000000e+00> : vector<8x8xf32>
    %52 = vector.multi_reduction <add>, %51, %cst_20 [2] : vector<8x8x8xf32> to vector<8x8xf32>
    %53 = vector.shape_cast %52 : vector<8x8xf32> to vector<8x8x1xf32>
    %54 = tpu.reciprocal %53 {approx = true} : vector<8x8x1xf32> -> vector<8x8x1xf32>
    %55 = vector.broadcast %54 : vector<8x8x1xf32> to vector<8x8x8xf32>
    %56 = arith.mulf %51, %55 : vector<8x8x8xf32>
    %57 = arith.truncf %56 : vector<8x8x8xf32> to vector<8x8x8xbf16>
    "tpu.trace_start"() <{level = 10 : i32, message = "bqk,bkd->bqd"}> : () -> ()
    %cst_21 = arith.constant dense<0.000000e+00> : vector<8x8x64xf32>
    %58 = tpu.matmul %57, %45, %cst_21 {dimension_numbers = #tpu.dot_dimension_numbers<[2], [1], [1], [2], [0, 0, 0, 1, 1, 2], [0], [0]>} : vector<8x8x8xbf16>, vector<8x8x64xbf16>, vector<8x8x64xf32> -> vector<8x8x64xf32>
    "tpu.trace_stop"() : () -> ()
    %59 = vector.shape_cast %58 : vector<8x8x64xf32> to vector<64x64xf32>
    %60 = vector.extract_strided_slice %17 {offsets = [0, 0, 128], sizes = [8, 8, 64], strides = [1, 1, 1]} : vector<8x8x256xf32> to vector<8x8x64xf32>
    %61 = arith.truncf %60 : vector<8x8x64xf32> to vector<8x8x64xbf16>
    %62 = vector.extract_strided_slice %18 {offsets = [0, 0, 128], sizes = [8, 8, 64], strides = [1, 1, 1]} : vector<8x8x256xf32> to vector<8x8x64xf32>
    %63 = arith.truncf %62 : vector<8x8x64xf32> to vector<8x8x64xbf16>
    %64 = vector.extract_strided_slice %19 {offsets = [0, 0, 128], sizes = [8, 8, 64], strides = [1, 1, 1]} : vector<8x8x256xf32> to vector<8x8x64xf32>
    %65 = arith.truncf %64 : vector<8x8x64xf32> to vector<8x8x64xbf16>
    "tpu.trace_start"() <{level = 10 : i32, message = "bqd,bkd->bqk"}> : () -> ()
    %cst_22 = arith.constant dense<0.000000e+00> : vector<8x8x8xf32>
    %66 = tpu.matmul %61, %63, %cst_22 {dimension_numbers = #tpu.dot_dimension_numbers<[2], [2], [1], [1], [0, 0, 0, 1, 1, 1], [0], [0]>} : vector<8x8x64xbf16>, vector<8x8x64xbf16>, vector<8x8x8xf32> -> vector<8x8x8xf32>
    "tpu.trace_stop"() : () -> ()
    %cst_23 = arith.constant dense<0xFF800000> : vector<8x8xf32>
    %67 = vector.multi_reduction <maximumf>, %66, %cst_23 [2] : vector<8x8x8xf32> to vector<8x8xf32>
    %68 = vector.shape_cast %67 : vector<8x8xf32> to vector<8x8x1xf32>
    %69 = vector.broadcast %68 : vector<8x8x1xf32> to vector<8x8x8xf32>
    %70 = arith.subf %66, %69 : vector<8x8x8xf32>
    %71 = math.exp %70 : vector<8x8x8xf32>
    %cst_24 = arith.constant dense<0.000000e+00> : vector<8x8xf32>
    %72 = vector.multi_reduction <add>, %71, %cst_24 [2] : vector<8x8x8xf32> to vector<8x8xf32>
    %73 = vector.shape_cast %72 : vector<8x8xf32> to vector<8x8x1xf32>
    %74 = tpu.reciprocal %73 {approx = true} : vector<8x8x1xf32> -> vector<8x8x1xf32>
    %75 = vector.broadcast %74 : vector<8x8x1xf32> to vector<8x8x8xf32>
    %76 = arith.mulf %71, %75 : vector<8x8x8xf32>
    %77 = arith.truncf %76 : vector<8x8x8xf32> to vector<8x8x8xbf16>
    "tpu.trace_start"() <{level = 10 : i32, message = "bqk,bkd->bqd"}> : () -> ()
    %cst_25 = arith.constant dense<0.000000e+00> : vector<8x8x64xf32>
    %78 = tpu.matmul %77, %65, %cst_25 {dimension_numbers = #tpu.dot_dimension_numbers<[2], [1], [1], [2], [0, 0, 0, 1, 1, 2], [0], [0]>} : vector<8x8x8xbf16>, vector<8x8x64xbf16>, vector<8x8x64xf32> -> vector<8x8x64xf32>
    "tpu.trace_stop"() : () -> ()
    %79 = vector.shape_cast %78 : vector<8x8x64xf32> to vector<64x64xf32>
    %80 = vector.extract_strided_slice %17 {offsets = [0, 0, 192], sizes = [8, 8, 64], strides = [1, 1, 1]} : vector<8x8x256xf32> to vector<8x8x64xf32>
    %81 = arith.truncf %80 : vector<8x8x64xf32> to vector<8x8x64xbf16>
    %82 = vector.extract_strided_slice %18 {offsets = [0, 0, 192], sizes = [8, 8, 64], strides = [1, 1, 1]} : vector<8x8x256xf32> to vector<8x8x64xf32>
    %83 = arith.truncf %82 : vector<8x8x64xf32> to vector<8x8x64xbf16>
    %84 = vector.extract_strided_slice %19 {offsets = [0, 0, 192], sizes = [8, 8, 64], strides = [1, 1, 1]} : vector<8x8x256xf32> to vector<8x8x64xf32>
    %85 = arith.truncf %84 : vector<8x8x64xf32> to vector<8x8x64xbf16>
    "tpu.trace_start"() <{level = 10 : i32, message = "bqd,bkd->bqk"}> : () -> ()
    %cst_26 = arith.constant dense<0.000000e+00> : vector<8x8x8xf32>
    %86 = tpu.matmul %81, %83, %cst_26 {dimension_numbers = #tpu.dot_dimension_numbers<[2], [2], [1], [1], [0, 0, 0, 1, 1, 1], [0], [0]>} : vector<8x8x64xbf16>, vector<8x8x64xbf16>, vector<8x8x8xf32> -> vector<8x8x8xf32>
    "tpu.trace_stop"() : () -> ()
    %cst_27 = arith.constant dense<0xFF800000> : vector<8x8xf32>
    %87 = vector.multi_reduction <maximumf>, %86, %cst_27 [2] : vector<8x8x8xf32> to vector<8x8xf32>
    %88 = vector.shape_cast %87 : vector<8x8xf32> to vector<8x8x1xf32>
    %89 = vector.broadcast %88 : vector<8x8x1xf32> to vector<8x8x8xf32>
    %90 = arith.subf %86, %89 : vector<8x8x8xf32>
    %91 = math.exp %90 : vector<8x8x8xf32>
    %cst_28 = arith.constant dense<0.000000e+00> : vector<8x8xf32>
    %92 = vector.multi_reduction <add>, %91, %cst_28 [2] : vector<8x8x8xf32> to vector<8x8xf32>
    %93 = vector.shape_cast %92 : vector<8x8xf32> to vector<8x8x1xf32>
    %94 = tpu.reciprocal %93 {approx = true} : vector<8x8x1xf32> -> vector<8x8x1xf32>
    %95 = vector.broadcast %94 : vector<8x8x1xf32> to vector<8x8x8xf32>
    %96 = arith.mulf %91, %95 : vector<8x8x8xf32>
    %97 = arith.truncf %96 : vector<8x8x8xf32> to vector<8x8x8xbf16>
    "tpu.trace_start"() <{level = 10 : i32, message = "bqk,bkd->bqd"}> : () -> ()
    %cst_29 = arith.constant dense<0.000000e+00> : vector<8x8x64xf32>
    %98 = tpu.matmul %97, %85, %cst_29 {dimension_numbers = #tpu.dot_dimension_numbers<[2], [1], [1], [2], [0, 0, 0, 1, 1, 2], [0], [0]>} : vector<8x8x8xbf16>, vector<8x8x64xbf16>, vector<8x8x64xf32> -> vector<8x8x64xf32>
    "tpu.trace_stop"() : () -> ()
    %99 = vector.shape_cast %98 : vector<8x8x64xf32> to vector<64x64xf32>
    %100 = tpu.concatenate %39, %59, %79, %99 in 1 : vector<64x64xf32>, vector<64x64xf32>, vector<64x64xf32>, vector<64x64xf32> -> vector<64x256xf32>
    %101 = arith.truncf %100 : vector<64x256xf32> to vector<64x256xbf16>
    %c0_30 = arith.constant 0 : index
    %c0_31 = arith.constant 0 : index
    %102 = vector.load %arg7[%c0_30, %c0_31] : memref<256x256xbf16, #tpu.memory_space<vmem>>, vector<256x256xbf16>
    %cst_32 = arith.constant dense<0.000000e+00> : vector<64x256xf32>
    %103 = tpu.matmul %101, %102, %cst_32 {dimension_numbers = #tpu.dot_dimension_numbers<[1], [0], [0], [1], [0, 0, 1, 1], [], []>} : vector<64x256xbf16>, vector<256x256xbf16>, vector<64x256xf32> -> vector<64x256xf32>
    %c0_33 = arith.constant 0 : index
    %c0_34 = arith.constant 0 : index
    %104 = vector.load %arg8[%c0_33, %c0_34] : memref<1x256xf32, #tpu.memory_space<vmem>>, vector<1x256xf32>
    %105 = vector.broadcast %104 : vector<1x256xf32> to vector<64x256xf32>
    %106 = arith.addf %103, %105 : vector<64x256xf32>
    %c0_35 = arith.constant 0 : index
    %c0_36 = arith.constant 0 : index
    %107 = vector.load %arg9[%c0_35, %c0_36] : memref<1x256xf32, #tpu.memory_space<vmem>>, vector<1x256xf32>
    %c0_37 = arith.constant 0 : index
    %c0_38 = arith.constant 0 : index
    %108 = vector.load %arg10[%c0_37, %c0_38] : memref<1x256xf32, #tpu.memory_space<vmem>>, vector<1x256xf32>
    %cst_39 = arith.constant dense<0.000000e+00> : vector<64xf32>
    %109 = vector.multi_reduction <add>, %106, %cst_39 [1] : vector<64x256xf32> to vector<64xf32>
    %110 = vector.shape_cast %109 : vector<64xf32> to vector<64x1xf32>
    %cst_40 = arith.constant 2.560000e+02 : f32
    %111 = vector.broadcast %cst_40 : f32 to vector<64x1xf32>
    %112 = arith.divf %110, %111 : vector<64x1xf32>
    %113 = vector.broadcast %112 : vector<64x1xf32> to vector<64x256xf32>
    %114 = arith.subf %106, %113 : vector<64x256xf32>
    %115 = vector.broadcast %112 : vector<64x1xf32> to vector<64x256xf32>
    %116 = arith.subf %106, %115 : vector<64x256xf32>
    %117 = arith.mulf %114, %116 : vector<64x256xf32>
    %cst_41 = arith.constant dense<0.000000e+00> : vector<64xf32>
    %118 = vector.multi_reduction <add>, %117, %cst_41 [1] : vector<64x256xf32> to vector<64xf32>
    %119 = vector.shape_cast %118 : vector<64xf32> to vector<64x1xf32>
    %cst_42 = arith.constant 2.560000e+02 : f32
    %120 = vector.broadcast %cst_42 : f32 to vector<64x1xf32>
    %121 = arith.divf %119, %120 : vector<64x1xf32>
    %122 = vector.broadcast %112 : vector<64x1xf32> to vector<64x256xf32>
    %123 = arith.subf %106, %122 : vector<64x256xf32>
    %cst_43 = arith.constant 9.99999974E-6 : f32
    %124 = vector.broadcast %cst_43 : f32 to vector<64x1xf32>
    %125 = arith.addf %121, %124 : vector<64x1xf32>
    %126 = math.rsqrt %125 : vector<64x1xf32>
    %127 = vector.broadcast %126 : vector<64x1xf32> to vector<64x256xf32>
    %128 = arith.mulf %123, %127 : vector<64x256xf32>
    %129 = vector.broadcast %107 : vector<1x256xf32> to vector<64x256xf32>
    %130 = arith.mulf %128, %129 : vector<64x256xf32>
    %131 = vector.broadcast %108 : vector<1x256xf32> to vector<64x256xf32>
    %132 = arith.addf %130, %131 : vector<64x256xf32>
    %133 = arith.addf %132, %1 : vector<64x256xf32>
    %134 = arith.truncf %133 : vector<64x256xf32> to vector<64x256xbf16>
    %c0_44 = arith.constant 0 : index
    %c0_45 = arith.constant 0 : index
    %135 = vector.load %arg13[%c0_44, %c0_45] : memref<256x256xbf16, #tpu.memory_space<vmem>>, vector<256x256xbf16>
    %cst_46 = arith.constant dense<0.000000e+00> : vector<64x256xf32>
    %136 = tpu.matmul %134, %135, %cst_46 {dimension_numbers = #tpu.dot_dimension_numbers<[1], [0], [0], [1], [0, 0, 1, 1], [], []>} : vector<64x256xbf16>, vector<256x256xbf16>, vector<64x256xf32> -> vector<64x256xf32>
    %c0_47 = arith.constant 0 : index
    %c0_48 = arith.constant 0 : index
    %137 = vector.load %arg11[%c0_47, %c0_48] : memref<1x256xf32, #tpu.memory_space<vmem>>, vector<1x256xf32>
    %c0_49 = arith.constant 0 : index
    %c0_50 = arith.constant 0 : index
    %138 = vector.load %arg12[%c0_49, %c0_50] : memref<1x256xf32, #tpu.memory_space<vmem>>, vector<1x256xf32>
    %cst_51 = arith.constant dense<0.000000e+00> : vector<64xf32>
    %139 = vector.multi_reduction <add>, %136, %cst_51 [1] : vector<64x256xf32> to vector<64xf32>
    %140 = vector.shape_cast %139 : vector<64xf32> to vector<64x1xf32>
    %cst_52 = arith.constant 2.560000e+02 : f32
    %141 = vector.broadcast %cst_52 : f32 to vector<64x1xf32>
    %142 = arith.divf %140, %141 : vector<64x1xf32>
    %143 = vector.broadcast %142 : vector<64x1xf32> to vector<64x256xf32>
    %144 = arith.subf %136, %143 : vector<64x256xf32>
    %145 = vector.broadcast %142 : vector<64x1xf32> to vector<64x256xf32>
    %146 = arith.subf %136, %145 : vector<64x256xf32>
    %147 = arith.mulf %144, %146 : vector<64x256xf32>
    %cst_53 = arith.constant dense<0.000000e+00> : vector<64xf32>
    %148 = vector.multi_reduction <add>, %147, %cst_53 [1] : vector<64x256xf32> to vector<64xf32>
    %149 = vector.shape_cast %148 : vector<64xf32> to vector<64x1xf32>
    %cst_54 = arith.constant 2.560000e+02 : f32
    %150 = vector.broadcast %cst_54 : f32 to vector<64x1xf32>
    %151 = arith.divf %149, %150 : vector<64x1xf32>
    %152 = vector.broadcast %142 : vector<64x1xf32> to vector<64x256xf32>
    %153 = arith.subf %136, %152 : vector<64x256xf32>
    %cst_55 = arith.constant 9.99999974E-6 : f32
    %154 = vector.broadcast %cst_55 : f32 to vector<64x1xf32>
    %155 = arith.addf %151, %154 : vector<64x1xf32>
    %156 = math.rsqrt %155 : vector<64x1xf32>
    %157 = vector.broadcast %156 : vector<64x1xf32> to vector<64x256xf32>
    %158 = arith.mulf %153, %157 : vector<64x256xf32>
    %159 = vector.broadcast %137 : vector<1x256xf32> to vector<64x256xf32>
    %160 = arith.mulf %158, %159 : vector<64x256xf32>
    %161 = vector.broadcast %138 : vector<1x256xf32> to vector<64x256xf32>
    %162 = arith.addf %160, %161 : vector<64x256xf32>
    %163 = arith.addf %162, %133 : vector<64x256xf32>
    %164 = vector.shape_cast %163 : vector<64x256xf32> to vector<8x8x256xf32>
    %c0_56 = arith.constant 0 : index
    %c0_57 = arith.constant 0 : index
    %c0_58 = arith.constant 0 : index
    %165 = vector.load %arg15[%c0_56, %c0_57, %c0_58] : memref<8x8x256xf32, #tpu.memory_space<vmem>>, vector<8x8x256xf32>
    tpu.vector_store %arg15[%c0_56, %c0_57, %c0_58], %164 {strides = array<i32>} : memref<8x8x256xf32, #tpu.memory_space<vmem>>, vector<8x8x256xf32>,
    %166 = arith.truncf %163 : vector<64x256xf32> to vector<64x256xbf16>
    %c0_59 = arith.constant 0 : index
    %c0_60 = arith.constant 0 : index
    %167 = vector.load %arg14[%c0_59, %c0_60] : memref<256x256xbf16, #tpu.memory_space<vmem>>, vector<256x256xbf16>
    %cst_61 = arith.constant dense<0.000000e+00> : vector<64x256xf32>
    %168 = tpu.matmul %166, %167, %cst_61 {dimension_numbers = #tpu.dot_dimension_numbers<[1], [0], [0], [1], [0, 0, 1, 1], [], []>} : vector<64x256xbf16>, vector<256x256xbf16>, vector<64x256xf32> -> vector<64x256xf32>
    %169 = vector.shape_cast %168 : vector<64x256xf32> to vector<8x8x256xf32>
    %c0_62 = arith.constant 0 : index
    %c0_63 = arith.constant 0 : index
    %c0_64 = arith.constant 0 : index
    %170 = vector.load %arg16[%c0_62, %c0_63, %c0_64] : memref<8x8x256xf32, #tpu.memory_space<vmem>>, vector<8x8x256xf32>
    tpu.vector_store %arg16[%c0_62, %c0_63, %c0_64], %169 {strides = array<i32>} : memref<8x8x256xf32, #tpu.memory_space<vmem>>, vector<8x8x256xf32>,
    return
  }
  func.func @transform_0(%arg0: i32) -> (i32, i32, i32) {
    %c0_i32 = arith.constant 0 : i32
    %c0_i32_0 = arith.constant 0 : i32
    %c0_i32_1 = arith.constant 0 : i32
    return %arg0, %c0_i32, %c0_i32_0 : i32, i32, i32
  }
  func.func @transform_1(%arg0: i32) -> (i32, i32, i32) {
    %c0_i32 = arith.constant 0 : i32
    %c0_i32_0 = arith.constant 0 : i32
    %c0_i32_1 = arith.constant 0 : i32
    return %arg0, %c0_i32, %c0_i32_0 : i32, i32, i32
  }
  func.func @transform_2(%arg0: i32) -> (i32, i32) {
    %c0_i32 = arith.constant 0 : i32
    %c0_i32_0 = arith.constant 0 : i32
    %c0_i32_1 = arith.constant 0 : i32
    return %c0_i32, %c0_i32_0 : i32, i32
  }
  func.func @transform_3(%arg0: i32) -> (i32, i32) {
    %c0_i32 = arith.constant 0 : i32
    %c0_i32_0 = arith.constant 0 : i32
    %c0_i32_1 = arith.constant 0 : i32
    return %c0_i32, %c0_i32_0 : i32, i32
  }
  func.func @transform_4(%arg0: i32) -> (i32, i32) {
    %c0_i32 = arith.constant 0 : i32
    %c0_i32_0 = arith.constant 0 : i32
    %c0_i32_1 = arith.constant 0 : i32
    return %c0_i32, %c0_i32_0 : i32, i32
  }
  func.func @transform_5(%arg0: i32) -> (i32, i32) {
    %c0_i32 = arith.constant 0 : i32
    %c0_i32_0 = arith.constant 0 : i32
    %c0_i32_1 = arith.constant 0 : i32
    return %c0_i32, %c0_i32_0 : i32, i32
  }
  func.func @transform_6(%arg0: i32) -> (i32, i32) {
    %c0_i32 = arith.constant 0 : i32
    %c0_i32_0 = arith.constant 0 : i32
    %c0_i32_1 = arith.constant 0 : i32
    return %c0_i32, %c0_i32_0 : i32, i32
  }
  func.func @transform_7(%arg0: i32) -> (i32, i32) {
    %c0_i32 = arith.constant 0 : i32
    %c0_i32_0 = arith.constant 0 : i32
    %c0_i32_1 = arith.constant 0 : i32
    return %c0_i32, %c0_i32_0 : i32, i32
  }
  func.func @transform_8(%arg0: i32) -> (i32, i32) {
    %c0_i32 = arith.constant 0 : i32
    %c0_i32_0 = arith.constant 0 : i32
    %c0_i32_1 = arith.constant 0 : i32
    return %c0_i32, %c0_i32_0 : i32, i32
  }
  func.func @transform_9(%arg0: i32) -> (i32, i32) {
    %c0_i32 = arith.constant 0 : i32
    %c0_i32_0 = arith.constant 0 : i32
    %c0_i32_1 = arith.constant 0 : i32
    return %c0_i32, %c0_i32_0 : i32, i32
  }
  func.func @transform_10(%arg0: i32) -> (i32, i32) {
    %c0_i32 = arith.constant 0 : i32
    %c0_i32_0 = arith.constant 0 : i32
    %c0_i32_1 = arith.constant 0 : i32
    return %c0_i32, %c0_i32_0 : i32, i32
  }
  func.func @transform_11(%arg0: i32) -> (i32, i32) {
    %c0_i32 = arith.constant 0 : i32
    %c0_i32_0 = arith.constant 0 : i32
    %c0_i32_1 = arith.constant 0 : i32
    return %c0_i32, %c0_i32_0 : i32, i32
  }
  func.func @transform_12(%arg0: i32) -> (i32, i32) {
    %c0_i32 = arith.constant 0 : i32
    %c0_i32_0 = arith.constant 0 : i32
    %c0_i32_1 = arith.constant 0 : i32
    return %c0_i32, %c0_i32_0 : i32, i32
  }
  func.func @transform_13(%arg0: i32) -> (i32, i32) {
    %c0_i32 = arith.constant 0 : i32
    %c0_i32_0 = arith.constant 0 : i32
    %c0_i32_1 = arith.constant 0 : i32
    return %c0_i32, %c0_i32_0 : i32, i32
  }
  func.func @transform_14(%arg0: i32) -> (i32, i32, i32) {
    %c0_i32 = arith.constant 0 : i32
    %c0_i32_0 = arith.constant 0 : i32
    %c0_i32_1 = arith.constant 0 : i32
    return %arg0, %c0_i32, %c0_i32_0 : i32, i32, i32
  }
  func.func @transform_15(%arg0: i32) -> (i32, i32, i32) {
    %c0_i32 = arith.constant 0 : i32
    %c0_i32_0 = arith.constant 0 : i32
    %c0_i32_1 = arith.constant 0 : i32
    return %arg0, %c0_i32, %c0_i32_0 : i32, i32, i32
  }
}

</mosaic_0001>

<bundles_post_ra>
// kernel: tpu_custom_call.1
= control target key start
LH: loop header
LB: loop body
LE: loop exit
PB: predicated region body
PF: predicated region fallthrough
CT: control target
= control target key end

     0   :  { %21 = vsyncpa [#allocation3], 0  ;;  %s12697_s0 = inlined_call_operand.hbm [shape: f32[8,8,256], index: 0, kind: input, shape index: {}]   ;;  %s12698_s1 = inlined_call_operand.hbm [shape: bf16[8,8,1280], index: 1, kind: input, shape index: {}]   ;;  %s12699_s2 = inlined_call_operand.hbm [shape: bf16[256,256], index: 2, kind: input, shape index: {}]   ;;  %s12700_s3 = inlined_call_operand.hbm [shape: bf16[1280,512], index: 3, kind: input, shape index: {}]   ;;  %s12701_s4 = inlined_call_operand.hbm [shape: f32[1,256], index: 4, kind: input, shape index: {}]   ;;  %s12702_s5 = inlined_call_operand.hbm [shape: f32[1,512], index: 5, kind: input, shape index: {}]   ;;  %s12703_s6 = inlined_call_operand.hbm [shape: bf16[256,256], index: 6, kind: input, shape index: {}]   ;;  %s12704_s7 = inlined_call_operand.hbm [shape: f32[1,256], index: 7, kind: input, shape index: {}]   ;;  %s12705_s8 = inlined_call_operand.hbm [shape: f32[1,256], index: 8, kind: input, shape index: {}]   ;;  %s12706_s9 = inlined_call_operand.hbm [shape: f32[1,256], index: 9, kind: input, shape index: {}]   ;;  %s12707_s10 = inlined_call_operand.hbm [shape: f32[1,256], index: 10, kind: input, shape index: {}]   ;;  %s12708_s11 = inlined_call_operand.hbm [shape: f32[1,256], index: 11, kind: input, shape index: {}]   ;;  %s12709_s12 = inlined_call_operand.hbm [shape: bf16[256,256], index: 12, kind: input, shape index: {}]   ;;  %s12710_s13 = inlined_call_operand.hbm [shape: bf16[256,256], index: 13, kind: input, shape index: {}]   ;;  %s12711_s14 = inlined_call_operand.hbm [shape: f32[8,8,256], index: 14, kind: output, shape index: {0}]   ;;  %s12712_s15 = inlined_call_operand.hbm [shape: f32[8,8,256], index: 15, kind: output, shape index: {1}]  }
   0x1   :  { %22 = vsyncpa [#allocation6], 0 }
   0x2   :  { %23 = vsyncpa [#allocation9], 0 }
   0x3   :  { %24 = vsyncpa [#allocation12], 0 }
   0x4   :  { %25 = vsyncpa [#allocation15], 0 }
   0x5   :  { %26 = vsyncpa [#allocation18], 0 }
   0x6   :  { %27 = vsyncpa [#allocation21], 0 }
   0x7   :  { %28 = vsyncpa [#allocation24], 0 }
   0x8   :  { %29 = vsyncpa [#allocation4], 0  ;;  %s48_s20 = sshll.u32 %s12698_s1, 4  ;;  %s49_s20 = int_to_ptr.hbm [resolvable:$true] %s48_s20 }
   0x9   :  { %30 = vsyncpa [#allocation27], 0  ;;  %s10603_s21 = smov [#allocation5]   ;;  %s10604_s23 = smov 640  }
   0xa   :  { %s50_s22 = sshll.u32 %s10603_s21, 4  ;;  %s10605_s24 = smov 40   ;;  %s51_s22 = int_to_ptr.vmem [resolvable:$true] %s50_s22 }
   0xb   :  { %56 = dma.hbm_to_vmem [thread:$0]  %s49_s20, 5120, %s51_s22, [#allocation6], %s10604_s23, %s10604_s23, %s10605_s24  }
   0xc   :  { %s74_s27 = sshll.u32 %s12700_s3, 4  ;;  %s10606_s28 = smov [#allocation8]   ;;  %s75_s27 = int_to_ptr.hbm [resolvable:$true] %s74_s27 }
   0xd   :  { %s76_s29 = sshll.u32 %s10606_s28, 4  ;;  %s99_s17 = sshll.u32 %s12702_s5, 4  ;;  %s77_s29 = int_to_ptr.vmem [resolvable:$true] %s76_s29  ;;  %s100_s17 = int_to_ptr.hbm [resolvable:$true] %s99_s17 }
   0xe   :  { %s10607_s1 = smov 256   ;;  %s10608_s18 = smov 16  }
   0xf   :  { %82 = dma.hbm_to_vmem [thread:$0]  %s75_s27, 40960, %s77_s29, [#allocation9], %s10607_s1, %s10607_s1, %s10608_s18  }
  0x10   :  { %s123_s21 = sshll.u32 %s12704_s7, 4  ;;  %s10609_s3 = smov [#allocation11]   ;;  %s124_s21 = int_to_ptr.hbm [resolvable:$true] %s123_s21 }
  0x11   :  { %s101_s22 = sshll.u32 %s10609_s3, 4  ;;  %s10610_s23 = smov [#allocation14]   ;;  %s102_s22 = int_to_ptr.vmem [resolvable:$true] %s101_s22 }
  0x12   :  { %104 = dma.hbm_to_vmem [thread:$0]  %s100_s17, 64, %s102_s22, [#allocation12]  }
  0x13   :  { %s125_s24 = sshll.u32 %s10610_s23, 4  ;;  %s145_s26 = sshll.u32 %s12706_s9, 4  ;;  %s126_s24 = int_to_ptr.vmem [resolvable:$true] %s125_s24  ;;  %s146_s26 = int_to_ptr.hbm [resolvable:$true] %s145_s26 }
  0x14   :  { %128 = dma.hbm_to_vmem [thread:$0]  %s124_s21, 32, %s126_s24, [#allocation15]  }
  0x15   :  { %s167_s29 = sshll.u32 %s12708_s11, 4  ;;  %s10611_s30 = smov [#allocation17]   ;;  %s168_s29 = int_to_ptr.hbm [resolvable:$true] %s167_s29 }
  0x16   :  { %s147_s7 = sshll.u32 %s10611_s30, 4  ;;  %s10612_s16 = smov [#allocation20]   ;;  %s148_s7 = int_to_ptr.vmem [resolvable:$true] %s147_s7 }
  0x17   :  { %150 = dma.hbm_to_vmem [thread:$0]  %s146_s26, 32, %s148_s7, [#allocation18]  }
  0x18   :  { %s169_s17 = sshll.u32 %s10612_s16, 4  ;;  %s35_s3 = sshll.u32 %s12697_s0, 4  ;;  %s170_s17 = int_to_ptr.vmem [resolvable:$true] %s169_s17  ;;  %s36_s3 = int_to_ptr.hbm [resolvable:$true] %s35_s3 }
  0x19   :  { %172 = dma.hbm_to_vmem [thread:$0]  %s168_s29, 32, %s170_s17, [#allocation21]  }
  0x1a   :  { %s61_s22 = sshll.u32 %s12699_s2, 4  ;;  %s10613_s23 = smov [#allocation2]   ;;  %s62_s22 = int_to_ptr.hbm [resolvable:$true] %s61_s22 }
  0x1b   :  { %s37_s11 = sshll.u32 %s10613_s23, 4  ;;  %s10614_s24 = smov [#allocation7]   ;;  %s38_s11 = int_to_ptr.vmem [resolvable:$true] %s37_s11 }
  0x1c   :  { %43 = dma.hbm_to_vmem [thread:$0]  %s36_s3, 2048, %s38_s11, [#allocation3], %s10607_s1, %s10607_s1, %s10608_s18  }
  0x1d   :  { %s63_s5 = sshll.u32 %s10614_s24, 4  ;;  %s10615_s25 = smov 128   ;;  %s64_s5 = int_to_ptr.vmem [resolvable:$true] %s63_s5 }
  0x1e   :  { %s10616_s0 = smov 8   ;;  %s88_s2 = sshll.u32 %s12701_s4, 4  ;;  %s89_s2 = int_to_ptr.hbm [resolvable:$true] %s88_s2 }
  0x1f   :  { %69 = dma.hbm_to_vmem [thread:$0]  %s62_s22, 4096, %s64_s5, [#allocation6], %s10615_s25, %s10615_s25, %s10616_s0  }
  0x20   :  { %s10617_s27 = smov [#allocation10]   ;;  %s109_s16 = sshll.u32 %s12703_s6, 4  ;;  %s110_s16 = int_to_ptr.hbm [resolvable:$true] %s109_s16 }
  0x21   :  { %s90_s29 = sshll.u32 %s10617_s27, 4  ;;  %s10618_s17 = smov [#allocation13]   ;;  %s91_s29 = int_to_ptr.vmem [resolvable:$true] %s90_s29 }
  0x22   :  { %93 = dma.hbm_to_vmem [thread:$0]  %s89_s2, 32, %s91_s29, [#allocation9]  }
  0x23   :  { %s111_s19 = sshll.u32 %s10618_s17, 4  ;;  %s134_s9 = sshll.u32 %s12705_s8, 4  ;;  %s112_s19 = int_to_ptr.vmem [resolvable:$true] %s111_s19  ;;  %s135_s9 = int_to_ptr.hbm [resolvable:$true] %s134_s9 }
  0x24   :  { %117 = dma.hbm_to_vmem [thread:$0]  %s110_s16, 4096, %s112_s19, [#allocation12], %s10615_s25, %s10615_s25, %s10616_s0  }
  0x25   :  { %s156_s22 = sshll.u32 %s12707_s10, 4  ;;  %s10619_s23 = smov [#allocation16]   ;;  %s157_s22 = int_to_ptr.hbm [resolvable:$true] %s156_s22 }
  0x26   :  { %s136_s6 = sshll.u32 %s10619_s23, 4  ;;  %s10620_s11 = smov [#allocation19]   ;;  %s137_s6 = int_to_ptr.vmem [resolvable:$true] %s136_s6 }
  0x27   :  { %139 = dma.hbm_to_vmem [thread:$0]  %s135_s9, 32, %s137_s6, [#allocation15]  }
  0x28   :  { %s158_s24 = sshll.u32 %s10620_s11, 4  ;;  %s177_s8 = sshll.u32 %s12709_s12, 4  ;;  %s159_s24 = int_to_ptr.vmem [resolvable:$true] %s158_s24  ;;  %s178_s8 = int_to_ptr.hbm [resolvable:$true] %s177_s8 }
  0x29   :  { %161 = dma.hbm_to_vmem [thread:$0]  %s157_s22, 32, %s159_s24, [#allocation18]  }
  0x2a   :  { %s190_s27 = sshll.u32 %s12710_s13, 4  ;;  %s10621_s29 = smov [#allocation22]   ;;  %s191_s27 = int_to_ptr.hbm [resolvable:$true] %s190_s27 }
  0x2b   :  { %s179_s10 = sshll.u32 %s10621_s29, 4  ;;  %s10622_s30 = smov [#allocation23]   ;;  %s180_s10 = int_to_ptr.vmem [resolvable:$true] %s179_s10 }
  0x2c   :  { %185 = dma.hbm_to_vmem [thread:$0]  %s178_s8, 4096, %s180_s10, [#allocation21], %s10615_s25, %s10615_s25, %s10616_s0  }
  0x2d   :  { %s192_s7 = sshll.u32 %s10622_s30, 4  ;;  %s193_s7 = int_to_ptr.vmem [resolvable:$true] %s192_s7 }
  0x2e   :  { %198 = dma.hbm_to_vmem [thread:$0]  %s191_s27, 4096, %s193_s7, [#allocation24], %s10615_s25, %s10615_s25, %s10616_s0  }
  0x2f   :  { %10583 = dma.done.wait [#allocation3], 2048  }
  0x30   :  { %10584 = vsyncadd [#allocation3], 4294965248 }
  0x31   :  { %10585 = dma.done.wait [#allocation6], 9216  }
  0x32   :  { %10586 = vsyncadd [#allocation6], 4294958080 }
  0x33   :  { %10587 = dma.done.wait [#allocation9], 40992  }
  0x34   :  { %10588 = vsyncadd [#allocation9], 4294926304 }
  0x35   :  { %10589 = dma.done.wait [#allocation12], 4160  }
  0x36   :  { %10590 = vsyncadd [#allocation12], 4294963136 }
  0x37   :  { %10591 = dma.done.wait [#allocation15], 64  }
  0x38   :  { %10592 = vsyncadd [#allocation15], 4294967232 }
  0x39   :  { %10593 = dma.done.wait [#allocation18], 64  }
  0x3a   :  { %10594 = vsyncadd [#allocation18], 4294967232 }
  0x3b   :  { %10595 = dma.done.wait [#allocation21], 4128  }
  0x3c   :  { %10596 = vsyncadd [#allocation21], 4294963168 }
  0x3d   :  { %10597 = dma.done.wait [#allocation24], 4096  }
  0x3e   :  { %10598 = vsyncadd [#allocation24], 4294963200  ;;  %v7510_v0 = vld [vmem:[#allocation7 + $0x70] sm:$0xf]  ;;  %v9523_v1 = vld [vmem:[#allocation7 + $0x74] sm:$0xf0] }
  0x3f   :  { %v7574_v2 = vld [vmem:[#allocation7 + $0xf0] sm:$0xf]  ;;  %v7511_v3 = vor.u32 %v9523_v1, %v7510_v0  ;;  %v9539_v4 = vld [vmem:[#allocation7 + $0xf4] sm:$0xf0]  ;;  %v9522_v5 = vld [vmem:[#allocation7 + $0x74] sm:$0xf] }
  0x40   :  { %v7512_v6 = vld [vmem:[#allocation7 + $0x78] sm:$0xf0]  ;;  %v7575_v7 = vor.u32 %v9539_v4, %v7574_v2  ;;  %v9538_v9 = vld [vmem:[#allocation7 + $0xf4] sm:$0xf]  ;;  %v7502_v11 = vld [vmem:[#allocation7 + $0x60] sm:$0xf] }
  0x41   :  { %v7515_v8 = vor.u32 %v9522_v5, %v7512_v6  ;;  %v7576_v10 = vld [vmem:[#allocation7 + $0xf8] sm:$0xf0]  ;;  %518 = vmatpush.bf16.msra.mxu0 %v7511_v3  ;;  %v9521_v13 = vld [vmem:[#allocation7 + $0x64] sm:$0xf0]  ;;  %v7566_v14 = vld [vmem:[#allocation7 + $0xe0] sm:$0xf] }
  0x42   :  { %v7579_v12 = vor.u32 %v9538_v9, %v7576_v10  ;;  %v9537_v15 = vld [vmem:[#allocation7 + $0xe4] sm:$0xf0]  ;;  %547 = vmatpush.bf16.msra.mxu1 %v7575_v7  ;;  %v7503_v16 = vor.u32 %v9521_v13, %v7502_v11  ;;  %v9520_v18 = vld [vmem:[#allocation7 + $0x64] sm:$0xf]  ;;  %v7504_v19 = vld [vmem:[#allocation7 + $0x68] sm:$0xf0] }
  0x43   :  { %576 = vmatpush.bf16.msra.mxu2 %v7515_v8  ;;  %v7567_v17 = vor.u32 %v9537_v15, %v7566_v14  ;;  %v9536_v20 = vld [vmem:[#allocation7 + $0xe4] sm:$0xf]  ;;  %v7507_v21 = vor.u32 %v9520_v18, %v7504_v19  ;;  %v7568_v22 = vld [vmem:[#allocation7 + $0xe8] sm:$0xf0]  ;;  %v7494_v23 = vld [vmem:[#allocation7 + $0x50] sm:$0xf] }
  0x44   :  { %605 = vmatpush.bf16.msra.mxu3 %v7579_v12  ;;  %v9519_v24 = vld [vmem:[#allocation7 + $0x54] sm:$0xf0]  ;;  %v7571_v25 = vor.u32 %v9536_v20, %v7568_v22  ;;  %v7558_v26 = vld [vmem:[#allocation7 + $0xd0] sm:$0xf]  ;;  %v9518_v28 = vld [vmem:[#allocation7 + $0x54] sm:$0xf] }
  0x45   :  { %v9535_v27 = vld [vmem:[#allocation7 + $0xd4] sm:$0xf0]  ;;  %519 = vmatpush.bf16.msra.mxu0 %v7503_v16  ;;  %v7495_v29 = vor.u32 %v9519_v24, %v7494_v23  ;;  %v7496_v30 = vld [vmem:[#allocation7 + $0x58] sm:$0xf0]  ;;  %v9534_v31 = vld [vmem:[#allocation7 + $0xd4] sm:$0xf] }
  0x46   :  { %v7560_v32 = vld [vmem:[#allocation7 + $0xd8] sm:$0xf0]  ;;  %548 = vmatpush.bf16.msra.mxu1 %v7567_v17  ;;  %v7559_v33 = vor.u32 %v9535_v27, %v7558_v26  ;;  %v7499_v34 = vor.u32 %v9518_v28, %v7496_v30  ;;  %v7486_v35 = vld [vmem:[#allocation7 + $0x40] sm:$0xf]  ;;  %v9517_v36 = vld [vmem:[#allocation7 + $0x44] sm:$0xf0] }
  0x47   :  { %577 = vmatpush.bf16.msra.mxu2 %v7507_v21  ;;  %v7550_v37 = vld [vmem:[#allocation7 + $0xc0] sm:$0xf]  ;;  %v7563_v38 = vor.u32 %v9534_v31, %v7560_v32  ;;  %v9533_v39 = vld [vmem:[#allocation7 + $0xc4] sm:$0xf0]  ;;  %v9516_v40 = vld [vmem:[#allocation7 + $0x44] sm:$0xf]  ;;  %v7487_v44 = vor.u32 %v9517_v36, %v7486_v35 }
  0x48   :  { %606 = vmatpush.bf16.msra.mxu3 %v7571_v25  ;;  %v7488_v41 = vld [vmem:[#allocation7 + $0x48] sm:$0xf0]  ;;  %v9532_v42 = vld [vmem:[#allocation7 + $0xc4] sm:$0xf]  ;;  %v7551_v45 = vor.u32 %v9533_v39, %v7550_v37  ;;  %v7478_v47 = vld [vmem:[#allocation7 + $0x30] sm:$0xf] }
  0x49   :  { %v7552_v43 = vld [vmem:[#allocation7 + $0xc8] sm:$0xf0]  ;;  %520 = vmatpush.bf16.msra.mxu0 %v7495_v29  ;;  %v7491_v46 = vor.u32 %v9516_v40, %v7488_v41  ;;  %v9515_v48 = vld [vmem:[#allocation7 + $0x34] sm:$0xf0]  ;;  %v7542_v49 = vld [vmem:[#allocation7 + $0xb0] sm:$0xf] }
  0x4a   :  { %549 = vmatpush.bf16.msra.mxu1 %v7559_v33  ;;  %v7555_v50 = vor.u32 %v9532_v42, %v7552_v43  ;;  %v9531_v51 = vld [vmem:[#allocation7 + $0xb4] sm:$0xf0]  ;;  %v9514_v52 = vld [vmem:[#allocation7 + $0x34] sm:$0xf]  ;;  %v7480_v53 = vld [vmem:[#allocation7 + $0x38] sm:$0xf0]  ;;  %v7479_v56 = vor.u32 %v9515_v48, %v7478_v47 }
  0x4b   :  { %578 = vmatpush.bf16.msra.mxu2 %v7499_v34  ;;  %v9530_v54 = vld [vmem:[#allocation7 + $0xb4] sm:$0xf]  ;;  %v7544_v55 = vld [vmem:[#allocation7 + $0xb8] sm:$0xf0]  ;;  %v7543_v57 = vor.u32 %v9531_v51, %v7542_v49  ;;  %v7483_v58 = vor.u32 %v9514_v52, %v7480_v53  ;;  %v7470_v59 = vld [vmem:[#allocation7 + $0x20] sm:$0xf] }
  0x4c   :  { %607 = vmatpush.bf16.msra.mxu3 %v7563_v38  ;;  %v9513_v60 = vld [vmem:[#allocation7 + $0x24] sm:$0xf0]  ;;  %v7534_v61 = vld [vmem:[#allocation7 + $0xa0] sm:$0xf]  ;;  %v7547_v62 = vor.u32 %v9530_v54, %v7544_v55  ;;  %v9512_v0 = vld [vmem:[#allocation7 + $0x24] sm:$0xf] }
  0x4d   :  { %521 = vmatpush.bf16.msra.mxu0 %v7487_v44  ;;  %v9529_v63 = vld [vmem:[#allocation7 + $0xa4] sm:$0xf0]  ;;  %v7472_v1 = vld [vmem:[#allocation7 + $0x28] sm:$0xf0]  ;;  %v9528_v2 = vld [vmem:[#allocation7 + $0xa4] sm:$0xf]  ;;  %v7471_v4 = vor.u32 %v9513_v60, %v7470_v59 }
  0x4e   :  { %550 = vmatpush.bf16.msra.mxu1 %v7551_v45  ;;  %v7536_v3 = vld [vmem:[#allocation7 + $0xa8] sm:$0xf0]  ;;  %v7535_v5 = vor.u32 %v9529_v63, %v7534_v61  ;;  %v7475_v6 = vor.u32 %v9512_v0, %v7472_v1  ;;  %v7462_v7 = vld [vmem:[#allocation7 + $0x10] sm:$0xf]  ;;  %v9511_v8 = vld [vmem:[#allocation7 + $0x14] sm:$0xf0] }
  0x4f   :  { %579 = vmatpush.bf16.msra.mxu2 %v7491_v46  ;;  %v7526_v9 = vld [vmem:[#allocation7 + $0x90] sm:$0xf]  ;;  %v7539_v10 = vor.u32 %v9528_v2, %v7536_v3  ;;  %v9527_v11 = vld [vmem:[#allocation7 + $0x94] sm:$0xf0]  ;;  %v9510_v12 = vld [vmem:[#allocation7 + $0x14] sm:$0xf]  ;;  %v7463_v16 = vor.u32 %v9511_v8, %v7462_v7 }
  0x50   :  { %608 = vmatpush.bf16.msra.mxu3 %v7555_v50  ;;  %v7464_v13 = vld [vmem:[#allocation7 + $0x18] sm:$0xf0]  ;;  %v9526_v14 = vld [vmem:[#allocation7 + $0x94] sm:$0xf]  ;;  %v7454_v17 = vld [vmem:[#allocation7] sm:$0xf]  ;;  %v7527_v19 = vor.u32 %v9527_v11, %v7526_v9 }
  0x51   :  { %522 = vmatpush.bf16.msra.mxu0 %v7479_v56  ;;  %v7528_v15 = vld [vmem:[#allocation7 + $0x98] sm:$0xf0]  ;;  %v9509_v18 = vld [vmem:[#allocation7 + $0x4] sm:$0xf0]  ;;  %v7467_v20 = vor.u32 %v9510_v12, %v7464_v13  ;;  %v7518_v21 = vld [vmem:[#allocation7 + $0x80] sm:$0xf] }
  0x52   :  { %551 = vmatpush.bf16.msra.mxu1 %v7543_v57  ;;  %v9525_v22 = vld [vmem:[#allocation7 + $0x84] sm:$0xf0]  ;;  %v9508_v23 = vld [vmem:[#allocation7 + $0x4] sm:$0xf]  ;;  %v7531_v24 = vor.u32 %v9526_v14, %v7528_v15  ;;  %v7456_v25 = vld [vmem:[#allocation7 + $0x8] sm:$0xf0]  ;;  %v7455_v31 = vor.u32 %v9509_v18, %v7454_v17 }
  0x53   :  { %580 = vmatpush.bf16.msra.mxu2 %v7483_v58  ;;  %v9524_v26 = vld [vmem:[#allocation7 + $0x84] sm:$0xf]  ;;  %v7520_v27 = vld [vmem:[#allocation7 + $0x88] sm:$0xf0]  ;;  %v7854_v29 = vld [vmem:[#allocation8 + $0xe0] sm:$0xf]  ;;  %v7519_v35 = vor.u32 %v9525_v22, %v7518_v21  ;;  %v7459_v36 = vor.u32 %v9508_v23, %v7456_v25 }
  0x54   :  { %609 = vmatpush.bf16.msra.mxu3 %v7547_v62  ;;  %v256_v28 = vld [vmem:[#allocation2] sm:$0xff]  ;;  %v9570_v30 = vld [vmem:[#allocation8 + $0xec] sm:$0xf0]  ;;  %v257_v37 = vld [vmem:[#allocation2 + $0x8] sm:$0xff]  ;;  %v7523_v39 = vor.u32 %v9524_v26, %v7520_v27  ;;  %s10623_s12 = smov 64   ;;  %vm3948_vm0 = vcmask 523264  }
  0x55   :  { %523 = vmatpush.bf16.msra.mxu0 %v7471_v4  ;;  %v258_v32 = vld [vmem:[#allocation2 + $0x10] sm:$0xff]  ;;  %v7982_v33 = vld [vmem:[#allocation8 + $0x1e0] sm:$0xf]  ;;  %v259_v38 = vld [vmem:[#allocation2 + $0x18] sm:$0xff]  ;;  %v7855_v40 = vor.u32 %v9570_v30, %v7854_v29  ;;  %vm4201_vm1 = vcmask 1043456   ;;  %vm4101_vm2 = vcmask 64512  }
  0x56   :  { %552 = vmatpush.bf16.msra.mxu1 %v7535_v5  ;;  %v9602_v34 = vld [vmem:[#allocation8 + $0x1ec] sm:$0xf0]  ;;  %v7838_v41 = vld [vmem:[#allocation8 + $0xc0] sm:$0xf]  ;;  %v312_v44 = vpack.c.bf16 %v258_v32, %v256_v28  ;;  %v313_v49 = vpack.c.bf16 %v259_v38, %v257_v37  ;;  %v263_v25 = vld [vmem:[#allocation2 + $0x38] sm:$0xff]  ;;  %s7414_s0 = sshll.u32 %s12711_s14, 4  ;;  %s7415_s0 = int_to_ptr.hbm [resolvable:$true] %s7414_s0 }
  0x57   :  { %581 = vmatpush.bf16.msra.mxu2 %v7475_v6  ;;  %v8110_v42 = vld [vmem:[#allocation8 + $0x2e0] sm:$0xf]  ;;  %v9634_v43 = vld [vmem:[#allocation8 + $0x2ec] sm:$0xf0]  ;;  %v7983_v46 = vor.u32 %v9602_v34, %v7982_v33  ;;  %s10625_s16 = smov [#allocation25]   ;;  %s10626_s14 = smov [#allocation26]  }
  0x58   :  { %610 = vmatpush.bf16.msra.mxu3 %v7539_v10  ;;  %v9566_v45 = vld [vmem:[#allocation8 + $0xcc] sm:$0xf0]  ;;  %v8238_v47 = vld [vmem:[#allocation8 + $0x3e0] sm:$0xf]  ;;  %v8111_v52 = vor.u32 %v9634_v43, %v8110_v42  ;;  %s7412_s17 = sshll.u32 %s10625_s16, 4  ;;  %s7425_s19 = sshll.u32 %s10626_s14, 4  ;;  %s7413_s17 = int_to_ptr.vmem [resolvable:$true] %s7412_s17  ;;  %s7426_s19 = int_to_ptr.vmem [resolvable:$true] %s7425_s19 }
  0x59   :  { %524 = vmatpush.bf16.msra.mxu0 %v7463_v16  ;;  %v9666_v48 = vld [vmem:[#allocation8 + $0x3ec] sm:$0xf0]  ;;  %v7966_v50 = vld [vmem:[#allocation8 + $0x1c0] sm:$0xf]  ;;  %v7839_v53 = vor.u32 %v9566_v45, %v7838_v41  ;;  %s7427_s9 = sshll.u32 %s12712_s15, 4  ;;  %s7428_s9 = int_to_ptr.hbm [resolvable:$true] %s7427_s9 }
  0x5a   :  { %553 = vmatpush.bf16.msra.mxu1 %v7527_v19  ;;  %v9598_v51 = vld [vmem:[#allocation8 + $0x1cc] sm:$0xf0]  ;;  %v8094_v54 = vld [vmem:[#allocation8 + $0x2c0] sm:$0xf]  ;;  %v8239_v56 = vor.u32 %v9666_v48, %v8238_v47 }
  0x5b   :  { %582 = vmatpush.bf16.msra.mxu2 %v7467_v20  ;;  %v9630_v55 = vld [vmem:[#allocation8 + $0x2cc] sm:$0xf0]  ;;  %v7822_v57 = vld [vmem:[#allocation8 + $0xa0] sm:$0xf]  ;;  %v7967_v59 = vor.u32 %v9598_v51, %v7966_v50 }
  0x5c   :  { %611 = vmatpush.bf16.msra.mxu3 %v7531_v24  ;;  %v9562_v58 = vld [vmem:[#allocation8 + $0xac] sm:$0xf0]  ;;  %v8095_v60 = vor.u32 %v9630_v55, %v8094_v54  ;;  %v7806_v61 = vld [vmem:[#allocation8 + $0x80] sm:$0xf]  ;;  %v261_v24 = vld [vmem:[#allocation2 + $0x28] sm:$0xff] }
  0x5d   :  { %525 = vmatpush.bf16.msra.mxu0 %v7455_v31  ;;  %v9558_v62 = vld [vmem:[#allocation8 + $0x8c] sm:$0xf0]  ;;  %v7950_v63 = vld [vmem:[#allocation8 + $0x1a0] sm:$0xf]  ;;  %v7823_v0 = vor.u32 %v9562_v58, %v7822_v57  ;;  %v315_v30 = vpack.c.bf16 %v263_v25, %v261_v24  ;;  %v271_v24 = vld [vmem:[#allocation2 + $0x78] sm:$0xff] }
  0x5e   :  { %554 = vmatpush.bf16.msra.mxu1 %v7519_v35  ;;  %v9594_v1 = vld [vmem:[#allocation8 + $0x1ac] sm:$0xf0]  ;;  %v8222_v2 = vld [vmem:[#allocation8 + $0x3c0] sm:$0xf]  ;;  %v7807_v13 = vor.u32 %v9558_v62, %v7806_v61 }
  0x5f   :  { %583 = vmatpush.bf16.msra.mxu2 %v7459_v36  ;;  %v9662_v3 = vld [vmem:[#allocation8 + $0x3cc] sm:$0xf0]  ;;  %v7951_v4 = vor.u32 %v9594_v1, %v7950_v63  ;;  %v8078_v6 = vld [vmem:[#allocation8 + $0x2a0] sm:$0xf] }
  0x60   :  { %612 = vmatpush.bf16.msra.mxu3 %v7523_v39  ;;  %526 = vmatmul.bf16.vlgmr.msra.gmra.mxu0 %v312_v44  ;;  %v8223_v5 = vor.u32 %v9662_v3, %v8222_v2  ;;  %v9626_v7 = vld [vmem:[#allocation8 + $0x2ac] sm:$0xf0]  ;;  %v8206_v8 = vld [vmem:[#allocation8 + $0x3a0] sm:$0xf] }
  0x61   :  { %2764 = vmatpush.bf16.msrb.mxu0 %v7855_v40  ;;  %555 = vmatmul.bf16.vlgmr.msra.gmra.mxu1 %v313_v49  ;;  %v9658_v9 = vld [vmem:[#allocation8 + $0x3ac] sm:$0xf0]  ;;  %v8079_v10 = vor.u32 %v9626_v7, %v8078_v6  ;;  %v7934_v11 = vld [vmem:[#allocation8 + $0x180] sm:$0xf] }
  0x62   :  { %2793 = vmatpush.bf16.msrb.mxu1 %v7983_v46  ;;  %584 = vmatmul.bf16.vlgmr.msra.gmra.mxu2 %v312_v44  ;;  %v9590_v12 = vld [vmem:[#allocation8 + $0x18c] sm:$0xf0]  ;;  %v8207_v14 = vor.u32 %v9658_v9, %v8206_v8  ;;  %v7790_v15 = vld [vmem:[#allocation8 + $0x60] sm:$0xf]  ;;  %v265_v9 = vld [vmem:[#allocation2 + $0x48] sm:$0xff] }
  0x63   :  { %613 = vmatmul.bf16.vlgmr.msra.gmra.mxu3 %v313_v49  ;;  %2822 = vmatpush.bf16.msrb.mxu2 %v8111_v52  ;;  %v8062_v16 = vld [vmem:[#allocation8 + $0x280] sm:$0xf]  ;;  %v9622_v17 = vld [vmem:[#allocation8 + $0x28c] sm:$0xf0]  ;;  %v7935_v19 = vor.u32 %v9590_v12, %v7934_v11 }
  0x64   :  { %2851 = vmatpush.bf16.msrb.mxu3 %v8239_v56  ;;  %v9554_v18 = vld [vmem:[#allocation8 + $0x6c] sm:$0xf0]  ;;  %v8190_v20 = vld [vmem:[#allocation8 + $0x380] sm:$0xf]  ;;  %v8063_v26 = vor.u32 %v9622_v17, %v8062_v16 }
  0x65   :  { %2765 = vmatpush.bf16.msrb.mxu0 %v7839_v53  ;;  %v9654_v21 = vld [vmem:[#allocation8 + $0x38c] sm:$0xf0]  ;;  %v260_v22 = vld [vmem:[#allocation2 + $0x20] sm:$0xff]  ;;  %v7791_v27 = vor.u32 %v9554_v18, %v7790_v15 }
  0x66   :  { %2794 = vmatpush.bf16.msrb.mxu1 %v7967_v59  ;;  %v262_v23 = vld [vmem:[#allocation2 + $0x30] sm:$0xff]  ;;  %v8191_v28 = vor.u32 %v9654_v21, %v8190_v20  ;;  %v7918_v31 = vld [vmem:[#allocation8 + $0x160] sm:$0xf] }
  0x67   :  { %2823 = vmatpush.bf16.msrb.mxu2 %v8095_v60  ;;  %v314_v29 = vpack.c.bf16 %v262_v23, %v260_v22  ;;  %v9586_v32 = vld [vmem:[#allocation8 + $0x16c] sm:$0xf0]  ;;  %v8046_v33 = vld [vmem:[#allocation8 + $0x260] sm:$0xf]  ;;  %v269_v23 = vld [vmem:[#allocation2 + $0x68] sm:$0xff] }
  0x68   :  { %2852 = vmatpush.bf16.msrb.mxu3 %v8223_v5  ;;  %v7919_v34 = vor.u32 %v9586_v32, %v7918_v31  ;;  %v9618_v35 = vld [vmem:[#allocation8 + $0x26c] sm:$0xf0]  ;;  %v8174_v36 = vld [vmem:[#allocation8 + $0x360] sm:$0xf] }
  0x69   :  { %2766 = vmatpush.bf16.msrb.mxu0 %v7823_v0  ;;  %v9650_v37 = vld [vmem:[#allocation8 + $0x36c] sm:$0xf0]  ;;  %v8047_v38 = vor.u32 %v9618_v35, %v8046_v33  ;;  %v7774_v40 = vld [vmem:[#allocation8 + $0x40] sm:$0xf] }
  0x6a   :  { %2795 = vmatpush.bf16.msrb.mxu1 %v7951_v4  ;;  %v8175_v39 = vor.u32 %v9650_v37, %v8174_v36  ;;  %v9550_v41 = vld [vmem:[#allocation8 + $0x4c] sm:$0xf0]  ;;  %v7902_v42 = vld [vmem:[#allocation8 + $0x140] sm:$0xf] }
  0x6b   :  { %2824 = vmatpush.bf16.msrb.mxu2 %v8079_v10  ;;  %v7775_v43 = vor.u32 %v9550_v41, %v7774_v40  ;;  %v9582_v44 = vld [vmem:[#allocation8 + $0x14c] sm:$0xf0]  ;;  %v8030_v45 = vld [vmem:[#allocation8 + $0x240] sm:$0xf]  ;;  %v267_v10 = vld [vmem:[#allocation2 + $0x58] sm:$0xff] }
  0x6c   :  { %2853 = vmatpush.bf16.msrb.mxu3 %v8207_v14  ;;  %v9614_v46 = vld [vmem:[#allocation8 + $0x24c] sm:$0xf0]  ;;  %v7903_v47 = vor.u32 %v9582_v44, %v7902_v42  ;;  %v8158_v49 = vld [vmem:[#allocation8 + $0x340] sm:$0xf]  ;;  %v317_v16 = vpack.c.bf16 %v267_v10, %v265_v9 }
  0x6d   :  { %2767 = vmatpush.bf16.msrb.mxu0 %v7807_v13  ;;  %v8031_v48 = vor.u32 %v9614_v46, %v8030_v45  ;;  %v9646_v50 = vld [vmem:[#allocation8 + $0x34c] sm:$0xf0]  ;;  %v7758_v51 = vld [vmem:[#allocation8 + $0x20] sm:$0xf] }
  0x6e   :  { %2796 = vmatpush.bf16.msrb.mxu1 %v7935_v19  ;;  %v8159_v52 = vor.u32 %v9646_v50, %v8158_v49  ;;  %v9546_v53 = vld [vmem:[#allocation8 + $0x2c] sm:$0xf0]  ;;  %v7886_v54 = vld [vmem:[#allocation8 + $0x120] sm:$0xf]  ;;  %v9473_v49 = vld [vmem:[#allocation5 + $0x24] sm:$0xf0] }
  0x6f   :  { %2825 = vmatpush.bf16.msrb.mxu2 %v8063_v26  ;;  %v9578_v55 = vld [vmem:[#allocation8 + $0x12c] sm:$0xf0]  ;;  %v7759_v56 = vor.u32 %v9546_v53, %v7758_v51  ;;  %v8014_v57 = vld [vmem:[#allocation8 + $0x220] sm:$0xf]  ;;  %v319_v26 = vpack.c.bf16 %v271_v24, %v269_v23  ;;  %v9468_v50 = vld [vmem:[#allocation5 + $0x4] sm:$0xf] }
  0x70   :  { %2854 = vmatpush.bf16.msrb.mxu3 %v8191_v28  ;;  %531 = vmatmul.bf16.gmra.mxu0 %v314_v29  ;;  %v9610_v58 = vld [vmem:[#allocation8 + $0x22c] sm:$0xf0]  ;;  %v8142_v59 = vld [vmem:[#allocation8 + $0x320] sm:$0xf]  ;;  %v7887_v60 = vor.u32 %v9578_v55, %v7886_v54  ;;  %v7584_v51 = vld [vmem:[#allocation5 + $0x28] sm:$0xf0] }
  0x71   :  { %2768 = vmatpush.bf16.msrb.mxu0 %v7791_v27  ;;  %560 = vmatmul.bf16.gmra.mxu1 %v315_v30  ;;  %v9642_v61 = vld [vmem:[#allocation8 + $0x32c] sm:$0xf0]  ;;  %v7742_v62 = vld [vmem:[#allocation8] sm:$0xf]  ;;  %v8015_v1 = vor.u32 %v9610_v58, %v8014_v57  ;;  %v9469_v54 = vld [vmem:[#allocation5 + $0xc] sm:$0xf]  ;;  %v10769_v57 = vor.u32 %v9468_v50, %v7584_v51 }
  0x72   :  { %589 = vmatmul.bf16.gmra.mxu2 %v314_v29  ;;  %2797 = vmatpush.bf16.msrb.mxu1 %v7919_v34  ;;  %v9542_v63 = vld [vmem:[#allocation8 + $0xc] sm:$0xf0]  ;;  %v264_v0 = vld [vmem:[#allocation2 + $0x40] sm:$0xff]  ;;  %v8143_v2 = vor.u32 %v9642_v61, %v8142_v59  ;;  %v7592_v55 = vld [vmem:[#allocation5 + $0x30] sm:$0xf0] }
  0x73   :  { %618 = vmatmul.bf16.gmra.mxu3 %v315_v30  ;;  %2826 = vmatpush.bf16.msrb.mxu2 %v8047_v38  ;;  %v7870_v3 = vld [vmem:[#allocation8 + $0x100] sm:$0xf]  ;;  %v9574_v4 = vld [vmem:[#allocation8 + $0x10c] sm:$0xf0]  ;;  %v7743_v6 = vor.u32 %v9542_v63, %v7742_v62  ;;  %12765 = vst [vmem:[#allocation39_spill] sm:$0xff] %v10769_v57  ;;  %v10773_v59 = vor.u32 %v9469_v54, %v7592_v55 }
  0x74   :  { %2855 = vmatpush.bf16.msrb.mxu3 %v8175_v39  ;;  %v266_v5 = vld [vmem:[#allocation2 + $0x50] sm:$0xff]  ;;  %v7998_v7 = vld [vmem:[#allocation8 + $0x200] sm:$0xf]  ;;  %v7871_v11 = vor.u32 %v9574_v4, %v7870_v3  ;;  %v9483_v23 = vld [vmem:[#allocation5 + $0x74] sm:$0xf0] }
  0x75   :  { %2769 = vmatpush.bf16.msrb.mxu0 %v7775_v43  ;;  %v9606_v8 = vld [vmem:[#allocation8 + $0x20c] sm:$0xf0]  ;;  %v316_v12 = vpack.c.bf16 %v266_v5, %v264_v0  ;;  %v8126_v14 = vld [vmem:[#allocation8 + $0x300] sm:$0xf]  ;;  %12767 = vst [vmem:[#allocation41_spill] sm:$0xff] %v10773_v59 }
  0x76   :  { %2798 = vmatpush.bf16.msrb.mxu1 %v7903_v47  ;;  %v7999_v13 = vor.u32 %v9606_v8, %v7998_v7  ;;  %v9638_v15 = vld [vmem:[#allocation8 + $0x30c] sm:$0xf0]  ;;  %v8366_v18 = vld [vmem:[#allocation8 + $0x4e0] sm:$0xf]  ;;  %v9478_v24 = vld [vmem:[#allocation5 + $0x54] sm:$0xf] }
  0x77   :  { %2827 = vmatpush.bf16.msrb.mxu2 %v8031_v48  ;;  %v8127_v17 = vor.u32 %v9638_v15, %v8126_v14  ;;  %v9698_v19 = vld [vmem:[#allocation8 + $0x4ec] sm:$0xf0]  ;;  %v268_v21 = vld [vmem:[#allocation2 + $0x60] sm:$0xff] }
  0x78   :  { %2856 = vmatpush.bf16.msrb.mxu3 %v8159_v52  ;;  %v8367_v20 = vor.u32 %v9698_v19, %v8366_v18  ;;  %v270_v22 = vld [vmem:[#allocation2 + $0x70] sm:$0xff]  ;;  %v8350_v27 = vld [vmem:[#allocation8 + $0x4c0] sm:$0xf]  ;;  %v7590_v52 = vld [vmem:[#allocation5 + $0x8] sm:$0xf] }
  0x79   :  { %2770 = vmatpush.bf16.msrb.mxu0 %v7759_v56  ;;  %v318_v25 = vpack.c.bf16 %v270_v22, %v268_v21  ;;  %v9694_v28 = vld [vmem:[#allocation8 + $0x4cc] sm:$0xf0]  ;;  %v8494_v29 = vld [vmem:[#allocation8 + $0x5e0] sm:$0xf] }
  0x7a   :  { %2799 = vmatpush.bf16.msrb.mxu1 %v7887_v60  ;;  %v8351_v30 = vor.u32 %v9694_v28, %v8350_v27  ;;  %v9730_v31 = vld [vmem:[#allocation8 + $0x5ec] sm:$0xf0]  ;;  %v8622_v32 = vld [vmem:[#allocation8 + $0x6e0] sm:$0xf] }
  0x7b   :  { %2828 = vmatpush.bf16.msrb.mxu2 %v8015_v1  ;;  %v9762_v33 = vld [vmem:[#allocation8 + $0x6ec] sm:$0xf0]  ;;  %v8495_v34 = vor.u32 %v9730_v31, %v8494_v29  ;;  %v8334_v36 = vld [vmem:[#allocation8 + $0x4a0] sm:$0xf]  ;;  %v9479_v29 = vld [vmem:[#allocation5 + $0x5c] sm:$0xf] }
  0x7c   :  { %2857 = vmatpush.bf16.msrb.mxu3 %v8143_v2  ;;  %v8623_v35 = vor.u32 %v9762_v33, %v8622_v32  ;;  %v9690_v37 = vld [vmem:[#allocation8 + $0x4ac] sm:$0xf0]  ;;  %v8478_v38 = vld [vmem:[#allocation8 + $0x5c0] sm:$0xf] }
  0x7d   :  { %2771 = vmatpush.bf16.msrb.mxu0 %v7743_v6  ;;  %v8335_v39 = vor.u32 %v9690_v37, %v8334_v36  ;;  %v9726_v40 = vld [vmem:[#allocation8 + $0x5cc] sm:$0xf0]  ;;  %v8606_v41 = vld [vmem:[#allocation8 + $0x6c0] sm:$0xf] }
  0x7e   :  { %2800 = vmatpush.bf16.msrb.mxu1 %v7871_v11  ;;  %v9758_v42 = vld [vmem:[#allocation8 + $0x6cc] sm:$0xf0]  ;;  %v8479_v43 = vor.u32 %v9726_v40, %v8478_v38  ;;  %v8750_v45 = vld [vmem:[#allocation8 + $0x7e0] sm:$0xf] }
  0x7f   :  { %2829 = vmatpush.bf16.msrb.mxu2 %v7999_v13  ;;  %v8607_v44 = vor.u32 %v9758_v42, %v8606_v41  ;;  %v9794_v46 = vld [vmem:[#allocation8 + $0x7ec] sm:$0xf0]  ;;  %v7582_v48 = vld [vmem:[#allocation5] sm:$0xf] }
  0x80   :  { %536 = vmatmul.bf16.gmra.mxu0 %v316_v12  ;;  %2858 = vmatpush.bf16.msrb.mxu3 %v8127_v17  ;;  %v8751_v47 = vor.u32 %v9794_v46, %v8750_v45  ;;  %v9474_v53 = vld [vmem:[#allocation5 + $0x2c] sm:$0xf0]  ;;  %v10767_v56 = vor.u32 %v9473_v49, %v7582_v48  ;;  %v8318_v60 = vld [vmem:[#allocation8 + $0x480] sm:$0xf] }
  0x81   :  { %565 = vmatmul.bf16.gmra.mxu1 %v317_v16  ;;  %2880 = vmatpush.bf16.msra.mxu0 %v8367_v20  ;;  %v10771_v58 = vor.u32 %v9474_v53, %v7590_v52  ;;  %v9686_v61 = vld [vmem:[#allocation8 + $0x48c] sm:$0xf0]  ;;  %v8462_v62 = vld [vmem:[#allocation8 + $0x5a0] sm:$0xf] }
  0x82   :  { %594 = vmatmul.bf16.gmra.mxu2 %v316_v12  ;;  %2909 = vmatpush.bf16.msra.mxu1 %v8495_v34  ;;  %12764 = vst [vmem:[#allocation38_spill] sm:$0xff] %v10767_v56  ;;  %v8319_v63 = vor.u32 %v9686_v61, %v8318_v60  ;;  %v9722_v0 = vld [vmem:[#allocation8 + $0x5ac] sm:$0xf0]  ;;  %v8734_v1 = vld [vmem:[#allocation8 + $0x7c0] sm:$0xf] }
  0x83   :  { %623 = vmatmul.bf16.gmra.mxu3 %v317_v16  ;;  %2938 = vmatpush.bf16.msra.mxu2 %v8623_v35  ;;  %12766 = vst [vmem:[#allocation40_spill] sm:$0xff] %v10771_v58  ;;  %v9790_v2 = vld [vmem:[#allocation8 + $0x7cc] sm:$0xf0]  ;;  %v8463_v3 = vor.u32 %v9722_v0, %v8462_v62  ;;  %v8590_v5 = vld [vmem:[#allocation8 + $0x6a0] sm:$0xf] }
  0x84   :  { %2967 = vmatpush.bf16.msra.mxu3 %v8751_v47  ;;  %v8735_v4 = vor.u32 %v9790_v2, %v8734_v1  ;;  %v9754_v6 = vld [vmem:[#allocation8 + $0x6ac] sm:$0xf0]  ;;  %v8718_v7 = vld [vmem:[#allocation8 + $0x7a0] sm:$0xf] }
  0x85   :  { %2881 = vmatpush.bf16.msra.mxu0 %v8351_v30  ;;  %v8591_v8 = vor.u32 %v9754_v6, %v8590_v5  ;;  %v9786_v9 = vld [vmem:[#allocation8 + $0x7ac] sm:$0xf0]  ;;  %v8302_v10 = vld [vmem:[#allocation8 + $0x460] sm:$0xf]  ;;  %v7632_v30 = vld [vmem:[#allocation5 + $0x80] sm:$0xf0] }
  0x86   :  { %2910 = vmatpush.bf16.msra.mxu1 %v8479_v43  ;;  %v9682_v11 = vld [vmem:[#allocation8 + $0x46c] sm:$0xf0]  ;;  %v8719_v12 = vor.u32 %v9786_v9, %v8718_v7  ;;  %v8446_v14 = vld [vmem:[#allocation8 + $0x580] sm:$0xf]  ;;  %v10785_v34 = vor.u32 %v9479_v29, %v7632_v30  ;;  %v9493_v7 = vld [vmem:[#allocation5 + $0xc4] sm:$0xf0] }
  0x87   :  { %2939 = vmatpush.bf16.msra.mxu2 %v8607_v44  ;;  %v8303_v13 = vor.u32 %v9682_v11, %v8302_v10  ;;  %v9718_v15 = vld [vmem:[#allocation8 + $0x58c] sm:$0xf0]  ;;  %v8574_v16 = vld [vmem:[#allocation8 + $0x680] sm:$0xf]  ;;  %v7664_v11 = vld [vmem:[#allocation5 + $0xc8] sm:$0xf0] }
  0x88   :  { %2968 = vmatpush.bf16.msra.mxu3 %v8735_v4  ;;  %v8447_v17 = vor.u32 %v9718_v15, %v8446_v14  ;;  %v9750_v18 = vld [vmem:[#allocation8 + $0x68c] sm:$0xf0]  ;;  %v8702_v19 = vld [vmem:[#allocation8 + $0x780] sm:$0xf]  ;;  %12771 = vst [vmem:[#allocation45_spill] sm:$0xff] %v10785_v34 }
  0x89   :  { %2882 = vmatpush.bf16.msra.mxu0 %v8335_v39  ;;  %v9782_v20 = vld [vmem:[#allocation8 + $0x78c] sm:$0xf0]  ;;  %v8575_v21 = vor.u32 %v9750_v18, %v8574_v16  ;;  %v9484_v27 = vld [vmem:[#allocation5 + $0x7c] sm:$0xf0]  ;;  %v9489_v14 = vld [vmem:[#allocation5 + $0xac] sm:$0xf] }
  0x8a   :  { %2911 = vmatpush.bf16.msra.mxu1 %v8463_v3  ;;  %v7622_v22 = vld [vmem:[#allocation5 + $0x50] sm:$0xf]  ;;  %v8703_v28 = vor.u32 %v9782_v20, %v8702_v19  ;;  %v8430_v35 = vld [vmem:[#allocation8 + $0x560] sm:$0xf]  ;;  %v7672_v15 = vld [vmem:[#allocation5 + $0xd0] sm:$0xf0] }
  0x8b   :  { %2940 = vmatpush.bf16.msra.mxu2 %v8591_v8  ;;  %v10779_v31 = vor.u32 %v9483_v23, %v7622_v22  ;;  %v9714_v36 = vld [vmem:[#allocation8 + $0x56c] sm:$0xf0]  ;;  %v8558_v37 = vld [vmem:[#allocation8 + $0x660] sm:$0xf]  ;;  %v9488_v8 = vld [vmem:[#allocation5 + $0xa4] sm:$0xf] }
  0x8c   :  { %2969 = vmatpush.bf16.msra.mxu3 %v8719_v12  ;;  %v8431_v38 = vor.u32 %v9714_v36, %v8430_v35  ;;  %v9746_v39 = vld [vmem:[#allocation8 + $0x66c] sm:$0xf0]  ;;  %v8686_v40 = vld [vmem:[#allocation8 + $0x760] sm:$0xf]  ;;  %v7670_v12 = vld [vmem:[#allocation5 + $0xa8] sm:$0xf]  ;;  %v10793_v20 = vor.u32 %v9488_v8, %v7664_v11 }
  0x8d   :  { %2883 = vmatpush.bf16.msra.mxu0 %v8319_v63  ;;  %12768 = vst [vmem:[#allocation42_spill] sm:$0xff] %v10779_v31  ;;  %v9778_v41 = vld [vmem:[#allocation8 + $0x76c] sm:$0xf0]  ;;  %v8559_v42 = vor.u32 %v9746_v39, %v8558_v37  ;;  %v8286_v44 = vld [vmem:[#allocation8 + $0x440] sm:$0xf] }
  0x8e   :  { %2912 = vmatpush.bf16.msra.mxu1 %v8447_v17  ;;  %v8687_v43 = vor.u32 %v9778_v41, %v8686_v40  ;;  %v9678_v45 = vld [vmem:[#allocation8 + $0x44c] sm:$0xf0]  ;;  %v8414_v46 = vld [vmem:[#allocation8 + $0x540] sm:$0xf]  ;;  %12773 = vst [vmem:[#allocation47_spill] sm:$0xff] %v10793_v20 }
  0x8f   :  { %2941 = vmatpush.bf16.msra.mxu2 %v8575_v21  ;;  %v8287_v47 = vor.u32 %v9678_v45, %v8286_v44  ;;  %v9710_v48 = vld [vmem:[#allocation8 + $0x54c] sm:$0xf0]  ;;  %v8542_v49 = vld [vmem:[#allocation8 + $0x640] sm:$0xf]  ;;  %v9503_v37 = vld [vmem:[#allocation5 + $0x114] sm:$0xf0] }
  0x90   :  { %541 = vmatmul.bf16.gmra.mxu0 %v318_v25  ;;  %2970 = vmatpush.bf16.msra.mxu3 %v8703_v28  ;;  %v9742_v50 = vld [vmem:[#allocation8 + $0x64c] sm:$0xf0]  ;;  %v8415_v51 = vor.u32 %v9710_v48, %v8414_v46  ;;  %v8670_v53 = vld [vmem:[#allocation8 + $0x740] sm:$0xf]  ;;  %v7704_v39 = vld [vmem:[#allocation5 + $0x118] sm:$0xf0] }
  0x91   :  { %570 = vmatmul.bf16.gmra.mxu1 %v319_v26  ;;  %2884 = vmatpush.bf16.msra.mxu0 %v8303_v13  ;;  %v8543_v52 = vor.u32 %v9742_v50, %v8542_v49  ;;  %v9774_v54 = vld [vmem:[#allocation8 + $0x74c] sm:$0xf0]  ;;  %v8270_v55 = vld [vmem:[#allocation8 + $0x420] sm:$0xf]  ;;  %v7710_v40 = vld [vmem:[#allocation5 + $0xf8] sm:$0xf] }
  0x92   :  { %599 = vmatmul.bf16.gmra.mxu2 %v318_v25  ;;  %v7624_v25 = vld [vmem:[#allocation5 + $0x78] sm:$0xf0]  ;;  %2913 = vmatpush.bf16.msra.mxu1 %v8431_v38  ;;  %v8671_v60 = vor.u32 %v9774_v54, %v8670_v53  ;;  %v9674_v61 = vld [vmem:[#allocation8 + $0x42c] sm:$0xf0]  ;;  %v8398_v62 = vld [vmem:[#allocation8 + $0x520] sm:$0xf] }
  0x93   :  { %628 = vmatmul.bf16.gmra.mxu3 %v319_v26  ;;  %v7630_v26 = vld [vmem:[#allocation5 + $0x58] sm:$0xf]  ;;  %v10781_v32 = vor.u32 %v9478_v24, %v7624_v25  ;;  %2942 = vmatpush.bf16.msra.mxu2 %v8559_v42  ;;  %v9706_v63 = vld [vmem:[#allocation8 + $0x52c] sm:$0xf0]  ;;  %v8271_v0 = vor.u32 %v9674_v61, %v8270_v55  ;;  %v8526_v1 = vld [vmem:[#allocation8 + $0x620] sm:$0xf] }
  0x94   :  { %v10783_v33 = vor.u32 %v9484_v27, %v7630_v26  ;;  %2971 = vmatpush.bf16.msra.mxu3 %v8687_v43  ;;  %v9738_v2 = vld [vmem:[#allocation8 + $0x62c] sm:$0xf0]  ;;  %v8654_v3 = vld [vmem:[#allocation8 + $0x720] sm:$0xf]  ;;  %v8399_v4 = vor.u32 %v9706_v63, %v8398_v62  ;;  %v10797_v26 = vor.u32 %v9489_v14, %v7672_v15  ;;  %v9498_v38 = vld [vmem:[#allocation5 + $0xf4] sm:$0xf] }
  0x95   :  { %12769 = vst [vmem:[#allocation43_spill] sm:$0xff] %v10781_v32  ;;  %2885 = vmatpush.bf16.msra.mxu0 %v8287_v47  ;;  %v9770_v5 = vld [vmem:[#allocation8 + $0x72c] sm:$0xf0]  ;;  %v7662_v6 = vld [vmem:[#allocation5 + $0xa0] sm:$0xf]  ;;  %v8527_v9 = vor.u32 %v9738_v2, %v8526_v1  ;;  %v10805_v45 = vor.u32 %v9498_v38, %v7704_v39 }
  0x96   :  { %12770 = vst [vmem:[#allocation44_spill] sm:$0xff] %v10783_v33  ;;  %2914 = vmatpush.bf16.msra.mxu1 %v8415_v51  ;;  %v8655_v10 = vor.u32 %v9770_v5, %v8654_v3  ;;  %v9494_v13 = vld [vmem:[#allocation5 + $0xcc] sm:$0xf0]  ;;  %v10791_v16 = vor.u32 %v9493_v7, %v7662_v6  ;;  %v8254_v17 = vld [vmem:[#allocation8 + $0x400] sm:$0xf] }
  0x97   :  { %2943 = vmatpush.bf16.msra.mxu2 %v8543_v52  ;;  %v9670_v18 = vld [vmem:[#allocation8 + $0x40c] sm:$0xf0]  ;;  %v8382_v19 = vld [vmem:[#allocation8 + $0x500] sm:$0xf]  ;;  %v10795_v21 = vor.u32 %v9494_v13, %v7670_v12  ;;  %v9499_v42 = vld [vmem:[#allocation5 + $0xfc] sm:$0xf] }
  0x98   :  { %2972 = vmatpush.bf16.msra.mxu3 %v8671_v60  ;;  %12772 = vst [vmem:[#allocation46_spill] sm:$0xff] %v10791_v16  ;;  %v8255_v22 = vor.u32 %v9670_v18, %v8254_v17  ;;  %v9702_v23 = vld [vmem:[#allocation8 + $0x50c] sm:$0xf0]  ;;  %v8510_v24 = vld [vmem:[#allocation8 + $0x600] sm:$0xf] }
  0x99   :  { %2886 = vmatpush.bf16.msra.mxu0 %v8271_v0  ;;  %v9734_v25 = vld [vmem:[#allocation8 + $0x60c] sm:$0xf0]  ;;  %v8383_v27 = vor.u32 %v9702_v23, %v8382_v19  ;;  %v8638_v29 = vld [vmem:[#allocation8 + $0x700] sm:$0xf]  ;;  %v7712_v43 = vld [vmem:[#allocation5 + $0x120] sm:$0xf0] }
  0x9a   :  { %2915 = vmatpush.bf16.msra.mxu1 %v8399_v4  ;;  %v8511_v28 = vor.u32 %v9734_v25, %v8510_v24  ;;  %v9766_v30 = vld [vmem:[#allocation8 + $0x70c] sm:$0xf0]  ;;  %v9504_v41 = vld [vmem:[#allocation5 + $0x11c] sm:$0xf0]  ;;  %12775 = vst [vmem:[#allocation49_spill] sm:$0xff] %v10805_v45  ;;  %v10809_v47 = vor.u32 %v9499_v42, %v7712_v43 }
  0x9b   :  { %2944 = vmatpush.bf16.msra.mxu2 %v8527_v9  ;;  %v8639_v35 = vor.u32 %v9766_v30, %v8638_v29  ;;  %v7702_v36 = vld [vmem:[#allocation5 + $0xf0] sm:$0xf]  ;;  %v10807_v46 = vor.u32 %v9504_v41, %v7710_v40  ;;  %v8878_v48 = vld [vmem:[#allocation8 + $0x8e0] sm:$0xf]  ;;  %v9475_v54 = vld [vmem:[#allocation5 + $0x34] sm:$0xf0] }
  0x9c   :  { %2973 = vmatpush.bf16.msra.mxu3 %v8655_v10  ;;  %v10803_v44 = vor.u32 %v9503_v37, %v7702_v36  ;;  %12777 = vst [vmem:[#allocation51_spill] sm:$0xff] %v10809_v47  ;;  %v9826_v49 = vld [vmem:[#allocation8 + $0x8ec] sm:$0xf0]  ;;  %v352_v51 = vld [vmem:[#allocation10] sm:$0x3] }
  0x9d   :  { %2887 = vmatpush.bf16.msra.mxu0 %v8255_v22  ;;  %12776 = vst [vmem:[#allocation50_spill] sm:$0xff] %v10807_v46  ;;  %v8879_v50 = vor.u32 %v9826_v49, %v8878_v48  ;;  %v10815_v52 = vperm.slane %v352_v51, 0  ;;  %v7598_v53 = vld [vmem:[#allocation5 + $0x10] sm:$0xf]  ;;  %v9470_v55 = vld [vmem:[#allocation5 + $0x14] sm:$0xf] }
  0x9e   :  { %2916 = vmatpush.bf16.msra.mxu1 %v8383_v27  ;;  %12774 = vst [vmem:[#allocation48_spill] sm:$0xff] %v10803_v44  ;;  %v7600_v60 = vld [vmem:[#allocation5 + $0x38] sm:$0xf0]  ;;  %v7606_v61 = vld [vmem:[#allocation5 + $0x18] sm:$0xf]  ;;  %v10817_v1 = vor.u32 %v9475_v54, %v7598_v53  ;;  %v10831_v23 = vperm.slane %v352_v51, 1 }
  0x9f   :  { %2945 = vmatpush.bf16.msra.mxu2 %v8511_v28  ;;  %v9476_v62 = vld [vmem:[#allocation5 + $0x3c] sm:$0xf0]  ;;  %v9471_v63 = vld [vmem:[#allocation5 + $0x1c] sm:$0xf]  ;;  %v7608_v0 = vld [vmem:[#allocation5 + $0x40] sm:$0xf0]  ;;  %v10819_v3 = vor.u32 %v9470_v55, %v7600_v60 }
  0xa0   :  { %2772 = vmatmul.bf16.vlgmr.msrb.gmra.mxu0 %v10767_v56  ;;  %2974 = vmatpush.bf16.msra.mxu3 %v8639_v35  ;;  %12778 = vst [vmem:[#allocation52_spill] sm:$0xff] %v10817_v1  ;;  %v10821_v4 = vor.u32 %v9476_v62, %v7606_v61  ;;  %v8862_v5 = vld [vmem:[#allocation8 + $0x8c0] sm:$0xf]  ;;  %v9822_v6 = vld [vmem:[#allocation8 + $0x8cc] sm:$0xf0]  ;;  %v10824_v10 = vor.u32 %v9471_v63, %v7608_v0 }
  0xa1   :  { %2801 = vmatmul.bf16.vlgmr.msrb.gmra.mxu1 %v10769_v57  ;;  %2996 = vmatpush.bf16.msrb.mxu0 %v8879_v50  ;;  %12779 = vst [vmem:[#allocation53_spill] sm:$0xff] %v10819_v3  ;;  %v9006_v7 = vld [vmem:[#allocation8 + $0x9e0] sm:$0xf]  ;;  %v8863_v11 = vor.u32 %v9822_v6, %v8862_v5  ;;  %v9858_v12 = vld [vmem:[#allocation8 + $0x9ec] sm:$0xf0] }
  0xa2   :  { %2830 = vmatmul.bf16.vlgmr.msrb.gmra.mxu2 %v10771_v58  ;;  %12780 = vst [vmem:[#allocation54_spill] sm:$0xff] %v10821_v4  ;;  %v9568_v13 = vld [vmem:[#allocation8 + $0xe4] sm:$0xf]  ;;  %v7856_v14 = vld [vmem:[#allocation8 + $0xf0] sm:$0xf0]  ;;  %v9007_v15 = vor.u32 %v9858_v12, %v9006_v7 }
  0xa3   :  { %2859 = vmatmul.bf16.vlgmr.msrb.gmra.mxu3 %v10773_v59  ;;  %12781 = vst [vmem:[#allocation55_spill] sm:$0xff] %v10824_v10  ;;  %v7859_v17 = vor.u32 %v9568_v13, %v7856_v14  ;;  %v9600_v19 = vld [vmem:[#allocation8 + $0x1e4] sm:$0xf]  ;;  %v7984_v22 = vld [vmem:[#allocation8 + $0x1f0] sm:$0xf0] }
  0xa4   :  { %v7987_v24 = vor.u32 %v9600_v19, %v7984_v22  ;;  %3025 = vmatpush.bf16.msrb.mxu1 %v9007_v15  ;;  %v8990_v27 = vld [vmem:[#allocation8 + $0x9c0] sm:$0xf]  ;;  %v9854_v28 = vld [vmem:[#allocation8 + $0x9cc] sm:$0xf0]  ;;  %v9564_v29 = vld [vmem:[#allocation8 + $0xc4] sm:$0xf] }
  0xa5   :  { %2997 = vmatpush.bf16.msrb.mxu0 %v8863_v11  ;;  %3054 = vmatpush.bf16.msrb.mxu2 %v7859_v17  ;;  %v8991_v37 = vor.u32 %v9854_v28, %v8990_v27  ;;  %v7840_v38 = vld [vmem:[#allocation8 + $0xd0] sm:$0xf0]  ;;  %v9596_v39 = vld [vmem:[#allocation8 + $0x1c4] sm:$0xf]  ;;  %v8846_v43 = vld [vmem:[#allocation8 + $0x8a0] sm:$0xf] }
  0xa6   :  { %3083 = vmatpush.bf16.msrb.mxu3 %v7987_v24  ;;  %v7968_v40 = vld [vmem:[#allocation8 + $0x1d0] sm:$0xf0]  ;;  %v9818_v48 = vld [vmem:[#allocation8 + $0x8ac] sm:$0xf0]  ;;  %v7843_v49 = vor.u32 %v9564_v29, %v7840_v38  ;;  %v7638_v53 = vld [vmem:[#allocation5 + $0x60] sm:$0xf] }
  0xa7   :  { %v7971_v50 = vor.u32 %v9596_v39, %v7968_v40  ;;  %v9485_v54 = vld [vmem:[#allocation5 + $0x84] sm:$0xf0]  ;;  %v8847_v55 = vor.u32 %v9818_v48, %v8846_v43  ;;  %v9480_v61 = vld [vmem:[#allocation5 + $0x64] sm:$0xf]  ;;  %v8974_v62 = vld [vmem:[#allocation8 + $0x9a0] sm:$0xf] }
  0xa8   :  { %3026 = vmatpush.bf16.msrb.mxu1 %v8991_v37  ;;  %v9850_v63 = vld [vmem:[#allocation8 + $0x9ac] sm:$0xf0]  ;;  %v9560_v0 = vld [vmem:[#allocation8 + $0xa4] sm:$0xf]  ;;  %v7824_v5 = vld [vmem:[#allocation8 + $0xb0] sm:$0xf0]  ;;  %v10840_v19 = vor.u32 %v9485_v54, %v7638_v53 }
  0xa9   :  { %3055 = vmatpush.bf16.msrb.mxu2 %v7843_v49  ;;  %2998 = vmatpush.bf16.msrb.mxu0 %v8847_v55  ;;  %v9592_v6 = vld [vmem:[#allocation8 + $0x1a4] sm:$0xf]  ;;  %v7952_v7 = vld [vmem:[#allocation8 + $0x1b0] sm:$0xf0]  ;;  %v9486_v11 = vld [vmem:[#allocation5 + $0x8c] sm:$0xf0]  ;;  %v7827_v12 = vor.u32 %v9560_v0, %v7824_v5 }
  0xaa   :  { %3084 = vmatpush.bf16.msrb.mxu3 %v7971_v50  ;;  %v7955_v13 = vor.u32 %v9592_v6, %v7952_v7  ;;  %v9481_v14 = vld [vmem:[#allocation5 + $0x6c] sm:$0xf]  ;;  %v7648_v15 = vld [vmem:[#allocation5 + $0x90] sm:$0xf0]  ;;  %12785 = vst [vmem:[#allocation59_spill] sm:$0xff] %v10840_v19 }
  0xab   :  { %v8830_v22 = vld [vmem:[#allocation8 + $0x880] sm:$0xf]  ;;  %v9814_v24 = vld [vmem:[#allocation8 + $0x88c] sm:$0xf0]  ;;  %v9556_v38 = vld [vmem:[#allocation8 + $0x84] sm:$0xf] }
  0xac   :  { %v9846_v37 = vld [vmem:[#allocation8 + $0x98c] sm:$0xf0]  ;;  %v7808_v39 = vld [vmem:[#allocation8 + $0x90] sm:$0xf0]  ;;  %v9588_v49 = vld [vmem:[#allocation8 + $0x184] sm:$0xf] }
  0xad   :  { %3056 = vmatpush.bf16.msrb.mxu2 %v7827_v12  ;;  %v7811_v48 = vor.u32 %v9556_v38, %v7808_v39  ;;  %v7936_v50 = vld [vmem:[#allocation8 + $0x190] sm:$0xf0]  ;;  %v9842_v5 = vld [vmem:[#allocation8 + $0x96c] sm:$0xf0]  ;;  %v9552_v7 = vld [vmem:[#allocation8 + $0x64] sm:$0xf] }
  0xae   :  { %3085 = vmatpush.bf16.msrb.mxu3 %v7955_v13  ;;  %v7939_v54 = vor.u32 %v9588_v49, %v7936_v50  ;;  %v7904_v49 = vld [vmem:[#allocation8 + $0x150] sm:$0xf0] }
  0xb0   :  { %2777 = vmatmul.bf16.gmra.mxu0 %v10779_v31 }
  0xb1   :  { %2806 = vmatmul.bf16.gmra.mxu1 %v10781_v32  ;;  %3057 = vmatpush.bf16.msrb.mxu2 %v7811_v48  ;;  %v9580_v48 = vld [vmem:[#allocation8 + $0x144] sm:$0xf] }
  0xb2   :  { %2835 = vmatmul.bf16.gmra.mxu2 %v10783_v33  ;;  %3086 = vmatpush.bf16.msrb.mxu3 %v7939_v54  ;;  %v7678_v54 = vld [vmem:[#allocation5 + $0xb0] sm:$0xf] }
  0xb3   :  { %2864 = vmatmul.bf16.gmra.mxu3 %v10785_v34 }
  0xc0   :  { %2782 = vmatmul.bf16.gmra.mxu0 %v10791_v16 }
  0xc1   :  { %2811 = vmatmul.bf16.gmra.mxu1 %v10793_v20 }
  0xc2   :  { %2840 = vmatmul.bf16.gmra.mxu2 %v10795_v21 }
  0xc3   :  { %2869 = vmatmul.bf16.gmra.mxu3 %v10797_v26 }
  0xd0   :  { %2787 = vmatmul.bf16.gmra.mxu0 %v10803_v44 }
  0xd1   :  { %2816 = vmatmul.bf16.gmra.mxu1 %v10805_v45 }
  0xd2   :  { %2845 = vmatmul.bf16.gmra.mxu2 %v10807_v46 }
  0xd3   :  { %2874 = vmatmul.bf16.gmra.mxu3 %v10809_v47 }
  0xdd   :  { %v527_v2 = vpop.f32.mrf.mxu0 }
  0xde   :  { %v528_v8 = vadd.f32 %v527_v2, %v10815_v52  ;;  %v556_v9 = vpop.f32.mrf.mxu1  ;;  %v8975_v2 = vor.u32 %v9850_v63, %v8974_v62  ;;  %v9810_v62 = vld [vmem:[#allocation8 + $0x86c] sm:$0xf0] }
  0xe0   :  { %v10826_v18 = vadd.f32 %v556_v9, %v528_v8  ;;  %2888 = vmatmul.bf16.vlgmr.msra.gmra.mxu0 %v10817_v1  ;;  %v7640_v8 = vld [vmem:[#allocation5 + $0x88] sm:$0xf0]  ;;  %v7646_v9 = vld [vmem:[#allocation5 + $0x68] sm:$0xf]  ;;  %3027 = vmatpush.bf16.msrb.mxu1 %v8975_v2  ;;  %v8942_v2 = vld [vmem:[#allocation8 + $0x960] sm:$0xf] }
  0xe1   :  { %2917 = vmatmul.bf16.vlgmr.msra.gmra.mxu1 %v10819_v3  ;;  %v8943_v6 = vor.u32 %v9842_v5, %v8942_v2  ;;  %v9490_v2 = vld [vmem:[#allocation5 + $0xb4] sm:$0xf]  ;;  %v7680_v5 = vld [vmem:[#allocation5 + $0xd8] sm:$0xf0] }
  0xe2   :  { %12782 = vst [vmem:[#allocation56_spill] sm:$0xff] %v10826_v18  ;;  %2946 = vmatmul.bf16.vlgmr.msra.gmra.mxu2 %v10821_v4  ;;  %v8016_v18 = vld [vmem:[#allocation8 + $0x230] sm:$0xf0] }
  0xe3   :  { %2975 = vmatmul.bf16.vlgmr.msra.gmra.mxu3 %v10824_v10 }
  0xe5   :  { %v585_v25 = vpop.f32.mrf.mxu2  ;;  %v529_v36 = vpop.f32.mrf.mxu0 }
  0xe6   :  { %v586_v30 = vadd.f32 %v585_v25, %v10831_v23  ;;  %v614_v35 = vpop.f32.mrf.mxu3  ;;  %v530_v41 = vadd.f32 %v529_v36, %v10815_v52  ;;  %v558_v42 = vpop.f32.mrf.mxu1  ;;  %v8958_v25 = vld [vmem:[#allocation8 + $0x980] sm:$0xf]  ;;  %v8831_v36 = vor.u32 %v9814_v24, %v8830_v22 }
  0xe7   :  { %v8959_v43 = vor.u32 %v9846_v37, %v8958_v25  ;;  %v9548_v37 = vld [vmem:[#allocation8 + $0x44] sm:$0xf] }
  0xe8   :  { %v10836_v51 = vadd.f32 %v614_v35, %v586_v30  ;;  %v10838_v60 = vadd.f32 %v558_v42, %v530_v41  ;;  %v10843_v30 = vor.u32 %v9480_v61, %v7640_v8  ;;  %v10845_v35 = vor.u32 %v9486_v11, %v7646_v9  ;;  %2999 = vmatpush.bf16.msrb.mxu0 %v8831_v36  ;;  %v8814_v61 = vld [vmem:[#allocation8 + $0x860] sm:$0xf]  ;;  %v7792_v8 = vld [vmem:[#allocation8 + $0x70] sm:$0xf0]  ;;  %v9584_v9 = vld [vmem:[#allocation8 + $0x164] sm:$0xf] }
  0xe9   :  { %v10848_v42 = vor.u32 %v9481_v14, %v7648_v15  ;;  %3028 = vmatpush.bf16.msrb.mxu1 %v8959_v43  ;;  %v8815_v63 = vor.u32 %v9810_v62, %v8814_v61  ;;  %v7795_v13 = vor.u32 %v9552_v7, %v7792_v8  ;;  %v7920_v14 = vld [vmem:[#allocation8 + $0x170] sm:$0xf0]  ;;  %v8798_v15 = vld [vmem:[#allocation8 + $0x840] sm:$0xf]  ;;  %v9838_v36 = vld [vmem:[#allocation8 + $0x94c] sm:$0xf0]  ;;  %v7907_v62 = vor.u32 %v9580_v48, %v7904_v49 }
  0xea   :  { %12783 = vst [vmem:[#allocation57_spill] sm:$0xff] %v10836_v51  ;;  %v7776_v43 = vld [vmem:[#allocation8 + $0x50] sm:$0xf0]  ;;  %v8782_v7 = vld [vmem:[#allocation8 + $0x820] sm:$0xf]  ;;  %v10869_v49 = vor.u32 %v9490_v2, %v7680_v5 }
  0xeb   :  { %12784 = vst [vmem:[#allocation58_spill] sm:$0xff] %v10838_v60  ;;  %3058 = vmatpush.bf16.msrb.mxu2 %v7795_v13  ;;  %v7779_v61 = vor.u32 %v9548_v37, %v7776_v43  ;;  %v9802_v8 = vld [vmem:[#allocation8 + $0x82c] sm:$0xf0]  ;;  %v9544_v13 = vld [vmem:[#allocation8 + $0x24] sm:$0xf] }
  0xec   :  { %12786 = vst [vmem:[#allocation60_spill] sm:$0xff] %v10843_v30  ;;  %3000 = vmatpush.bf16.msrb.mxu0 %v8815_v63  ;;  %v7872_v5 = vld [vmem:[#allocation8 + $0x110] sm:$0xf0]  ;;  %v9676_v60 = vld [vmem:[#allocation8 + $0x444] sm:$0xf] }
  0xed   :  { %v587_v17 = vpop.f32.mrf.mxu2  ;;  %v532_v29 = vpop.f32.mrf.mxu0  ;;  %12787 = vst [vmem:[#allocation61_spill] sm:$0xff] %v10845_v35  ;;  %3029 = vmatpush.bf16.msrb.mxu1 %v8943_v6  ;;  %v7686_v6 = vld [vmem:[#allocation5 + $0xb8] sm:$0xf] }
  0xee   :  { %v588_v27 = vadd.f32 %v587_v17, %v10831_v23  ;;  %v616_v28 = vpop.f32.mrf.mxu3  ;;  %v533_v40 = vadd.f32 %v532_v29, %v10815_v52  ;;  %v561_v41 = vpop.f32.mrf.mxu1  ;;  %12788 = vst [vmem:[#allocation62_spill] sm:$0xff] %v10848_v42  ;;  %v9806_v17 = vld [vmem:[#allocation8 + $0x84c] sm:$0xf0]  ;;  %v8926_v29 = vld [vmem:[#allocation8 + $0x940] sm:$0xf] }
  0xef   :  { %3059 = vmatpush.bf16.msrb.mxu2 %v7779_v61 }
  0xf0   :  { %v10850_v53 = vadd.f32 %v616_v28, %v588_v27  ;;  %v562_v55 = vadd.f32 %v561_v41, %v533_v40  ;;  %2893 = vmatmul.bf16.gmra.mxu0 %v10840_v19  ;;  %v7923_v27 = vor.u32 %v9584_v9, %v7920_v14  ;;  %v8799_v28 = vor.u32 %v9806_v17, %v8798_v15  ;;  %v8910_v9 = vld [vmem:[#allocation8 + $0x920] sm:$0xf]  ;;  %v7760_v14 = vld [vmem:[#allocation8 + $0x30] sm:$0xf0] }
  0xf1   :  { %2922 = vmatmul.bf16.gmra.mxu1 %v10843_v30  ;;  %v8927_v41 = vor.u32 %v9838_v36, %v8926_v29  ;;  %v9496_v15 = vld [vmem:[#allocation5 + $0xdc] sm:$0xf0] }
  0xf2   :  { %12789 = vst [vmem:[#allocation63_spill] sm:$0xff] %v10850_v53  ;;  %2951 = vmatmul.bf16.gmra.mxu2 %v10845_v35  ;;  %v10855_v0 = vpack.c.bf16 %v562_v55, %v562_v55  ;;  %v9495_v55 = vld [vmem:[#allocation5 + $0xd4] sm:$0xf0]  ;;  %3087 = vmatpush.bf16.msrb.mxu3 %v7923_v27  ;;  %v9491_v27 = vld [vmem:[#allocation5 + $0xbc] sm:$0xf]  ;;  %v10871_v61 = vor.u32 %v9496_v15, %v7686_v6 }
  0xf3   :  { %2980 = vmatmul.bf16.gmra.mxu3 %v10848_v42  ;;  %3001 = vmatpush.bf16.msrb.mxu0 %v8799_v28  ;;  %v7688_v28 = vld [vmem:[#allocation5 + $0xe0] sm:$0xf0]  ;;  %v10866_v37 = vor.u32 %v9495_v55, %v7678_v54 }
  0xf4   :  { %12790 = vst [vmem:[#allocation64_spill] sm:$0xff] %v10855_v0  ;;  %v4410_v12 = vunpack.c.l.b16 %v10855_v0  ;;  %3030 = vmatpush.bf16.msrb.mxu1 %v8927_v41  ;;  %v10874_v54 = vor.u32 %v9491_v27, %v7688_v28 }
  0xf5   :  { %v590_v11 = vpop.f32.mrf.mxu2  ;;  %v534_v25 = vpop.f32.mrf.mxu0 }
  0xf6   :  { %v591_v22 = vadd.f32 %v590_v11, %v10831_v23  ;;  %v619_v24 = vpop.f32.mrf.mxu3  ;;  %v535_v38 = vadd.f32 %v534_v25, %v10815_v52  ;;  %v563_v39 = vpop.f32.mrf.mxu1  ;;  %v4411_v40 = vpack.c.b16 %v4410_v12, %v4410_v12  ;;  %v8783_v11 = vor.u32 %v9802_v8, %v8782_v7  ;;  %v9834_v12 = vld [vmem:[#allocation8 + $0x92c] sm:$0xf0]  ;;  %v7888_v25 = vld [vmem:[#allocation8 + $0x130] sm:$0xf0]  ;;  %3088 = vmatpush.bf16.msrb.mxu3 %v7907_v62  ;;  %v9540_v62 = vld [vmem:[#allocation8 + $0x4] sm:$0xf] }
  0xf7   :  { %v8911_v17 = vor.u32 %v9834_v12, %v8910_v9  ;;  %v9830_v8 = vld [vmem:[#allocation8 + $0x90c] sm:$0xf0]  ;;  %v7744_v12 = vld [vmem:[#allocation8 + $0x10] sm:$0xf0] }
  0xf8   :  { %v10861_v50 = vadd.f32 %v619_v24, %v591_v22  ;;  %v10863_v63 = vadd.f32 %v563_v39, %v535_v38  ;;  %4412 = vrot.lane.b32.xlu1 %v4411_v40, %s10623_s12  ;;  %v7763_v22 = vor.u32 %v9544_v13, %v7760_v14  ;;  %v9576_v24 = vld [vmem:[#allocation8 + $0x124] sm:$0xf]  ;;  %3002 = vmatpush.bf16.msrb.mxu0 %v8783_v11  ;;  %v8766_v38 = vld [vmem:[#allocation8 + $0x800] sm:$0xf]  ;;  %v9798_v39 = vld [vmem:[#allocation8 + $0x80c] sm:$0xf0] }
  0xf9   :  { %v7891_v29 = vor.u32 %v9576_v24, %v7888_v25  ;;  %v8894_v40 = vld [vmem:[#allocation8 + $0x900] sm:$0xf]  ;;  %3031 = vmatpush.bf16.msrb.mxu1 %v8911_v17  ;;  %v8767_v7 = vor.u32 %v9798_v39, %v8766_v38  ;;  %v9572_v13 = vld [vmem:[#allocation8 + $0x104] sm:$0xf]  ;;  %v7747_v2 = vor.u32 %v9540_v62, %v7744_v12  ;;  %v9505_v39 = vld [vmem:[#allocation5 + $0x124] sm:$0xf0] }
  0xfa   :  { %12791 = vst [vmem:[#allocation65_spill] sm:$0xff] %v10861_v50  ;;  %3060 = vmatpush.bf16.msrb.mxu2 %v7763_v22  ;;  %v8895_v55 = vor.u32 %v9830_v8, %v8894_v40  ;;  %v7875_v15 = vor.u32 %v9572_v13, %v7872_v5  ;;  %v7718_v38 = vld [vmem:[#allocation5 + $0x100] sm:$0xf]  ;;  %v9500_v40 = vld [vmem:[#allocation5 + $0x104] sm:$0xf] }
  0xfb   :  { %12792 = vst [vmem:[#allocation66_spill] sm:$0xff] %v10863_v63  ;;  %3089 = vmatpush.bf16.msrb.mxu3 %v7891_v29  ;;  %v7728_v8 = vld [vmem:[#allocation5 + $0x130] sm:$0xf0] }
  0xfc   :  { %3003 = vmatpush.bf16.msrb.mxu0 %v8767_v7  ;;  %v9501_v7 = vld [vmem:[#allocation5 + $0x10c] sm:$0xf]  ;;  %v8160_v63 = vld [vmem:[#allocation8 + $0x350] sm:$0xf0] }
  0xfd   :  { %v592_v36 = vpop.f32.mrf.mxu2  ;;  %v537_v48 = vpop.f32.mrf.mxu0  ;;  %3032 = vmatpush.bf16.msrb.mxu1 %v8895_v55 }
  0xfe   :  { %v593_v41 = vadd.f32 %v592_v36, %v10831_v23  ;;  %v621_v43 = vpop.f32.mrf.mxu3  ;;  %v538_v9 = vadd.f32 %v537_v48, %v10815_v52  ;;  %v566_v11 = vpop.f32.mrf.mxu1  ;;  %3061 = vmatpush.bf16.msrb.mxu2 %v7747_v2  ;;  %v9506_v48 = vld [vmem:[#allocation5 + $0x12c] sm:$0xf0] }
  0xff   :  { %3090 = vmatpush.bf16.msrb.mxu3 %v7875_v15 }
 0x100   :  { %v10876_v14 = vadd.f32 %v621_v43, %v593_v41  ;;  %v10878_v6 = vadd.f32 %v566_v11, %v538_v9  ;;  %2898 = vmatmul.bf16.gmra.mxu0 %v10866_v37  ;;  %v7720_v41 = vld [vmem:[#allocation5 + $0x128] sm:$0xf0]  ;;  %v7726_v43 = vld [vmem:[#allocation5 + $0x108] sm:$0xf]  ;;  %v10890_v9 = vor.u32 %v9505_v39, %v7718_v38 }
 0x101   :  { %2927 = vmatmul.bf16.gmra.mxu1 %v10869_v49  ;;  %v10893_v13 = vor.u32 %v9500_v40, %v7720_v41  ;;  %v10895_v2 = vor.u32 %v9506_v48, %v7726_v43 }
 0x102   :  { %12793 = vst [vmem:[#allocation67_spill] sm:$0xff] %v10876_v14  ;;  %2956 = vmatmul.bf16.gmra.mxu2 %v10871_v61 }
 0x103   :  { %12794 = vst [vmem:[#allocation68_spill] sm:$0xff] %v10878_v6  ;;  %2985 = vmatmul.bf16.gmra.mxu3 %v10874_v54  ;;  %v9684_v6 = vld [vmem:[#allocation8 + $0x484] sm:$0xf] }
 0x104   :  { %12797 = vst [vmem:[#allocation71_spill] sm:$0xff] %v10895_v2 }
 0x105   :  { %v595_v17 = vpop.f32.mrf.mxu2  ;;  %v539_v25 = vpop.f32.mrf.mxu0 }
 0x106   :  { %v596_v22 = vadd.f32 %v595_v17, %v10831_v23  ;;  %v624_v24 = vpop.f32.mrf.mxu3  ;;  %v540_v27 = vadd.f32 %v539_v25, %v10815_v52  ;;  %v568_v28 = vpop.f32.mrf.mxu1  ;;  %v10898_v17 = vor.u32 %v9501_v7, %v7728_v8  ;;  %v9632_v25 = vld [vmem:[#allocation8 + $0x2e4] sm:$0xf] }
 0x107   :  { %v10912_v8 = vld [vmem:[#allocation11] sm:$0xf] }
 0x108   :  { %v10886_v29 = vadd.f32 %v624_v24, %v596_v22  ;;  %v10888_v36 = vadd.f32 %v568_v28, %v540_v27  ;;  %12798 = vst [vmem:[#allocation72_spill] sm:$0xff] %v10898_v17  ;;  %v8112_v27 = vld [vmem:[#allocation8 + $0x2f0] sm:$0xf0]  ;;  %v10917_v50 = vperm.slane %v10912_v8, 0 }
 0x109   :  { %v8115_v28 = vor.u32 %v9632_v25, %v8112_v27  ;;  %v8240_v27 = vld [vmem:[#allocation8 + $0x3f0] sm:$0xf0] }
 0x10a   :  { %12795 = vst [vmem:[#allocation69_spill] sm:$0xff] %v10886_v29 }
 0x10b   :  { %12796 = vst [vmem:[#allocation70_spill] sm:$0xff] %v10888_v36  ;;  %3112 = vmatpush.bf16.msra.mxu0 %v8115_v28  ;;  %v9696_v28 = vld [vmem:[#allocation8 + $0x4e4] sm:$0xf] }
 0x10d   :  { %v597_v62 = vpop.f32.mrf.mxu2  ;;  %v542_v12 = vpop.f32.mrf.mxu0 }
 0x10e   :  { %v598_v11 = vadd.f32 %v597_v62, %v10831_v23  ;;  %v626_v55 = vpop.f32.mrf.mxu3  ;;  %v543_v5 = vadd.f32 %v542_v12, %v10815_v52  ;;  %v571_v15 = vpop.f32.mrf.mxu1  ;;  %v7614_v62 = vld [vmem:[#allocation5 + $0x20] sm:$0xf]  ;;  %v9628_v12 = vld [vmem:[#allocation8 + $0x2c4] sm:$0xf] }
 0x110   :  { %v10900_v22 = vadd.f32 %v626_v55, %v598_v11  ;;  %v10902_v24 = vadd.f32 %v571_v15, %v543_v5  ;;  %2903 = vmatmul.bf16.gmra.mxu0 %v10890_v9  ;;  %v9477_v11 = vld [vmem:[#allocation5 + $0x44] sm:$0xf0]  ;;  %v8096_v5 = vld [vmem:[#allocation8 + $0x2d0] sm:$0xf0]  ;;  %v9664_v15 = vld [vmem:[#allocation8 + $0x3e4] sm:$0xf] }
 0x111   :  { %2932 = vmatmul.bf16.gmra.mxu1 %v10893_v13  ;;  %v8099_v25 = vor.u32 %v9628_v12, %v8096_v5  ;;  %v10919_v14 = vor.u32 %v9477_v11, %v7614_v62  ;;  %v9660_v62 = vld [vmem:[#allocation8 + $0x3c4] sm:$0xf] }
 0x112   :  { %12799 = vst [vmem:[#allocation73_spill] sm:$0xff] %v10900_v22  ;;  %2961 = vmatmul.bf16.gmra.mxu2 %v10895_v2  ;;  %v9692_v11 = vld [vmem:[#allocation8 + $0x4c4] sm:$0xf] }
 0x113   :  { %12800 = vst [vmem:[#allocation74_spill] sm:$0xff] %v10902_v24  ;;  %2990 = vmatmul.bf16.gmra.mxu3 %v10898_v17  ;;  %3113 = vmatpush.bf16.msra.mxu0 %v8099_v25  ;;  %v8080_v25 = vld [vmem:[#allocation8 + $0x2b0] sm:$0xf0]  ;;  %v7656_v24 = vld [vmem:[#allocation5 + $0x98] sm:$0xf0] }
 0x115   :  { %v600_v38 = vpop.f32.mrf.mxu2  ;;  %v544_v41 = vpop.f32.mrf.mxu0 }
 0x116   :  { %v601_v39 = vadd.f32 %v600_v38, %v10831_v23  ;;  %v629_v40 = vpop.f32.mrf.mxu3  ;;  %v545_v43 = vadd.f32 %v544_v41, %v10815_v52  ;;  %v573_v48 = vpop.f32.mrf.mxu1  ;;  %v8368_v38 = vld [vmem:[#allocation8 + $0x4f0] sm:$0xf0]  ;;  %v9472_v52 = vld [vmem:[#allocation5 + $0x24] sm:$0xf]  ;;  %v7616_v41 = vld [vmem:[#allocation5 + $0x48] sm:$0xf0] }
 0x117   :  { %v10922_v5 = vor.u32 %v9472_v52, %v7616_v41  ;;  %v9728_v52 = vld [vmem:[#allocation8 + $0x5e4] sm:$0xf]  ;;  %v8496_v41 = vld [vmem:[#allocation8 + $0x5f0] sm:$0xf0] }
 0x118   :  { %v10910_v7 = vadd.f32 %v629_v40, %v601_v39  ;;  %v10914_v55 = vadd.f32 %v573_v48, %v545_v43  ;;  %v8243_v39 = vor.u32 %v9664_v15, %v8240_v27  ;;  %v8371_v40 = vor.u32 %v9696_v28, %v8368_v38  ;;  %v9624_v15 = vld [vmem:[#allocation8 + $0x2a4] sm:$0xf]  ;;  %v8352_v27 = vld [vmem:[#allocation8 + $0x4d0] sm:$0xf0] }
 0x119   :  { %v8355_v38 = vor.u32 %v9692_v11, %v8352_v27  ;;  %v9620_v27 = vld [vmem:[#allocation8 + $0x284] sm:$0xf] }
 0x11a   :  { %12801 = vst [vmem:[#allocation75_spill] sm:$0xff] %v10910_v7  ;;  %3141 = vmatpush.bf16.msra.mxu1 %v8243_v39  ;;  %3170 = vmatpush.bf16.msra.mxu2 %v8371_v40  ;;  %v9724_v39 = vld [vmem:[#allocation8 + $0x5c4] sm:$0xf]  ;;  %v8480_v40 = vld [vmem:[#allocation8 + $0x5d0] sm:$0xf0] }
 0x11b   :  { %12802 = vst [vmem:[#allocation76_spill] sm:$0xff] %v10914_v55 }
 0x11d   :  { %v602_v7 = vpop.f32.mrf.mxu2  ;;  %v2773_v12 = vpop.f32.mrf.mxu0 }
 0x11e   :  { %v603_v43 = vadd.f32 %v602_v7, %v10831_v23  ;;  %v631_v48 = vpop.f32.mrf.mxu3  ;;  %v2774_v22 = vadd.f32 %v2773_v12, %v10917_v50  ;;  %v2802_v53 = vpop.f32.mrf.mxu1  ;;  %v8083_v23 = vor.u32 %v9624_v15, %v8080_v25  ;;  %v8224_v7 = vld [vmem:[#allocation8 + $0x3d0] sm:$0xf0]  ;;  %3171 = vmatpush.bf16.msra.mxu2 %v8355_v38  ;;  %v8483_v15 = vor.u32 %v9724_v39, %v8480_v40  ;;  %v9720_v40 = vld [vmem:[#allocation8 + $0x5a4] sm:$0xf] }
 0x11f   :  { %v8227_v28 = vor.u32 %v9660_v62, %v8224_v7  ;;  %v7654_v62 = vld [vmem:[#allocation5 + $0x70] sm:$0xf]  ;;  %v9487_v7 = vld [vmem:[#allocation5 + $0x94] sm:$0xf0] }
 0x120   :  { %v10925_v29 = vadd.f32 %v631_v48, %v603_v43  ;;  %v2803_v51 = vadd.f32 %v2802_v53, %v2774_v22  ;;  %3004 = vmatmul.bf16.vlgmr.msrb.gmra.mxu0 %v10919_v14  ;;  %v8499_v53 = vor.u32 %v9728_v52, %v8496_v41  ;;  %v8064_v52 = vld [vmem:[#allocation8 + $0x290] sm:$0xf0]  ;;  %v10934_v36 = vor.u32 %v9487_v7, %v7654_v62 }
 0x121   :  { %3033 = vmatmul.bf16.vlgmr.msrb.gmra.mxu1 %v10922_v5  ;;  %3114 = vmatpush.bf16.msra.mxu0 %v8083_v23  ;;  %v9482_v23 = vld [vmem:[#allocation5 + $0x74] sm:$0xf]  ;;  %v8067_v38 = vor.u32 %v9620_v27, %v8064_v52 }
 0x122   :  { %12803 = vst [vmem:[#allocation77_spill] sm:$0xff] %v10925_v29  ;;  %3062 = vmatmul.bf16.vlgmr.msrb.gmra.mxu2 %v10767_v56  ;;  %3142 = vmatpush.bf16.msra.mxu1 %v8227_v28  ;;  %v9656_v28 = vld [vmem:[#allocation8 + $0x3a4] sm:$0xf]  ;;  %v8208_v41 = vld [vmem:[#allocation8 + $0x3b0] sm:$0xf0]  ;;  %v10936_v0 = vor.u32 %v9482_v23, %v7656_v24 }
 0x123   :  { %3091 = vmatmul.bf16.vlgmr.msrb.gmra.mxu3 %v10769_v57  ;;  %v9648_v23 = vld [vmem:[#allocation8 + $0x364] sm:$0xf] }
 0x124   :  { %3199 = vmatpush.bf16.msra.mxu3 %v8499_v53  ;;  %v8211_v53 = vor.u32 %v9656_v28, %v8208_v41  ;;  %v8320_v41 = vld [vmem:[#allocation8 + $0x490] sm:$0xf0]  ;;  %v9768_v56 = vld [vmem:[#allocation8 + $0x724] sm:$0xf] }
 0x125   :  { %v2831_v22 = vpop.f32.mrf.mxu2  ;;  %v2775_v12 = vpop.f32.mrf.mxu0  ;;  %3115 = vmatpush.bf16.msra.mxu0 %v8067_v38  ;;  %v8323_v62 = vor.u32 %v9684_v6, %v8320_v41  ;;  %v9612_v41 = vld [vmem:[#allocation8 + $0x244] sm:$0xf] }
 0x126   :  { %v2832_v43 = vadd.f32 %v2831_v22, %v2803_v51  ;;  %v2860_v48 = vpop.f32.mrf.mxu3  ;;  %v2776_v25 = vadd.f32 %v2775_v12, %v10917_v50  ;;  %v2804_v29 = vpop.f32.mrf.mxu1  ;;  %v9688_v51 = vld [vmem:[#allocation8 + $0x4a4] sm:$0xf]  ;;  %v8336_v22 = vld [vmem:[#allocation8 + $0x4b0] sm:$0xf0]  ;;  %3143 = vmatpush.bf16.msra.mxu1 %v8211_v53 }
 0x127   :  { %v8339_v39 = vor.u32 %v9688_v51, %v8336_v22  ;;  %v8464_v12 = vld [vmem:[#allocation8 + $0x5b0] sm:$0xf0]  ;;  %v9716_v51 = vld [vmem:[#allocation8 + $0x584] sm:$0xf] }
 0x128   :  { %v10932_v55 = vadd.f32 %v2860_v48, %v2832_v43  ;;  %v2805_v11 = vadd.f32 %v2804_v29, %v2776_v25  ;;  %3200 = vmatpush.bf16.msra.mxu3 %v8483_v15  ;;  %v8467_v43 = vor.u32 %v9720_v40, %v8464_v12  ;;  %v9652_v29 = vld [vmem:[#allocation8 + $0x384] sm:$0xf]  ;;  %v8192_v25 = vld [vmem:[#allocation8 + $0x390] sm:$0xf0] }
 0x129   :  { %3172 = vmatpush.bf16.msra.mxu2 %v8339_v39  ;;  %v8195_v28 = vor.u32 %v9652_v29, %v8192_v25  ;;  %v8448_v22 = vld [vmem:[#allocation8 + $0x590] sm:$0xf0]  ;;  %v9712_v25 = vld [vmem:[#allocation8 + $0x564] sm:$0xf] }
 0x12a   :  { %v8451_v53 = vor.u32 %v9716_v51, %v8448_v22  ;;  %v8048_v12 = vld [vmem:[#allocation8 + $0x270] sm:$0xf0]  ;;  %v9644_v22 = vld [vmem:[#allocation8 + $0x344] sm:$0xf] }
 0x12b   :  { %3144 = vmatpush.bf16.msra.mxu1 %v8195_v28  ;;  %v8304_v29 = vld [vmem:[#allocation8 + $0x470] sm:$0xf0] }
 0x12c   :  { %3201 = vmatpush.bf16.msra.mxu3 %v8467_v43  ;;  %v8176_v43 = vld [vmem:[#allocation8 + $0x370] sm:$0xf0] }
 0x12d   :  { %v2833_v48 = vpop.f32.mrf.mxu2  ;;  %v2778_v15 = vpop.f32.mrf.mxu0  ;;  %3173 = vmatpush.bf16.msra.mxu2 %v8323_v62  ;;  %v8179_v6 = vor.u32 %v9648_v23, %v8176_v43  ;;  %v8032_v51 = vld [vmem:[#allocation8 + $0x250] sm:$0xf0] }
 0x12e   :  { %v2834_v27 = vadd.f32 %v2833_v48, %v2805_v11  ;;  %v2862_v52 = vpop.f32.mrf.mxu3  ;;  %v2779_v38 = vadd.f32 %v2778_v15, %v10917_v50  ;;  %v2807_v40 = vpop.f32.mrf.mxu1  ;;  %v9616_v11 = vld [vmem:[#allocation8 + $0x264] sm:$0xf]  ;;  %v8288_v62 = vld [vmem:[#allocation8 + $0x450] sm:$0xf0] }
 0x12f   :  { %v8051_v24 = vor.u32 %v9616_v11, %v8048_v12  ;;  %v9680_v48 = vld [vmem:[#allocation8 + $0x464] sm:$0xf]  ;;  %3145 = vmatpush.bf16.msra.mxu1 %v8179_v6  ;;  %v8035_v12 = vor.u32 %v9612_v41, %v8032_v51  ;;  %v7694_v6 = vld [vmem:[#allocation5 + $0xc0] sm:$0xf] }
 0x130   :  { %v10939_v7 = vadd.f32 %v2862_v52, %v2834_v27  ;;  %v2808_v39 = vadd.f32 %v2807_v40, %v2779_v38  ;;  %3009 = vmatmul.bf16.gmra.mxu0 %v10934_v36  ;;  %v8432_v27 = vld [vmem:[#allocation8 + $0x570] sm:$0xf0]  ;;  %3202 = vmatpush.bf16.msra.mxu3 %v8451_v53  ;;  %v8307_v52 = vor.u32 %v9680_v48, %v8304_v29  ;;  %v9708_v48 = vld [vmem:[#allocation8 + $0x544] sm:$0xf] }
 0x131   :  { %3038 = vmatmul.bf16.gmra.mxu1 %v10936_v0  ;;  %3116 = vmatpush.bf16.msra.mxu0 %v8051_v24  ;;  %v8435_v15 = vor.u32 %v9712_v25, %v8432_v27  ;;  %v8163_v24 = vor.u32 %v9644_v22, %v8160_v63  ;;  %v8291_v53 = vor.u32 %v9676_v60, %v8288_v62  ;;  %v8416_v29 = vld [vmem:[#allocation8 + $0x550] sm:$0xf0]  ;;  %v9497_v27 = vld [vmem:[#allocation5 + $0xe4] sm:$0xf0]  ;;  %v9492_v41 = vld [vmem:[#allocation5 + $0xc4] sm:$0xf] }
 0x132   :  { %3067 = vmatmul.bf16.gmra.mxu2 %v10779_v31  ;;  %v9608_v51 = vld [vmem:[#allocation8 + $0x224] sm:$0xf]  ;;  %v8144_v31 = vld [vmem:[#allocation8 + $0x330] sm:$0xf0]  ;;  %v7696_v60 = vld [vmem:[#allocation5 + $0xe8] sm:$0xf0] }
 0x133   :  { %3096 = vmatmul.bf16.gmra.mxu3 %v10781_v32  ;;  %3174 = vmatpush.bf16.msra.mxu2 %v8307_v52  ;;  %v9640_v32 = vld [vmem:[#allocation8 + $0x324] sm:$0xf]  ;;  %v8272_v63 = vld [vmem:[#allocation8 + $0x430] sm:$0xf0]  ;;  %v10950_v57 = vor.u32 %v9492_v41, %v7696_v60 }
 0x134   :  { %3203 = vmatpush.bf16.msra.mxu3 %v8435_v15  ;;  %3146 = vmatpush.bf16.msra.mxu1 %v8163_v24  ;;  %v9672_v52 = vld [vmem:[#allocation8 + $0x424] sm:$0xf]  ;;  %v8147_v22 = vor.u32 %v9640_v32, %v8144_v31  ;;  %v8400_v62 = vld [vmem:[#allocation8 + $0x530] sm:$0xf0] }
 0x135   :  { %v2836_v28 = vpop.f32.mrf.mxu2  ;;  %v2780_v11 = vpop.f32.mrf.mxu0  ;;  %3117 = vmatpush.bf16.msra.mxu0 %v8035_v12  ;;  %v8000_v24 = vld [vmem:[#allocation8 + $0x210] sm:$0xf0]  ;;  %12804 = vst [vmem:[#allocation78_spill] sm:$0xff] %v10950_v57  ;;  %v9668_v32 = vld [vmem:[#allocation8 + $0x404] sm:$0xf] }
 0x136   :  { %v2837_v38 = vadd.f32 %v2836_v28, %v2808_v39  ;;  %v2865_v40 = vpop.f32.mrf.mxu3  ;;  %v2781_v23 = vadd.f32 %v2780_v11, %v10917_v50  ;;  %v2809_v43 = vpop.f32.mrf.mxu1  ;;  %v8419_v39 = vor.u32 %v9708_v48, %v8416_v29  ;;  %v8019_v11 = vor.u32 %v9608_v51, %v8016_v18  ;;  %v9636_v48 = vld [vmem:[#allocation8 + $0x304] sm:$0xf]  ;;  %v8128_v31 = vld [vmem:[#allocation8 + $0x310] sm:$0xf0] }
 0x137   :  { %3175 = vmatpush.bf16.msra.mxu2 %v8291_v53 }
 0x138   :  { %v10946_v25 = vadd.f32 %v2865_v40, %v2837_v38  ;;  %v2810_v28 = vadd.f32 %v2809_v43, %v2781_v23  ;;  %v8275_v38 = vor.u32 %v9672_v52, %v8272_v63  ;;  %v9704_v40 = vld [vmem:[#allocation8 + $0x524] sm:$0xf]  ;;  %3204 = vmatpush.bf16.msra.mxu3 %v8419_v39  ;;  %v10948_v23 = vor.u32 %v9497_v27, %v7694_v6  ;;  %v8256_v52 = vld [vmem:[#allocation8 + $0x410] sm:$0xf0] }
 0x139   :  { %3118 = vmatpush.bf16.msra.mxu0 %v8019_v11  ;;  %v8403_v15 = vor.u32 %v9704_v40, %v8400_v62  ;;  %3147 = vmatpush.bf16.msra.mxu1 %v8147_v22  ;;  %v9604_v43 = vld [vmem:[#allocation8 + $0x204] sm:$0xf]  ;;  %v8131_v63 = vor.u32 %v9636_v48, %v8128_v31  ;;  %v8259_v6 = vor.u32 %v9668_v32, %v8256_v52  ;;  %v8384_v22 = vld [vmem:[#allocation8 + $0x510] sm:$0xf0] }
 0x13a   :  { %v8003_v53 = vor.u32 %v9604_v43, %v8000_v24  ;;  %v9700_v27 = vld [vmem:[#allocation8 + $0x504] sm:$0xf] }
 0x13b   :  { %3176 = vmatpush.bf16.msra.mxu2 %v8275_v38 }
 0x13c   :  { %3205 = vmatpush.bf16.msra.mxu3 %v8403_v15 }
 0x13d   :  { %v2838_v12 = vpop.f32.mrf.mxu2  ;;  %v2783_v51 = vpop.f32.mrf.mxu0  ;;  %3119 = vmatpush.bf16.msra.mxu0 %v8003_v53  ;;  %3148 = vmatpush.bf16.msra.mxu1 %v8131_v63  ;;  %v7736_v53 = vld [vmem:[#allocation5 + $0x138] sm:$0xf0] }
 0x13e   :  { %v2839_v18 = vadd.f32 %v2838_v12, %v2810_v28  ;;  %v2867_v29 = vpop.f32.mrf.mxu3  ;;  %v2784_v39 = vadd.f32 %v2783_v51, %v10917_v50  ;;  %v2812_v11 = vpop.f32.mrf.mxu1  ;;  %v8387_v28 = vor.u32 %v9700_v27, %v8384_v22  ;;  %v9502_v51 = vld [vmem:[#allocation5 + $0x114] sm:$0xf] }
 0x13f   :  { %3177 = vmatpush.bf16.msra.mxu2 %v8259_v6  ;;  %v10964_v63 = vor.u32 %v9502_v51, %v7736_v53  ;;  %v9756_v53 = vld [vmem:[#allocation8 + $0x6c4] sm:$0xf] }
 0x140   :  { %v10953_v40 = vadd.f32 %v2867_v29, %v2839_v18  ;;  %v2813_v62 = vadd.f32 %v2812_v11, %v2784_v39  ;;  %3014 = vmatmul.bf16.gmra.mxu0 %v10948_v23  ;;  %3206 = vmatpush.bf16.msra.mxu3 %v8387_v28  ;;  %v7734_v18 = vld [vmem:[#allocation5 + $0x110] sm:$0xf]  ;;  %v9507_v29 = vld [vmem:[#allocation5 + $0x134] sm:$0xf0] }
 0x141   :  { %3043 = vmatmul.bf16.gmra.mxu1 %v10950_v57  ;;  %v10962_v32 = vor.u32 %v9507_v29, %v7734_v18  ;;  %12806 = vst [vmem:[#allocation80_spill] sm:$0xff] %v10964_v63  ;;  %v9832_v57 = vld [vmem:[#allocation8 + $0x924] sm:$0xf] }
 0x142   :  { %3072 = vmatmul.bf16.gmra.mxu2 %v10791_v16 }
 0x143   :  { %3101 = vmatmul.bf16.gmra.mxu3 %v10793_v20  ;;  %12805 = vst [vmem:[#allocation79_spill] sm:$0xff] %v10962_v32 }
 0x145   :  { %v2841_v41 = vpop.f32.mrf.mxu2  ;;  %v2785_v12 = vpop.f32.mrf.mxu0 }
 0x146   :  { %v2842_v60 = vadd.f32 %v2841_v41, %v2813_v62  ;;  %v2870_v38 = vpop.f32.mrf.mxu3  ;;  %v2786_v15 = vadd.f32 %v2785_v12, %v10917_v50  ;;  %v2814_v43 = vpop.f32.mrf.mxu1  ;;  %v9760_v62 = vld [vmem:[#allocation8 + $0x6e4] sm:$0xf]  ;;  %v8624_v41 = vld [vmem:[#allocation8 + $0x6f0] sm:$0xf0] }
 0x148   :  { %v10960_v24 = vadd.f32 %v2870_v38, %v2842_v60  ;;  %v2815_v48 = vadd.f32 %v2814_v43, %v2786_v15  ;;  %v8627_v60 = vor.u32 %v9760_v62, %v8624_v41 }
 0x14a   :  { %3228 = vmatpush.bf16.msrb.mxu0 %v8627_v60 }
 0x14d   :  { %v2843_v31 = vpop.f32.mrf.mxu2  ;;  %v2788_v11 = vpop.f32.mrf.mxu0 }
 0x14e   :  { %v2844_v52 = vadd.f32 %v2843_v31, %v2815_v48  ;;  %v2872_v39 = vpop.f32.mrf.mxu3  ;;  %v2789_v6 = vadd.f32 %v2788_v11, %v10917_v50  ;;  %v2817_v27 = vpop.f32.mrf.mxu1  ;;  %v8608_v31 = vld [vmem:[#allocation8 + $0x6d0] sm:$0xf0] }
 0x14f   :  { %v8752_v11 = vld [vmem:[#allocation8 + $0x7f0] sm:$0xf0] }
 0x150   :  { %v10967_v22 = vadd.f32 %v2872_v39, %v2844_v52  ;;  %v2818_v28 = vadd.f32 %v2817_v27, %v2789_v6  ;;  %3019 = vmatmul.bf16.gmra.mxu0 %v10962_v32  ;;  %v9792_v52 = vld [vmem:[#allocation8 + $0x7e4] sm:$0xf]  ;;  %v8611_v39 = vor.u32 %v9756_v53, %v8608_v31  ;;  %v8880_v27 = vld [vmem:[#allocation8 + $0x8f0] sm:$0xf0] }
 0x151   :  { %3048 = vmatmul.bf16.gmra.mxu1 %v10964_v63  ;;  %v9824_v6 = vld [vmem:[#allocation8 + $0x8e4] sm:$0xf]  ;;  %v8755_v62 = vor.u32 %v9792_v52, %v8752_v11  ;;  %v8736_v31 = vld [vmem:[#allocation8 + $0x7d0] sm:$0xf0] }
 0x152   :  { %3077 = vmatmul.bf16.gmra.mxu2 %v10803_v44  ;;  %v8883_v41 = vor.u32 %v9824_v6, %v8880_v27  ;;  %3229 = vmatpush.bf16.msrb.mxu0 %v8611_v39  ;;  %v9820_v52 = vld [vmem:[#allocation8 + $0x8c4] sm:$0xf]  ;;  %v9008_v27 = vld [vmem:[#allocation8 + $0x9f0] sm:$0xf0] }
 0x153   :  { %3106 = vmatmul.bf16.gmra.mxu3 %v10805_v45  ;;  %3257 = vmatpush.bf16.msrb.mxu1 %v8755_v62  ;;  %v9856_v6 = vld [vmem:[#allocation8 + $0x9e4] sm:$0xf]  ;;  %v8976_v45 = vld [vmem:[#allocation8 + $0x9b0] sm:$0xf0] }
 0x154   :  { %3286 = vmatpush.bf16.msrb.mxu2 %v8883_v41  ;;  %v9011_v62 = vor.u32 %v9856_v6, %v9008_v27  ;;  %v9816_v6 = vld [vmem:[#allocation8 + $0x8a4] sm:$0xf]  ;;  %v8848_v27 = vld [vmem:[#allocation8 + $0x8b0] sm:$0xf0] }
 0x155   :  { %v2846_v38 = vpop.f32.mrf.mxu2  ;;  %v2790_v43 = vpop.f32.mrf.mxu0  ;;  %v8656_v32 = vld [vmem:[#allocation8 + $0x730] sm:$0xf0] }
 0x156   :  { %v2847_v12 = vadd.f32 %v2846_v38, %v2818_v28  ;;  %v2875_v15 = vpop.f32.mrf.mxu3  ;;  %v2791_v48 = vadd.f32 %v2790_v43, %v10917_v50  ;;  %v2819_v18 = vpop.f32.mrf.mxu1  ;;  %v9752_v43 = vld [vmem:[#allocation8 + $0x6a4] sm:$0xf]  ;;  %3315 = vmatpush.bf16.msrb.mxu3 %v9011_v62  ;;  %v8659_v17 = vor.u32 %v9768_v56, %v8656_v32 }
 0x157   :  { %v9780_v62 = vld [vmem:[#allocation8 + $0x784] sm:$0xf] }
 0x158   :  { %v10974_v29 = vadd.f32 %v2875_v15, %v2847_v12  ;;  %v2820_v51 = vadd.f32 %v2819_v18, %v2791_v48  ;;  %v8592_v48 = vld [vmem:[#allocation8 + $0x6b0] sm:$0xf0]  ;;  %v9788_v18 = vld [vmem:[#allocation8 + $0x7c4] sm:$0xf] }
 0x159   :  { %v8595_v53 = vor.u32 %v9752_v43, %v8592_v48  ;;  %v8739_v39 = vor.u32 %v9788_v18, %v8736_v31  ;;  %v9748_v18 = vld [vmem:[#allocation8 + $0x684] sm:$0xf]  ;;  %v8576_v31 = vld [vmem:[#allocation8 + $0x690] sm:$0xf0] }
 0x15b   :  { %3230 = vmatpush.bf16.msrb.mxu0 %v8595_v53  ;;  %3258 = vmatpush.bf16.msrb.mxu1 %v8739_v39  ;;  %v8720_v53 = vld [vmem:[#allocation8 + $0x7b0] sm:$0xf0] }
 0x15d   :  { %v2848_v60 = vpop.f32.mrf.mxu2  ;;  %v10976_v50 = vpop.f32.mrf.mxu0 }
 0x15e   :  { %v2849_v28 = vadd.f32 %v2848_v60, %v2820_v51  ;;  %v2877_v38 = vpop.f32.mrf.mxu3  ;;  %v10978_v12 = vpop.f32.mrf.mxu1  ;;  %v8864_v51 = vld [vmem:[#allocation8 + $0x8d0] sm:$0xf0]  ;;  %v9852_v60 = vld [vmem:[#allocation8 + $0x9c4] sm:$0xf] }
 0x15f   :  { %v8867_v11 = vor.u32 %v9820_v52, %v8864_v51  ;;  %v9784_v52 = vld [vmem:[#allocation8 + $0x7a4] sm:$0xf]  ;;  %v8579_v51 = vor.u32 %v9748_v18, %v8576_v31  ;;  %v8832_v31 = vld [vmem:[#allocation8 + $0x890] sm:$0xf0] }
 0x160   :  { %v10980_v15 = vadd.f32 %v2877_v38, %v2849_v28  ;;  %3120 = vmatmul.bf16.vlgmr.msra.gmra.mxu0 %v10771_v58  ;;  %v8992_v28 = vld [vmem:[#allocation8 + $0x9d0] sm:$0xf0]  ;;  %v8723_v39 = vor.u32 %v9784_v52, %v8720_v53  ;;  %v9844_v52 = vld [vmem:[#allocation8 + $0x984] sm:$0xf] }
 0x161   :  { %3149 = vmatmul.bf16.vlgmr.msra.gmra.mxu1 %v10773_v59  ;;  %3287 = vmatpush.bf16.msrb.mxu2 %v8867_v11  ;;  %v8995_v48 = vor.u32 %v9852_v60, %v8992_v28  ;;  %v8851_v11 = vor.u32 %v9816_v6, %v8848_v27  ;;  %v8704_v60 = vld [vmem:[#allocation8 + $0x790] sm:$0xf0]  ;;  %v9812_v28 = vld [vmem:[#allocation8 + $0x884] sm:$0xf] }
 0x162   :  { %3178 = vmatmul.bf16.vlgmr.msra.gmra.mxu2 %v10817_v1  ;;  %3231 = vmatpush.bf16.msrb.mxu0 %v8579_v51  ;;  %v8960_v53 = vld [vmem:[#allocation8 + $0x990] sm:$0xf0]  ;;  %v8835_v51 = vor.u32 %v9812_v28, %v8832_v31  ;;  %v9840_v31 = vld [vmem:[#allocation8 + $0x964] sm:$0xf] }
 0x163   :  { %3207 = vmatmul.bf16.vlgmr.msra.gmra.mxu3 %v10819_v3  ;;  %v9848_v3 = vld [vmem:[#allocation8 + $0x9a4] sm:$0xf]  ;;  %3259 = vmatpush.bf16.msrb.mxu1 %v8723_v39  ;;  %v8560_v27 = vld [vmem:[#allocation8 + $0x670] sm:$0xf0] }
 0x164   :  { %3316 = vmatpush.bf16.msrb.mxu3 %v8995_v48  ;;  %v8979_v44 = vor.u32 %v9848_v3, %v8976_v45  ;;  %v8707_v48 = vor.u32 %v9780_v62, %v8704_v60  ;;  %v8963_v45 = vor.u32 %v9844_v52, %v8960_v53  ;;  %v9744_v3 = vld [vmem:[#allocation8 + $0x664] sm:$0xf]  ;;  %v8816_v60 = vld [vmem:[#allocation8 + $0x870] sm:$0xf0] }
 0x165   :  { %v10986_v41 = vpop.f32.mrf.mxu2  ;;  %v10990_v43 = vpop.f32.mrf.mxu0  ;;  %3288 = vmatpush.bf16.msrb.mxu2 %v8851_v11  ;;  %v9776_v39 = vld [vmem:[#allocation8 + $0x764] sm:$0xf]  ;;  %v8563_v11 = vor.u32 %v9744_v3, %v8560_v27  ;;  %v8944_v52 = vld [vmem:[#allocation8 + $0x970] sm:$0xf0] }
 0x166   :  { %v10988_v38 = vpop.f32.mrf.mxu3  ;;  %v10992_v1 = vpop.f32.mrf.mxu1  ;;  %v9808_v62 = vld [vmem:[#allocation8 + $0x864] sm:$0xf]  ;;  %v8947_v53 = vor.u32 %v9840_v31, %v8944_v52  ;;  %v8528_v52 = vld [vmem:[#allocation8 + $0x630] sm:$0xf0] }
 0x167   :  { %3260 = vmatpush.bf16.msrb.mxu1 %v8707_v48  ;;  %v8819_v28 = vor.u32 %v9808_v62, %v8816_v60  ;;  %3232 = vmatpush.bf16.msrb.mxu0 %v8563_v11  ;;  %v9836_v62 = vld [vmem:[#allocation8 + $0x944] sm:$0xf]  ;;  %v8928_v60 = vld [vmem:[#allocation8 + $0x950] sm:$0xf0] }
 0x168   :  { %3317 = vmatpush.bf16.msrb.mxu3 %v8979_v44  ;;  %v8688_v44 = vld [vmem:[#allocation8 + $0x770] sm:$0xf0]  ;;  %v9736_v31 = vld [vmem:[#allocation8 + $0x624] sm:$0xf] }
 0x169   :  { %3289 = vmatpush.bf16.msrb.mxu2 %v8835_v51  ;;  %v8691_v59 = vor.u32 %v9776_v39, %v8688_v44  ;;  %v9804_v51 = vld [vmem:[#allocation8 + $0x844] sm:$0xf]  ;;  %v8800_v39 = vld [vmem:[#allocation8 + $0x850] sm:$0xf0]  ;;  %v8531_v63 = vor.u32 %v9736_v31, %v8528_v52 }
 0x16a   :  { %v9796_v31 = vld [vmem:[#allocation8 + $0x804] sm:$0xf]  ;;  %v8896_v52 = vld [vmem:[#allocation8 + $0x910] sm:$0xf0] }
 0x16b   :  { %3261 = vmatpush.bf16.msrb.mxu1 %v8691_v59  ;;  %v8931_v59 = vor.u32 %v9836_v62, %v8928_v60  ;;  %v8640_v60 = vld [vmem:[#allocation8 + $0x710] sm:$0xf0] }
 0x16c   :  { %3318 = vmatpush.bf16.msrb.mxu3 %v8963_v45  ;;  %v8803_v45 = vor.u32 %v9804_v51, %v8800_v39  ;;  %v9764_v51 = vld [vmem:[#allocation8 + $0x704] sm:$0xf] }
 0x16d   :  { %v10994_v20 = vpop.f32.mrf.mxu2  ;;  %v10998_v18 = vpop.f32.mrf.mxu0  ;;  %3290 = vmatpush.bf16.msrb.mxu2 %v8819_v28  ;;  %v8912_v28 = vld [vmem:[#allocation8 + $0x930] sm:$0xf0] }
 0x16e   :  { %v10996_v16 = vpop.f32.mrf.mxu3  ;;  %v11000_v6 = vpop.f32.mrf.mxu1 }
 0x170   :  { %3125 = vmatmul.bf16.gmra.mxu0 %v10783_v33  ;;  %v8544_v33 = vld [vmem:[#allocation8 + $0x650] sm:$0xf0]  ;;  %3319 = vmatpush.bf16.msrb.mxu3 %v8947_v53 }
 0x171   :  { %3154 = vmatmul.bf16.gmra.mxu1 %v10785_v34  ;;  %v9740_v34 = vld [vmem:[#allocation8 + $0x644] sm:$0xf]  ;;  %3291 = vmatpush.bf16.msrb.mxu2 %v8803_v45  ;;  %v8512_v53 = vld [vmem:[#allocation8 + $0x610] sm:$0xf0] }
 0x172   :  { %3183 = vmatmul.bf16.gmra.mxu2 %v10840_v19  ;;  %v9772_v19 = vld [vmem:[#allocation8 + $0x744] sm:$0xf]  ;;  %v8547_v58 = vor.u32 %v9740_v34, %v8544_v33  ;;  %v8784_v34 = vld [vmem:[#allocation8 + $0x830] sm:$0xf0] }
 0x173   :  { %3212 = vmatmul.bf16.gmra.mxu3 %v10843_v30  ;;  %v8672_v30 = vld [vmem:[#allocation8 + $0x750] sm:$0xf0]  ;;  %v9800_v33 = vld [vmem:[#allocation8 + $0x824] sm:$0xf] }
 0x174   :  { %v8675_v11 = vor.u32 %v9772_v19, %v8672_v30  ;;  %3233 = vmatpush.bf16.msrb.mxu0 %v8547_v58  ;;  %v8787_v2 = vor.u32 %v9800_v33, %v8784_v34  ;;  %3320 = vmatpush.bf16.msrb.mxu3 %v8931_v59  ;;  %v8915_v19 = vor.u32 %v9832_v57, %v8912_v28  ;;  %v9732_v58 = vld [vmem:[#allocation8 + $0x604] sm:$0xf]  ;;  %v8768_v45 = vld [vmem:[#allocation8 + $0x810] sm:$0xf0] }
 0x175   :  { %v11006_v48 = vpop.f32.mrf.mxu2  ;;  %v11010_v27 = vpop.f32.mrf.mxu0  ;;  %v8515_v62 = vor.u32 %v9732_v58, %v8512_v53  ;;  %v8643_v59 = vor.u32 %v9764_v51, %v8640_v60  ;;  %v9828_v57 = vld [vmem:[#allocation8 + $0x904] sm:$0xf] }
 0x176   :  { %v11008_v3 = vpop.f32.mrf.mxu3  ;;  %v11012_v44 = vpop.f32.mrf.mxu1  ;;  %3262 = vmatpush.bf16.msrb.mxu1 %v8675_v11  ;;  %3292 = vmatpush.bf16.msrb.mxu2 %v8787_v2 }
 0x178   :  { %3234 = vmatpush.bf16.msrb.mxu0 %v8531_v63  ;;  %v8771_v63 = vor.u32 %v9796_v31, %v8768_v45  ;;  %3321 = vmatpush.bf16.msrb.mxu3 %v8915_v19 }
 0x17a   :  { %3263 = vmatpush.bf16.msrb.mxu1 %v8659_v17  ;;  %v8899_v17 = vor.u32 %v9828_v57, %v8896_v52  ;;  %3293 = vmatpush.bf16.msrb.mxu2 %v8771_v63 }
 0x17c   :  { %3235 = vmatpush.bf16.msrb.mxu0 %v8515_v62  ;;  %3322 = vmatpush.bf16.msrb.mxu3 %v8899_v17 }
 0x17d   :  { %v11014_v30 = vpop.f32.mrf.mxu2  ;;  %v2899_v11 = vpop.f32.mrf.mxu0 }
 0x17e   :  { %v11016_v39 = vpop.f32.mrf.mxu3  ;;  %v2900_v56 = vadd.f32 %v2899_v11, %v10960_v24  ;;  %v2928_v32 = vpop.f32.mrf.mxu1  ;;  %3264 = vmatpush.bf16.msrb.mxu1 %v8643_v59 }
 0x180   :  { %v2929_v33 = vadd.f32 %v2928_v32, %v2900_v56  ;;  %3130 = vmatmul.bf16.gmra.mxu0 %v10795_v21 }
 0x181   :  { %3159 = vmatmul.bf16.gmra.mxu1 %v10797_v26 }
 0x182   :  { %3188 = vmatmul.bf16.gmra.mxu2 %v10866_v37 }
 0x183   :  { %3217 = vmatmul.bf16.gmra.mxu3 %v10869_v49 }
 0x185   :  { %v2957_v2 = vpop.f32.mrf.mxu2  ;;  %v2901_v28 = vpop.f32.mrf.mxu0 }
 0x186   :  { %v2958_v24 = vadd.f32 %v2957_v2, %v2929_v33  ;;  %v2986_v34 = vpop.f32.mrf.mxu3  ;;  %v2902_v19 = vadd.f32 %v2901_v28, %v10967_v22  ;;  %v2930_v58 = vpop.f32.mrf.mxu1  ;;  %v2890_v22 = vadd.f32 %v10976_v50, %v10932_v55  ;;  %v2892_v55 = vadd.f32 %v10990_v43, %v10939_v7 }
 0x188   :  { %v11024_v53 = vadd.f32 %v2986_v34, %v2958_v24  ;;  %v2931_v51 = vadd.f32 %v2930_v58, %v2902_v19  ;;  %v7862_v24 = vld [vmem:[#allocation8 + $0xe8] sm:$0xf]  ;;  %v9571_v34 = vld [vmem:[#allocation8 + $0xf4] sm:$0xf0] }
 0x189   :  { %v7863_v19 = vor.u32 %v9571_v34, %v7862_v24  ;;  %v2895_v34 = vadd.f32 %v10998_v18, %v10946_v25  ;;  %v9631_v25 = vld [vmem:[#allocation8 + $0x2d4] sm:$0xf0]  ;;  %v8230_v18 = vld [vmem:[#allocation8 + $0x3c8] sm:$0xf] }
 0x18b   :  { %3344 = vmatpush.bf16.msra.mxu0 %v7863_v19 }
 0x18d   :  { %v2959_v11 = vpop.f32.mrf.mxu2  ;;  %v2904_v31 = vpop.f32.mrf.mxu0 }
 0x18e   :  { %v2960_v62 = vadd.f32 %v2959_v11, %v2931_v51  ;;  %v2988_v60 = vpop.f32.mrf.mxu3  ;;  %v2905_v45 = vadd.f32 %v2904_v31, %v10974_v29  ;;  %v2933_v56 = vpop.f32.mrf.mxu1  ;;  %v2919_v29 = vadd.f32 %v10978_v12, %v2890_v22  ;;  %v9567_v12 = vld [vmem:[#allocation8 + $0xd4] sm:$0xf0]  ;;  %v8118_v22 = vld [vmem:[#allocation8 + $0x2e8] sm:$0xf] }
 0x190   :  { %v11027_v32 = vadd.f32 %v2988_v60, %v2960_v62  ;;  %v2934_v59 = vadd.f32 %v2933_v56, %v2905_v45  ;;  %3135 = vmatmul.bf16.gmra.mxu0 %v10807_v46  ;;  %v2948_v58 = vadd.f32 %v10986_v41, %v2919_v29  ;;  %v7846_v62 = vld [vmem:[#allocation8 + $0xc8] sm:$0xf]  ;;  %v2921_v41 = vadd.f32 %v10992_v1, %v2892_v55 }
 0x191   :  { %3164 = vmatmul.bf16.gmra.mxu1 %v10809_v47  ;;  %v7990_v60 = vld [vmem:[#allocation8 + $0x1e8] sm:$0xf]  ;;  %v7847_v56 = vor.u32 %v9567_v12, %v7846_v62  ;;  %v11051_v1 = vperm.slane %v10912_v8, 1 }
 0x192   :  { %3193 = vmatmul.bf16.gmra.mxu2 %v10890_v9  ;;  %v2977_v50 = vadd.f32 %v10988_v38, %v2948_v58  ;;  %v2950_v38 = vadd.f32 %v10994_v20, %v2921_v41  ;;  %v7974_v55 = vld [vmem:[#allocation8 + $0x1c8] sm:$0xf] }
 0x193   :  { %3222 = vmatmul.bf16.gmra.mxu3 %v10893_v13  ;;  %3345 = vmatpush.bf16.msra.mxu0 %v7847_v56 }
 0x194   :  { %v2979_v20 = vadd.f32 %v10996_v16, %v2950_v38  ;;  %v9563_v16 = vld [vmem:[#allocation8 + $0xb4] sm:$0xf0]  ;;  %v7958_v38 = vld [vmem:[#allocation8 + $0x1a8] sm:$0xf] }
 0x195   :  { %v2962_v63 = vpop.f32.mrf.mxu2  ;;  %v2906_v17 = vpop.f32.mrf.mxu0 }
 0x196   :  { %v2963_v57 = vadd.f32 %v2962_v63, %v2934_v59  ;;  %v2991_v52 = vpop.f32.mrf.mxu3  ;;  %v2907_v33 = vadd.f32 %v2906_v17, %v10980_v15  ;;  %v2935_v2 = vpop.f32.mrf.mxu1  ;;  %v9603_v59 = vld [vmem:[#allocation8 + $0x1f4] sm:$0xf0] }
 0x197   :  { %v9635_v63 = vld [vmem:[#allocation8 + $0x2f4] sm:$0xf0]  ;;  %v7991_v17 = vor.u32 %v9603_v59, %v7990_v60  ;;  %v8102_v60 = vld [vmem:[#allocation8 + $0x2c8] sm:$0xf] }
 0x198   :  { %v11037_v28 = vadd.f32 %v2991_v52, %v2963_v57  ;;  %v2936_v51 = vadd.f32 %v2935_v2, %v2907_v33  ;;  %v8119_v29 = vor.u32 %v9635_v63, %v8118_v22  ;;  %v8246_v33 = vld [vmem:[#allocation8 + $0x3e8] sm:$0xf]  ;;  %v9667_v2 = vld [vmem:[#allocation8 + $0x3f4] sm:$0xf0]  ;;  %v8103_v22 = vor.u32 %v9631_v25, %v8102_v60 }
 0x199   :  { %3373 = vmatpush.bf16.msra.mxu1 %v7991_v17  ;;  %v8247_v24 = vor.u32 %v9667_v2, %v8246_v33  ;;  %v7830_v59 = vld [vmem:[#allocation8 + $0xa8] sm:$0xf]  ;;  %v9663_v63 = vld [vmem:[#allocation8 + $0x3d4] sm:$0xf0] }
 0x19a   :  { %3402 = vmatpush.bf16.msra.mxu2 %v8119_v29  ;;  %v9627_v2 = vld [vmem:[#allocation8 + $0x2b4] sm:$0xf0] }
 0x19b   :  { %3431 = vmatpush.bf16.msra.mxu3 %v8247_v24  ;;  %v8214_v24 = vld [vmem:[#allocation8 + $0x3a8] sm:$0xf] }
 0x19d   :  { %v2964_v11 = vpop.f32.mrf.mxu2  ;;  %v3005_v45 = vpop.f32.mrf.mxu0 }
 0x19e   :  { %v2965_v15 = vadd.f32 %v2964_v11, %v2936_v51  ;;  %v2993_v31 = vpop.f32.mrf.mxu3  ;;  %v3006_v57 = vadd.f32 %v3005_v45, %v2977_v50  ;;  %v3034_v52 = vpop.f32.mrf.mxu1  ;;  %v9599_v50 = vld [vmem:[#allocation8 + $0x1d4] sm:$0xf0]  ;;  %3403 = vmatpush.bf16.msra.mxu2 %v8103_v22  ;;  %v8198_v22 = vld [vmem:[#allocation8 + $0x388] sm:$0xf] }
 0x19f   :  { %v7975_v12 = vor.u32 %v9599_v50, %v7974_v55 }
 0x1a0   :  { %v11044_v7 = vadd.f32 %v2993_v31, %v2965_v15  ;;  %v3035_v43 = vadd.f32 %v3034_v52, %v3006_v57  ;;  %3236 = vmatmul.bf16.vlgmr.msrb.gmra.mxu0 %v10821_v4  ;;  %v2924_v15 = vadd.f32 %v11000_v6, %v2895_v34  ;;  %v7831_v57 = vor.u32 %v9563_v16, %v7830_v59  ;;  %v9595_v6 = vld [vmem:[#allocation8 + $0x1b4] sm:$0xf0] }
 0x1a1   :  { %3265 = vmatmul.bf16.vlgmr.msrb.gmra.mxu1 %v10824_v10  ;;  %v8231_v52 = vor.u32 %v9663_v63, %v8230_v18  ;;  %v7959_v33 = vor.u32 %v9595_v6, %v7958_v38  ;;  %v9659_v34 = vld [vmem:[#allocation8 + $0x3b4] sm:$0xf0]  ;;  %v7798_v38 = vld [vmem:[#allocation8 + $0x68] sm:$0xf] }
 0x1a2   :  { %3294 = vmatmul.bf16.vlgmr.msrb.gmra.mxu2 %v10919_v14  ;;  %v11055_v19 = vpack.c.bf16 %v3035_v43, %v3035_v43  ;;  %3374 = vmatpush.bf16.msra.mxu1 %v7975_v12  ;;  %v2953_v17 = vadd.f32 %v11006_v48, %v2924_v15  ;;  %v8086_v43 = vld [vmem:[#allocation8 + $0x2a8] sm:$0xf]  ;;  %v8215_v48 = vor.u32 %v9659_v34, %v8214_v24  ;;  %v9655_v63 = vld [vmem:[#allocation8 + $0x394] sm:$0xf0] }
 0x1a3   :  { %3323 = vmatmul.bf16.vlgmr.msrb.gmra.mxu3 %v10922_v5  ;;  %3346 = vmatpush.bf16.msra.mxu0 %v7831_v57  ;;  %v7942_v12 = vld [vmem:[#allocation8 + $0x188] sm:$0xf]  ;;  %v9555_v6 = vld [vmem:[#allocation8 + $0x74] sm:$0xf0] }
 0x1a4   :  { %v4357_v51 = vunpack.c.l.b16 %v11055_v19  ;;  %3432 = vmatpush.bf16.msra.mxu3 %v8231_v52  ;;  %v2982_v55 = vadd.f32 %v11008_v3, %v2953_v17  ;;  %v8054_v24 = vld [vmem:[#allocation8 + $0x268] sm:$0xf]  ;;  %v9619_v34 = vld [vmem:[#allocation8 + $0x274] sm:$0xf0] }
 0x1a5   :  { %v3063_v58 = vpop.f32.mrf.mxu2  ;;  %v3007_v62 = vpop.f32.mrf.mxu0 }
 0x1a6   :  { %v3064_v8 = vadd.f32 %v3063_v58, %v11051_v1  ;;  %v3092_v11 = vpop.f32.mrf.mxu3  ;;  %v3008_v31 = vadd.f32 %v3007_v62, %v2979_v20  ;;  %v3036_v45 = vpop.f32.mrf.mxu1  ;;  %v4358_v56 = vpack.c.b16 %v4357_v51, %v4357_v51  ;;  %v2897_v20 = vadd.f32 %v11010_v27, %v10953_v40  ;;  %3375 = vmatpush.bf16.msra.mxu1 %v7959_v33  ;;  %v9559_v62 = vld [vmem:[#allocation8 + $0x94] sm:$0xf0]  ;;  %v8070_v27 = vld [vmem:[#allocation8 + $0x288] sm:$0xf] }
 0x1a7   :  { %v8087_v51 = vor.u32 %v9627_v2, %v8086_v43  ;;  %v9591_v40 = vld [vmem:[#allocation8 + $0x194] sm:$0xf0]  ;;  %v7926_v43 = vld [vmem:[#allocation8 + $0x168] sm:$0xf]  ;;  %v7799_v33 = vor.u32 %v9555_v6, %v7798_v38 }
 0x1a8   :  { %v11062_v41 = vadd.f32 %v3092_v11, %v3064_v8  ;;  %v3037_v29 = vadd.f32 %v3036_v45, %v3008_v31  ;;  %4359 = vrot.lane.b32.xlu0 %v4358_v56, %s10623_s12  ;;  %v7814_v11 = vld [vmem:[#allocation8 + $0x88] sm:$0xf]  ;;  %3433 = vmatpush.bf16.msra.mxu3 %v8215_v48  ;;  %v9623_v31 = vld [vmem:[#allocation8 + $0x294] sm:$0xf0]  ;;  %v2926_v45 = vadd.f32 %v11012_v44, %v2897_v20 }
 0x1a9   :  { %3404 = vmatpush.bf16.msra.mxu2 %v8087_v51  ;;  %v7815_v15 = vor.u32 %v9559_v62, %v7814_v11  ;;  %v7943_v16 = vor.u32 %v9591_v40, %v7942_v12  ;;  %v8071_v52 = vor.u32 %v9623_v31, %v8070_v27  ;;  %v8199_v44 = vor.u32 %v9655_v63, %v8198_v22  ;;  %v9587_v2 = vld [vmem:[#allocation8 + $0x174] sm:$0xf0]  ;;  %v8182_v51 = vld [vmem:[#allocation8 + $0x368] sm:$0xf] }
 0x1aa   :  { %v11068_v58 = vpack.c.bf16 %v3037_v29, %v3037_v29  ;;  %v2955_v17 = vadd.f32 %v11014_v30, %v2926_v45  ;;  %v7927_v30 = vor.u32 %v9587_v2, %v7926_v43  ;;  %v9651_v48 = vld [vmem:[#allocation8 + $0x374] sm:$0xf0]  ;;  %v7782_v12 = vld [vmem:[#allocation8 + $0x48] sm:$0xf] }
 0x1ab   :  { %3347 = vmatpush.bf16.msra.mxu0 %v7815_v15  ;;  %3376 = vmatpush.bf16.msra.mxu1 %v7943_v16  ;;  %v8183_v62 = vor.u32 %v9651_v48, %v8182_v51  ;;  %v7910_v27 = vld [vmem:[#allocation8 + $0x148] sm:$0xf]  ;;  %v9583_v31 = vld [vmem:[#allocation8 + $0x154] sm:$0xf0] }
 0x1ac   :  { %12807 = vst [vmem:[#allocation81_spill] sm:$0xff] %v11068_v58  ;;  %v4386_v8 = vunpack.c.l.b16 %v11068_v58  ;;  %3434 = vmatpush.bf16.msra.mxu3 %v8199_v44  ;;  %v8038_v45 = vld [vmem:[#allocation8 + $0x248] sm:$0xf]  ;;  %v9615_v16 = vld [vmem:[#allocation8 + $0x254] sm:$0xf0] }
 0x1ad   :  { %v3065_v50 = vpop.f32.mrf.mxu2  ;;  %v3010_v18 = vpop.f32.mrf.mxu0  ;;  %3405 = vmatpush.bf16.msra.mxu2 %v8071_v52  ;;  %v8166_v22 = vld [vmem:[#allocation8 + $0x348] sm:$0xf]  ;;  %v9647_v63 = vld [vmem:[#allocation8 + $0x354] sm:$0xf0] }
 0x1ae   :  { %v3066_v60 = vadd.f32 %v3065_v50, %v11051_v1  ;;  %v3094_v25 = vpop.f32.mrf.mxu3  ;;  %v3011_v56 = vadd.f32 %v3010_v18, %v2982_v55  ;;  %v3039_v3 = vpop.f32.mrf.mxu1  ;;  %v4387_v59 = vpack.c.b16 %v4386_v8, %v4386_v8  ;;  %v8055_v55 = vor.u32 %v9619_v34, %v8054_v24  ;;  %v7766_v6 = vld [vmem:[#allocation8 + $0x28] sm:$0xf]  ;;  %v9547_v44 = vld [vmem:[#allocation8 + $0x34] sm:$0xf0] }
 0x1af   :  { %3348 = vmatpush.bf16.msra.mxu0 %v7799_v33  ;;  %v2984_v50 = vadd.f32 %v11016_v39, %v2955_v17  ;;  %3377 = vmatpush.bf16.msra.mxu1 %v7927_v30  ;;  %v7911_v39 = vor.u32 %v9583_v31, %v7910_v27  ;;  %v8039_v17 = vor.u32 %v9615_v16, %v8038_v45  ;;  %v7894_v43 = vld [vmem:[#allocation8 + $0x128] sm:$0xf]  ;;  %v9579_v2 = vld [vmem:[#allocation8 + $0x134] sm:$0xf0] }
 0x1b0   :  { %v11074_v57 = vadd.f32 %v3094_v25, %v3066_v60  ;;  %v3040_v29 = vadd.f32 %v3039_v3, %v3011_v56  ;;  %3241 = vmatmul.bf16.gmra.mxu0 %v10845_v35  ;;  %4388 = vrot.lane.b32.xlu2 %v4387_v59, %s10623_s12  ;;  %v9551_v60 = vld [vmem:[#allocation8 + $0x54] sm:$0xf0]  ;;  %v8167_v38 = vor.u32 %v9647_v63, %v8166_v22  ;;  %v8022_v24 = vld [vmem:[#allocation8 + $0x228] sm:$0xf] }
 0x1b1   :  { %3270 = vmatmul.bf16.gmra.mxu1 %v10848_v42  ;;  %v7783_v40 = vor.u32 %v9551_v60, %v7782_v12  ;;  %3406 = vmatpush.bf16.msra.mxu2 %v8055_v55  ;;  %v7767_v33 = vor.u32 %v9547_v44, %v7766_v6  ;;  %v9611_v34 = vld [vmem:[#allocation8 + $0x234] sm:$0xf0]  ;;  %v7895_v51 = vor.u32 %v9579_v2, %v7894_v43  ;;  %v8150_v55 = vld [vmem:[#allocation8 + $0x328] sm:$0xf] }
 0x1b2   :  { %3299 = vmatmul.bf16.gmra.mxu2 %v10934_v36  ;;  %v11081_v20 = vpack.c.bf16 %v3040_v29, %v3040_v29  ;;  %3435 = vmatpush.bf16.msra.mxu3 %v8183_v62  ;;  %v8023_v48 = vor.u32 %v9611_v34, %v8022_v24  ;;  %v7750_v62 = vld [vmem:[#allocation8 + $0x8] sm:$0xf]  ;;  %v9543_v12 = vld [vmem:[#allocation8 + $0x14] sm:$0xf0] }
 0x1b3   :  { %3328 = vmatmul.bf16.gmra.mxu3 %v10936_v0  ;;  %3349 = vmatpush.bf16.msra.mxu0 %v7783_v40  ;;  %v7878_v60 = vld [vmem:[#allocation8 + $0x108] sm:$0xf]  ;;  %v7751_v40 = vor.u32 %v9543_v12, %v7750_v62  ;;  %v9575_v27 = vld [vmem:[#allocation8 + $0x114] sm:$0xf0] }
 0x1b4   :  { %v4415_v8 = vunpack.c.l.b16 %v11081_v20  ;;  %3378 = vmatpush.bf16.msra.mxu1 %v7911_v39  ;;  %v8006_v31 = vld [vmem:[#allocation8 + $0x208] sm:$0xf]  ;;  %v9607_v45 = vld [vmem:[#allocation8 + $0x214] sm:$0xf0]  ;;  %v7879_v39 = vor.u32 %v9575_v27, %v7878_v60 }
 0x1b5   :  { %v3068_v11 = vpop.f32.mrf.mxu2  ;;  %v3012_v15 = vpop.f32.mrf.mxu0  ;;  %3407 = vmatpush.bf16.msra.mxu2 %v8039_v17  ;;  %v8007_v63 = vor.u32 %v9607_v45, %v8006_v31  ;;  %v12815_v27 = vld [vmem:[#allocation79_spill] sm:$0xff]  ;;  %v12816_v45 = vld [vmem:[#allocation80_spill] sm:$0xff]  ;;  %v8534_v58 = vld [vmem:[#allocation8 + $0x628] sm:$0xf] }
 0x1b6   :  { %v3069_v25 = vadd.f32 %v3068_v11, %v11051_v1  ;;  %v3097_v18 = vpop.f32.mrf.mxu3  ;;  %v4416_v56 = vpack.c.b16 %v4415_v8, %v4415_v8  ;;  %v3013_v3 = vadd.f32 %v3012_v15, %v2984_v50  ;;  %v3041_v59 = vpop.f32.mrf.mxu1  ;;  %v9643_v50 = vld [vmem:[#allocation8 + $0x334] sm:$0xf0]  ;;  %3436 = vmatpush.bf16.msra.mxu3 %v8167_v38 }
 0x1b7   :  { %3350 = vmatpush.bf16.msra.mxu0 %v7767_v33  ;;  %v8151_v22 = vor.u32 %v9643_v50, %v8150_v55  ;;  %v9639_v38 = vld [vmem:[#allocation8 + $0x314] sm:$0xf0] }
 0x1b8   :  { %v11087_v52 = vadd.f32 %v3097_v18, %v3069_v25  ;;  %v3042_v29 = vadd.f32 %v3041_v59, %v3013_v3  ;;  %4417 = vrot.lane.b32.xlu1 %v4416_v56, %s10623_s12  ;;  %3379 = vmatpush.bf16.msra.mxu1 %v7895_v51 }
 0x1b9   :  { %3408 = vmatpush.bf16.msra.mxu2 %v8023_v48 }
 0x1ba   :  { %v11090_v30 = vpack.c.bf16 %v3042_v29, %v3042_v29  ;;  %v8134_v29 = vld [vmem:[#allocation8 + $0x308] sm:$0xf]  ;;  %3437 = vmatpush.bf16.msra.mxu3 %v8151_v22 }
 0x1bb   :  { %3351 = vmatpush.bf16.msra.mxu0 %v7751_v40  ;;  %v8135_v6 = vor.u32 %v9639_v38, %v8134_v29  ;;  %v12814_v40 = vld [vmem:[#allocation72_spill] sm:$0xff]  ;;  %v8358_v38 = vld [vmem:[#allocation8 + $0x4c8] sm:$0xf] }
 0x1bc   :  { %12808 = vst [vmem:[#allocation82_spill] sm:$0xff] %v11090_v30  ;;  %v4444_v8 = vunpack.c.l.b16 %v11090_v30  ;;  %3380 = vmatpush.bf16.msra.mxu1 %v7879_v39  ;;  %v8550_v30 = vld [vmem:[#allocation8 + $0x648] sm:$0xf] }
 0x1bd   :  { %v3070_v11 = vpop.f32.mrf.mxu2  ;;  %v3015_v15 = vpop.f32.mrf.mxu0  ;;  %3409 = vmatpush.bf16.msra.mxu2 %v8007_v63 }
 0x1be   :  { %v3071_v25 = vadd.f32 %v3070_v11, %v11051_v1  ;;  %v3099_v18 = vpop.f32.mrf.mxu3  ;;  %v3016_v56 = vadd.f32 %v3015_v15, %v11024_v53  ;;  %v3044_v3 = vpop.f32.mrf.mxu1  ;;  %v4445_v59 = vpack.c.b16 %v4444_v8, %v4444_v8  ;;  %v12810_v53 = vld [vmem:[#allocation78_spill] sm:$0xff]  ;;  %3438 = vmatpush.bf16.msra.mxu3 %v8135_v6  ;;  %v9699_v15 = vld [vmem:[#allocation8 + $0x4f4] sm:$0xf0] }
 0x1bf   :  { %v9695_v6 = vld [vmem:[#allocation8 + $0x4d4] sm:$0xf0] }
 0x1c0   :  { %v11095_v16 = vadd.f32 %v3099_v18, %v3071_v25  ;;  %v11097_v17 = vadd.f32 %v3044_v3, %v3016_v56  ;;  %3246 = vmatmul.bf16.gmra.mxu0 %v10871_v61  ;;  %4446 = vrot.lane.b32.xlu2 %v4445_v59, %s10623_s12  ;;  %v12813_v18 = vld [vmem:[#allocation71_spill] sm:$0xff] }
 0x1c1   :  { %3275 = vmatmul.bf16.gmra.mxu1 %v10874_v54 }
 0x1c2   :  { %12809 = vst [vmem:[#allocation83_spill] sm:$0xff] %v11097_v17  ;;  %3304 = vmatmul.bf16.gmra.mxu2 %v10948_v23 }
 0x1c3   :  { %3333 = vmatmul.bf16.gmra.mxu3 %v12810_v53 }
 0x1c5   :  { %v3073_v44 = vpop.f32.mrf.mxu2  ;;  %v3017_v2 = vpop.f32.mrf.mxu0 }
 0x1c6   :  { %v3074_v43 = vadd.f32 %v3073_v44, %v11051_v1  ;;  %v3102_v33 = vpop.f32.mrf.mxu3  ;;  %v3018_v24 = vadd.f32 %v3017_v2, %v11027_v32  ;;  %v3046_v34 = vpop.f32.mrf.mxu1  ;;  %v8374_v32 = vld [vmem:[#allocation8 + $0x4e8] sm:$0xf] }
 0x1c7   :  { %v8375_v31 = vor.u32 %v9699_v15, %v8374_v32  ;;  %v8502_v44 = vld [vmem:[#allocation8 + $0x5e8] sm:$0xf] }
 0x1c8   :  { %v11106_v51 = vadd.f32 %v3102_v33, %v3074_v43  ;;  %v11108_v48 = vadd.f32 %v3046_v34, %v3018_v24  ;;  %v8359_v43 = vor.u32 %v9695_v6, %v8358_v38  ;;  %v9731_v33 = vld [vmem:[#allocation8 + $0x5f4] sm:$0xf0]  ;;  %v8630_v2 = vld [vmem:[#allocation8 + $0x6e8] sm:$0xf] }
 0x1c9   :  { %3460 = vmatpush.bf16.msrb.mxu0 %v8375_v31  ;;  %v9763_v24 = vld [vmem:[#allocation8 + $0x6f4] sm:$0xf0]  ;;  %v8503_v34 = vor.u32 %v9731_v33, %v8502_v44  ;;  %v12818_v31 = vld [vmem:[#allocation38_spill] sm:$0xff]  ;;  %v12821_v44 = vld [vmem:[#allocation41_spill] sm:$0xff] }
 0x1ca   :  { %12811 = vst [vmem:[#allocation78_spill] sm:$0xff] %v11108_v48  ;;  %v9727_v38 = vld [vmem:[#allocation8 + $0x5d4] sm:$0xf0]  ;;  %v8758_v33 = vld [vmem:[#allocation8 + $0x7e8] sm:$0xf] }
 0x1cb   :  { %3489 = vmatpush.bf16.msrb.mxu1 %v8503_v34  ;;  %v9759_v6 = vld [vmem:[#allocation8 + $0x6d4] sm:$0xf0] }
 0x1cd   :  { %v3075_v55 = vpop.f32.mrf.mxu2  ;;  %v3020_v11 = vpop.f32.mrf.mxu0  ;;  %3461 = vmatpush.bf16.msrb.mxu0 %v8359_v43 }
 0x1ce   :  { %v3076_v50 = vadd.f32 %v3075_v55, %v11051_v1  ;;  %v3104_v8 = vpop.f32.mrf.mxu3  ;;  %v3021_v62 = vadd.f32 %v3020_v11, %v11037_v28  ;;  %v3049_v12 = vpop.f32.mrf.mxu1  ;;  %v8631_v55 = vor.u32 %v9763_v24, %v8630_v2  ;;  %v9795_v2 = vld [vmem:[#allocation8 + $0x7f4] sm:$0xf0] }
 0x1cf   :  { %v8759_v24 = vor.u32 %v9795_v2, %v8758_v33  ;;  %v9723_v33 = vld [vmem:[#allocation8 + $0x5b4] sm:$0xf0] }
 0x1d0   :  { %v11112_v60 = vadd.f32 %v3104_v8, %v3076_v50  ;;  %v11114_v25 = vadd.f32 %v3049_v12, %v3021_v62  ;;  %3251 = vmatmul.bf16.gmra.mxu0 %v12813_v18  ;;  %3518 = vmatpush.bf16.msrb.mxu2 %v8631_v55  ;;  %v8742_v55 = vld [vmem:[#allocation8 + $0x7c8] sm:$0xf] }
 0x1d1   :  { %3280 = vmatmul.bf16.gmra.mxu1 %v12814_v40  ;;  %3547 = vmatpush.bf16.msrb.mxu3 %v8759_v24 }
 0x1d2   :  { %12812 = vst [vmem:[#allocation84_spill] sm:$0xff] %v11114_v25  ;;  %3309 = vmatmul.bf16.gmra.mxu2 %v12815_v27  ;;  %v8566_v25 = vld [vmem:[#allocation8 + $0x668] sm:$0xf] }
 0x1d3   :  { %3338 = vmatmul.bf16.gmra.mxu3 %v12816_v45 }
 0x1d5   :  { %v3078_v56 = vpop.f32.mrf.mxu2  ;;  %v3022_v59 = vpop.f32.mrf.mxu0 }
 0x1d6   :  { %v3079_v28 = vadd.f32 %v3078_v56, %v11051_v1  ;;  %v3107_v3 = vpop.f32.mrf.mxu3  ;;  %v3023_v39 = vadd.f32 %v3022_v59, %v11044_v7  ;;  %v3051_v22 = vpop.f32.mrf.mxu1  ;;  %v8342_v56 = vld [vmem:[#allocation8 + $0x4a8] sm:$0xf]  ;;  %v12819_v59 = vld [vmem:[#allocation39_spill] sm:$0xff] }
 0x1d8   :  { %v11122_v63 = vadd.f32 %v3107_v3, %v3079_v28  ;;  %v11124_v29 = vadd.f32 %v3051_v22, %v3023_v39  ;;  %v9691_v28 = vld [vmem:[#allocation8 + $0x4b4] sm:$0xf0]  ;;  %v8486_v3 = vld [vmem:[#allocation8 + $0x5c8] sm:$0xf]  ;;  %v12820_v39 = vld [vmem:[#allocation40_spill] sm:$0xff] }
 0x1d9   :  { %v8343_v22 = vor.u32 %v9691_v28, %v8342_v56 }
 0x1da   :  { %12817 = vst [vmem:[#allocation71_spill] sm:$0xff] %v11124_v29  ;;  %v9787_v29 = vld [vmem:[#allocation8 + $0x7b4] sm:$0xf0] }
 0x1db   :  { %3462 = vmatpush.bf16.msrb.mxu0 %v8343_v22  ;;  %v8470_v22 = vld [vmem:[#allocation8 + $0x5a8] sm:$0xf] }
 0x1dc   :  { %v8471_v2 = vor.u32 %v9723_v33, %v8470_v22 }
 0x1dd   :  { %v3080_v50 = vpop.f32.mrf.mxu2  ;;  %v3121_v11 = vpop.f32.mrf.mxu0 }
 0x1de   :  { %v3081_v7 = vadd.f32 %v3080_v50, %v11051_v1  ;;  %v3109_v8 = vpop.f32.mrf.mxu3  ;;  %v3122_v62 = vadd.f32 %v3121_v11, %v11062_v41  ;;  %v3150_v12 = vpop.f32.mrf.mxu1  ;;  %v8614_v1 = vld [vmem:[#allocation8 + $0x6c8] sm:$0xf]  ;;  %v8487_v41 = vor.u32 %v9727_v38, %v8486_v3  ;;  %v9791_v50 = vld [vmem:[#allocation8 + $0x7d4] sm:$0xf0] }
 0x1df   :  { %v8615_v43 = vor.u32 %v9759_v6, %v8614_v1  ;;  %v8326_v38 = vld [vmem:[#allocation8 + $0x488] sm:$0xf]  ;;  %v9687_v1 = vld [vmem:[#allocation8 + $0x494] sm:$0xf0] }
 0x1e0   :  { %v11128_v32 = vadd.f32 %v3109_v8, %v3081_v7  ;;  %v3151_v15 = vadd.f32 %v3150_v12, %v3122_v62  ;;  %3352 = vmatmul.bf16.vlgmr.msra.gmra.mxu0 %v12818_v31  ;;  %3490 = vmatpush.bf16.msrb.mxu1 %v8487_v41  ;;  %v8743_v62 = vor.u32 %v9791_v50, %v8742_v55  ;;  %v8598_v41 = vld [vmem:[#allocation8 + $0x6a8] sm:$0xf]  ;;  %v9719_v50 = vld [vmem:[#allocation8 + $0x594] sm:$0xf0] }
 0x1e1   :  { %3381 = vmatmul.bf16.vlgmr.msra.gmra.mxu1 %v12819_v59  ;;  %3519 = vmatpush.bf16.msrb.mxu2 %v8615_v43  ;;  %v8327_v6 = vor.u32 %v9687_v1, %v8326_v38  ;;  %v9755_v43 = vld [vmem:[#allocation8 + $0x6b4] sm:$0xf0]  ;;  %v8710_v38 = vld [vmem:[#allocation8 + $0x788] sm:$0xf] }
 0x1e2   :  { %3410 = vmatmul.bf16.vlgmr.msra.gmra.mxu2 %v12820_v39  ;;  %3548 = vmatpush.bf16.msrb.mxu3 %v8743_v62  ;;  %v9751_v62 = vld [vmem:[#allocation8 + $0x694] sm:$0xf0] }
 0x1e3   :  { %3439 = vmatmul.bf16.vlgmr.msra.gmra.mxu3 %v12821_v44  ;;  %3463 = vmatpush.bf16.msrb.mxu0 %v8327_v6  ;;  %v9783_v1 = vld [vmem:[#allocation8 + $0x794] sm:$0xf0] }
 0x1e4   :  { %3491 = vmatpush.bf16.msrb.mxu1 %v8471_v2  ;;  %v12822_v2 = vld [vmem:[#allocation42_spill] sm:$0xff] }
 0x1e5   :  { %v3179_v34 = vpop.f32.mrf.mxu2  ;;  %v3123_v11 = vpop.f32.mrf.mxu0 }
 0x1e6   :  { %v3180_v7 = vadd.f32 %v3179_v34, %v3151_v15  ;;  %v3208_v8 = vpop.f32.mrf.mxu3  ;;  %v3124_v12 = vadd.f32 %v3123_v11, %v11074_v57  ;;  %v3152_v56 = vpop.f32.mrf.mxu1  ;;  %v8599_v15 = vor.u32 %v9755_v43, %v8598_v41  ;;  %v8726_v34 = vld [vmem:[#allocation8 + $0x7a8] sm:$0xf] }
 0x1e7   :  { %v8727_v24 = vor.u32 %v9787_v29, %v8726_v34  ;;  %v8454_v57 = vld [vmem:[#allocation8 + $0x588] sm:$0xf]  ;;  %v8711_v29 = vor.u32 %v9783_v1, %v8710_v38  ;;  %v9683_v34 = vld [vmem:[#allocation8 + $0x474] sm:$0xf0] }
 0x1e8   :  { %v11135_v28 = vadd.f32 %v3208_v8, %v3180_v7  ;;  %v3153_v3 = vadd.f32 %v3152_v56, %v3124_v12  ;;  %3520 = vmatpush.bf16.msrb.mxu2 %v8599_v15  ;;  %v8582_v7 = vld [vmem:[#allocation8 + $0x688] sm:$0xf]  ;;  %v8455_v56 = vor.u32 %v9719_v50, %v8454_v57  ;;  %v9715_v50 = vld [vmem:[#allocation8 + $0x574] sm:$0xf0] }
 0x1e9   :  { %3549 = vmatpush.bf16.msrb.mxu3 %v8727_v24  ;;  %v8583_v41 = vor.u32 %v9751_v62, %v8582_v7  ;;  %v8310_v15 = vld [vmem:[#allocation8 + $0x468] sm:$0xf]  ;;  %v12824_v24 = vld [vmem:[#allocation44_spill] sm:$0xff]  ;;  %v9779_v62 = vld [vmem:[#allocation8 + $0x774] sm:$0xf0] }
 0x1ea   :  { %3492 = vmatpush.bf16.msrb.mxu1 %v8455_v56  ;;  %v8311_v57 = vor.u32 %v9683_v34, %v8310_v15  ;;  %v8294_v1 = vld [vmem:[#allocation8 + $0x448] sm:$0xf] }
 0x1ec   :  { %3521 = vmatpush.bf16.msrb.mxu2 %v8583_v41  ;;  %3464 = vmatpush.bf16.msrb.mxu0 %v8311_v57 }
 0x1ed   :  { %v3181_v55 = vpop.f32.mrf.mxu2  ;;  %v3126_v12 = vpop.f32.mrf.mxu0  ;;  %3550 = vmatpush.bf16.msrb.mxu3 %v8711_v29  ;;  %v8678_v29 = vld [vmem:[#allocation8 + $0x748] sm:$0xf] }
 0x1ee   :  { %v3182_v8 = vadd.f32 %v3181_v55, %v3153_v3  ;;  %v3210_v11 = vpop.f32.mrf.mxu3  ;;  %v3127_v22 = vadd.f32 %v3126_v12, %v11087_v52  ;;  %v3155_v33 = vpop.f32.mrf.mxu1  ;;  %v8438_v3 = vld [vmem:[#allocation8 + $0x568] sm:$0xf]  ;;  %v12823_v55 = vld [vmem:[#allocation43_spill] sm:$0xff] }
 0x1ef   :  { %v9747_v52 = vld [vmem:[#allocation8 + $0x674] sm:$0xf0]  ;;  %v12825_v12 = vld [vmem:[#allocation45_spill] sm:$0xff]  ;;  %v8439_v7 = vor.u32 %v9715_v50, %v8438_v3 }
 0x1f0   :  { %v11138_v6 = vadd.f32 %v3210_v11, %v3182_v8  ;;  %v3156_v43 = vadd.f32 %v3155_v33, %v3127_v22  ;;  %3357 = vmatmul.bf16.gmra.mxu0 %v12822_v2  ;;  %v8567_v8 = vor.u32 %v9747_v52, %v8566_v25  ;;  %v8694_v11 = vld [vmem:[#allocation8 + $0x768] sm:$0xf]  ;;  %v9679_v22 = vld [vmem:[#allocation8 + $0x454] sm:$0xf0] }
 0x1f1   :  { %3386 = vmatmul.bf16.gmra.mxu1 %v12823_v55  ;;  %v8695_v38 = vor.u32 %v9779_v62, %v8694_v11  ;;  %v8422_v33 = vld [vmem:[#allocation8 + $0x548] sm:$0xf]  ;;  %v8295_v17 = vor.u32 %v9679_v22, %v8294_v1  ;;  %v9775_v50 = vld [vmem:[#allocation8 + $0x754] sm:$0xf0] }
 0x1f2   :  { %3415 = vmatmul.bf16.gmra.mxu2 %v12824_v24  ;;  %3493 = vmatpush.bf16.msrb.mxu1 %v8439_v7  ;;  %v9711_v24 = vld [vmem:[#allocation8 + $0x554] sm:$0xf0]  ;;  %v8679_v7 = vor.u32 %v9775_v50, %v8678_v29  ;;  %v8278_v11 = vld [vmem:[#allocation8 + $0x428] sm:$0xf] }
 0x1f3   :  { %3444 = vmatmul.bf16.gmra.mxu3 %v12825_v12  ;;  %v9743_v12 = vld [vmem:[#allocation8 + $0x654] sm:$0xf0]  ;;  %3522 = vmatpush.bf16.msrb.mxu2 %v8567_v8  ;;  %v8423_v3 = vor.u32 %v9711_v24, %v8422_v33  ;;  %v8518_v50 = vld [vmem:[#allocation8 + $0x608] sm:$0xf] }
 0x1f4   :  { %v8551_v57 = vor.u32 %v9743_v12, %v8550_v30  ;;  %3551 = vmatpush.bf16.msrb.mxu3 %v8695_v38  ;;  %3465 = vmatpush.bf16.msrb.mxu0 %v8295_v17  ;;  %v9675_v62 = vld [vmem:[#allocation8 + $0x434] sm:$0xf0]  ;;  %v8662_v30 = vld [vmem:[#allocation8 + $0x728] sm:$0xf] }
 0x1f5   :  { %v3184_v56 = vpop.f32.mrf.mxu2  ;;  %v3128_v34 = vpop.f32.mrf.mxu0  ;;  %v8279_v1 = vor.u32 %v9675_v62, %v8278_v11  ;;  %v9707_v22 = vld [vmem:[#allocation8 + $0x534] sm:$0xf0]  ;;  %v8262_v17 = vld [vmem:[#allocation8 + $0x408] sm:$0xf] }
 0x1f6   :  { %v3185_v48 = vadd.f32 %v3184_v56, %v3156_v43  ;;  %v3213_v15 = vpop.f32.mrf.mxu3  ;;  %v3129_v41 = vadd.f32 %v3128_v34, %v11095_v16  ;;  %v3157_v25 = vpop.f32.mrf.mxu1  ;;  %3494 = vmatpush.bf16.msrb.mxu1 %v8423_v3  ;;  %v8406_v56 = vld [vmem:[#allocation8 + $0x528] sm:$0xf]  ;;  %v9739_v16 = vld [vmem:[#allocation8 + $0x634] sm:$0xf0] }
 0x1f7   :  { %3523 = vmatpush.bf16.msrb.mxu2 %v8551_v57  ;;  %v8407_v8 = vor.u32 %v9707_v22, %v8406_v56  ;;  %v8535_v24 = vor.u32 %v9739_v16, %v8534_v58  ;;  %v9771_v12 = vld [vmem:[#allocation8 + $0x734] sm:$0xf0]  ;;  %v8646_v56 = vld [vmem:[#allocation8 + $0x708] sm:$0xf] }
 0x1f8   :  { %v11145_v52 = vadd.f32 %v3213_v15, %v3185_v48  ;;  %v3158_v43 = vadd.f32 %v3157_v25, %v3129_v41  ;;  %3552 = vmatpush.bf16.msrb.mxu3 %v8679_v7  ;;  %3466 = vmatpush.bf16.msrb.mxu0 %v8279_v1  ;;  %v8663_v48 = vor.u32 %v9771_v12, %v8662_v30  ;;  %v9671_v33 = vld [vmem:[#allocation8 + $0x414] sm:$0xf0]  ;;  %v8390_v15 = vld [vmem:[#allocation8 + $0x508] sm:$0xf] }
 0x1f9   :  { %v8263_v3 = vor.u32 %v9671_v33, %v8262_v17  ;;  %v9703_v29 = vld [vmem:[#allocation8 + $0x514] sm:$0xf0] }
 0x1fa   :  { %3495 = vmatpush.bf16.msrb.mxu1 %v8407_v8  ;;  %v9735_v11 = vld [vmem:[#allocation8 + $0x614] sm:$0xf0]  ;;  %v8391_v62 = vor.u32 %v9703_v29, %v8390_v15  ;;  %v12826_v8 = vld [vmem:[#allocation46_spill] sm:$0xff] }
 0x1fb   :  { %3524 = vmatpush.bf16.msrb.mxu2 %v8535_v24  ;;  %v8519_v7 = vor.u32 %v9735_v11, %v8518_v50  ;;  %v9767_v1 = vld [vmem:[#allocation8 + $0x714] sm:$0xf0] }
 0x1fc   :  { %3553 = vmatpush.bf16.msrb.mxu3 %v8663_v48  ;;  %3467 = vmatpush.bf16.msrb.mxu0 %v8263_v3  ;;  %v8647_v16 = vor.u32 %v9767_v1, %v8646_v56  ;;  %v12827_v30 = vld [vmem:[#allocation47_spill] sm:$0xff] }
 0x1fd   :  { %v3186_v38 = vpop.f32.mrf.mxu2  ;;  %v3131_v25 = vpop.f32.mrf.mxu0 }
 0x1fe   :  { %v3187_v34 = vadd.f32 %v3186_v38, %v3158_v43  ;;  %v3215_v41 = vpop.f32.mrf.mxu3  ;;  %v3132_v57 = vadd.f32 %v3131_v25, %v11106_v51  ;;  %v3160_v58 = vpop.f32.mrf.mxu1  ;;  %3496 = vmatpush.bf16.msrb.mxu1 %v8391_v62  ;;  %v12829_v62 = vld [vmem:[#allocation49_spill] sm:$0xff] }
 0x1ff   :  { %3525 = vmatpush.bf16.msrb.mxu2 %v8519_v7  ;;  %v9827_v7 = vld [vmem:[#allocation8 + $0x8f4] sm:$0xf0] }
 0x200   :  { %v11148_v22 = vadd.f32 %v3215_v41, %v3187_v34  ;;  %v3161_v43 = vadd.f32 %v3160_v58, %v3132_v57  ;;  %3362 = vmatmul.bf16.gmra.mxu0 %v12826_v8  ;;  %3554 = vmatpush.bf16.msrb.mxu3 %v8647_v16  ;;  %v12828_v58 = vld [vmem:[#allocation48_spill] sm:$0xff] }
 0x201   :  { %3391 = vmatmul.bf16.gmra.mxu1 %v12827_v30 }
 0x202   :  { %3420 = vmatmul.bf16.gmra.mxu2 %v10795_v21 }
 0x203   :  { %3449 = vmatmul.bf16.gmra.mxu3 %v10797_v26 }
 0x205   :  { %v3189_v51 = vpop.f32.mrf.mxu2  ;;  %v3133_v38 = vpop.f32.mrf.mxu0 }
 0x206   :  { %v3190_v24 = vadd.f32 %v3189_v51, %v3161_v43  ;;  %v3218_v12 = vpop.f32.mrf.mxu3  ;;  %v3134_v48 = vadd.f32 %v3133_v38, %v11112_v60  ;;  %v3162_v17 = vpop.f32.mrf.mxu1  ;;  %v8886_v60 = vld [vmem:[#allocation8 + $0x8e8] sm:$0xf] }
 0x207   :  { %v8887_v1 = vor.u32 %v9827_v7, %v8886_v60  ;;  %v9859_v60 = vld [vmem:[#allocation8 + $0x9f4] sm:$0xf0]  ;;  %v9569_v7 = vld [vmem:[#allocation8 + $0xec] sm:$0xf] }
 0x208   :  { %v11155_v33 = vadd.f32 %v3218_v12, %v3190_v24  ;;  %v3163_v15 = vadd.f32 %v3162_v17, %v3134_v48 }
 0x209   :  { %3576 = vmatpush.bf16.msra.mxu0 %v8887_v1 }
 0x20d   :  { %v3191_v34 = vpop.f32.mrf.mxu2  ;;  %v3136_v3 = vpop.f32.mrf.mxu0 }
 0x20e   :  { %v3192_v41 = vadd.f32 %v3191_v34, %v3163_v15  ;;  %v3220_v25 = vpop.f32.mrf.mxu3  ;;  %v3137_v29 = vadd.f32 %v3136_v3, %v11122_v63  ;;  %v3165_v50 = vpop.f32.mrf.mxu1  ;;  %v9014_v3 = vld [vmem:[#allocation8 + $0x9e8] sm:$0xf] }
 0x20f   :  { %v9015_v1 = vor.u32 %v9859_v60, %v9014_v3  ;;  %v9565_v3 = vld [vmem:[#allocation8 + $0xcc] sm:$0xf] }
 0x210   :  { %v11158_v11 = vadd.f32 %v3220_v25, %v3192_v41  ;;  %v3166_v57 = vadd.f32 %v3165_v50, %v3137_v29  ;;  %3367 = vmatmul.bf16.gmra.mxu0 %v12828_v58  ;;  %v8870_v41 = vld [vmem:[#allocation8 + $0x8c8] sm:$0xf]  ;;  %v9823_v25 = vld [vmem:[#allocation8 + $0x8d4] sm:$0xf0] }
 0x211   :  { %3396 = vmatmul.bf16.gmra.mxu1 %v12829_v62 }
 0x212   :  { %3425 = vmatmul.bf16.gmra.mxu2 %v10807_v46  ;;  %3605 = vmatpush.bf16.msra.mxu1 %v9015_v1  ;;  %v9545_v46 = vld [vmem:[#allocation8 + $0x2c] sm:$0xf] }
 0x213   :  { %3454 = vmatmul.bf16.gmra.mxu3 %v10809_v47  ;;  %v9851_v47 = vld [vmem:[#allocation8 + $0x9b4] sm:$0xf0] }
 0x215   :  { %v3194_v56 = vpop.f32.mrf.mxu2  ;;  %v3138_v51 = vpop.f32.mrf.mxu0 }
 0x216   :  { %v3195_v16 = vadd.f32 %v3194_v56, %v3166_v57  ;;  %v3223_v43 = vpop.f32.mrf.mxu3  ;;  %v3139_v63 = vadd.f32 %v3138_v51, %v11128_v32  ;;  %v3167_v24 = vpop.f32.mrf.mxu1  ;;  %v8871_v57 = vor.u32 %v9823_v25, %v8870_v41  ;;  %v7864_v56 = vld [vmem:[#allocation8 + $0xf8] sm:$0xf0]  ;;  %v12830_v51 = vld [vmem:[#allocation52_spill] sm:$0xff]  ;;  %v9855_v25 = vld [vmem:[#allocation8 + $0x9d4] sm:$0xf0] }
 0x218   :  { %v11165_v12 = vadd.f32 %v3223_v43, %v3195_v16  ;;  %v3168_v38 = vadd.f32 %v3167_v24, %v3139_v63  ;;  %v7867_v16 = vor.u32 %v9569_v7, %v7864_v56  ;;  %v9601_v63 = vld [vmem:[#allocation8 + $0x1ec] sm:$0xf]  ;;  %v7992_v24 = vld [vmem:[#allocation8 + $0x1f8] sm:$0xf0]  ;;  %3577 = vmatpush.bf16.msra.mxu0 %v8871_v57 }
 0x21a   :  { %3634 = vmatpush.bf16.msra.mxu2 %v7867_v16 }
 0x21d   :  { %v3196_v48 = vpop.f32.mrf.mxu2  ;;  %v3237_v34 = vpop.f32.mrf.mxu0 }
 0x21e   :  { %v3197_v17 = vadd.f32 %v3196_v48, %v3168_v38  ;;  %v3225_v15 = vpop.f32.mrf.mxu3  ;;  %v3238_v29 = vadd.f32 %v3237_v34, %v11135_v28  ;;  %v3266_v50 = vpop.f32.mrf.mxu1  ;;  %v12831_v38 = vld [vmem:[#allocation53_spill] sm:$0xff]  ;;  %v7995_v48 = vor.u32 %v9601_v63, %v7992_v24  ;;  %v7976_v24 = vld [vmem:[#allocation8 + $0x1d8] sm:$0xf0] }
 0x21f   :  { %v8854_v28 = vld [vmem:[#allocation8 + $0x8a8] sm:$0xf]  ;;  %v9597_v63 = vld [vmem:[#allocation8 + $0x1cc] sm:$0xf] }
 0x220   :  { %v11168_v32 = vadd.f32 %v3225_v15, %v3197_v17  ;;  %v3267_v43 = vadd.f32 %v3266_v50, %v3238_v29  ;;  %3468 = vmatmul.bf16.vlgmr.msrb.gmra.mxu0 %v12830_v51  ;;  %v9819_v17 = vld [vmem:[#allocation8 + $0x8b4] sm:$0xf0]  ;;  %v8998_v15 = vld [vmem:[#allocation8 + $0x9c8] sm:$0xf]  ;;  %v7848_v29 = vld [vmem:[#allocation8 + $0xd8] sm:$0xf0]  ;;  %3663 = vmatpush.bf16.msra.mxu3 %v7995_v48  ;;  %v7979_v16 = vor.u32 %v9597_v63, %v7976_v24 }
 0x221   :  { %3497 = vmatmul.bf16.vlgmr.msrb.gmra.mxu1 %v12831_v38  ;;  %v8855_v41 = vor.u32 %v9819_v17, %v8854_v28  ;;  %v8999_v56 = vor.u32 %v9855_v25, %v8998_v15  ;;  %v8982_v17 = vld [vmem:[#allocation8 + $0x9a8] sm:$0xf]  ;;  %v9593_v15 = vld [vmem:[#allocation8 + $0x1ac] sm:$0xf]  ;;  %v7960_v25 = vld [vmem:[#allocation8 + $0x1b8] sm:$0xf0] }
 0x222   :  { %3526 = vmatmul.bf16.vlgmr.msrb.gmra.mxu2 %v10821_v4  ;;  %v7851_v4 = vor.u32 %v9565_v3, %v7848_v29  ;;  %v8983_v48 = vor.u32 %v9851_v47, %v8982_v17  ;;  %v7963_v29 = vor.u32 %v9593_v15, %v7960_v25  ;;  %v9847_v24 = vld [vmem:[#allocation8 + $0x994] sm:$0xf0] }
 0x223   :  { %3555 = vmatmul.bf16.vlgmr.msrb.gmra.mxu3 %v10824_v10  ;;  %3578 = vmatpush.bf16.msra.mxu0 %v8855_v41  ;;  %v9815_v41 = vld [vmem:[#allocation8 + $0x894] sm:$0xf0] }
 0x224   :  { %3606 = vmatpush.bf16.msra.mxu1 %v8999_v56  ;;  %3635 = vmatpush.bf16.msra.mxu2 %v7851_v4 }
 0x225   :  { %v3295_v34 = vpop.f32.mrf.mxu2  ;;  %v3239_v7 = vpop.f32.mrf.mxu0  ;;  %3664 = vmatpush.bf16.msra.mxu3 %v7979_v16 }
 0x226   :  { %v3296_v50 = vadd.f32 %v3295_v34, %v3267_v43  ;;  %v3324_v60 = vpop.f32.mrf.mxu3  ;;  %v3240_v57 = vadd.f32 %v3239_v7, %v11138_v6  ;;  %v3268_v1 = vpop.f32.mrf.mxu1  ;;  %v9561_v43 = vld [vmem:[#allocation8 + $0xac] sm:$0xf]  ;;  %v7832_v34 = vld [vmem:[#allocation8 + $0xb8] sm:$0xf0]  ;;  %v8838_v7 = vld [vmem:[#allocation8 + $0x888] sm:$0xf] }
 0x227   :  { %v7835_v3 = vor.u32 %v9561_v43, %v7832_v34  ;;  %v8839_v63 = vor.u32 %v9815_v41, %v8838_v7  ;;  %v9589_v34 = vld [vmem:[#allocation8 + $0x18c] sm:$0xf]  ;;  %v8950_v7 = vld [vmem:[#allocation8 + $0x968] sm:$0xf]  ;;  %v12835_v41 = vld [vmem:[#allocation60_spill] sm:$0xff] }
 0x228   :  { %v11175_v10 = vadd.f32 %v3324_v60, %v3296_v50  ;;  %v3269_v28 = vadd.f32 %v3268_v1, %v3240_v57  ;;  %3607 = vmatpush.bf16.msra.mxu1 %v8983_v48  ;;  %v8966_v50 = vld [vmem:[#allocation8 + $0x988] sm:$0xf]  ;;  %v9557_v57 = vld [vmem:[#allocation8 + $0x8c] sm:$0xf]  ;;  %v7816_v1 = vld [vmem:[#allocation8 + $0x98] sm:$0xf0] }
 0x229   :  { %3636 = vmatpush.bf16.msra.mxu2 %v7835_v3  ;;  %3665 = vmatpush.bf16.msra.mxu3 %v7963_v29  ;;  %v8967_v17 = vor.u32 %v9847_v24, %v8966_v50  ;;  %v7819_v43 = vor.u32 %v9557_v57, %v7816_v1  ;;  %v7944_v48 = vld [vmem:[#allocation8 + $0x198] sm:$0xf0]  ;;  %v9843_v50 = vld [vmem:[#allocation8 + $0x974] sm:$0xf0] }
 0x22a   :  { %12832 = vst [vmem:[#allocation72_spill] sm:$0xff] %v11175_v10  ;;  %3579 = vmatpush.bf16.msra.mxu0 %v8839_v63  ;;  %v7947_v25 = vor.u32 %v9589_v34, %v7944_v48  ;;  %v12834_v29 = vld [vmem:[#allocation59_spill] sm:$0xff]  ;;  %v9585_v63 = vld [vmem:[#allocation8 + $0x16c] sm:$0xf]  ;;  %v8934_v34 = vld [vmem:[#allocation8 + $0x948] sm:$0xf] }
 0x22b   :  { %v7800_v24 = vld [vmem:[#allocation8 + $0x78] sm:$0xf0]  ;;  %v9839_v10 = vld [vmem:[#allocation8 + $0x954] sm:$0xf0] }
 0x22c   :  { %3608 = vmatpush.bf16.msra.mxu1 %v8967_v17  ;;  %v7928_v57 = vld [vmem:[#allocation8 + $0x178] sm:$0xf0]  ;;  %v9807_v17 = vld [vmem:[#allocation8 + $0x854] sm:$0xf0] }
 0x22d   :  { %v3297_v6 = vpop.f32.mrf.mxu2  ;;  %v3242_v56 = vpop.f32.mrf.mxu0  ;;  %3637 = vmatpush.bf16.msra.mxu2 %v7819_v43  ;;  %3666 = vmatpush.bf16.msra.mxu3 %v7947_v25  ;;  %v7931_v1 = vor.u32 %v9585_v63, %v7928_v57  ;;  %v9581_v25 = vld [vmem:[#allocation8 + $0x14c] sm:$0xf]  ;;  %v8790_v63 = vld [vmem:[#allocation8 + $0x828] sm:$0xf]  ;;  %v9803_v57 = vld [vmem:[#allocation8 + $0x834] sm:$0xf0] }
 0x22e   :  { %v3298_v60 = vadd.f32 %v3297_v6, %v3269_v28  ;;  %v3326_v4 = vpop.f32.mrf.mxu3  ;;  %v3243_v47 = vadd.f32 %v3242_v56, %v11145_v52  ;;  %v3271_v16 = vpop.f32.mrf.mxu1  ;;  %v8822_v28 = vld [vmem:[#allocation8 + $0x868] sm:$0xf]  ;;  %v9811_v6 = vld [vmem:[#allocation8 + $0x874] sm:$0xf0]  ;;  %v9553_v56 = vld [vmem:[#allocation8 + $0x6c] sm:$0xf] }
 0x22f   :  { %v8823_v52 = vor.u32 %v9811_v6, %v8822_v28 }
 0x230   :  { %v11178_v15 = vadd.f32 %v3326_v4, %v3298_v60  ;;  %v3272_v3 = vadd.f32 %v3271_v16, %v3243_v47  ;;  %3473 = vmatmul.bf16.gmra.mxu0 %v12834_v29  ;;  %v8951_v60 = vor.u32 %v9843_v50, %v8950_v7  ;;  %v7803_v4 = vor.u32 %v9553_v56, %v7800_v24  ;;  %v8806_v16 = vld [vmem:[#allocation8 + $0x848] sm:$0xf]  ;;  %v7912_v56 = vld [vmem:[#allocation8 + $0x158] sm:$0xf0] }
 0x231   :  { %3502 = vmatmul.bf16.gmra.mxu1 %v12835_v41  ;;  %3580 = vmatpush.bf16.msra.mxu0 %v8823_v52  ;;  %v8935_v50 = vor.u32 %v9839_v10, %v8934_v34 }
 0x232   :  { %12833 = vst [vmem:[#allocation79_spill] sm:$0xff] %v11178_v15  ;;  %3531 = vmatmul.bf16.gmra.mxu2 %v10845_v35  ;;  %3609 = vmatpush.bf16.msra.mxu1 %v8951_v60  ;;  %v8807_v15 = vor.u32 %v9807_v17, %v8806_v16  ;;  %v9549_v35 = vld [vmem:[#allocation8 + $0x4c] sm:$0xf]  ;;  %v7915_v60 = vor.u32 %v9581_v25, %v7912_v56  ;;  %v9835_v17 = vld [vmem:[#allocation8 + $0x934] sm:$0xf0] }
 0x233   :  { %3560 = vmatmul.bf16.gmra.mxu3 %v10848_v42  ;;  %v7784_v42 = vld [vmem:[#allocation8 + $0x58] sm:$0xf0]  ;;  %3638 = vmatpush.bf16.msra.mxu2 %v7803_v4  ;;  %v8791_v16 = vor.u32 %v9803_v57, %v8790_v63  ;;  %v9831_v25 = vld [vmem:[#allocation8 + $0x914] sm:$0xf0]  ;;  %v9541_v56 = vld [vmem:[#allocation8 + $0xc] sm:$0xf] }
 0x234   :  { %v7787_v52 = vor.u32 %v9549_v35, %v7784_v42  ;;  %3667 = vmatpush.bf16.msra.mxu3 %v7931_v1  ;;  %v9577_v35 = vld [vmem:[#allocation8 + $0x12c] sm:$0xf]  ;;  %v7896_v42 = vld [vmem:[#allocation8 + $0x138] sm:$0xf0] }
 0x235   :  { %v3300_v47 = vpop.f32.mrf.mxu2  ;;  %v3244_v6 = vpop.f32.mrf.mxu0  ;;  %3581 = vmatpush.bf16.msra.mxu0 %v8807_v15  ;;  %v7899_v34 = vor.u32 %v9577_v35, %v7896_v42  ;;  %v8774_v15 = vld [vmem:[#allocation8 + $0x808] sm:$0xf]  ;;  %v7752_v63 = vld [vmem:[#allocation8 + $0x18] sm:$0xf0]  ;;  %v9633_v42 = vld [vmem:[#allocation8 + $0x2ec] sm:$0xf] }
 0x236   :  { %v3301_v48 = vadd.f32 %v3300_v47, %v3272_v3  ;;  %v3329_v28 = vpop.f32.mrf.mxu3  ;;  %v3245_v43 = vadd.f32 %v3244_v6, %v11148_v22  ;;  %v3273_v7 = vpop.f32.mrf.mxu1  ;;  %3610 = vmatpush.bf16.msra.mxu1 %v8935_v50  ;;  %v8918_v47 = vld [vmem:[#allocation8 + $0x928] sm:$0xf]  ;;  %v7768_v22 = vld [vmem:[#allocation8 + $0x38] sm:$0xf0] }
 0x237   :  { %3639 = vmatpush.bf16.msra.mxu2 %v7787_v52  ;;  %v8919_v4 = vor.u32 %v9835_v17, %v8918_v47  ;;  %v7771_v10 = vor.u32 %v9545_v46, %v7768_v22  ;;  %v9573_v47 = vld [vmem:[#allocation8 + $0x10c] sm:$0xf] }
 0x238   :  { %v11185_v24 = vadd.f32 %v3329_v28, %v3301_v48  ;;  %v3274_v3 = vadd.f32 %v3273_v7, %v3245_v43  ;;  %3668 = vmatpush.bf16.msra.mxu3 %v7915_v60  ;;  %v9799_v48 = vld [vmem:[#allocation8 + $0x814] sm:$0xf0]  ;;  %v8902_v28 = vld [vmem:[#allocation8 + $0x908] sm:$0xf]  ;;  %v7755_v60 = vor.u32 %v9541_v56, %v7752_v63  ;;  %v9729_v63 = vld [vmem:[#allocation8 + $0x5ec] sm:$0xf] }
 0x239   :  { %3582 = vmatpush.bf16.msra.mxu0 %v8791_v16  ;;  %v8775_v50 = vor.u32 %v9799_v48, %v8774_v15  ;;  %v8903_v57 = vor.u32 %v9831_v25, %v8902_v28  ;;  %v7880_v16 = vld [vmem:[#allocation8 + $0x118] sm:$0xf0] }
 0x23a   :  { %12836 = vst [vmem:[#allocation80_spill] sm:$0xff] %v11185_v24  ;;  %3611 = vmatpush.bf16.msra.mxu1 %v8919_v4  ;;  %v7883_v22 = vor.u32 %v9573_v47, %v7880_v16  ;;  %v8104_v47 = vld [vmem:[#allocation8 + $0x2d8] sm:$0xf0]  ;;  %v9661_v16 = vld [vmem:[#allocation8 + $0x3cc] sm:$0xf] }
 0x23b   :  { %3640 = vmatpush.bf16.msra.mxu2 %v7771_v10 }
 0x23c   :  { %3669 = vmatpush.bf16.msra.mxu3 %v7899_v34  ;;  %v8120_v34 = vld [vmem:[#allocation8 + $0x2f8] sm:$0xf0] }
 0x23d   :  { %v3302_v1 = vpop.f32.mrf.mxu2  ;;  %v3247_v7 = vpop.f32.mrf.mxu0  ;;  %3583 = vmatpush.bf16.msra.mxu0 %v8775_v50  ;;  %v8123_v28 = vor.u32 %v9633_v42, %v8120_v34  ;;  %v8488_v42 = vld [vmem:[#allocation8 + $0x5d8] sm:$0xf0] }
 0x23e   :  { %v3303_v6 = vadd.f32 %v3302_v1, %v3274_v3  ;;  %v3331_v43 = vpop.f32.mrf.mxu3  ;;  %v3248_v52 = vadd.f32 %v3247_v7, %v11155_v33  ;;  %v3276_v46 = vpop.f32.mrf.mxu1  ;;  %3612 = vmatpush.bf16.msra.mxu1 %v8903_v57  ;;  %v9665_v1 = vld [vmem:[#allocation8 + $0x3ec] sm:$0xf]  ;;  %v8376_v7 = vld [vmem:[#allocation8 + $0x4f8] sm:$0xf0] }
 0x23f   :  { %3641 = vmatpush.bf16.msra.mxu2 %v7755_v60  ;;  %v9629_v60 = vld [vmem:[#allocation8 + $0x2cc] sm:$0xf] }
 0x240   :  { %v11188_v17 = vadd.f32 %v3331_v43, %v3303_v6  ;;  %v3277_v3 = vadd.f32 %v3276_v46, %v3248_v52  ;;  %3478 = vmatmul.bf16.gmra.mxu0 %v10866_v37  ;;  %3670 = vmatpush.bf16.msra.mxu3 %v7883_v22  ;;  %v8248_v6 = vld [vmem:[#allocation8 + $0x3f8] sm:$0xf0]  ;;  %v9697_v43 = vld [vmem:[#allocation8 + $0x4ec] sm:$0xf] }
 0x241   :  { %3507 = vmatmul.bf16.gmra.mxu1 %v10869_v49  ;;  %v8251_v25 = vor.u32 %v9665_v1, %v8248_v6  ;;  %v8379_v56 = vor.u32 %v9697_v43, %v8376_v7  ;;  %v8504_v52 = vld [vmem:[#allocation8 + $0x5f8] sm:$0xf0]  ;;  %3692 = vmatpush.bf16.msrb.mxu0 %v8123_v28  ;;  %v9625_v6 = vld [vmem:[#allocation8 + $0x2ac] sm:$0xf] }
 0x242   :  { %12837 = vst [vmem:[#allocation38_spill] sm:$0xff] %v11188_v17  ;;  %3536 = vmatmul.bf16.gmra.mxu2 %v10871_v61  ;;  %v8507_v57 = vor.u32 %v9729_v63, %v8504_v52  ;;  %v8232_v22 = vld [vmem:[#allocation8 + $0x3d8] sm:$0xf0]  ;;  %v9657_v7 = vld [vmem:[#allocation8 + $0x3ac] sm:$0xf] }
 0x243   :  { %3565 = vmatmul.bf16.gmra.mxu3 %v10874_v54  ;;  %3721 = vmatpush.bf16.msrb.mxu1 %v8251_v25  ;;  %v8088_v43 = vld [vmem:[#allocation8 + $0x2b8] sm:$0xf0]  ;;  %v9841_v17 = vld [vmem:[#allocation8 + $0x96c] sm:$0xf] }
 0x244   :  { %3750 = vmatpush.bf16.msrb.mxu2 %v8379_v56  ;;  %3779 = vmatpush.bf16.msrb.mxu3 %v8507_v57  ;;  %v8091_v63 = vor.u32 %v9625_v6, %v8088_v43  ;;  %v8216_v52 = vld [vmem:[#allocation8 + $0x3b8] sm:$0xf0]  ;;  %v9689_v57 = vld [vmem:[#allocation8 + $0x4ac] sm:$0xf] }
 0x245   :  { %v3305_v33 = vpop.f32.mrf.mxu2  ;;  %v3249_v35 = vpop.f32.mrf.mxu0  ;;  %v8456_v6 = vld [vmem:[#allocation8 + $0x598] sm:$0xf0] }
 0x246   :  { %v3306_v4 = vadd.f32 %v3305_v33, %v3277_v3  ;;  %v3334_v10 = vpop.f32.mrf.mxu3  ;;  %v3250_v15 = vadd.f32 %v3249_v35, %v11158_v11  ;;  %v3278_v48 = vpop.f32.mrf.mxu1  ;;  %v8107_v11 = vor.u32 %v9629_v60, %v8104_v47  ;;  %v9693_v3 = vld [vmem:[#allocation8 + $0x4cc] sm:$0xf]  ;;  %v8360_v33 = vld [vmem:[#allocation8 + $0x4d8] sm:$0xf0]  ;;  %v8235_v35 = vor.u32 %v9661_v16, %v8232_v22 }
 0x247   :  { %v8344_v60 = vld [vmem:[#allocation8 + $0x4b8] sm:$0xf0]  ;;  %v8219_v16 = vor.u32 %v9657_v7, %v8216_v52 }
 0x248   :  { %v11195_v50 = vadd.f32 %v3334_v10, %v3306_v4  ;;  %v3279_v46 = vadd.f32 %v3278_v48, %v3250_v15  ;;  %v8363_v4 = vor.u32 %v9693_v3, %v8360_v33  ;;  %v9725_v10 = vld [vmem:[#allocation8 + $0x5cc] sm:$0xf]  ;;  %3693 = vmatpush.bf16.msrb.mxu0 %v8107_v11  ;;  %3722 = vmatpush.bf16.msrb.mxu1 %v8235_v35  ;;  %v8472_v22 = vld [vmem:[#allocation8 + $0x5b8] sm:$0xf0] }
 0x249   :  { %v8491_v34 = vor.u32 %v9725_v10, %v8488_v42  ;;  %v8347_v11 = vor.u32 %v9689_v57, %v8344_v60  ;;  %v8072_v35 = vld [vmem:[#allocation8 + $0x298] sm:$0xf0]  ;;  %v9617_v57 = vld [vmem:[#allocation8 + $0x26c] sm:$0xf] }
 0x24a   :  { %12838 = vst [vmem:[#allocation39_spill] sm:$0xff] %v11195_v50  ;;  %3751 = vmatpush.bf16.msrb.mxu2 %v8363_v4  ;;  %v9653_v4 = vld [vmem:[#allocation8 + $0x38c] sm:$0xf]  ;;  %v8200_v42 = vld [vmem:[#allocation8 + $0x398] sm:$0xf0] }
 0x24b   :  { %3780 = vmatpush.bf16.msrb.mxu3 %v8491_v34  ;;  %v9685_v34 = vld [vmem:[#allocation8 + $0x48c] sm:$0xf]  ;;  %v8056_v60 = vld [vmem:[#allocation8 + $0x278] sm:$0xf0] }
 0x24c   :  { %3694 = vmatpush.bf16.msrb.mxu0 %v8091_v63  ;;  %3723 = vmatpush.bf16.msrb.mxu1 %v8219_v16  ;;  %v8184_v16 = vld [vmem:[#allocation8 + $0x378] sm:$0xf0]  ;;  %v9837_v50 = vld [vmem:[#allocation8 + $0x94c] sm:$0xf] }
 0x24d   :  { %v3307_v1 = vpop.f32.mrf.mxu2  ;;  %v3252_v28 = vpop.f32.mrf.mxu0 }
 0x24e   :  { %v3308_v15 = vadd.f32 %v3307_v1, %v3279_v46  ;;  %v3336_v48 = vpop.f32.mrf.mxu3  ;;  %v3253_v25 = vadd.f32 %v3252_v28, %v11165_v12  ;;  %v3281_v56 = vpop.f32.mrf.mxu1  ;;  %v9721_v46 = vld [vmem:[#allocation8 + $0x5ac] sm:$0xf]  ;;  %v8328_v1 = vld [vmem:[#allocation8 + $0x498] sm:$0xf0]  ;;  %3752 = vmatpush.bf16.msrb.mxu2 %v8347_v11 }
 0x24f   :  { %v8475_v33 = vor.u32 %v9721_v46, %v8472_v22  ;;  %v9621_v12 = vld [vmem:[#allocation8 + $0x28c] sm:$0xf] }
 0x250   :  { %v11198_v47 = vadd.f32 %v3336_v48, %v3308_v15  ;;  %v3282_v3 = vadd.f32 %v3281_v56, %v3253_v25  ;;  %3483 = vmatmul.bf16.gmra.mxu0 %v10890_v9  ;;  %v8075_v10 = vor.u32 %v9621_v12, %v8072_v35  ;;  %v8203_v15 = vor.u32 %v9653_v4, %v8200_v42  ;;  %v9717_v28 = vld [vmem:[#allocation8 + $0x58c] sm:$0xf]  ;;  %v8312_v35 = vld [vmem:[#allocation8 + $0x478] sm:$0xf0] }
 0x251   :  { %3512 = vmatmul.bf16.gmra.mxu1 %v10893_v13  ;;  %v8331_v48 = vor.u32 %v9685_v34, %v8328_v1  ;;  %3781 = vmatpush.bf16.msrb.mxu3 %v8475_v33  ;;  %v8459_v7 = vor.u32 %v9717_v28, %v8456_v6  ;;  %v9649_v46 = vld [vmem:[#allocation8 + $0x36c] sm:$0xf]  ;;  %v8059_v12 = vor.u32 %v9617_v57, %v8056_v60  ;;  %v8440_v34 = vld [vmem:[#allocation8 + $0x578] sm:$0xf0]  ;;  %v11207_v60 = vld [vmem:[#allocation11] sm:$0xf] }
 0x252   :  { %12839 = vst [vmem:[#allocation40_spill] sm:$0xff] %v11198_v47  ;;  %3541 = vmatmul.bf16.gmra.mxu2 %v12813_v18  ;;  %3695 = vmatpush.bf16.msrb.mxu0 %v8075_v10  ;;  %v9681_v11 = vld [vmem:[#allocation8 + $0x46c] sm:$0xf]  ;;  %v8187_v33 = vor.u32 %v9649_v46, %v8184_v16  ;;  %v8296_v57 = vld [vmem:[#allocation8 + $0x458] sm:$0xf0] }
 0x253   :  { %3570 = vmatmul.bf16.gmra.mxu3 %v12814_v40  ;;  %3724 = vmatpush.bf16.msrb.mxu1 %v8203_v15  ;;  %v8315_v42 = vor.u32 %v9681_v11, %v8312_v35  ;;  %v9613_v6 = vld [vmem:[#allocation8 + $0x24c] sm:$0xf] }
 0x254   :  { %3753 = vmatpush.bf16.msrb.mxu2 %v8331_v48  ;;  %v9677_v10 = vld [vmem:[#allocation8 + $0x44c] sm:$0xf] }
 0x255   :  { %v3310_v43 = vpop.f32.mrf.mxu2  ;;  %v3254_v52 = vpop.f32.mrf.mxu0  ;;  %3782 = vmatpush.bf16.msrb.mxu3 %v8459_v7  ;;  %v9709_v48 = vld [vmem:[#allocation8 + $0x54c] sm:$0xf]  ;;  %v8299_v7 = vor.u32 %v9677_v10, %v8296_v57 }
 0x256   :  { %v3311_v25 = vadd.f32 %v3310_v43, %v3282_v3  ;;  %v3339_v56 = vpop.f32.mrf.mxu3  ;;  %v3255_v63 = vadd.f32 %v3254_v52, %v11168_v32  ;;  %v3283_v22 = vpop.f32.mrf.mxu1  ;;  %v9713_v3 = vld [vmem:[#allocation8 + $0x56c] sm:$0xf]  ;;  %v8040_v43 = vld [vmem:[#allocation8 + $0x258] sm:$0xf0]  ;;  %3696 = vmatpush.bf16.msrb.mxu0 %v8059_v12 }
 0x257   :  { %v8443_v28 = vor.u32 %v9713_v3, %v8440_v34  ;;  %v9645_v32 = vld [vmem:[#allocation8 + $0x34c] sm:$0xf]  ;;  %v8168_v52 = vld [vmem:[#allocation8 + $0x358] sm:$0xf0]  ;;  %v8043_v15 = vor.u32 %v9613_v6, %v8040_v43  ;;  %3725 = vmatpush.bf16.msrb.mxu1 %v8187_v33 }
 0x258   :  { %v11205_v4 = vadd.f32 %v3339_v56, %v3311_v25  ;;  %v3284_v1 = vadd.f32 %v3283_v22, %v3255_v63  ;;  %v11210_v25 = vperm.slane %v11207_v60, 2  ;;  %v8424_v56 = vld [vmem:[#allocation8 + $0x558] sm:$0xf0]  ;;  %3754 = vmatpush.bf16.msrb.mxu2 %v8315_v42  ;;  %v8171_v46 = vor.u32 %v9645_v32, %v8168_v52  ;;  %v9609_v3 = vld [vmem:[#allocation8 + $0x22c] sm:$0xf] }
 0x259   :  { %3783 = vmatpush.bf16.msrb.mxu3 %v8443_v28  ;;  %v8427_v22 = vor.u32 %v9709_v48, %v8424_v56  ;;  %v8024_v34 = vld [vmem:[#allocation8 + $0x238] sm:$0xf0]  ;;  %v9673_v43 = vld [vmem:[#allocation8 + $0x42c] sm:$0xf] }
 0x25a   :  { %12840 = vst [vmem:[#allocation41_spill] sm:$0xff] %v11205_v4  ;;  %v9641_v4 = vld [vmem:[#allocation8 + $0x32c] sm:$0xf]  ;;  %3697 = vmatpush.bf16.msrb.mxu0 %v8043_v15  ;;  %v8027_v12 = vor.u32 %v9609_v3, %v8024_v34  ;;  %v8152_v6 = vld [vmem:[#allocation8 + $0x338] sm:$0xf0] }
 0x25b   :  { %v8280_v33 = vld [vmem:[#allocation8 + $0x438] sm:$0xf0]  ;;  %3726 = vmatpush.bf16.msrb.mxu1 %v8171_v46  ;;  %v8155_v28 = vor.u32 %v9641_v4, %v8152_v6  ;;  %v9605_v15 = vld [vmem:[#allocation8 + $0x20c] sm:$0xf] }
 0x25c   :  { %3755 = vmatpush.bf16.msrb.mxu2 %v8299_v7  ;;  %v8283_v32 = vor.u32 %v9673_v43, %v8280_v33  ;;  %v8408_v52 = vld [vmem:[#allocation8 + $0x538] sm:$0xf0]  ;;  %v9637_v56 = vld [vmem:[#allocation8 + $0x30c] sm:$0xf] }
 0x25d   :  { %v3312_v63 = vpop.f32.mrf.mxu2  ;;  %v3353_v35 = vpop.f32.mrf.mxu0  ;;  %3784 = vmatpush.bf16.msrb.mxu3 %v8427_v22  ;;  %v8008_v48 = vld [vmem:[#allocation8 + $0x218] sm:$0xf0]  ;;  %v9669_v7 = vld [vmem:[#allocation8 + $0x40c] sm:$0xf] }
 0x25e   :  { %v3313_v16 = vadd.f32 %v3312_v63, %v3284_v1  ;;  %v3341_v11 = vpop.f32.mrf.mxu3  ;;  %v3354_v24 = vadd.f32 %v3353_v35, %v11210_v25  ;;  %v3382_v47 = vpop.f32.mrf.mxu1  ;;  %v9705_v1 = vld [vmem:[#allocation8 + $0x52c] sm:$0xf]  ;;  %3698 = vmatpush.bf16.msrb.mxu0 %v8027_v12  ;;  %v8011_v46 = vor.u32 %v9605_v15, %v8008_v48  ;;  %v8136_v4 = vld [vmem:[#allocation8 + $0x318] sm:$0xf0] }
 0x25f   :  { %v8411_v57 = vor.u32 %v9705_v1, %v8408_v52  ;;  %v8264_v63 = vld [vmem:[#allocation8 + $0x418] sm:$0xf0]  ;;  %3727 = vmatpush.bf16.msrb.mxu1 %v8155_v28  ;;  %v9701_v22 = vld [vmem:[#allocation8 + $0x50c] sm:$0xf] }
 0x260   :  { %v11213_v42 = vadd.f32 %v3341_v11, %v3313_v16  ;;  %v3383_v10 = vadd.f32 %v3382_v47, %v3354_v24  ;;  %3584 = vmatmul.bf16.vlgmr.msra.gmra.mxu0 %v10919_v14  ;;  %3756 = vmatpush.bf16.msrb.mxu2 %v8283_v32  ;;  %v8139_v24 = vor.u32 %v9637_v56, %v8136_v4  ;;  %v8392_v16 = vld [vmem:[#allocation8 + $0x518] sm:$0xf0]  ;;  %v9761_v11 = vld [vmem:[#allocation8 + $0x6ec] sm:$0xf] }
 0x261   :  { %3613 = vmatmul.bf16.vlgmr.msra.gmra.mxu1 %v10922_v5  ;;  %v8267_v47 = vor.u32 %v9669_v7, %v8264_v63  ;;  %3785 = vmatpush.bf16.msrb.mxu3 %v8411_v57  ;;  %v8632_v3 = vld [vmem:[#allocation8 + $0x6f8] sm:$0xf0]  ;;  %v9793_v34 = vld [vmem:[#allocation8 + $0x7ec] sm:$0xf] }
 0x262   :  { %12841 = vst [vmem:[#allocation42_spill] sm:$0xff] %v11213_v42  ;;  %3642 = vmatmul.bf16.vlgmr.msra.gmra.mxu2 %v12818_v31  ;;  %v8395_v31 = vor.u32 %v9701_v22, %v8392_v16  ;;  %v8760_v6 = vld [vmem:[#allocation8 + $0x7f8] sm:$0xf0]  ;;  %v8635_v33 = vor.u32 %v9761_v11, %v8632_v3  ;;  %v9825_v52 = vld [vmem:[#allocation8 + $0x8ec] sm:$0xf]  ;;  %3699 = vmatpush.bf16.msrb.mxu0 %v8011_v46 }
 0x263   :  { %3671 = vmatmul.bf16.vlgmr.msra.gmra.mxu3 %v12819_v59  ;;  %v8763_v1 = vor.u32 %v9793_v34, %v8760_v6  ;;  %v8888_v15 = vld [vmem:[#allocation8 + $0x8f8] sm:$0xf0]  ;;  %v9857_v28 = vld [vmem:[#allocation8 + $0x9ec] sm:$0xf]  ;;  %3728 = vmatpush.bf16.msrb.mxu1 %v8139_v24 }
 0x264   :  { %v8891_v56 = vor.u32 %v9825_v52, %v8888_v15  ;;  %v9016_v4 = vld [vmem:[#allocation8 + $0x9f8] sm:$0xf0]  ;;  %v9757_v7 = vld [vmem:[#allocation8 + $0x6cc] sm:$0xf]  ;;  %3757 = vmatpush.bf16.msrb.mxu2 %v8267_v47 }
 0x265   :  { %v3411_v35 = vpop.f32.mrf.mxu2  ;;  %v3355_v12 = vpop.f32.mrf.mxu0  ;;  %v8616_v57 = vld [vmem:[#allocation8 + $0x6d8] sm:$0xf0]  ;;  %v9789_v22 = vld [vmem:[#allocation8 + $0x7cc] sm:$0xf]  ;;  %3786 = vmatpush.bf16.msrb.mxu3 %v8395_v31 }
 0x266   :  { %v3412_v43 = vadd.f32 %v3411_v35, %v3383_v10  ;;  %v3440_v59 = vpop.f32.mrf.mxu3  ;;  %v3356_v32 = vadd.f32 %v3355_v12, %v11210_v25  ;;  %v3384_v48 = vpop.f32.mrf.mxu1  ;;  %v9019_v10 = vor.u32 %v9857_v28, %v9016_v4  ;;  %v8744_v16 = vld [vmem:[#allocation8 + $0x7d8] sm:$0xf0]  ;;  %v9821_v11 = vld [vmem:[#allocation8 + $0x8cc] sm:$0xf]  ;;  %3808 = vmatpush.bf16.msra.mxu0 %v8635_v33  ;;  %v8619_v3 = vor.u32 %v9757_v7, %v8616_v57 }
 0x267   :  { %v8872_v34 = vld [vmem:[#allocation8 + $0x8d8] sm:$0xf0]  ;;  %v9853_v6 = vld [vmem:[#allocation8 + $0x9cc] sm:$0xf]  ;;  %3837 = vmatpush.bf16.msra.mxu1 %v8763_v1  ;;  %v8747_v46 = vor.u32 %v9789_v22, %v8744_v16 }
 0x268   :  { %v11220_v63 = vadd.f32 %v3440_v59, %v3412_v43  ;;  %v3385_v35 = vadd.f32 %v3384_v48, %v3356_v32  ;;  %v9000_v12 = vld [vmem:[#allocation8 + $0x9d8] sm:$0xf0]  ;;  %3866 = vmatpush.bf16.msra.mxu2 %v8891_v56  ;;  %v8875_v52 = vor.u32 %v9821_v11, %v8872_v34  ;;  %v9753_v59 = vld [vmem:[#allocation8 + $0x6ac] sm:$0xf] }
 0x269   :  { %3895 = vmatpush.bf16.msra.mxu3 %v9019_v10  ;;  %v9003_v43 = vor.u32 %v9853_v6, %v9000_v12  ;;  %v8600_v24 = vld [vmem:[#allocation8 + $0x6b8] sm:$0xf0]  ;;  %v9785_v47 = vld [vmem:[#allocation8 + $0x7ac] sm:$0xf] }
 0x26a   :  { %3809 = vmatpush.bf16.msra.mxu0 %v8619_v3  ;;  %v8728_v28 = vld [vmem:[#allocation8 + $0x7b8] sm:$0xf0]  ;;  %v9817_v4 = vld [vmem:[#allocation8 + $0x8ac] sm:$0xf]  ;;  %v8603_v10 = vor.u32 %v9753_v59, %v8600_v24 }
 0x26b   :  { %v8856_v32 = vld [vmem:[#allocation8 + $0x8b8] sm:$0xf0]  ;;  %3838 = vmatpush.bf16.msra.mxu1 %v8747_v46  ;;  %v9849_v7 = vld [vmem:[#allocation8 + $0x9ac] sm:$0xf]  ;;  %v8731_v16 = vor.u32 %v9785_v47, %v8728_v28 }
 0x26c   :  { %3867 = vmatpush.bf16.msra.mxu2 %v8875_v52  ;;  %v8984_v1 = vld [vmem:[#allocation8 + $0x9b8] sm:$0xf0]  ;;  %v8859_v11 = vor.u32 %v9817_v4, %v8856_v32  ;;  %v9749_v3 = vld [vmem:[#allocation8 + $0x68c] sm:$0xf] }
 0x26d   :  { %v3413_v15 = vpop.f32.mrf.mxu2  ;;  %v3358_v48 = vpop.f32.mrf.mxu0  ;;  %3896 = vmatpush.bf16.msra.mxu3 %v9003_v43  ;;  %v8584_v34 = vld [vmem:[#allocation8 + $0x698] sm:$0xf0]  ;;  %v9781_v6 = vld [vmem:[#allocation8 + $0x78c] sm:$0xf] }
 0x26e   :  { %v3414_v31 = vadd.f32 %v3413_v15, %v3385_v35  ;;  %v3442_v33 = vpop.f32.mrf.mxu3  ;;  %v3359_v56 = vadd.f32 %v3358_v48, %v11210_v25  ;;  %v3387_v57 = vpop.f32.mrf.mxu1  ;;  %v8987_v35 = vor.u32 %v9849_v7, %v8984_v1  ;;  %v8712_v46 = vld [vmem:[#allocation8 + $0x798] sm:$0xf0]  ;;  %v9813_v52 = vld [vmem:[#allocation8 + $0x88c] sm:$0xf]  ;;  %3810 = vmatpush.bf16.msra.mxu0 %v8603_v10  ;;  %v8587_v24 = vor.u32 %v9749_v3, %v8584_v34 }
 0x26f   :  { %v8840_v15 = vld [vmem:[#allocation8 + $0x898] sm:$0xf0]  ;;  %v9845_v43 = vld [vmem:[#allocation8 + $0x98c] sm:$0xf]  ;;  %3839 = vmatpush.bf16.msra.mxu1 %v8731_v16  ;;  %v8715_v47 = vor.u32 %v9781_v6, %v8712_v46 }
 0x270   :  { %v11223_v22 = vadd.f32 %v3442_v33, %v3414_v31  ;;  %v3388_v12 = vadd.f32 %v3387_v57, %v3359_v56  ;;  %3589 = vmatmul.bf16.gmra.mxu0 %v10934_v36  ;;  %v8968_v59 = vld [vmem:[#allocation8 + $0x998] sm:$0xf0]  ;;  %3868 = vmatpush.bf16.msra.mxu2 %v8859_v11  ;;  %v8843_v28 = vor.u32 %v9813_v52, %v8840_v15  ;;  %v9745_v4 = vld [vmem:[#allocation8 + $0x66c] sm:$0xf] }
 0x271   :  { %3618 = vmatmul.bf16.gmra.mxu1 %v10936_v0  ;;  %v8568_v32 = vld [vmem:[#allocation8 + $0x678] sm:$0xf0]  ;;  %v9777_v31 = vld [vmem:[#allocation8 + $0x76c] sm:$0xf]  ;;  %3897 = vmatpush.bf16.msra.mxu3 %v8987_v35  ;;  %v8971_v48 = vor.u32 %v9845_v43, %v8968_v59 }
 0x272   :  { %3647 = vmatmul.bf16.gmra.mxu2 %v12822_v2  ;;  %v8696_v7 = vld [vmem:[#allocation8 + $0x778] sm:$0xf0]  ;;  %v9809_v1 = vld [vmem:[#allocation8 + $0x86c] sm:$0xf]  ;;  %3811 = vmatpush.bf16.msra.mxu0 %v8587_v24  ;;  %v8571_v11 = vor.u32 %v9745_v4, %v8568_v32 }
 0x273   :  { %3676 = vmatmul.bf16.gmra.mxu3 %v12823_v55  ;;  %v8824_v56 = vld [vmem:[#allocation8 + $0x878] sm:$0xf0]  ;;  %3840 = vmatpush.bf16.msra.mxu1 %v8715_v47  ;;  %v8699_v34 = vor.u32 %v9777_v31, %v8696_v7  ;;  %v9741_v35 = vld [vmem:[#allocation8 + $0x64c] sm:$0xf] }
 0x274   :  { %v8952_v55 = vld [vmem:[#allocation8 + $0x978] sm:$0xf0]  ;;  %3869 = vmatpush.bf16.msra.mxu2 %v8843_v28  ;;  %v8827_v6 = vor.u32 %v9809_v1, %v8824_v56  ;;  %v9773_v52 = vld [vmem:[#allocation8 + $0x74c] sm:$0xf] }
 0x275   :  { %v3416_v33 = vpop.f32.mrf.mxu2  ;;  %v3360_v42 = vpop.f32.mrf.mxu0  ;;  %v8552_v46 = vld [vmem:[#allocation8 + $0x658] sm:$0xf0]  ;;  %3898 = vmatpush.bf16.msra.mxu3 %v8971_v48  ;;  %v9805_v59 = vld [vmem:[#allocation8 + $0x84c] sm:$0xf] }
 0x276   :  { %v3417_v2 = vadd.f32 %v3416_v33, %v3388_v12  ;;  %v3445_v57 = vpop.f32.mrf.mxu3  ;;  %v3361_v10 = vadd.f32 %v3360_v42, %v11210_v25  ;;  %v3389_v16 = vpop.f32.mrf.mxu1  ;;  %v8955_v12 = vor.u32 %v9841_v17, %v8952_v55  ;;  %v8680_v43 = vld [vmem:[#allocation8 + $0x758] sm:$0xf0]  ;;  %3812 = vmatpush.bf16.msra.mxu0 %v8571_v11  ;;  %v8555_v24 = vor.u32 %v9741_v35, %v8552_v46  ;;  %v9737_v28 = vld [vmem:[#allocation8 + $0x62c] sm:$0xf] }
 0x277   :  { %v8808_v33 = vld [vmem:[#allocation8 + $0x858] sm:$0xf0]  ;;  %3841 = vmatpush.bf16.msra.mxu1 %v8699_v34  ;;  %v8683_v4 = vor.u32 %v9773_v52, %v8680_v43  ;;  %v9769_v31 = vld [vmem:[#allocation8 + $0x72c] sm:$0xf] }
 0x278   :  { %v11230_v3 = vadd.f32 %v3445_v57, %v3417_v2  ;;  %v3390_v15 = vadd.f32 %v3389_v16, %v3361_v10  ;;  %v8936_v42 = vld [vmem:[#allocation8 + $0x958] sm:$0xf0]  ;;  %3870 = vmatpush.bf16.msra.mxu2 %v8827_v6  ;;  %v8811_v47 = vor.u32 %v9805_v59, %v8808_v33  ;;  %v9801_v48 = vld [vmem:[#allocation8 + $0x82c] sm:$0xf] }
 0x279   :  { %v8536_v32 = vld [vmem:[#allocation8 + $0x638] sm:$0xf0]  ;;  %3899 = vmatpush.bf16.msra.mxu3 %v8955_v12  ;;  %v8939_v1 = vor.u32 %v9837_v50, %v8936_v42  ;;  %v9833_v10 = vld [vmem:[#allocation8 + $0x92c] sm:$0xf] }
 0x27a   :  { %v8664_v56 = vld [vmem:[#allocation8 + $0x738] sm:$0xf0]  ;;  %3813 = vmatpush.bf16.msra.mxu0 %v8555_v24  ;;  %v8539_v6 = vor.u32 %v9737_v28, %v8536_v32  ;;  %v9733_v50 = vld [vmem:[#allocation8 + $0x60c] sm:$0xf] }
 0x27b   :  { %v8792_v17 = vld [vmem:[#allocation8 + $0x838] sm:$0xf0]  ;;  %3842 = vmatpush.bf16.msra.mxu1 %v8683_v4  ;;  %v8667_v46 = vor.u32 %v9769_v31, %v8664_v56  ;;  %v9765_v43 = vld [vmem:[#allocation8 + $0x70c] sm:$0xf] }
 0x27c   :  { %v8920_v16 = vld [vmem:[#allocation8 + $0x938] sm:$0xf0]  ;;  %3871 = vmatpush.bf16.msra.mxu2 %v8811_v47  ;;  %v8795_v52 = vor.u32 %v9801_v48, %v8792_v17  ;;  %v9797_v42 = vld [vmem:[#allocation8 + $0x80c] sm:$0xf] }
 0x27d   :  { %v3418_v7 = vpop.f32.mrf.mxu2  ;;  %v3363_v55 = vpop.f32.mrf.mxu0  ;;  %v8520_v12 = vld [vmem:[#allocation8 + $0x618] sm:$0xf0]  ;;  %3900 = vmatpush.bf16.msra.mxu3 %v8939_v1  ;;  %v9829_v24 = vld [vmem:[#allocation8 + $0x90c] sm:$0xf] }
 0x27e   :  { %v3419_v2 = vadd.f32 %v3418_v7, %v3390_v15  ;;  %v3447_v57 = vpop.f32.mrf.mxu3  ;;  %v3364_v11 = vadd.f32 %v3363_v55, %v11210_v25  ;;  %v3392_v34 = vpop.f32.mrf.mxu1  ;;  %v8923_v15 = vor.u32 %v9833_v10, %v8920_v16  ;;  %v8648_v33 = vld [vmem:[#allocation8 + $0x718] sm:$0xf0]  ;;  %3814 = vmatpush.bf16.msra.mxu0 %v8539_v6  ;;  %v8523_v47 = vor.u32 %v9733_v50, %v8520_v12 }
 0x27f   :  { %v8776_v7 = vld [vmem:[#allocation8 + $0x818] sm:$0xf0]  ;;  %3843 = vmatpush.bf16.msra.mxu1 %v8667_v46  ;;  %v8651_v28 = vor.u32 %v9765_v43, %v8648_v33 }
 0x280   :  { %v11233_v35 = vadd.f32 %v3447_v57, %v3419_v2  ;;  %v3393_v59 = vadd.f32 %v3392_v34, %v3364_v11  ;;  %3594 = vmatmul.bf16.gmra.mxu0 %v10948_v23  ;;  %v8904_v4 = vld [vmem:[#allocation8 + $0x918] sm:$0xf0]  ;;  %3872 = vmatpush.bf16.msra.mxu2 %v8795_v52  ;;  %v8779_v32 = vor.u32 %v9797_v42, %v8776_v7 }
 0x281   :  { %3623 = vmatmul.bf16.gmra.mxu1 %v12810_v53  ;;  %3901 = vmatpush.bf16.msra.mxu3 %v8923_v15  ;;  %v8907_v1 = vor.u32 %v9829_v24, %v8904_v4 }
 0x282   :  { %3652 = vmatmul.bf16.gmra.mxu2 %v12826_v8  ;;  %3815 = vmatpush.bf16.msra.mxu0 %v8523_v47 }
 0x283   :  { %3681 = vmatmul.bf16.gmra.mxu3 %v12827_v30  ;;  %3844 = vmatpush.bf16.msra.mxu1 %v8651_v28 }
 0x284   :  { %3873 = vmatpush.bf16.msra.mxu2 %v8779_v32 }
 0x285   :  { %v3421_v31 = vpop.f32.mrf.mxu2  ;;  %v3365_v17 = vpop.f32.mrf.mxu0  ;;  %3902 = vmatpush.bf16.msra.mxu3 %v8907_v1  ;;  %v3991_v1 = vsel %vm3948_vm0, %v11081_v20, 0 }
 0x286   :  { %v3422_v56 = vadd.f32 %v3421_v31, %v3393_v59  ;;  %v3450_v48 = vpop.f32.mrf.mxu3  ;;  %v3366_v2 = vadd.f32 %v3365_v17, %v11210_v25  ;;  %v3394_v57 = vpop.f32.mrf.mxu1 }
 0x288   :  { %v11240_v8 = vadd.f32 %v3450_v48, %v3422_v56  ;;  %v3395_v30 = vadd.f32 %v3394_v57, %v3366_v2  ;;  %v12843_v48 = vld [vmem:[#allocation82_spill] sm:$0xff] }
 0x28d   :  { %v3423_v55 = vpop.f32.mrf.mxu2  ;;  %v3368_v11 = vpop.f32.mrf.mxu0 }
 0x28e   :  { %v3424_v10 = vadd.f32 %v3423_v55, %v3395_v30  ;;  %v3452_v16 = vpop.f32.mrf.mxu3  ;;  %v3369_v34 = vadd.f32 %v3368_v11, %v11210_v25  ;;  %v3397_v6 = vpop.f32.mrf.mxu1 }
 0x290   :  { %v11243_v46 = vadd.f32 %v3452_v16, %v3424_v10  ;;  %v3398_v52 = vadd.f32 %v3397_v6, %v3369_v34  ;;  %3599 = vmatmul.bf16.gmra.mxu0 %v12815_v27 }
 0x291   :  { %3628 = vmatmul.bf16.gmra.mxu1 %v12816_v45 }
 0x292   :  { %3657 = vmatmul.bf16.gmra.mxu2 %v12828_v58 }
 0x293   :  { %3686 = vmatmul.bf16.gmra.mxu3 %v12829_v62 }
 0x295   :  { %v3426_v50 = vpop.f32.mrf.mxu2  ;;  %v3370_v59 = vpop.f32.mrf.mxu0 }
 0x296   :  { %v3427_v12 = vadd.f32 %v3426_v50, %v3398_v52  ;;  %v3455_v43 = vpop.f32.mrf.mxu3  ;;  %v3371_v15 = vadd.f32 %v3370_v59, %v11210_v25  ;;  %v3399_v33 = vpop.f32.mrf.mxu1  ;;  %v3953_v25 = vsel %vm3948_vm0, %v11055_v19, 0  ;;  %v12844_v50 = vld [vmem:[#allocation44_spill] sm:$0xff] }
 0x298   :  { %v11250_v42 = vadd.f32 %v3455_v43, %v3427_v12  ;;  %v3400_v7 = vadd.f32 %v3399_v33, %v3371_v15  ;;  %v12845_v12 = vld [vmem:[#allocation45_spill] sm:$0xff] }
 0x29d   :  { %v3428_v24 = vpop.f32.mrf.mxu2  ;;  %v3469_v28 = vpop.f32.mrf.mxu0 }
 0x29e   :  { %v3429_v4 = vadd.f32 %v3428_v24, %v3400_v7  ;;  %v3457_v47 = vpop.f32.mrf.mxu3  ;;  %v3470_v32 = vadd.f32 %v3469_v28, %v11220_v63  ;;  %v3498_v58 = vpop.f32.mrf.mxu1  ;;  %v12842_v63 = vld [vmem:[#allocation81_spill] sm:$0xff] }
 0x29f   :  { %v3972_v56 = vsel %vm3948_vm0, %v12842_v63, 0 }
 0x2a0   :  { %v11253_v31 = vadd.f32 %v3457_v47, %v3429_v4  ;;  %v3499_v62 = vadd.f32 %v3498_v58, %v3470_v32  ;;  %3700 = vmatmul.bf16.vlgmr.msrb.gmra.mxu0 %v12820_v39  ;;  %v4010_v39 = vsel %vm3948_vm0, %v12843_v48, 0 }
 0x2a1   :  { %3729 = vmatmul.bf16.vlgmr.msrb.gmra.mxu1 %v12821_v44  ;;  %3962 = vmatpush.bf16.xpose.msrb.mxu0 %v3953_v25 }
 0x2a2   :  { %3758 = vmatmul.bf16.vlgmr.msrb.gmra.mxu2 %v12830_v51  ;;  %3981 = vmatpush.bf16.xpose.msrb.mxu1 %v3972_v56 }
 0x2a3   :  { %3787 = vmatmul.bf16.vlgmr.msrb.gmra.mxu3 %v12831_v38  ;;  %4000 = vmatpush.bf16.xpose.msrb.mxu2 %v3991_v1 }
 0x2a4   :  { %4019 = vmatpush.bf16.xpose.msrb.mxu3 %v4010_v39 }
 0x2a5   :  { %v3527_v19 = vpop.f32.mrf.mxu2  ;;  %v3471_v2 = vpop.f32.mrf.mxu0 }
 0x2a6   :  { %v3528_v17 = vadd.f32 %v3527_v19, %v3499_v62  ;;  %v3556_v44 = vpop.f32.mrf.mxu3  ;;  %v3472_v51 = vadd.f32 %v3471_v2, %v11223_v22  ;;  %v3500_v57 = vpop.f32.mrf.mxu1 }
 0x2a8   :  { %v11268_v20 = vadd.f32 %v3556_v44, %v3528_v17  ;;  %v3501_v38 = vadd.f32 %v3500_v57, %v3472_v51  ;;  %v12846_v51 = vld [vmem:[#allocation50_spill] sm:$0xff]  ;;  %v12847_v57 = vld [vmem:[#allocation51_spill] sm:$0xff] }
 0x2ad   :  { %v3529_v30 = vpop.f32.mrf.mxu2  ;;  %v3474_v16 = vpop.f32.mrf.mxu0 }
 0x2ae   :  { %v3530_v55 = vadd.f32 %v3529_v30, %v3501_v38  ;;  %v3558_v10 = vpop.f32.mrf.mxu3  ;;  %v3475_v11 = vadd.f32 %v3474_v16, %v11230_v3  ;;  %v3503_v34 = vpop.f32.mrf.mxu1 }
 0x2b0   :  { %v11271_v6 = vadd.f32 %v3558_v10, %v3530_v55  ;;  %v3504_v52 = vadd.f32 %v3503_v34, %v3475_v11  ;;  %3705 = vmatmul.bf16.gmra.mxu0 %v12844_v50 }
 0x2b1   :  { %3734 = vmatmul.bf16.gmra.mxu1 %v12845_v12 }
 0x2b2   :  { %3763 = vmatmul.bf16.gmra.mxu2 %v12834_v29 }
 0x2b3   :  { %3792 = vmatmul.bf16.gmra.mxu3 %v12835_v41 }
 0x2b5   :  { %v3532_v22 = vpop.f32.mrf.mxu2  ;;  %v3476_v15 = vpop.f32.mrf.mxu0 }
 0x2b6   :  { %v3533_v43 = vadd.f32 %v3532_v22, %v3504_v52  ;;  %v3561_v59 = vpop.f32.mrf.mxu3  ;;  %v3477_v33 = vadd.f32 %v3476_v15, %v11233_v35  ;;  %v3505_v7 = vpop.f32.mrf.mxu1  ;;  %v12848_v52 = vld [vmem:[#allocation83_spill] sm:$0xff] }
 0x2b7   :  { %v11302_v50 = vpack.c.bf16 %v12848_v52, %v12848_v52 }
 0x2b8   :  { %v11278_v3 = vadd.f32 %v3561_v59, %v3533_v43  ;;  %v3506_v24 = vadd.f32 %v3505_v7, %v3477_v33  ;;  %v12850_v59 = vld [vmem:[#allocation84_spill] sm:$0xff]  ;;  %v12851_v33 = vld [vmem:[#allocation71_spill] sm:$0xff] }
 0x2b9   :  { %v11318_v7 = vpack.c.bf16 %v12851_v33, %v12851_v33 }
 0x2bd   :  { %v3534_v4 = vpop.f32.mrf.mxu2  ;;  %v3479_v32 = vpop.f32.mrf.mxu0 }
 0x2be   :  { %v3535_v47 = vadd.f32 %v3534_v4, %v3506_v24  ;;  %v3563_v28 = vpop.f32.mrf.mxu3  ;;  %v3480_v58 = vadd.f32 %v3479_v32, %v11240_v8  ;;  %v3508_v62 = vpop.f32.mrf.mxu1  ;;  %v12852_v4 = vld [vmem:[#allocation54_spill] sm:$0xff]  ;;  %v11328_v32 = vperm.slane %v11207_v60, 3 }
 0x2c0   :  { %v11281_v29 = vadd.f32 %v3563_v28, %v3535_v47  ;;  %v3509_v41 = vadd.f32 %v3508_v62, %v3480_v58  ;;  %3710 = vmatmul.bf16.gmra.mxu0 %v10795_v21  ;;  %v4029_v47 = vsel %vm3948_vm0, %v11302_v50, 0  ;;  %v12853_v28 = vld [vmem:[#allocation55_spill] sm:$0xff] }
 0x2c1   :  { %3739 = vmatmul.bf16.gmra.mxu1 %v10797_v26 }
 0x2c2   :  { %3768 = vmatmul.bf16.gmra.mxu2 %v10866_v37 }
 0x2c3   :  { %3797 = vmatmul.bf16.gmra.mxu3 %v10869_v49 }
 0x2c5   :  { %v3537_v35 = vpop.f32.mrf.mxu2  ;;  %v3481_v63 = vpop.f32.mrf.mxu0 }
 0x2c6   :  { %v3538_v25 = vadd.f32 %v3537_v35, %v3509_v41  ;;  %v3566_v1 = vpop.f32.mrf.mxu3  ;;  %v3482_v56 = vadd.f32 %v3481_v63, %v11243_v46  ;;  %v3510_v48 = vpop.f32.mrf.mxu1  ;;  %v4086_v41 = vsel %vm3948_vm0, %v11318_v7, 0 }
 0x2c8   :  { %v11288_v8 = vadd.f32 %v3566_v1, %v3538_v25  ;;  %v3511_v39 = vadd.f32 %v3510_v48, %v3482_v56 }
 0x2cd   :  { %v3539_v19 = vpop.f32.mrf.mxu2  ;;  %v3484_v21 = vpop.f32.mrf.mxu0 }
 0x2ce   :  { %v3540_v17 = vadd.f32 %v3539_v19, %v3511_v39  ;;  %v3568_v44 = vpop.f32.mrf.mxu3  ;;  %v3485_v26 = vadd.f32 %v3484_v21, %v11250_v42  ;;  %v3513_v2 = vpop.f32.mrf.mxu1  ;;  %v12855_v21 = vld [vmem:[#allocation62_spill] sm:$0xff] }
 0x2d0   :  { %v11291_v37 = vadd.f32 %v3568_v44, %v3540_v17  ;;  %v3514_v49 = vadd.f32 %v3513_v2, %v3485_v26  ;;  %3715 = vmatmul.bf16.gmra.mxu0 %v12846_v51  ;;  %v12854_v44 = vld [vmem:[#allocation61_spill] sm:$0xff] }
 0x2d1   :  { %3744 = vmatmul.bf16.gmra.mxu1 %v12847_v57 }
 0x2d2   :  { %3773 = vmatmul.bf16.gmra.mxu2 %v10890_v9 }
 0x2d3   :  { %3802 = vmatmul.bf16.gmra.mxu3 %v10893_v13  ;;  %v12849_v13 = vld [vmem:[#allocation78_spill] sm:$0xff] }
 0x2d4   :  { %v11308_v43 = vpack.c.bf16 %v12849_v13, %v12849_v13 }
 0x2d5   :  { %v3542_v46 = vpop.f32.mrf.mxu2  ;;  %v3486_v55 = vpop.f32.mrf.mxu0 }
 0x2d6   :  { %v3543_v38 = vadd.f32 %v3542_v46, %v3514_v49  ;;  %v3571_v30 = vpop.f32.mrf.mxu3  ;;  %v3487_v10 = vadd.f32 %v3486_v55, %v11253_v31  ;;  %v3515_v16 = vpop.f32.mrf.mxu1  ;;  %v11312_v31 = vpack.c.bf16 %v12850_v59, %v12850_v59  ;;  %v4048_v62 = vsel %vm3948_vm0, %v11308_v43, 0 }
 0x2d8   :  { %v11298_v42 = vadd.f32 %v3571_v30, %v3543_v38  ;;  %v3516_v11 = vadd.f32 %v3515_v16, %v3487_v10  ;;  %v4067_v58 = vsel %vm3948_vm0, %v11312_v31, 0 }
 0x2dd   :  { %v3544_v34 = vpop.f32.mrf.mxu2  ;;  %v11304_v9 = vpop.f32.mrf.mxu0 }
 0x2de   :  { %v3545_v12 = vadd.f32 %v3544_v34, %v3516_v11  ;;  %v3573_v22 = vpop.f32.mrf.mxu3  ;;  %v11314_v15 = vpop.f32.mrf.mxu1 }
 0x2e0   :  { %v11320_v24 = vadd.f32 %v3573_v22, %v3545_v12  ;;  %3816 = vmatmul.bf16.vlgmr.msra.gmra.mxu0 %v12852_v4 }
 0x2e1   :  { %3845 = vmatmul.bf16.vlgmr.msra.gmra.mxu1 %v12853_v28  ;;  %4038 = vmatpush.bf16.xpose.msra.mxu0 %v4029_v47 }
 0x2e2   :  { %3874 = vmatmul.bf16.vlgmr.msra.gmra.mxu2 %v10919_v14  ;;  %4057 = vmatpush.bf16.xpose.msra.mxu1 %v4048_v62 }
 0x2e3   :  { %3903 = vmatmul.bf16.vlgmr.msra.gmra.mxu3 %v10922_v5  ;;  %4076 = vmatpush.bf16.xpose.msra.mxu2 %v4067_v58 }
 0x2e4   :  { %4095 = vmatpush.bf16.xpose.msra.mxu3 %v4086_v41 }
 0x2e5   :  { %v3643_v35 = vpop.f32.mrf.mxu2  ;;  %v3587_v25 = vpop.f32.mrf.mxu0 }
 0x2e6   :  { %v3644_v14 = vadd.f32 %v3643_v35, %v11328_v32  ;;  %v3672_v60 = vpop.f32.mrf.mxu3  ;;  %v3616_v1 = vpop.f32.mrf.mxu1  ;;  %v3588_v28 = vadd.f32 %v3587_v25, %v11271_v6 }
 0x2e8   :  { %v11338_v63 = vadd.f32 %v3672_v60, %v3644_v14 }
 0x2ed   :  { %v3645_v56 = vpop.f32.mrf.mxu2  ;;  %v3590_v39 = vpop.f32.mrf.mxu0 }
 0x2ee   :  { %v3646_v5 = vadd.f32 %v3645_v56, %v11328_v32  ;;  %v3674_v48 = vpop.f32.mrf.mxu3  ;;  %v3619_v19 = vpop.f32.mrf.mxu1  ;;  %v3591_v58 = vadd.f32 %v3590_v39, %v11278_v3  ;;  %v12859_v56 = vld [vmem:[#allocation58_spill] sm:$0xff] }
 0x2ef   :  { %v12860_v39 = vld [vmem:[#allocation66_spill] sm:$0xff] }
 0x2f0   :  { %v11341_v17 = vadd.f32 %v3674_v48, %v3646_v5  ;;  %3821 = vmatmul.bf16.gmra.mxu0 %v12854_v44  ;;  %v3620_v41 = vadd.f32 %v3619_v19, %v3591_v58  ;;  %v11396_v5 = vpack.c.bf16 %v12859_v56, %v12859_v56  ;;  %v11402_v19 = vpack.c.bf16 %v12860_v39, %v12860_v39 }
 0x2f1   :  { %3850 = vmatmul.bf16.gmra.mxu1 %v12855_v21 }
 0x2f2   :  { %3879 = vmatmul.bf16.gmra.mxu2 %v10934_v36  ;;  %v11391_v25 = vpack.c.bf16 %v3620_v41, %v3620_v41  ;;  %v12865_v41 = vld [vmem:[#allocation76_spill] sm:$0xff] }
 0x2f3   :  { %3908 = vmatmul.bf16.gmra.mxu3 %v10936_v0 }
 0x2f5   :  { %v3648_v26 = vpop.f32.mrf.mxu2  ;;  %v3592_v51 = vpop.f32.mrf.mxu0 }
 0x2f6   :  { %v3649_v2 = vadd.f32 %v3648_v26, %v11328_v32  ;;  %v3677_v49 = vpop.f32.mrf.mxu3  ;;  %v3621_v57 = vpop.f32.mrf.mxu1  ;;  %v4241_v26 = vsel %vm4201_vm1, %v11391_v25, 0 }
 0x2f8   :  { %v11348_v46 = vadd.f32 %v3677_v49, %v3649_v2 }
 0x2fd   :  { %v3650_v38 = vpop.f32.mrf.mxu2  ;;  %v3595_v10 = vpop.f32.mrf.mxu0 }
 0x2fe   :  { %v3651_v30 = vadd.f32 %v3650_v38, %v11328_v32  ;;  %v3679_v55 = vpop.f32.mrf.mxu3  ;;  %v11351_v16 = vpop.f32.mrf.mxu1 }
 0x300   :  { %v11353_v11 = vadd.f32 %v3679_v55, %v3651_v30  ;;  %3826 = vmatmul.bf16.gmra.mxu0 %v10871_v61 }
 0x301   :  { %3855 = vmatmul.bf16.gmra.mxu1 %v10874_v54 }
 0x302   :  { %3884 = vmatmul.bf16.gmra.mxu2 %v10948_v23  ;;  %v3586_v23 = vadd.f32 %v11304_v9, %v11268_v20  ;;  %v12857_v20 = vld [vmem:[#allocation56_spill] sm:$0xff] }
 0x303   :  { %3913 = vmatmul.bf16.gmra.mxu3 %v12810_v53  ;;  %v11383_v9 = vpack.c.bf16 %v12857_v20, %v12857_v20 }
 0x305   :  { %v3653_v0 = vpop.f32.mrf.mxu2  ;;  %v3597_v52 = vpop.f32.mrf.mxu0 }
 0x306   :  { %v3654_v36 = vadd.f32 %v3653_v0, %v11328_v32  ;;  %v3682_v34 = vpop.f32.mrf.mxu3  ;;  %v3626_v12 = vpop.f32.mrf.mxu1  ;;  %v3598_v0 = vadd.f32 %v3597_v52, %v11291_v37  ;;  %v12862_v52 = vld [vmem:[#allocation68_spill] sm:$0xff] }
 0x308   :  { %v11360_v22 = vadd.f32 %v3682_v34, %v3654_v36 }
 0x30d   :  { %v11362_v13 = vpop.f32.mrf.mxu2  ;;  %v3600_v33 = vpop.f32.mrf.mxu0 }
 0x30e   :  { %v11364_v59 = vpop.f32.mrf.mxu3  ;;  %v3629_v61 = vpop.f32.mrf.mxu1  ;;  %v3601_v36 = vadd.f32 %v3600_v33, %v11298_v42  ;;  %v11439_v42 = vpack.c.bf16 %v12862_v52, %v12862_v52 }
 0x310   :  { %3831 = vmatmul.bf16.gmra.mxu0 %v12813_v18  ;;  %v3593_v18 = vadd.f32 %v3592_v51, %v11281_v29 }
 0x311   :  { %3860 = vmatmul.bf16.gmra.mxu1 %v12814_v40 }
 0x312   :  { %3889 = vmatmul.bf16.gmra.mxu2 %v12815_v27  ;;  %v3615_v27 = vadd.f32 %v11314_v15, %v3586_v23  ;;  %v3622_v35 = vadd.f32 %v3621_v57, %v3593_v18  ;;  %v3596_v57 = vadd.f32 %v3595_v10, %v11288_v8 }
 0x313   :  { %3918 = vmatmul.bf16.gmra.mxu3 %v12816_v45  ;;  %v3617_v45 = vadd.f32 %v3616_v1, %v3588_v28  ;;  %v3630_v28 = vadd.f32 %v3629_v61, %v3601_v36  ;;  %v12863_v61 = vld [vmem:[#allocation70_spill] sm:$0xff] }
 0x314   :  { %v11385_v60 = vpack.c.bf16 %v3615_v27, %v3615_v27  ;;  %v11398_v48 = vpack.c.bf16 %v3622_v35, %v3622_v35  ;;  %v11458_v35 = vpack.c.bf16 %v12865_v41, %v12865_v41 }
 0x315   :  { %v3658_v54 = vpop.f32.mrf.mxu2  ;;  %v3602_v47 = vpop.f32.mrf.mxu0  ;;  %v11389_v29 = vpack.c.bf16 %v3617_v45, %v3617_v45 }
 0x316   :  { %v3659_v53 = vadd.f32 %v3658_v54, %v11328_v32  ;;  %v3687_v4 = vpop.f32.mrf.mxu3  ;;  %v3631_v62 = vpop.f32.mrf.mxu1  ;;  %v4203_v21 = vsel %vm4201_vm1, %v11385_v60, 0  ;;  %v4260_v49 = vsel %vm4201_vm1, %v11398_v48, 0  ;;  %v3603_v54 = vadd.f32 %v3602_v47, %v11320_v24 }
 0x317   :  { %v4222_v2 = vsel %vm4201_vm1, %v11389_v29, 0  ;;  %v11443_v24 = vpack.c.bf16 %v3630_v28, %v3630_v28  ;;  %v11448_v47 = vpack.c.bf16 %v12863_v61, %v12863_v61 }
 0x318   :  { %v11376_v40 = vadd.f32 %v3687_v4, %v3659_v53  ;;  %v3625_v53 = vadd.f32 %v11351_v16, %v3596_v57  ;;  %v3627_v4 = vadd.f32 %v3626_v12, %v3598_v0  ;;  %v3632_v58 = vadd.f32 %v3631_v62, %v3603_v54  ;;  %v12864_v62 = vld [vmem:[#allocation74_spill] sm:$0xff] }
 0x319   :  { %v11452_v27 = vpack.c.bf16 %v12864_v62, %v12864_v62 }
 0x31a   :  { %v11433_v10 = vpack.c.bf16 %v3625_v53, %v3625_v53  ;;  %v11441_v33 = vpack.c.bf16 %v3627_v4, %v3627_v4  ;;  %v11454_v45 = vpack.c.bf16 %v3632_v58, %v3632_v58 }
 0x31d   :  { %v11379_v14 = vpop.f32.mrf.mxu2  ;;  %v3701_v3 = vpop.f32.mrf.mxu0 }
 0x31e   :  { %12856 = vst [vmem:[#allocation43_spill] sm:$0xff] %v11379_v14  ;;  %v11387_v6 = vpop.f32.mrf.mxu3  ;;  %v3702_v15 = vadd.f32 %v3701_v3, %v11338_v63  ;;  %v3730_v1 = vpop.f32.mrf.mxu1  ;;  %v12861_v63 = vld [vmem:[#allocation64_spill] sm:$0xff]  ;;  %v4317_v3 = vsel %vm4201_vm1, %v11443_v24, 0 }
 0x31f   :  { %12858 = vst [vmem:[#allocation46_spill] sm:$0xff] %v11387_v6 }
 0x320   :  { %v3731_v44 = vadd.f32 %v3730_v1, %v3702_v15  ;;  %9020 = vmatmul.msk.bf16.vlgmr.msrb.gmra.mxu0 %vm3948_vm0, %v11383_v9  ;;  %v4298_v15 = vsel %vm4201_vm1, %v11441_v33, 0  ;;  %v4336_v1 = vsel %vm4201_vm1, %v11454_v45, 0 }
 0x321   :  { %9021 = vmatmul.msk.bf16.vlgmr.msrb.gmra.mxu1 %vm3948_vm0, %v11396_v5  ;;  %4212 = vmatpush.bf16.msrb.mxu0 %v4203_v21 }
 0x322   :  { %9022 = vmatmul.msk.bf16.vlgmr.msrb.gmra.mxu2 %vm3948_vm0, %v12861_v63  ;;  %4231 = vmatpush.bf16.msrb.mxu1 %v4222_v2 }
 0x323   :  { %9023 = vmatmul.msk.bf16.vlgmr.msrb.gmra.mxu3 %vm3948_vm0, %v11402_v19  ;;  %4250 = vmatpush.bf16.msrb.mxu2 %v4241_v26 }
 0x324   :  { %4269 = vmatpush.bf16.msrb.mxu3 %v4260_v49 }
 0x325   :  { %v3759_v51 = vpop.f32.mrf.mxu2  ;;  %v11421_v55 = vpop.f32.mrf.mxu0 }
 0x326   :  { %v3760_v38 = vadd.f32 %v3759_v51, %v3731_v44  ;;  %v3788_v30 = vpop.f32.mrf.mxu3  ;;  %v11425_v34 = vpop.f32.mrf.mxu1 }
 0x328   :  { %v11428_v23 = vadd.f32 %v3788_v30, %v3760_v38 }
 0x32d   :  { %v11431_v8 = vpop.f32.mrf.mxu2  ;;  %v3706_v37 = vpop.f32.mrf.mxu0 }
 0x32e   :  { %v11435_v18 = vpop.f32.mrf.mxu3  ;;  %v3707_v16 = vadd.f32 %v3706_v37, %v11348_v46  ;;  %v3735_v12 = vpop.f32.mrf.mxu1  ;;  %v4279_v46 = vsel %vm4201_vm1, %v11433_v10, 0 }
 0x330   :  { %v3736_v20 = vadd.f32 %v3735_v12, %v3707_v16  ;;  %9024 = vmatmul.msk.bf16.vlgmr.msra.gmra.mxu0 %vm3948_vm0, %v11439_v42 }
 0x331   :  { %9025 = vmatmul.msk.bf16.vlgmr.msra.gmra.mxu1 %vm3948_vm0, %v11448_v47  ;;  %4288 = vmatpush.bf16.msra.mxu0 %v4279_v46 }
 0x332   :  { %9026 = vmatmul.msk.bf16.vlgmr.msra.gmra.mxu2 %vm3948_vm0, %v11452_v27  ;;  %4307 = vmatpush.bf16.msra.mxu1 %v4298_v15 }
 0x333   :  { %9027 = vmatmul.msk.bf16.vlgmr.msra.gmra.mxu3 %vm3948_vm0, %v11458_v35  ;;  %4326 = vmatpush.bf16.msra.mxu2 %v4317_v3 }
 0x334   :  { %4345 = vmatpush.bf16.msra.mxu3 %v4336_v1 }
 0x335   :  { %v3764_v56 = vpop.f32.mrf.mxu2  ;;  %v11476_v21 = vpop.f32.mrf.mxu0 }
 0x336   :  { %v3765_v39 = vadd.f32 %v3764_v56, %v3736_v20  ;;  %v3793_v44 = vpop.f32.mrf.mxu3  ;;  %v11478_v63 = vpop.f32.mrf.mxu1 }
 0x338   :  { %v3794_v26 = vadd.f32 %v3793_v44, %v3765_v39 }
 0x33d   :  { %v11480_v2 = vpop.f32.mrf.mxu2  ;;  %v3711_v51 = vpop.f32.mrf.mxu0 }
 0x33e   :  { %12866 = vst [vmem:[#allocation47_spill] sm:$0xff] %v11480_v2  ;;  %v11482_v49 = vpop.f32.mrf.mxu3  ;;  %v3712_v57 = vadd.f32 %v3711_v51, %v11360_v22  ;;  %v3740_v38 = vpop.f32.mrf.mxu1 }
 0x33f   :  { %12867 = vst [vmem:[#allocation48_spill] sm:$0xff] %v11482_v49 }
 0x340   :  { %v3741_v30 = vadd.f32 %v3740_v38, %v3712_v57 }
 0x345   :  { %v3769_v0 = vpop.f32.mrf.mxu2  ;;  %v11485_v53 = vpop.f32.mrf.mxu0 }
 0x346   :  { %v3770_v36 = vadd.f32 %v3769_v0, %v3741_v30  ;;  %v3798_v54 = vpop.f32.mrf.mxu3  ;;  %v11487_v4 = vpop.f32.mrf.mxu1 }
 0x348   :  { %v3799_v28 = vadd.f32 %v3798_v54, %v3770_v36 }
 0x34d   :  { %v11489_v58 = vpop.f32.mrf.mxu2  ;;  %v3716_v52 = vpop.f32.mrf.mxu0 }
 0x34e   :  { %v11491_v37 = vpop.f32.mrf.mxu3  ;;  %v3717_v16 = vadd.f32 %v3716_v52, %v11376_v40  ;;  %v3745_v12 = vpop.f32.mrf.mxu1 }
 0x34f   :  { %12868 = vst [vmem:[#allocation49_spill] sm:$0xff] %v11491_v37 }
 0x350   :  { %v3746_v61 = vadd.f32 %v3745_v12, %v3717_v16 }
 0x355   :  { %v3774_v22 = vpop.f32.mrf.mxu2  ;;  %v11494_v20 = vpop.f32.mrf.mxu0 }
 0x356   :  { %v3775_v62 = vadd.f32 %v3774_v22, %v3746_v61  ;;  %v3803_v41 = vpop.f32.mrf.mxu3  ;;  %12869 = vst [vmem:[#allocation52_spill] sm:$0xff] %v11494_v20  ;;  %v11496_v46 = vpop.f32.mrf.mxu1 }
 0x357   :  { %12870 = vst [vmem:[#allocation53_spill] sm:$0xff] %v11496_v46 }
 0x358   :  { %v3804_v3 = vadd.f32 %v3803_v41, %v3775_v62 }
 0x35d   :  { %v11498_v15 = vpop.f32.mrf.mxu2  ;;  %v3817_v56 = vpop.f32.mrf.mxu0 }
 0x35e   :  { %12871 = vst [vmem:[#allocation59_spill] sm:$0xff] %v11498_v15  ;;  %v11500_v1 = vpop.f32.mrf.mxu3  ;;  %v3818_v39 = vadd.f32 %v3817_v56, %v11428_v23  ;;  %v3846_v44 = vpop.f32.mrf.mxu1 }
 0x35f   :  { %12872 = vst [vmem:[#allocation60_spill] sm:$0xff] %v11500_v1 }
 0x360   :  { %v3847_v51 = vadd.f32 %v3846_v44, %v3818_v39 }
 0x365   :  { %v3875_v40 = vpop.f32.mrf.mxu2  ;;  %v11503_v30 = vpop.f32.mrf.mxu0 }
 0x366   :  { %v3876_v57 = vadd.f32 %v3875_v40, %v3847_v51  ;;  %v3904_v38 = vpop.f32.mrf.mxu3  ;;  %v11505_v0 = vpop.f32.mrf.mxu1 }
 0x368   :  { %v11507_v36 = vadd.f32 %v3904_v38, %v3876_v57 }
 0x36d   :  { %v11509_v54 = vpop.f32.mrf.mxu2  ;;  %v3822_v16 = vpop.f32.mrf.mxu0 }
 0x36e   :  { %v11511_v52 = vpop.f32.mrf.mxu3  ;;  %v3823_v12 = vadd.f32 %v3822_v16, %v3794_v26  ;;  %v3851_v61 = vpop.f32.mrf.mxu1 }
 0x370   :  { %v3852_v22 = vadd.f32 %v3851_v61, %v3823_v12 }
 0x375   :  { %v3880_v23 = vpop.f32.mrf.mxu2  ;;  %v11513_v56 = vpop.f32.mrf.mxu0 }
 0x376   :  { %v3881_v62 = vadd.f32 %v3880_v23, %v3852_v22  ;;  %v3909_v41 = vpop.f32.mrf.mxu3  ;;  %12873 = vst [vmem:[#allocation81_spill] sm:$0xff] %v11513_v56  ;;  %v11515_v39 = vpop.f32.mrf.mxu1 }
 0x377   :  { %12874 = vst [vmem:[#allocation82_spill] sm:$0xff] %v11515_v39 }
 0x378   :  { %v11517_v44 = vadd.f32 %v3909_v41, %v3881_v62 }
 0x37a   :  { %12875 = vst [vmem:[#allocation44_spill] sm:$0xff] %v11517_v44 }
 0x37d   :  { %v11519_v51 = vpop.f32.mrf.mxu2  ;;  %v3827_v57 = vpop.f32.mrf.mxu0 }
 0x37e   :  { %12876 = vst [vmem:[#allocation45_spill] sm:$0xff] %v11519_v51  ;;  %v11521_v40 = vpop.f32.mrf.mxu3  ;;  %v3828_v38 = vadd.f32 %v3827_v57, %v3799_v28  ;;  %v3856_v1 = vpop.f32.mrf.mxu1 }
 0x37f   :  { %12877 = vst [vmem:[#allocation50_spill] sm:$0xff] %v11521_v40 }
 0x380   :  { %v3857_v15 = vadd.f32 %v3856_v1, %v3828_v38 }
 0x385   :  { %v3885_v26 = vpop.f32.mrf.mxu2  ;;  %v11523_v61 = vpop.f32.mrf.mxu0 }
 0x386   :  { %v3886_v16 = vadd.f32 %v3885_v26, %v3857_v15  ;;  %v3914_v12 = vpop.f32.mrf.mxu3  ;;  %12878 = vst [vmem:[#allocation51_spill] sm:$0xff] %v11523_v61  ;;  %v11525_v22 = vpop.f32.mrf.mxu1 }
 0x387   :  { %12879 = vst [vmem:[#allocation83_spill] sm:$0xff] %v11525_v22  ;;  %v11563_v22 = vpop.permute.xlu0 %4359 }
 0x388   :  { %v11527_v23 = vadd.f32 %v3914_v12, %v3886_v16 }
 0x38d   :  { %v11529_v46 = vpop.f32.mrf.mxu2  ;;  %v3832_v41 = vpop.f32.mrf.mxu0 }
 0x38e   :  { %12880 = vst [vmem:[#allocation78_spill] sm:$0xff] %v11529_v46  ;;  %v11531_v62 = vpop.f32.mrf.mxu3  ;;  %v3833_v44 = vadd.f32 %v3832_v41, %v3804_v3  ;;  %v3861_v40 = vpop.f32.mrf.mxu1 }
 0x38f   :  { %12881 = vst [vmem:[#allocation84_spill] sm:$0xff] %v11531_v62  ;;  %v11559_v46 = vpop.permute.xlu1 %4412 }
 0x390   :  { %v3862_v51 = vadd.f32 %v3861_v40, %v3833_v44 }
 0x395   :  { %v3890_v28 = vpop.f32.mrf.mxu2  ;;  %v11533_v38 = vpop.f32.mrf.mxu0 }
 0x396   :  { %v3891_v57 = vadd.f32 %v3890_v28, %v3862_v51  ;;  %v3919_v1 = vpop.f32.mrf.mxu3  ;;  %12882 = vst [vmem:[#allocation71_spill] sm:$0xff] %v11533_v38  ;;  %v11535_v15 = vpop.f32.mrf.mxu1 }
 0x397   :  { %12883 = vst [vmem:[#allocation54_spill] sm:$0xff] %v11535_v15  ;;  %v11561_v56 = vpop.permute.xlu1 %4417 }
 0x398   :  { %v11537_v26 = vadd.f32 %v3919_v1, %v3891_v57 }
 0x39a   :  { %12884 = vst [vmem:[#allocation55_spill] sm:$0xff] %v11537_v26 }
 0x39d   :  { %v11539_v16 = vpop.f32.mrf.mxu2  ;;  %v3964_v39 = vpop.f32.mrf.mxu0 }
 0x39e   :  { %12885 = vst [vmem:[#allocation61_spill] sm:$0xff] %v11539_v16  ;;  %v11541_v12 = vpop.f32.mrf.mxu3  ;;  %v3983_v62 = vpop.f32.mrf.mxu1  ;;  %v4102_v3 = vsel %vm4101_vm2, %v3964_v39, -inf }
 0x39f   :  { %12886 = vst [vmem:[#allocation62_spill] sm:$0xff] %v11541_v12  ;;  %4103 = vmax.xlane.f32.xlu1 %v4102_v3  ;;  %v4105_v57 = vsel %vm4101_vm2, %v3983_v62, -inf }
 0x3a5   :  { %v4002_v44 = vpop.f32.mrf.mxu2  ;;  %v3966_v41 = vpop.f32.mrf.mxu0 }
 0x3a6   :  { %v4021_v40 = vpop.f32.mrf.mxu3  ;;  %v4108_v51 = vsel %vm4101_vm2, %v4002_v44, -inf  ;;  %v3985_v28 = vpop.f32.mrf.mxu1 }
 0x3a7   :  { %4109 = vmax.xlane.f32.xlu0 %v4108_v51  ;;  %4106 = vmax.xlane.f32.xlu1 %v4105_v57  ;;  %v4111_v16 = vsel %vm4101_vm2, %v4021_v40, -inf }
 0x3ad   :  { %v4004_v1 = vpop.f32.mrf.mxu2  ;;  %v11547_v12 = vpop.f32.mrf.mxu0 }
 0x3ae   :  { %v4023_v26 = vpop.f32.mrf.mxu3  ;;  %v4059_v15 = vpop.f32.mrf.mxu1  ;;  %v4114_v41 = vsel %vm4101_vm2, %v11547_v12, -inf }
 0x3af   :  { %4112 = vmax.xlane.f32.xlu0 %v4111_v16  ;;  %v4117_v3 = vsel %vm4101_vm2, %v4059_v15, -inf }
 0x3b0   :  { %4118 = vmax.xlane.f32.xlu1 %v4117_v3  ;;  %v4439_v3 = vunpack.c.l.b16 %v11402_v19 }
 0x3b2   :  { %v4440_v6 = vpack.c.b16 %v4439_v3, %v4439_v3 }
 0x3b5   :  { %v4078_v38 = vpop.f32.mrf.mxu2  ;;  %v4042_v28 = vpop.f32.mrf.mxu0 }
 0x3b6   :  { %v11550_v20 = vpop.f32.mrf.mxu3  ;;  %v4120_v51 = vsel %vm4101_vm2, %v4078_v38, -inf  ;;  %v4061_v26 = vpop.f32.mrf.mxu1 }
 0x3b7   :  { %4121 = vmax.xlane.f32.xlu2 %v4120_v51  ;;  %4115 = vmax.xlane.f32.xlu0 %v4114_v41  ;;  %v4123_v16 = vsel %vm4101_vm2, %v11550_v20, -inf  ;;  %v11565_v26 = vpop.permute.xlu2 %4388 }
 0x3bd   :  { %v4080_v57 = vpop.f32.mrf.mxu2 }
 0x3be   :  { %v4099_v1 = vpop.f32.mrf.mxu3 }
 0x3bf   :  { %4124 = vmax.xlane.f32.xlu2 %v4123_v16  ;;  %v11571_v14 = vpop.permute.xlu2 %4446 }
 0x3cb   :  { %4441 = vrot.lane.b32.xlu0 %v4440_v6, %s10623_s12 }
 0x412   :  { %v4104_v51 = vpop.xlane.xlu1 %4103 }
 0x413   :  { %v4126_v28 = vsub.f32 %v3964_v39, %v4104_v51 }
 0x415   :  { %v4134_v41 = vmul.f32 1.442695, %v4126_v28 }
 0x417   :  { %10020 = vpow2.f32 %v4134_v41 }
 0x41a   :  { %v4110_v57 = vpop.xlane.xlu0 %4109  ;;  %v4107_v1 = vpop.xlane.xlu1 %4106 }
 0x41b   :  { %v4127_v16 = vsub.f32 %v3983_v62, %v4107_v1  ;;  %v4128_v19 = vsub.f32 %v4002_v44, %v4110_v57 }
 0x41d   :  { %v11567_v49 = vpop.eup %10020  ;;  %v4136_v3 = vmul.f32 1.442695, %v4127_v16  ;;  %v4138_v61 = vmul.f32 1.442695, %v4128_v19 }
 0x41e   :  { %v4150_v6 = vsel %vm4101_vm2, %v11567_v49, 0.0 }
 0x41f   :  { %10022 = vpow2.f32 %v4136_v3  ;;  %4151 = vadd.xlane.f32.xlu1 %v4150_v6 }
 0x420   :  { %10024 = vpow2.f32 %v4138_v61 }
 0x422   :  { %v4113_v39 = vpop.xlane.xlu0 %4112 }
 0x423   :  { %v4129_v51 = vsub.f32 %v4021_v40, %v4113_v39  ;;  %v4119_v28 = vpop.xlane.xlu1 %4118 }
 0x424   :  { %v4131_v2 = vsub.f32 %v4059_v15, %v4119_v28  ;;  %v4352_v28 = vunpack.c.l.b16 %v11383_v9  ;;  %v4468_v9 = vunpack.c.l.b16 %v11439_v42  ;;  %v4704_v42 = vunpack.c.l.b16 %v11389_v29 }
 0x425   :  { %v4140_v41 = vmul.f32 1.442695, %v4129_v51  ;;  %v11573_v37 = vpop.eup %10022 }
 0x426   :  { %v4153_v62 = vsel %vm4101_vm2, %v11573_v37, 0.0  ;;  %v4144_v44 = vmul.f32 1.442695, %v4131_v2  ;;  %v11577_v1 = vpop.eup %10024  ;;  %v4381_v2 = vunpack.c.l.b16 %v11396_v5  ;;  %v4531_v5 = vunpack.c.l.b16 %v11312_v31 }
 0x427   :  { %10026 = vpow2.f32 %v4140_v41  ;;  %4154 = vadd.xlane.f32.xlu2 %v4153_v62  ;;  %v4156_v61 = vsel %vm4101_vm2, %v11577_v1, 0.0  ;;  %v4353_v41 = vpack.c.b16 %v4352_v28, %v4352_v28 }
 0x428   :  { %10028 = vpow2.f32 %v4144_v44  ;;  %v4382_v39 = vpack.c.b16 %v4381_v2, %v4381_v2  ;;  %v4532_v44 = vpack.c.b16 %v4531_v5, %v4531_v5  ;;  %v4473_v5 = vunpack.c.l.b16 %v11302_v50 }
 0x429   :  { %v4497_v50 = vunpack.c.l.b16 %v11448_v47 }
 0x42a   :  { %v4122_v57 = vpop.xlane.xlu2 %4121 }
 0x42b   :  { %v4132_v19 = vsub.f32 %v4078_v38, %v4122_v57 }
 0x42d   :  { %v11579_v16 = vpop.eup %10026  ;;  %v4146_v15 = vmul.f32 1.442695, %v4132_v19  ;;  %v4502_v19 = vunpack.c.l.b16 %v11308_v43  ;;  %v4752_v43 = vunpack.c.l.b16 %v11398_v48  ;;  %v4555_v48 = vunpack.c.l.b16 %v11458_v35 }
 0x42e   :  { %v4159_v40 = vsel %vm4101_vm2, %v11579_v16, 0.0  ;;  %v11585_v3 = vpop.eup %10028 }
 0x42f   :  { %4160 = vadd.xlane.f32.xlu0 %v4159_v40  ;;  %4157 = vadd.xlane.f32.xlu2 %v4156_v61  ;;  %10030 = vpow2.f32 %v4146_v15  ;;  %v4165_v6 = vsel %vm4101_vm2, %v11585_v3, 0.0  ;;  %v4503_v61 = vpack.c.b16 %v4502_v19, %v4502_v19  ;;  %v4116_v15 = vpop.xlane.xlu0 %4115  ;;  %v4526_v19 = vunpack.c.l.b16 %v11452_v27 }
 0x430   :  { %v4130_v31 = vsub.f32 %v11547_v12, %v4116_v15  ;;  %v4498_v15 = vpack.c.b16 %v4497_v50, %v4497_v50  ;;  %v4365_v27 = vsel %vm3948_vm0, %v11563_v22, 0 }
 0x432   :  { %v4125_v62 = vpop.xlane.xlu2 %4124 }
 0x433   :  { %v4133_v57 = vsub.f32 %v11550_v20, %v4125_v62  ;;  %v4474_v62 = vpack.c.b16 %v4473_v5, %v4473_v5 }
 0x435   :  { %v11591_v38 = vpop.eup %10030  ;;  %v4148_v40 = vmul.f32 1.442695, %v4133_v57  ;;  %v4560_v57 = vunpack.c.l.b16 %v11318_v7 }
 0x436   :  { %v4168_v51 = vsel %vm4101_vm2, %v11591_v38, 0.0 }
 0x437   :  { %4166 = vadd.xlane.f32.xlu0 %v4165_v6  ;;  %10032 = vpow2.f32 %v4148_v40  ;;  %v4469_v6 = vpack.c.b16 %v4468_v9, %v4468_v9  ;;  %v4561_v29 = vpack.c.b16 %v4560_v57, %v4560_v57  ;;  %v4527_v40 = vpack.c.b16 %v4526_v19, %v4526_v19 }
 0x438   :  { %4383 = vrot.lane.b32.xlu1 %v4382_v39, %s10623_s12  ;;  %v4142_v39 = vmul.f32 1.442695, %v4130_v31 }
 0x43a   :  { %10034 = vpow2.f32 %v4142_v39 }
 0x43d   :  { %v11603_v2 = vpop.eup %10032  ;;  %v11627_v9 = vpop.permute.xlu0 %4441 }
 0x43e   :  { %v4171_v20 = vsel %vm4101_vm2, %v11603_v2, 0.0 }
 0x43f   :  { %4169 = vadd.xlane.f32.xlu0 %v4168_v51  ;;  %v4753_v51 = vpack.c.b16 %v4752_v43, %v4752_v43 }
 0x440   :  { %v11611_v28 = vpop.eup %10034 }
 0x441   :  { %v4162_v12 = vsel %vm4101_vm2, %v11611_v28, 0.0 }
 0x447   :  { %4354 = vrot.lane.b32.xlu2 %v4353_v41, %s10623_s12  ;;  %v4705_v41 = vpack.c.b16 %v4704_v42, %v4704_v42 }
 0x453   :  { %4533 = vrot.lane.b32.xlu0 %v4532_v44, %s10623_s12  ;;  %v4556_v44 = vpack.c.b16 %v4555_v48, %v4555_v48  ;;  %v4452_v48 = vsel %vm3948_vm0, %v11571_v14, 0 }
 0x45b   :  { %4504 = vrot.lane.b32.xlu0 %v4503_v61, %s10623_s12 }
 0x462   :  { %4172 = vadd.xlane.f32.xlu1 %v4171_v20 }
 0x463   :  { %4470 = vrot.lane.b32.xlu0 %v4469_v6, %s10623_s12 }
 0x46b   :  { %4754 = vrot.lane.b32.xlu0 %v4753_v51, %s10623_s12 }
 0x470   :  { %4163 = vadd.xlane.f32.xlu2 %v4162_v12 }
 0x473   :  { %4706 = vrot.lane.b32.xlu0 %v4705_v41, %s10623_s12 }
 0x47b   :  { %4475 = vrot.lane.b32.xlu1 %v4474_v62, %s10623_s12 }
 0x483   :  { %4557 = vrot.lane.b32.xlu1 %v4556_v44, %s10623_s12 }
 0x488   :  { %4562 = vrot.lane.b32.xlu2 %v4561_v29, %s10623_s12 }
 0x490   :  { %4528 = vrot.lane.b32.xlu2 %v4527_v40, %s10623_s12 }
 0x492   :  { %v4152_v61 = vpop.xlane.xlu1 %4151 }
 0x493   :  { %10036 = vrcp.f32 %v4152_v61 }
 0x498   :  { %4499 = vrot.lane.b32.xlu2 %v4498_v15, %s10623_s12 }
 0x499   :  { %v10037_v35 = vpop.eup %10036 }
 0x49a   :  { %v4182_v7 = vmul.f32 %v10037_v35, %v11567_v49  ;;  %v4155_v31 = vpop.xlane.xlu2 %4154  ;;  %v4394_v49 = vsel %vm3948_vm0, %v11565_v26, 0  ;;  %v4423_v26 = vsel %vm3948_vm0, %v11561_v56, 0 }
 0x49b   :  { %10038 = vrcp.f32 %v4155_v31 }
 0x49c   :  { %v4190_v6 = vpack.c.bf16 %v4182_v7, %v4182_v7 }
 0x49e   :  { %9028 = vmatmul.msk.bf16.vlgmr.msrb.gmra.mxu0 %vm4101_vm2, %v4190_v6 }
 0x49f   :  { %4374 = vmatpush.bf16.xpose.msrb.mxu0 %v4365_v27 }
 0x4a1   :  { %v10039_v47 = vpop.eup %10038 }
 0x4a2   :  { %v4161_v20 = vpop.xlane.xlu0 %4160  ;;  %v4183_v39 = vmul.f32 %v10039_v47, %v11573_v37  ;;  %v4158_v43 = vpop.xlane.xlu2 %4157 }
 0x4a3   :  { %10040 = vrcp.f32 %v4161_v20 }
 0x4a4   :  { %10042 = vrcp.f32 %v4158_v43  ;;  %v4191_v51 = vpack.c.bf16 %v4183_v39, %v4183_v39 }
 0x4a6   :  { %9029 = vmatmul.msk.bf16.vlgmr.msrb.gmra.mxu1 %vm4101_vm2, %v4191_v51 }
 0x4a7   :  { %4403 = vmatpush.bf16.xpose.msrb.mxu1 %v4394_v49 }
 0x4a9   :  { %v10041_v42 = vpop.eup %10040 }
 0x4aa   :  { %v10043_v12 = vpop.eup %10042  ;;  %v4185_v22 = vmul.f32 %v10041_v42, %v11579_v16  ;;  %v4167_v41 = vpop.xlane.xlu0 %4166 }
 0x4ab   :  { %v4184_v5 = vmul.f32 %v10043_v12, %v11577_v1  ;;  %10044 = vrcp.f32 %v4167_v41  ;;  %v4384_v56 = vpop.permute.xlu1 %4383 }
 0x4ac   :  { %v4193_v62 = vpack.c.bf16 %v4185_v22, %v4185_v22 }
 0x4ad   :  { %v4192_v37 = vpack.c.bf16 %v4184_v5, %v4184_v5 }
 0x4ae   :  { %9031 = vmatmul.msk.bf16.vlgmr.msrb.gmra.mxu3 %vm4101_vm2, %v4193_v62 }
 0x4af   :  { %4461 = vmatpush.bf16.xpose.msrb.mxu3 %v4452_v48  ;;  %9030 = vmatmul.msk.bf16.vlgmr.msrb.gmra.mxu2 %vm4101_vm2, %v4192_v37 }
 0x4b0   :  { %4432 = vmatpush.bf16.xpose.msrb.mxu2 %v4423_v26 }
 0x4b1   :  { %v10045_v44 = vpop.eup %10044 }
 0x4b2   :  { %v4187_v16 = vmul.f32 %v10045_v44, %v11585_v3  ;;  %v4170_v57 = vpop.xlane.xlu0 %4169 }
 0x4b3   :  { %10046 = vrcp.f32 %v4170_v57 }
 0x4b4   :  { %v4195_v1 = vpack.c.bf16 %v4187_v16, %v4187_v16 }
 0x4b6   :  { %9033 = vmatmul.msk.bf16.vlgmr.msra.gmra.mxu1 %vm4101_vm2, %v4195_v1 }
 0x4b9   :  { %v10047_v29 = vpop.eup %10046 }
 0x4ba   :  { %v4188_v14 = vmul.f32 %v10047_v29, %v11591_v38  ;;  %v4355_v38 = vpop.permute.xlu2 %4354 }
 0x4bc   :  { %v4196_v19 = vpack.c.bf16 %v4188_v14, %v4188_v14 }
 0x4bf   :  { %9034 = vmatmul.msk.bf16.vlgmr.msra.gmra.mxu2 %vm4101_vm2, %v4196_v19 }
 0x4c5   :  { %v4534_v40 = vpop.permute.xlu0 %4533 }
 0x4c6   :  { %v4539_v50 = vsel %vm3948_vm0, %v4534_v40, 0  ;;  %9037 = vmatmul.msk.bf16.vlgmr.msrb.gmra.mxu1 %vm3948_vm0, %v4384_v56 }
 0x4c7   :  { %4548 = vmatpush.bf16.xpose.msra.mxu2 %v4539_v50 }
 0x4cd   :  { %v4505_v61 = vpop.permute.xlu0 %4504 }
 0x4ce   :  { %v4510_v3 = vsel %vm3948_vm0, %v4505_v61, 0 }
 0x4cf   :  { %4519 = vmatpush.bf16.xpose.msra.mxu1 %v4510_v3  ;;  %9038 = vmatmul.msk.bf16.vlgmr.msrb.gmra.mxu2 %vm3948_vm0, %v11559_v46 }
 0x4d5   :  { %v4471_v15 = vpop.permute.xlu0 %4470  ;;  %v4173_v35 = vpop.xlane.xlu1 %4172 }
 0x4d6   :  { %10048 = vrcp.f32 %v4173_v35 }
 0x4dc   :  { %v10049_v7 = vpop.eup %10048 }
 0x4dd   :  { %v4755_v31 = vpop.permute.xlu0 %4754  ;;  %v4189_v6 = vmul.f32 %v10049_v7, %v11603_v2 }
 0x4de   :  { %v4760_v22 = vsel %vm4201_vm1, %v4755_v31, 0 }
 0x4df   :  { %v4197_v27 = vpack.c.bf16 %v4189_v6, %v4189_v6 }
 0x4e1   :  { %9035 = vmatmul.msk.bf16.vlgmr.msra.gmra.mxu3 %vm4101_vm2, %v4197_v27 }
 0x4e3   :  { %v4164_v47 = vpop.xlane.xlu2 %4163 }
 0x4e4   :  { %10050 = vrcp.f32 %v4164_v47 }
 0x4e5   :  { %v4707_v20 = vpop.permute.xlu0 %4706 }
 0x4e6   :  { %v4712_v39 = vsel %vm4201_vm1, %v4707_v20, 0 }
 0x4e7   :  { %4721 = vmatpush.bf16.msrb.mxu1 %v4712_v39 }
 0x4ea   :  { %v10051_v43 = vpop.eup %10050 }
 0x4eb   :  { %v4186_v46 = vmul.f32 %v10051_v43, %v11611_v28  ;;  %v4563_v51 = vpop.permute.xlu2 %4562 }
 0x4ec   :  { %v4568_v49 = vsel %vm3948_vm0, %v4563_v51, 0 }
 0x4ed   :  { %v4194_v42 = vpack.c.bf16 %v4186_v46, %v4186_v46  ;;  %v4476_v12 = vpop.permute.xlu1 %4475  ;;  %4577 = vmatpush.bf16.xpose.msra.mxu3 %v4568_v49 }
 0x4ee   :  { %v4481_v2 = vsel %vm3948_vm0, %v4476_v12, 0 }
 0x4ef   :  { %9032 = vmatmul.msk.bf16.vlgmr.msra.gmra.mxu0 %vm4101_vm2, %v4194_v42 }
 0x4f0   :  { %4490 = vmatpush.bf16.xpose.msra.mxu0 %v4481_v2 }
 0x4f1   :  { %9039 = vmatmul.msk.bf16.vlgmr.msrb.gmra.mxu3 %vm3948_vm0, %v11627_v9 }
 0x4f3   :  { %v4529_v41 = vpop.permute.xlu2 %4528 }
 0x4f4   :  { %9042 = vmatmul.msk.bf16.vlgmr.msra.gmra.mxu2 %vm3948_vm0, %v4529_v41 }
 0x4f5   :  { %4769 = vmatpush.bf16.msrb.mxu3 %v4760_v22  ;;  %v4558_v5 = vpop.permute.xlu1 %4557 }
 0x4fb   :  { %v4500_v28 = vpop.permute.xlu2 %4499 }
 0x4fc   :  { %9041 = vmatmul.msk.bf16.vlgmr.msra.gmra.mxu1 %vm3948_vm0, %v4500_v28 }
 0x4ff   :  { %9036 = vmatmul.msk.bf16.vlgmr.msrb.gmra.mxu0 %vm3948_vm0, %v4355_v38  ;;  %v4728_v38 = vunpack.c.l.b16 %v11391_v25 }
 0x501   :  { %9043 = vmatmul.msk.bf16.vlgmr.msra.gmra.mxu3 %vm3948_vm0, %v4558_v5  ;;  %v4729_v7 = vpack.c.b16 %v4728_v38, %v4728_v38 }
 0x50f   :  { %9040 = vmatmul.msk.bf16.vlgmr.msra.gmra.mxu0 %vm3948_vm0, %v4471_v15 }
 0x51b   :  { %v11669_v62 = vpop.f32.mrf.mxu0 }
 0x523   :  { %v4216_v37 = vpop.f32.mrf.mxu0  ;;  %v11671_v48 = vpop.f32.mrf.mxu1 }
 0x524   :  { %v4680_v37 = vunpack.c.l.b16 %v11385_v60 }
 0x52b   :  { %v4235_v9 = vpop.f32.mrf.mxu1 }
 0x52c   :  { %v4681_v9 = vpack.c.b16 %v4680_v37, %v4680_v37 }
 0x531   :  { %v11673_v26 = vpop.f32.mrf.mxu3 }
 0x532   :  { %v11675_v44 = vpop.f32.mrf.mxu2 }
 0x533   :  { %v11677_v16 = vpop.f32.mrf.mxu1 }
 0x539   :  { %v4273_v57 = vpop.f32.mrf.mxu3 }
 0x53a   :  { %v4254_v1 = vpop.f32.mrf.mxu2 }
 0x53b   :  { %v4311_v29 = vpop.f32.mrf.mxu1 }
 0x542   :  { %v11679_v14 = vpop.f32.mrf.mxu2 }
 0x543   :  { %v4405_v19 = vpop.f32.mrf.mxu1 }
 0x544   :  { %v4586_v40 = vsel %vm4101_vm2, %v4405_v19, -inf }
 0x545   :  { %4587 = vmax.xlane.f32.xlu1 %v4586_v40 }
 0x54a   :  { %v4330_v56 = vpop.f32.mrf.mxu2 }
 0x54b   :  { %v4407_v50 = vpop.f32.mrf.mxu1 }
 0x552   :  { %v4434_v61 = vpop.f32.mrf.mxu2 }
 0x553   :  { %v4589_v3 = vsel %vm4101_vm2, %v4434_v61, -inf }
 0x554   :  { %4590 = vmax.xlane.f32.xlu1 %v4589_v3 }
 0x55a   :  { %v4436_v15 = vpop.f32.mrf.mxu2 }
 0x564   :  { %v11683_v35 = vpop.f32.mrf.mxu3 }
 0x56c   :  { %v4349_v31 = vpop.f32.mrf.mxu3  ;;  %v11687_v6 = vpop.f32.mrf.mxu0 }
 0x56d   :  { %4730 = vrot.lane.b32.xlu1 %v4729_v7, %s10623_s12 }
 0x574   :  { %v4292_v27 = vpop.f32.mrf.mxu0  ;;  %v4463_v47 = vpop.f32.mrf.mxu3 }
 0x575   :  { %v4592_v20 = vsel %vm4101_vm2, %v4463_v47, -inf }
 0x576   :  { %4593 = vmax.xlane.f32.xlu0 %v4592_v20 }
 0x577   :  { %v4550_v39 = vpop.f32.mrf.mxu2 }
 0x578   :  { %v4601_v41 = vsel %vm4101_vm2, %v4550_v39, -inf }
 0x579   :  { %v4521_v43 = vpop.f32.mrf.mxu1 }
 0x57a   :  { %v4598_v49 = vsel %vm4101_vm2, %v4521_v43, -inf }
 0x57c   :  { %v4376_v46 = vpop.f32.mrf.mxu0  ;;  %v4465_v51 = vpop.f32.mrf.mxu3 }
 0x57d   :  { %v4583_v42 = vsel %vm4101_vm2, %v4376_v46, -inf }
 0x57e   :  { %4599 = vmax.xlane.f32.xlu0 %v4598_v49  ;;  %4584 = vmax.xlane.f32.xlu2 %v4583_v42 }
 0x57f   :  { %v4552_v25 = vpop.f32.mrf.mxu2 }
 0x581   :  { %v4523_v12 = vpop.f32.mrf.mxu1 }
 0x584   :  { %v4378_v2 = vpop.f32.mrf.mxu0  ;;  %v11692_v22 = vpop.f32.mrf.mxu3 }
 0x585   :  { %v4604_v50 = vsel %vm4101_vm2, %v11692_v22, -inf }
 0x586   :  { %4602 = vmax.xlane.f32.xlu0 %v4601_v41 }
 0x58c   :  { %v4492_v28 = vpop.f32.mrf.mxu0  ;;  %v4581_v5 = vpop.f32.mrf.mxu3 }
 0x58d   :  { %v4595_v1 = vsel %vm4101_vm2, %v4492_v28, -inf }
 0x594   :  { %v4494_v57 = vpop.f32.mrf.mxu0 }
 0x596   :  { %4682 = vrot.lane.b32.xlu2 %v4681_v9, %s10623_s12 }
 0x597   :  { %4596 = vmax.xlane.f32.xlu1 %v4595_v1 }
 0x5b8   :  { %v4588_v29 = vpop.xlane.xlu1 %4587 }
 0x5b9   :  { %v4608_v40 = vsub.f32 %v4405_v19, %v4588_v29 }
 0x5bb   :  { %v4617_v56 = vmul.f32 1.442695, %v4608_v40 }
 0x5bd   :  { %10052 = vpow2.f32 %v4617_v56 }
 0x5bf   :  { %4605 = vmax.xlane.f32.xlu2 %v4604_v50 }
 0x5c3   :  { %v11700_v3 = vpop.eup %10052 }
 0x5c4   :  { %v4634_v60 = vsel %vm4101_vm2, %v11700_v3, 0.0 }
 0x5c7   :  { %v4591_v15 = vpop.xlane.xlu1 %4590  ;;  %4635 = vadd.xlane.f32.xlu2 %v4634_v60 }
 0x5c8   :  { %v4609_v38 = vsub.f32 %v4434_v61, %v4591_v15 }
 0x5ca   :  { %v4619_v7 = vmul.f32 1.442695, %v4609_v38 }
 0x5cc   :  { %10054 = vpow2.f32 %v4619_v7 }
 0x5d2   :  { %v11704_v31 = vpop.eup %10054 }
 0x5d3   :  { %v4637_v19 = vsel %vm4101_vm2, %v11704_v31, 0.0 }
 0x5d4   :  { %4638 = vadd.xlane.f32.xlu2 %v4637_v19 }
 0x5df   :  { %v4731_v27 = vpop.permute.xlu1 %4730 }
 0x5e0   :  { %v4736_v20 = vsel %vm4201_vm1, %v4731_v27, 0 }
 0x5e1   :  { %4745 = vmatpush.bf16.msrb.mxu2 %v4736_v20  ;;  %v4776_v20 = vunpack.c.l.b16 %v11433_v10 }
 0x5e9   :  { %v4594_v51 = vpop.xlane.xlu0 %4593 }
 0x5ea   :  { %v4610_v49 = vsub.f32 %v4463_v47, %v4594_v51  ;;  %v4777_v51 = vpack.c.b16 %v4776_v20, %v4776_v20 }
 0x5ec   :  { %v4621_v42 = vmul.f32 1.442695, %v4610_v49  ;;  %v4848_v49 = vunpack.c.l.b16 %v11454_v45 }
 0x5ee   :  { %10056 = vpow2.f32 %v4621_v42  ;;  %v4849_v42 = vpack.c.b16 %v4848_v49, %v4848_v49 }
 0x5f1   :  { %v4600_v25 = vpop.xlane.xlu0 %4599  ;;  %v4585_v12 = vpop.xlane.xlu2 %4584 }
 0x5f2   :  { %v4612_v61 = vsub.f32 %v4521_v43, %v4600_v25  ;;  %v4607_v2 = vsub.f32 %v4376_v46, %v4585_v12  ;;  %v4800_v25 = vunpack.c.l.b16 %v11441_v33 }
 0x5f4   :  { %v11709_v41 = vpop.eup %10056  ;;  %v4625_v5 = vmul.f32 1.442695, %v4612_v61  ;;  %v4615_v37 = vmul.f32 1.442695, %v4607_v2  ;;  %v4801_v12 = vpack.c.b16 %v4800_v25, %v4800_v25 }
 0x5f5   :  { %v4640_v9 = vsel %vm4101_vm2, %v11709_v41, 0.0 }
 0x5f6   :  { %10058 = vpow2.f32 %v4625_v5  ;;  %4641 = vadd.xlane.f32.xlu1 %v4640_v9 }
 0x5f7   :  { %10060 = vpow2.f32 %v4615_v37 }
 0x5f9   :  { %v4603_v57 = vpop.xlane.xlu0 %4602  ;;  %v4683_v1 = vpop.permute.xlu2 %4682 }
 0x5fa   :  { %v4613_v29 = vsub.f32 %v4550_v39, %v4603_v57  ;;  %v4688_v47 = vsel %vm4201_vm1, %v4683_v1, 0 }
 0x5fb   :  { %4697 = vmatpush.bf16.msrb.mxu0 %v4688_v47  ;;  %v4824_v47 = vunpack.c.l.b16 %v11443_v24 }
 0x5fc   :  { %v11714_v40 = vpop.eup %10058  ;;  %v4627_v43 = vmul.f32 1.442695, %v4613_v29 }
 0x5fd   :  { %v10061_v46 = vpop.eup %10060  ;;  %v4646_v56 = vsel %vm4101_vm2, %v11714_v40, 0.0 }
 0x5fe   :  { %10062 = vpow2.f32 %v4627_v43  ;;  %v4631_v50 = vsel %vm4101_vm2, %v10061_v46, 0.0  ;;  %4647 = vadd.xlane.f32.xlu1 %v4646_v56  ;;  %v4825_v43 = vpack.c.b16 %v4824_v47, %v4824_v47  ;;  %v12890_v47 = vld [vmem:[#allocation79_spill] sm:$0xff] }
 0x5ff   :  { %4632 = vadd.xlane.f32.xlu0 %v4631_v50 }
 0x604   :  { %v11719_v15 = vpop.eup %10062 }
 0x605   :  { %v4649_v39 = vsel %vm4101_vm2, %v11719_v15, 0.0 }
 0x606   :  { %4650 = vadd.xlane.f32.xlu1 %v4649_v39 }
 0x60a   :  { %v4597_v60 = vpop.xlane.xlu1 %4596 }
 0x60b   :  { %v4611_v38 = vsub.f32 %v4492_v28, %v4597_v60 }
 0x60d   :  { %v4623_v7 = vmul.f32 1.442695, %v4611_v38 }
 0x60f   :  { %10064 = vpow2.f32 %v4623_v7 }
 0x615   :  { %v10065_v19 = vpop.eup %10064 }
 0x616   :  { %v4643_v27 = vsel %vm4101_vm2, %v10065_v19, 0.0 }
 0x617   :  { %4644 = vadd.xlane.f32.xlu0 %v4643_v27 }
 0x61f   :  { %4778 = vrot.lane.b32.xlu1 %v4777_v51, %s10623_s12  ;;  %v12887_v51 = vld [vmem:[#allocation72_spill] sm:$0xff] }
 0x620   :  { %v11746_v49 = vpack.c.bf16 %v12887_v51, %v12887_v51 }
 0x62b   :  { %4850 = vrot.lane.b32.xlu0 %v4849_v42, %s10623_s12 }
 0x632   :  { %v4606_v28 = vpop.xlane.xlu2 %4605 }
 0x633   :  { %4802 = vrot.lane.b32.xlu0 %v4801_v12, %s10623_s12  ;;  %v4614_v61 = vsub.f32 %v11692_v22, %v4606_v28  ;;  %v12888_v12 = vld [vmem:[#allocation39_spill] sm:$0xff] }
 0x634   :  { %v11750_v28 = vpack.c.bf16 %v12888_v12, %v12888_v12 }
 0x635   :  { %v4629_v2 = vmul.f32 1.442695, %v4614_v61  ;;  %v4899_v61 = vsel %vm3948_vm0, %v11746_v49, 0 }
 0x637   :  { %10066 = vpow2.f32 %v4629_v2 }
 0x63a   :  { %v4636_v5 = vpop.xlane.xlu2 %4635 }
 0x63b   :  { %10068 = vrcp.f32 %v4636_v5  ;;  %v4975_v5 = vsel %vm3948_vm0, %v11750_v28, 0 }
 0x63d   :  { %v11731_v10 = vpop.eup %10066 }
 0x63e   :  { %v4652_v45 = vsel %vm4101_vm2, %v11731_v10, 0.0 }
 0x63f   :  { %4653 = vadd.xlane.f32.xlu2 %v4652_v45 }
 0x641   :  { %v10069_v37 = vpop.eup %10068 }
 0x642   :  { %v4664_v9 = vmul.f32 %v10069_v37, %v11700_v3  ;;  %v3704_v37 = vadd.f32 %v11421_v55, %v11341_v17  ;;  %v11775_v17 = vpack.c.bf16 %v11507_v36, %v11507_v36 }
 0x644   :  { %v4672_v33 = vpack.c.bf16 %v4664_v9, %v4664_v9  ;;  %v5147_v36 = vsel %vm4201_vm1, %v11775_v17, 0 }
 0x646   :  { %9045 = vmatmul.msk.bf16.vlgmr.msrb.gmra.mxu1 %vm4101_vm2, %v4672_v33 }
 0x647   :  { %v4639_v57 = vpop.xlane.xlu2 %4638 }
 0x648   :  { %10070 = vrcp.f32 %v4639_v57 }
 0x64e   :  { %v10071_v1 = vpop.eup %10070 }
 0x64f   :  { %v4665_v22 = vmul.f32 %v10071_v1, %v11704_v31  ;;  %v3733_v1 = vadd.f32 %v11425_v34, %v3704_v37  ;;  %v12892_v34 = vld [vmem:[#allocation40_spill] sm:$0xff] }
 0x651   :  { %v4673_v29 = vpack.c.bf16 %v4665_v22, %v4665_v22 }
 0x653   :  { %9046 = vmatmul.msk.bf16.vlgmr.msrb.gmra.mxu2 %vm4101_vm2, %v4673_v29  ;;  %v3762_v29 = vadd.f32 %v11431_v8, %v3733_v1  ;;  %v3656_v8 = vadd.f32 %v11362_v13, %v11328_v32 }
 0x655   :  { %v3685_v13 = vadd.f32 %v11364_v59, %v3656_v8  ;;  %v12903_v8 = vld [vmem:[#allocation83_spill] sm:$0xff] }
 0x657   :  { %4826 = vrot.lane.b32.xlu2 %v4825_v43, %s10623_s12  ;;  %v11771_v43 = vpack.c.bf16 %v12890_v47, %v12890_v47  ;;  %v12901_v47 = vld [vmem:[#allocation48_spill] sm:$0xff] }
 0x669   :  { %v4642_v56 = vpop.xlane.xlu1 %4641 }
 0x66a   :  { %10072 = vrcp.f32 %v4642_v56  ;;  %v12891_v56 = vld [vmem:[#allocation57_spill] sm:$0xff] }
 0x670   :  { %v10073_v50 = vpop.eup %10072 }
 0x671   :  { %v4666_v3 = vmul.f32 %v10073_v50, %v11709_v41  ;;  %v4648_v24 = vpop.xlane.xlu1 %4647  ;;  %v11780_v50 = vpack.c.bf16 %v12891_v56, %v12891_v56 }
 0x672   :  { %v4633_v39 = vpop.xlane.xlu0 %4632 }
 0x673   :  { %v4674_v60 = vpack.c.bf16 %v4666_v3, %v4666_v3  ;;  %10074 = vrcp.f32 %v4633_v39  ;;  %v11784_v39 = vpack.c.bf16 %v12892_v34, %v12892_v34 }
 0x675   :  { %9047 = vmatmul.msk.bf16.vlgmr.msrb.gmra.mxu3 %vm4101_vm2, %v4674_v60  ;;  %v3791_v60 = vadd.f32 %v11435_v18, %v3762_v29  ;;  %v4994_v18 = vsel %vm3948_vm0, %v11784_v39, 0 }
 0x679   :  { %v10075_v38 = vpop.eup %10074  ;;  %v4651_v27 = vpop.xlane.xlu1 %4650 }
 0x67a   :  { %v4663_v31 = vmul.f32 %v10075_v38, %v10061_v46 }
 0x67c   :  { %v4671_v7 = vpack.c.bf16 %v4663_v31, %v4663_v31  ;;  %v3820_v31 = vadd.f32 %v11503_v30, %v3791_v60  ;;  %v3709_v30 = vadd.f32 %v11476_v21, %v11353_v11 }
 0x67e   :  { %9044 = vmatmul.msk.bf16.vlgmr.msrb.gmra.mxu0 %vm4101_vm2, %v4671_v7 }
 0x68a   :  { %v4645_v20 = vpop.xlane.xlu0 %4644 }
 0x68b   :  { %10076 = vrcp.f32 %v4645_v20  ;;  %v3849_v20 = vadd.f32 %v11505_v0, %v3820_v31 }
 0x68c   :  { %10078 = vrcp.f32 %v4648_v24  ;;  %v3714_v24 = vadd.f32 %v11485_v53, %v3685_v13  ;;  %v12893_v53 = vld [vmem:[#allocation69_spill] sm:$0xff] }
 0x68d   :  { %v3878_v51 = vadd.f32 %v11509_v54, %v3849_v20  ;;  %10080 = vrcp.f32 %v4651_v27  ;;  %v11815_v0 = vpack.c.bf16 %v12893_v53, %v12893_v53  ;;  %v12894_v54 = vld [vmem:[#allocation49_spill] sm:$0xff] }
 0x691   :  { %v10077_v42 = vpop.eup %10076  ;;  %v4779_v25 = vpop.permute.xlu1 %4778 }
 0x692   :  { %v4667_v41 = vmul.f32 %v10077_v42, %v10065_v19  ;;  %v4784_v46 = vsel %vm4201_vm1, %v4779_v25, 0  ;;  %v12889_v19 = vld [vmem:[#allocation38_spill] sm:$0xff]  ;;  %v10079_v22 = vpop.eup %10078  ;;  %v3743_v42 = vadd.f32 %v11487_v4, %v3714_v24  ;;  %v11811_v25 = vpack.c.bf16 %v11527_v23, %v11527_v23  ;;  %v12896_v23 = vld [vmem:[#allocation63_spill] sm:$0xff] }
 0x693   :  { %4793 = vmatpush.bf16.msra.mxu0 %v4784_v46  ;;  %v11760_v45 = vpack.c.bf16 %v12889_v19, %v12889_v19  ;;  %v4668_v55 = vmul.f32 %v10079_v22, %v11714_v40  ;;  %v4918_v40 = vsel %vm3948_vm0, %v11771_v43, 0  ;;  %v3738_v4 = vadd.f32 %v11478_v63, %v3709_v30  ;;  %v10081_v21 = vpop.eup %10080  ;;  %v12898_v63 = vld [vmem:[#allocation80_spill] sm:$0xff]  ;;  %v12900_v22 = vld [vmem:[#allocation43_spill] sm:$0xff] }
 0x694   :  { %v4675_v2 = vpack.c.bf16 %v4667_v41, %v4667_v41  ;;  %v3772_v59 = vadd.f32 %v11489_v58, %v3743_v42  ;;  %v3907_v41 = vadd.f32 %v11511_v52, %v3878_v51  ;;  %v12895_v58 = vld [vmem:[#allocation47_spill] sm:$0xff]  ;;  %v5223_v52 = vsel %vm4201_vm1, %v11811_v25, 0  ;;  %v12907_v42 = vld [vmem:[#allocation52_spill] sm:$0xff] }
 0x695   :  { %v4956_v57 = vsel %vm3948_vm0, %v11760_v45, 0  ;;  %v4676_v7 = vpack.c.bf16 %v4668_v55, %v4668_v55  ;;  %v3767_v27 = vadd.f32 %v12895_v58, %v3738_v4  ;;  %v11833_v19 = vpack.c.bf16 %v12898_v63, %v12898_v63  ;;  %v12910_v4 = vld [vmem:[#allocation45_spill] sm:$0xff] }
 0x696   :  { %9048 = vmatmul.msk.bf16.vlgmr.msra.gmra.mxu0 %vm4101_vm2, %v4675_v2  ;;  %v3801_v46 = vadd.f32 %v12894_v54, %v3772_v59  ;;  %v11819_v11 = vpack.c.bf16 %v3907_v41, %v3907_v41  ;;  %v12897_v2 = vld [vmem:[#allocation51_spill] sm:$0xff]  ;;  %v3661_v29 = vadd.f32 %v12900_v22, %v11328_v32  ;;  %v12908_v59 = vld [vmem:[#allocation82_spill] sm:$0xff]  ;;  %v12914_v63 = vld [vmem:[#allocation73_spill] sm:$0xff] }
 0x697   :  { %4908 = vmatpush.bf16.xpose.msrb.mxu0 %v4899_v61  ;;  %v11828_v61 = vpack.c.bf16 %v12896_v23, %v12896_v23  ;;  %v3796_v55 = vadd.f32 %v12901_v47, %v3767_v27 }
 0x69d   :  { %v4851_v9 = vpop.permute.xlu0 %4850 }
 0x69e   :  { %v4856_v33 = vsel %vm4201_vm1, %v4851_v9, 0  ;;  %v4669_v9 = vmul.f32 %v10081_v21, %v11719_v15  ;;  %v12902_v15 = vld [vmem:[#allocation41_spill] sm:$0xff] }
 0x69f   :  { %4984 = vmatpush.bf16.xpose.msra.mxu0 %v4975_v5  ;;  %4865 = vmatpush.bf16.msra.mxu3 %v4856_v33  ;;  %v3830_v5 = vadd.f32 %v12897_v2, %v3801_v46  ;;  %v5166_v33 = vsel %vm4201_vm1, %v11819_v11, 0  ;;  %v11850_v34 = vpack.c.bf16 %v12902_v15, %v12902_v15  ;;  %v12911_v21 = vld [vmem:[#allocation53_spill] sm:$0xff]  ;;  %v12913_v2 = vld [vmem:[#allocation50_spill] sm:$0xff]  ;;  %v12918_v15 = vld [vmem:[#allocation71_spill] sm:$0xff] }
 0x6a1   :  { %v3859_v60 = vadd.f32 %v12903_v8, %v3830_v5  ;;  %v5013_v51 = vsel %vm3948_vm0, %v11850_v34, 0 }
 0x6a3   :  { %4965 = vmatpush.bf16.xpose.msrb.mxu3 %v4956_v57  ;;  %v12899_v57 = vld [vmem:[#allocation42_spill] sm:$0xff] }
 0x6a4   :  { %v11842_v1 = vpack.c.bf16 %v12899_v57, %v12899_v57 }
 0x6a5   :  { %v4803_v3 = vpop.permute.xlu0 %4802 }
 0x6a6   :  { %v4808_v38 = vsel %vm4201_vm1, %v4803_v3, 0  ;;  %9052 = vmatmul.msk.bf16.vlgmr.msrb.gmra.mxu0 %vm3948_vm0, %v11780_v50  ;;  %v5032_v20 = vsel %vm3948_vm0, %v11842_v1, 0 }
 0x6a7   :  { %4817 = vmatpush.bf16.msra.mxu1 %v4808_v38  ;;  %5156 = vmatpush.bf16.msrb.mxu0 %v5147_v36  ;;  %v4937_v36 = vsel %vm3948_vm0, %v11833_v19, 0 }
 0x6aa   :  { %9049 = vmatmul.msk.bf16.vlgmr.msra.gmra.mxu1 %vm4101_vm2, %v4676_v7  ;;  %v12905_v7 = vld [vmem:[#allocation78_spill] sm:$0xff] }
 0x6ab   :  { %4927 = vmatpush.bf16.xpose.msrb.mxu1 %v4918_v40  ;;  %v12904_v40 = vld [vmem:[#allocation81_spill] sm:$0xff]  ;;  %v3888_v13 = vadd.f32 %v12905_v7, %v3859_v60 }
 0x6ac   :  { %v3825_v31 = vadd.f32 %v12904_v40, %v3796_v55  ;;  %v12919_v60 = vld [vmem:[#allocation65_spill] sm:$0xff] }
 0x6ad   :  { %v12921_v7 = vld [vmem:[#allocation61_spill] sm:$0xff] }
 0x6ae   :  { %v3854_v41 = vadd.f32 %v12908_v59, %v3825_v31  ;;  %v12920_v31 = vld [vmem:[#allocation54_spill] sm:$0xff] }
 0x6b0   :  { %v3883_v54 = vadd.f32 %v12910_v4, %v3854_v41  ;;  %v12925_v41 = vld [vmem:[#allocation75_spill] sm:$0xff] }
 0x6b2   :  { %v4654_v12 = vpop.xlane.xlu2 %4653  ;;  %v3912_v5 = vadd.f32 %v12913_v2, %v3883_v54 }
 0x6b3   :  { %5003 = vmatpush.bf16.xpose.msra.mxu1 %v4994_v18  ;;  %10082 = vrcp.f32 %v4654_v12  ;;  %v12906_v18 = vld [vmem:[#allocation46_spill] sm:$0xff]  ;;  %v12909_v12 = vld [vmem:[#allocation84_spill] sm:$0xff] }
 0x6b4   :  { %v3690_v24 = vadd.f32 %v12906_v18, %v3661_v29  ;;  %v3917_v53 = vadd.f32 %v12909_v12, %v3888_v13  ;;  %v11885_v22 = vpack.c.bf16 %v3912_v5, %v3912_v5  ;;  %v12916_v29 = vld [vmem:[#allocation44_spill] sm:$0xff]  ;;  %v12922_v18 = vld [vmem:[#allocation62_spill] sm:$0xff]  ;;  %v11925_v12 = vpack.c.bf16 %v12925_v41, %v12925_v41 }
 0x6b5   :  { %v11889_v47 = vpack.c.bf16 %v12916_v29, %v12916_v29 }
 0x6b6   :  { %9056 = vmatmul.msk.bf16.vlgmr.msra.gmra.mxu0 %vm3948_vm0, %v11815_v0  ;;  %v3719_v30 = vadd.f32 %v12907_v42, %v3690_v24  ;;  %v11872_v27 = vpack.c.bf16 %v3917_v53, %v3917_v53 }
 0x6b7   :  { %5232 = vmatpush.bf16.msra.mxu0 %v5223_v52  ;;  %v12912_v52 = vld [vmem:[#allocation59_spill] sm:$0xff]  ;;  %v5185_v40 = vsel %vm4201_vm1, %v11889_v47, 0 }
 0x6b8   :  { %v3748_v58 = vadd.f32 %v12911_v21, %v3719_v30  ;;  %v12924_v30 = vld [vmem:[#allocation77_spill] sm:$0xff] }
 0x6b9   :  { %v10083_v37 = vpop.eup %10082  ;;  %v11921_v59 = vpack.c.bf16 %v12924_v30, %v12924_v30 }
 0x6ba   :  { %9053 = vmatmul.msk.bf16.vlgmr.msrb.gmra.mxu1 %vm3948_vm0, %v11828_v61  ;;  %v4670_v56 = vmul.f32 %v10083_v37, %v11731_v10  ;;  %v4827_v3 = vpop.permute.xlu2 %4826  ;;  %v4677_v10 = vpack.c.bf16 %v4669_v9, %v4669_v9  ;;  %v3777_v23 = vadd.f32 %v12912_v52, %v3748_v58  ;;  %v11878_v37 = vpack.c.bf16 %v12914_v63, %v12914_v63 }
 0x6bb   :  { %5175 = vmatpush.bf16.msrb.mxu1 %v5166_v33  ;;  %v4832_v38 = vsel %vm4201_vm1, %v4827_v3, 0  ;;  %v5242_v9 = vsel %vm4201_vm1, %v11872_v27, 0  ;;  %v12915_v33 = vld [vmem:[#allocation60_spill] sm:$0xff] }
 0x6bc   :  { %v4678_v32 = vpack.c.bf16 %v4670_v56, %v4670_v56  ;;  %4841 = vmatpush.bf16.msra.mxu2 %v4832_v38  ;;  %v3806_v57 = vadd.f32 %v12915_v33, %v3777_v23  ;;  %v12917_v56 = vld [vmem:[#allocation67_spill] sm:$0xff]  ;;  %v11898_v38 = vpack.c.bf16 %v12919_v60, %v12919_v60 }
 0x6bd   :  { %v11893_v3 = vpack.c.bf16 %v12917_v56, %v12917_v56 }
 0x6be   :  { %9051 = vmatmul.msk.bf16.vlgmr.msra.gmra.mxu3 %vm4101_vm2, %v4678_v32  ;;  %v3835_v8 = vadd.f32 %v12918_v15, %v3806_v57 }
 0x6bf   :  { %5041 = vmatpush.bf16.xpose.msra.mxu3 %v5032_v20  ;;  %9050 = vmatmul.msk.bf16.vlgmr.msra.gmra.mxu2 %vm4101_vm2, %v4677_v10 }
 0x6c0   :  { %4946 = vmatpush.bf16.xpose.msrb.mxu2 %v4937_v36  ;;  %v5204_v36 = vsel %vm4201_vm1, %v11885_v22, 0  ;;  %v3864_v32 = vadd.f32 %v12920_v31, %v3835_v8 }
 0x6c2   :  { %v3893_v13 = vadd.f32 %v12921_v7, %v3864_v32 }
 0x6c3   :  { %v11869_v46 = vpop.f32.mrf.mxu1 }
 0x6c4   :  { %v3922_v24 = vadd.f32 %v12922_v18, %v3893_v13 }
 0x6c6   :  { %v11913_v20 = vpack.c.bf16 %v3922_v24, %v3922_v24 }
 0x6c8   :  { %5022 = vmatpush.bf16.xpose.msra.mxu2 %v5013_v51  ;;  %v12923_v51 = vld [vmem:[#allocation55_spill] sm:$0xff]  ;;  %v5280_v4 = vsel %vm4201_vm1, %v11913_v20, 0 }
 0x6c9   :  { %v11917_v42 = vpack.c.bf16 %v12923_v51, %v12923_v51 }
 0x6ca   :  { %9057 = vmatmul.msk.bf16.vlgmr.msra.gmra.mxu1 %vm3948_vm0, %v11878_v37 }
 0x6cb   :  { %5251 = vmatpush.bf16.msra.mxu1 %v5242_v9  ;;  %v4725_v55 = vpop.f32.mrf.mxu1  ;;  %v5261_v54 = vsel %vm4201_vm1, %v11917_v42, 0 }
 0x6ce   :  { %9055 = vmatmul.msk.bf16.vlgmr.msrb.gmra.mxu3 %vm3948_vm0, %v11893_v3 }
 0x6cf   :  { %5213 = vmatpush.bf16.msrb.mxu3 %v5204_v36  ;;  %9054 = vmatmul.msk.bf16.vlgmr.msrb.gmra.mxu2 %vm3948_vm0, %v11898_v38 }
 0x6d0   :  { %5194 = vmatpush.bf16.msrb.mxu2 %v5185_v40 }
 0x6d6   :  { %v11910_v10 = vpop.f32.mrf.mxu2 }
 0x6de   :  { %v4749_v53 = vpop.f32.mrf.mxu2  ;;  %9059 = vmatmul.msk.bf16.vlgmr.msra.gmra.mxu3 %vm3948_vm0, %v11921_v59 }
 0x6df   :  { %5289 = vmatpush.bf16.msra.mxu3 %v5280_v4  ;;  %9058 = vmatmul.msk.bf16.vlgmr.msra.gmra.mxu2 %vm3948_vm0, %v11925_v12 }
 0x6e0   :  { %5270 = vmatpush.bf16.msra.mxu2 %v5261_v54 }
 0x6f8   :  { %v11935_v21 = vpop.f32.mrf.mxu3 }
 0x6f9   :  { %v9990_v58 = vpack.i.bf16 %v11935_v21, %v11910_v10 }
 0x6fb   :  { %v11939_v52 = vpop.f32.mrf.mxu0 }
 0x6fc   :  { %v9980_v23 = vpack.i.bf16 %v11869_v46, %v11939_v52 }
 0x700   :  { %v4773_v2 = vpop.f32.mrf.mxu3 }
 0x703   :  { %v4701_v5 = vpop.f32.mrf.mxu0 }
 0x713   :  { %v11943_v63 = vpop.f32.mrf.mxu0 }
 0x71b   :  { %v4797_v9 = vpop.f32.mrf.mxu0 }
 0x723   :  { %v4910_v33 = vpop.f32.mrf.mxu0 }
 0x724   :  { %v5047_v57 = vsel %vm4101_vm2, %v4910_v33, -inf }
 0x725   :  { %5048 = vmax.xlane.f32.xlu2 %v5047_v57 }
 0x727   :  { %v11946_v29 = vpop.f32.mrf.mxu1 }
 0x728   :  { %v10000_v55 = vpack.i.bf16 %v11946_v29, %v11943_v63 }
 0x72b   :  { %v4912_v56 = vpop.f32.mrf.mxu0 }
 0x72f   :  { %v4821_v15 = vpop.f32.mrf.mxu1 }
 0x730   :  { %v5330_v15 = vunpack.c.l.b16 %v11771_v43  ;;  %v5301_v43 = vunpack.c.l.b16 %v11746_v49 }
 0x733   :  { %v4986_v8 = vpop.f32.mrf.mxu0 }
 0x734   :  { %v5059_v32 = vsel %vm4101_vm2, %v4986_v8, -inf }
 0x737   :  { %v4929_v60 = vpop.f32.mrf.mxu1 }
 0x738   :  { %v5050_v36 = vsel %vm4101_vm2, %v4929_v60, -inf }
 0x739   :  { %5051 = vmax.xlane.f32.xlu1 %v5050_v36 }
 0x73b   :  { %v4988_v40 = vpop.f32.mrf.mxu0 }
 0x73f   :  { %v4931_v31 = vpop.f32.mrf.mxu1 }
 0x741   :  { %5060 = vmax.xlane.f32.xlu1 %v5059_v32  ;;  %v11952_v7 = vpop.f32.mrf.mxu3  ;;  %v5331_v32 = vpack.c.b16 %v5330_v15, %v5330_v15 }
 0x742   :  { %v11954_v13 = vpop.f32.mrf.mxu2 }
 0x743   :  { %v10010_v18 = vpack.i.bf16 %v11952_v7, %v11954_v13 }
 0x747   :  { %v5005_v24 = vpop.f32.mrf.mxu1 }
 0x748   :  { %v5062_v51 = vsel %vm4101_vm2, %v5005_v24, -inf }
 0x749   :  { %5063 = vmax.xlane.f32.xlu0 %v5062_v51  ;;  %v4869_v30 = vpop.f32.mrf.mxu3 }
 0x74a   :  { %v4845_v41 = vpop.f32.mrf.mxu2  ;;  %v5388_v30 = vunpack.c.l.b16 %v11760_v45 }
 0x74f   :  { %v5007_v53 = vpop.f32.mrf.mxu1 }
 0x750   :  { %v5389_v53 = vpack.c.b16 %v5388_v30, %v5388_v30 }
 0x751   :  { %v4967_v4 = vpop.f32.mrf.mxu3 }
 0x752   :  { %v4948_v54 = vpop.f32.mrf.mxu2  ;;  %v5056_v2 = vsel %vm4101_vm2, %v4967_v4, -inf }
 0x753   :  { %5057 = vmax.xlane.f32.xlu2 %v5056_v2  ;;  %v5053_v5 = vsel %vm4101_vm2, %v4948_v54, -inf  ;;  %v5359_v2 = vunpack.c.l.b16 %v11833_v19 }
 0x754   :  { %5054 = vmax.xlane.f32.xlu0 %v5053_v5  ;;  %v5302_v5 = vpack.c.b16 %v5301_v43, %v5301_v43 }
 0x759   :  { %v4969_v9 = vpop.f32.mrf.mxu3 }
 0x75a   :  { %v4950_v57 = vpop.f32.mrf.mxu2  ;;  %v5360_v9 = vpack.c.b16 %v5359_v2, %v5359_v2 }
 0x761   :  { %v11961_v56 = vpop.f32.mrf.mxu3 }
 0x762   :  { %v11964_v36 = vpop.f32.mrf.mxu2  ;;  %v5068_v40 = vsel %vm4101_vm2, %v11961_v56, -inf }
 0x763   :  { %5069 = vmax.xlane.f32.xlu1 %v5068_v40  ;;  %v5065_v31 = vsel %vm4101_vm2, %v11964_v36, -inf }
 0x764   :  { %5066 = vmax.xlane.f32.xlu2 %v5065_v31 }
 0x768   :  { %5332 = vrot.lane.b32.xlu0 %v5331_v32, %s10623_s12 }
 0x769   :  { %v5045_v51 = vpop.f32.mrf.mxu3 }
 0x76a   :  { %v5026_v41 = vpop.f32.mrf.mxu2 }
 0x770   :  { %5390 = vrot.lane.b32.xlu0 %v5389_v53, %s10623_s12 }
 0x77c   :  { %5361 = vrot.lane.b32.xlu2 %v5360_v9, %s10623_s12  ;;  %5303 = vrot.lane.b32.xlu1 %v5302_v5, %s10623_s12 }
 0x798   :  { %v5049_v57 = vpop.xlane.xlu2 %5048 }
 0x799   :  { %v5071_v15 = vsub.f32 %v4910_v33, %v5049_v57 }
 0x79b   :  { %v5079_v40 = vmul.f32 1.442695, %v5071_v15 }
 0x79d   :  { %10084 = vpow2.f32 %v5079_v40 }
 0x7a3   :  { %v11977_v31 = vpop.eup %10084 }
 0x7a4   :  { %v5095_v45 = vsel %vm4101_vm2, %v11977_v31, 0.0 }
 0x7a5   :  { %5096 = vadd.xlane.f32.xlu0 %v5095_v45 }
 0x7ac   :  { %v5052_v32 = vpop.xlane.xlu1 %5051 }
 0x7ad   :  { %v5072_v49 = vsub.f32 %v4929_v60, %v5052_v32 }
 0x7af   :  { %v5081_v51 = vmul.f32 1.442695, %v5072_v49 }
 0x7b1   :  { %10086 = vpow2.f32 %v5081_v51 }
 0x7b4   :  { %v5061_v19 = vpop.xlane.xlu1 %5060 }
 0x7b5   :  { %v5075_v30 = vsub.f32 %v4986_v8, %v5061_v19 }
 0x7b7   :  { %v11981_v41 = vpop.eup %10086  ;;  %v5087_v53 = vmul.f32 1.442695, %v5075_v30 }
 0x7b8   :  { %v5098_v33 = vsel %vm4101_vm2, %v11981_v41, 0.0 }
 0x7b9   :  { %10088 = vpow2.f32 %v5087_v53  ;;  %5099 = vadd.xlane.f32.xlu2 %v5098_v33 }
 0x7bc   :  { %v5064_v43 = vpop.xlane.xlu0 %5063 }
 0x7bd   :  { %v5076_v2 = vsub.f32 %v5005_v24, %v5064_v43 }
 0x7bf   :  { %v11985_v5 = vpop.eup %10088  ;;  %v5089_v9 = vmul.f32 1.442695, %v5076_v2 }
 0x7c0   :  { %v5107_v60 = vsel %vm4101_vm2, %v11985_v5, 0.0 }
 0x7c1   :  { %10090 = vpow2.f32 %v5089_v9  ;;  %5108 = vadd.xlane.f32.xlu2 %v5107_v60 }
 0x7c6   :  { %v5058_v8 = vpop.xlane.xlu2 %5057 }
 0x7c7   :  { %v11989_v57 = vpop.eup %10090  ;;  %v5074_v15 = vsub.f32 %v4967_v4, %v5058_v8  ;;  %v5055_v40 = vpop.xlane.xlu0 %5054 }
 0x7c8   :  { %v5110_v45 = vsel %vm4101_vm2, %v11989_v57, 0.0  ;;  %v5073_v32 = vsub.f32 %v4948_v54, %v5055_v40 }
 0x7c9   :  { %5111 = vadd.xlane.f32.xlu1 %v5110_v45  ;;  %v5085_v49 = vmul.f32 1.442695, %v5074_v15 }
 0x7ca   :  { %v5083_v24 = vmul.f32 1.442695, %v5073_v32  ;;  %v5354_v32 = vunpack.c.l.b16 %v11898_v38 }
 0x7cb   :  { %10092 = vpow2.f32 %v5085_v49 }
 0x7cc   :  { %10094 = vpow2.f32 %v5083_v24  ;;  %v5325_v24 = vunpack.c.l.b16 %v11828_v61  ;;  %v5441_v61 = vunpack.c.l.b16 %v11878_v37  ;;  %v5470_v37 = vunpack.c.l.b16 %v11925_v12 }
 0x7d1   :  { %v11993_v51 = vpop.eup %10092 }
 0x7d2   :  { %v11995_v19 = vpop.eup %10094  ;;  %v5104_v30 = vsel %vm4101_vm2, %v11993_v51, 0.0 }
 0x7d3   :  { %5105 = vadd.xlane.f32.xlu0 %v5104_v30  ;;  %v5101_v4 = vsel %vm4101_vm2, %v11995_v19, 0.0  ;;  %v5355_v30 = vpack.c.b16 %v5354_v32, %v5354_v32 }
 0x7d4   :  { %5102 = vadd.xlane.f32.xlu1 %v5101_v4  ;;  %v5475_v4 = vunpack.c.l.b16 %v11850_v34  ;;  %v5412_v34 = vunpack.c.l.b16 %v11815_v0 }
 0x7d6   :  { %v5070_v53 = vpop.xlane.xlu1 %5069 }
 0x7d7   :  { %v5078_v54 = vsub.f32 %v11961_v56, %v5070_v53  ;;  %v5067_v33 = vpop.xlane.xlu2 %5066  ;;  %v5296_v56 = vunpack.c.l.b16 %v11780_v50  ;;  %v5326_v53 = vpack.c.b16 %v5325_v24, %v5325_v24  ;;  %v5446_v50 = vunpack.c.l.b16 %v11784_v39 }
 0x7d8   :  { %v5077_v43 = vsub.f32 %v11964_v36, %v5067_v33  ;;  %v5383_v36 = vunpack.c.l.b16 %v11893_v3  ;;  %v5417_v3 = vunpack.c.l.b16 %v11750_v28  ;;  %v5504_v39 = vunpack.c.l.b16 %v11842_v1 }
 0x7d9   :  { %v5093_v2 = vmul.f32 1.442695, %v5078_v54  ;;  %v5297_v45 = vpack.c.b16 %v5296_v56, %v5296_v56  ;;  %v5476_v54 = vpack.c.b16 %v5475_v4, %v5475_v4  ;;  %v5447_v38 = vpack.c.b16 %v5446_v50, %v5446_v50 }
 0x7da   :  { %v5091_v9 = vmul.f32 1.442695, %v5077_v43  ;;  %v5384_v49 = vpack.c.b16 %v5383_v36, %v5383_v36  ;;  %v5418_v33 = vpack.c.b16 %v5417_v3, %v5417_v3  ;;  %v5442_v43 = vpack.c.b16 %v5441_v61, %v5441_v61 }
 0x7db   :  { %10096 = vpow2.f32 %v5093_v2  ;;  %v5413_v2 = vpack.c.b16 %v5412_v34, %v5412_v34  ;;  %v5505_v28 = vpack.c.b16 %v5504_v39, %v5504_v39  ;;  %v5471_v56 = vpack.c.b16 %v5470_v37, %v5470_v37 }
 0x7dc   :  { %10098 = vpow2.f32 %v5091_v9  ;;  %v5333_v9 = vpop.permute.xlu0 %5332 }
 0x7df   :  { %v5362_v24 = vpop.permute.xlu2 %5361 }
 0x7e1   :  { %v12003_v60 = vpop.eup %10096 }
 0x7e2   :  { %v12005_v8 = vpop.eup %10098  ;;  %v5116_v15 = vsel %vm4101_vm2, %v12003_v60, 0.0 }
 0x7e3   :  { %5117 = vadd.xlane.f32.xlu2 %v5116_v15  ;;  %v5113_v40 = vsel %vm4101_vm2, %v12005_v8, 0.0  ;;  %v5499_v15 = vunpack.c.l.b16 %v11921_v59 }
 0x7e4   :  { %5114 = vadd.xlane.f32.xlu0 %v5113_v40  ;;  %v5391_v0 = vpop.permute.xlu0 %5390 }
 0x7e5   :  { %v5500_v40 = vpack.c.b16 %v5499_v15, %v5499_v15 }
 0x7ed   :  { %5298 = vrot.lane.b32.xlu1 %v5297_v45, %s10623_s12 }
 0x7ee   :  { %v5304_v32 = vpop.permute.xlu1 %5303 }
 0x7ef   :  { %v5309_v59 = vsel %vm3948_vm0, %v5304_v32, 0 }
 0x7f5   :  { %5385 = vrot.lane.b32.xlu1 %v5384_v49, %s10623_s12 }
 0x7f8   :  { %5356 = vrot.lane.b32.xlu0 %v5355_v30, %s10623_s12 }
 0x7fb   :  { %5327 = vrot.lane.b32.xlu2 %v5326_v53, %s10623_s12 }
 0x7fd   :  { %5477 = vrot.lane.b32.xlu1 %v5476_v54, %s10623_s12  ;;  %v5338_v54 = vsel %vm3948_vm0, %v5333_v9, 0 }
 0x800   :  { %5448 = vrot.lane.b32.xlu0 %v5447_v38, %s10623_s12 }
 0x803   :  { %5419 = vrot.lane.b32.xlu2 %v5418_v33, %s10623_s12 }
 0x805   :  { %5443 = vrot.lane.b32.xlu1 %v5442_v43, %s10623_s12 }
 0x808   :  { %5414 = vrot.lane.b32.xlu0 %v5413_v2, %s10623_s12 }
 0x80b   :  { %5506 = vrot.lane.b32.xlu2 %v5505_v28, %s10623_s12 }
 0x810   :  { %5501 = vrot.lane.b32.xlu0 %v5500_v40, %s10623_s12  ;;  %v5396_v40 = vsel %vm3948_vm0, %v5391_v0, 0 }
 0x813   :  { %5472 = vrot.lane.b32.xlu2 %v5471_v56, %s10623_s12 }
 0x818   :  { %v5097_v1 = vpop.xlane.xlu0 %5096 }
 0x819   :  { %10100 = vrcp.f32 %v5097_v1 }
 0x81f   :  { %v10101_v45 = vpop.eup %10100 }
 0x820   :  { %v5127_v36 = vmul.f32 %v10101_v45, %v11977_v31 }
 0x822   :  { %v5135_v49 = vpack.c.bf16 %v5127_v36, %v5127_v36 }
 0x824   :  { %9060 = vmatmul.msk.bf16.vlgmr.msrb.gmra.mxu0 %vm4101_vm2, %v5135_v49 }
 0x825   :  { %5318 = vmatpush.bf16.xpose.msrb.mxu0 %v5309_v59 }
 0x82c   :  { %v5100_v12 = vpop.xlane.xlu2 %5099 }
 0x82d   :  { %10102 = vrcp.f32 %v5100_v12 }
 0x833   :  { %v10103_v30 = vpop.eup %10102 }
 0x834   :  { %v5128_v4 = vmul.f32 %v10103_v30, %v11981_v41  ;;  %v5109_v53 = vpop.xlane.xlu2 %5108 }
 0x835   :  { %10104 = vrcp.f32 %v5109_v53 }
 0x836   :  { %v5136_v50 = vpack.c.bf16 %v5128_v4, %v5128_v4 }
 0x838   :  { %9061 = vmatmul.msk.bf16.vlgmr.msrb.gmra.mxu1 %vm4101_vm2, %v5136_v50 }
 0x839   :  { %5347 = vmatpush.bf16.xpose.msrb.mxu1 %v5338_v54 }
 0x83b   :  { %v10105_v31 = vpop.eup %10104 }
 0x83c   :  { %v5131_v3 = vmul.f32 %v10105_v31, %v11985_v5  ;;  %v5112_v38 = vpop.xlane.xlu1 %5111 }
 0x83d   :  { %10106 = vrcp.f32 %v5112_v38 }
 0x83e   :  { %v5139_v61 = vpack.c.bf16 %v5131_v3, %v5131_v3 }
 0x840   :  { %9064 = vmatmul.msk.bf16.vlgmr.msra.gmra.mxu0 %vm4101_vm2, %v5139_v61 }
 0x843   :  { %v10107_v33 = vpop.eup %10106 }
 0x844   :  { %v5132_v34 = vmul.f32 %v10107_v33, %v11989_v57  ;;  %v5367_v57 = vsel %vm3948_vm0, %v5362_v24, 0 }
 0x846   :  { %v5140_v41 = vpack.c.bf16 %v5132_v34, %v5132_v34  ;;  %v5106_v43 = vpop.xlane.xlu0 %5105 }
 0x847   :  { %10108 = vrcp.f32 %v5106_v43  ;;  %v5103_v39 = vpop.xlane.xlu1 %5102 }
 0x848   :  { %9065 = vmatmul.msk.bf16.vlgmr.msra.gmra.mxu1 %vm4101_vm2, %v5140_v41  ;;  %10110 = vrcp.f32 %v5103_v39 }
 0x84d   :  { %v10109_v2 = vpop.eup %10108 }
 0x84e   :  { %v10111_v9 = vpop.eup %10110  ;;  %v5130_v28 = vmul.f32 %v10109_v2, %v11993_v51 }
 0x84f   :  { %v5129_v5 = vmul.f32 %v10111_v9, %v11995_v19 }
 0x850   :  { %v5138_v15 = vpack.c.bf16 %v5130_v28, %v5130_v28 }
 0x851   :  { %v5137_v37 = vpack.c.bf16 %v5129_v5, %v5129_v5 }
 0x852   :  { %9063 = vmatmul.msk.bf16.vlgmr.msrb.gmra.mxu3 %vm4101_vm2, %v5138_v15 }
 0x853   :  { %5405 = vmatpush.bf16.xpose.msrb.mxu3 %v5396_v40  ;;  %9062 = vmatmul.msk.bf16.vlgmr.msrb.gmra.mxu2 %vm4101_vm2, %v5137_v37 }
 0x854   :  { %5376 = vmatpush.bf16.xpose.msrb.mxu2 %v5367_v57 }
 0x856   :  { %v5118_v56 = vpop.xlane.xlu2 %5117 }
 0x857   :  { %10112 = vrcp.f32 %v5118_v56  ;;  %v5115_v1 = vpop.xlane.xlu0 %5114 }
 0x858   :  { %10114 = vrcp.f32 %v5115_v1 }
 0x85d   :  { %v10113_v45 = vpop.eup %10112 }
 0x85e   :  { %v10115_v51 = vpop.eup %10114  ;;  %v5134_v19 = vmul.f32 %v10113_v45, %v12003_v60  ;;  %v5328_v36 = vpop.permute.xlu2 %5327 }
 0x85f   :  { %v5133_v32 = vmul.f32 %v10115_v51, %v12005_v8  ;;  %9069 = vmatmul.msk.bf16.vlgmr.msrb.gmra.mxu1 %vm3948_vm0, %v5328_v36  ;;  %v5299_v0 = vpop.permute.xlu1 %5298 }
 0x860   :  { %v5142_v49 = vpack.c.bf16 %v5134_v19, %v5134_v19  ;;  %9068 = vmatmul.msk.bf16.vlgmr.msrb.gmra.mxu0 %vm3948_vm0, %v5299_v0 }
 0x861   :  { %v5141_v24 = vpack.c.bf16 %v5133_v32, %v5133_v32 }
 0x862   :  { %9067 = vmatmul.msk.bf16.vlgmr.msra.gmra.mxu3 %vm4101_vm2, %v5142_v49 }
 0x863   :  { %9066 = vmatmul.msk.bf16.vlgmr.msra.gmra.mxu2 %vm4101_vm2, %v5141_v24 }
 0x866   :  { %v5420_v59 = vpop.permute.xlu2 %5419 }
 0x867   :  { %v5425_v12 = vsel %vm3948_vm0, %v5420_v59, 0  ;;  %v5386_v30 = vpop.permute.xlu1 %5385 }
 0x868   :  { %5434 = vmatpush.bf16.xpose.msra.mxu0 %v5425_v12 }
 0x86a   :  { %v5357_v60 = vpop.permute.xlu0 %5356 }
 0x86e   :  { %v5507_v4 = vpop.permute.xlu2 %5506 }
 0x86f   :  { %v5512_v8 = vsel %vm3948_vm0, %v5507_v4, 0  ;;  %v5478_v53 = vpop.permute.xlu1 %5477 }
 0x870   :  { %v5483_v50 = vsel %vm3948_vm0, %v5478_v53, 0  ;;  %5521 = vmatpush.bf16.xpose.msra.mxu3 %v5512_v8 }
 0x871   :  { %5492 = vmatpush.bf16.xpose.msra.mxu2 %v5483_v50 }
 0x872   :  { %v5449_v54 = vpop.permute.xlu0 %5448  ;;  %9071 = vmatmul.msk.bf16.vlgmr.msrb.gmra.mxu3 %vm3948_vm0, %v5386_v30 }
 0x873   :  { %v5454_v31 = vsel %vm3948_vm0, %v5449_v54, 0  ;;  %9070 = vmatmul.msk.bf16.vlgmr.msrb.gmra.mxu2 %vm3948_vm0, %v5357_v60 }
 0x874   :  { %5463 = vmatpush.bf16.xpose.msra.mxu1 %v5454_v31 }
 0x876   :  { %v5473_v61 = vpop.permute.xlu2 %5472 }
 0x877   :  { %v5444_v3 = vpop.permute.xlu1 %5443 }
 0x87a   :  { %v5415_v38 = vpop.permute.xlu0 %5414 }
 0x87b   :  { %9072 = vmatmul.msk.bf16.vlgmr.msra.gmra.mxu0 %vm3948_vm0, %v5415_v38  ;;  %9073 = vmatmul.msk.bf16.vlgmr.msra.gmra.mxu1 %vm3948_vm0, %v5444_v3 }
 0x882   :  { %v5502_v33 = vpop.permute.xlu0 %5501 }
 0x883   :  { %9074 = vmatmul.msk.bf16.vlgmr.msra.gmra.mxu2 %vm3948_vm0, %v5473_v61  ;;  %9075 = vmatmul.msk.bf16.vlgmr.msra.gmra.mxu3 %vm3948_vm0, %v5502_v33 }
 0x8a1   :  { %v12067_v34 = vpop.f32.mrf.mxu0 }
 0x8a9   :  { %v5160_v41 = vpop.f32.mrf.mxu0 }
 0x8b5   :  { %v12069_v43 = vpop.f32.mrf.mxu1 }
 0x8bd   :  { %v5179_v39 = vpop.f32.mrf.mxu1  ;;  %v12071_v2 = vpop.f32.mrf.mxu0 }
 0x8c5   :  { %v5236_v9 = vpop.f32.mrf.mxu0  ;;  %v12073_v28 = vpop.f32.mrf.mxu1 }
 0x8cd   :  { %v5255_v5 = vpop.f32.mrf.mxu1 }
 0x8d5   :  { %v12075_v15 = vpop.f32.mrf.mxu3 }
 0x8d6   :  { %v12077_v37 = vpop.f32.mrf.mxu2 }
 0x8dc   :  { %v5349_v40 = vpop.f32.mrf.mxu1 }
 0x8dd   :  { %v5217_v57 = vpop.f32.mrf.mxu3  ;;  %v5320_v56 = vpop.f32.mrf.mxu0  ;;  %v5530_v1 = vsel %vm4101_vm2, %v5349_v40, -inf }
 0x8de   :  { %5531 = vmax.xlane.f32.xlu2 %v5530_v1  ;;  %v5198_v45 = vpop.f32.mrf.mxu2  ;;  %v5527_v51 = vsel %vm4101_vm2, %v5320_v56, -inf  ;;  %v5648_v57 = vunpack.c.l.b16 %v11819_v11  ;;  %v5720_v11 = vunpack.c.l.b16 %v11811_v25 }
 0x8df   :  { %5528 = vmax.xlane.f32.xlu1 %v5527_v51  ;;  %v5672_v45 = vunpack.c.l.b16 %v11889_v47  ;;  %v5624_v51 = vunpack.c.l.b16 %v11775_v17 }
 0x8e0   :  { %v5649_v1 = vpack.c.b16 %v5648_v57, %v5648_v57 }
 0x8e4   :  { %v5351_v19 = vpop.f32.mrf.mxu1 }
 0x8e5   :  { %v12081_v36 = vpop.f32.mrf.mxu3  ;;  %v5322_v32 = vpop.f32.mrf.mxu0  ;;  %v5696_v19 = vunpack.c.l.b16 %v11885_v22 }
 0x8e6   :  { %v12083_v0 = vpop.f32.mrf.mxu2  ;;  %v5673_v32 = vpack.c.b16 %v5672_v45, %v5672_v45 }
 0x8ed   :  { %v5293_v49 = vpop.f32.mrf.mxu3 }
 0x8ee   :  { %v5274_v24 = vpop.f32.mrf.mxu2  ;;  %v5625_v49 = vpack.c.b16 %v5624_v51, %v5624_v51 }
 0x8ef   :  { %v5697_v24 = vpack.c.b16 %v5696_v19, %v5696_v19 }
 0x8f5   :  { %v12085_v59 = vpop.f32.mrf.mxu3 }
 0x8f6   :  { %v12087_v12 = vpop.f32.mrf.mxu2  ;;  %v5536_v30 = vsel %vm4101_vm2, %v12085_v59, -inf }
 0x8f7   :  { %5537 = vmax.xlane.f32.xlu1 %v5536_v30  ;;  %v5533_v38 = vsel %vm4101_vm2, %v12087_v12, -inf  ;;  %v5721_v30 = vpack.c.b16 %v5720_v11, %v5720_v11 }
 0x8f8   :  { %v5436_v60 = vpop.f32.mrf.mxu0  ;;  %v5465_v4 = vpop.f32.mrf.mxu1 }
 0x8f9   :  { %v5542_v8 = vsel %vm4101_vm2, %v5465_v4, -inf  ;;  %v5539_v53 = vsel %vm4101_vm2, %v5436_v60, -inf }
 0x8fa   :  { %5543 = vmax.xlane.f32.xlu0 %v5542_v8  ;;  %5540 = vmax.xlane.f32.xlu2 %v5539_v53 }
 0x8fd   :  { %v5409_v50 = vpop.f32.mrf.mxu3 }
 0x8fe   :  { %v5380_v54 = vpop.f32.mrf.mxu2 }
 0x900   :  { %v5438_v31 = vpop.f32.mrf.mxu0  ;;  %v5467_v3 = vpop.f32.mrf.mxu1 }
 0x902   :  { %5534 = vmax.xlane.f32.xlu0 %v5533_v38 }
 0x906   :  { %v12095_v61 = vpop.f32.mrf.mxu2  ;;  %v5523_v33 = vpop.f32.mrf.mxu3 }
 0x907   :  { %v5545_v41 = vsel %vm4101_vm2, %v12095_v61, -inf  ;;  %v5548_v39 = vsel %vm4101_vm2, %v5523_v33, -inf }
 0x908   :  { %5546 = vmax.xlane.f32.xlu1 %v5545_v41  ;;  %5549 = vmax.xlane.f32.xlu2 %v5548_v39 }
 0x90e   :  { %v5496_v9 = vpop.f32.mrf.mxu2  ;;  %v5525_v5 = vpop.f32.mrf.mxu3 }
 0x916   :  { %5650 = vrot.lane.b32.xlu0 %v5649_v1, %s10623_s12 }
 0x91e   :  { %5674 = vrot.lane.b32.xlu0 %v5673_v32, %s10623_s12 }
 0x920   :  { %5626 = vrot.lane.b32.xlu2 %v5625_v49, %s10623_s12 }
 0x921   :  { %5698 = vrot.lane.b32.xlu1 %v5697_v24, %s10623_s12 }
 0x929   :  { %5722 = vrot.lane.b32.xlu1 %v5721_v30, %s10623_s12 }
 0x951   :  { %v5532_v8 = vpop.xlane.xlu2 %5531 }
 0x952   :  { %v5552_v47 = vsub.f32 %v5349_v40, %v5532_v8  ;;  %v5529_v53 = vpop.xlane.xlu1 %5528 }
 0x953   :  { %v5551_v17 = vsub.f32 %v5320_v56, %v5529_v53 }
 0x954   :  { %v5561_v50 = vmul.f32 1.442695, %v5552_v47 }
 0x955   :  { %v5559_v22 = vmul.f32 1.442695, %v5551_v17 }
 0x956   :  { %10116 = vpow2.f32 %v5561_v50  ;;  %v5792_v50 = vunpack.c.l.b16 %v11913_v20 }
 0x957   :  { %10118 = vpow2.f32 %v5559_v22 }
 0x95c   :  { %v12110_v54 = vpop.eup %10116 }
 0x95d   :  { %v12112_v31 = vpop.eup %10118  ;;  %v5578_v3 = vsel %vm4101_vm2, %v12110_v54, 0.0 }
 0x95e   :  { %5579 = vadd.xlane.f32.xlu1 %v5578_v3  ;;  %v5575_v25 = vsel %vm4101_vm2, %v12112_v31, 0.0 }
 0x95f   :  { %5576 = vadd.xlane.f32.xlu0 %v5575_v25 }
 0x96a   :  { %v5538_v5 = vpop.xlane.xlu1 %5537 }
 0x96b   :  { %v5554_v51 = vsub.f32 %v12085_v59, %v5538_v5 }
 0x96d   :  { %v5544_v38 = vpop.xlane.xlu0 %5543  ;;  %v5541_v40 = vpop.xlane.xlu2 %5540  ;;  %v5565_v24 = vmul.f32 1.442695, %v5554_v51 }
 0x96e   :  { %v5556_v41 = vsub.f32 %v5465_v4, %v5544_v38  ;;  %v5555_v56 = vsub.f32 %v5436_v60, %v5541_v40  ;;  %v5793_v40 = vpack.c.b16 %v5792_v50, %v5792_v50  ;;  %v9126_v50 = vld [vmem:[#allocation13 + $0x50] sm:$0xf] }
 0x970   :  { %v5569_v39 = vmul.f32 1.442695, %v5556_v41  ;;  %v5567_v9 = vmul.f32 1.442695, %v5555_v56 }
 0x972   :  { %10120 = vpow2.f32 %v5569_v39 }
 0x973   :  { %10122 = vpow2.f32 %v5567_v9  ;;  %v5768_v9 = vunpack.c.l.b16 %v11917_v42 }
 0x975   :  { %v5535_v57 = vpop.xlane.xlu0 %5534  ;;  %v5769_v51 = vpack.c.b16 %v5768_v9, %v5768_v9  ;;  %v9094_v9 = vld [vmem:[#allocation13 + $0x10] sm:$0xf] }
 0x976   :  { %v5553_v1 = vsub.f32 %v12087_v12, %v5535_v57 }
 0x978   :  { %v12119_v45 = vpop.eup %10120  ;;  %v5563_v19 = vmul.f32 1.442695, %v5553_v1  ;;  %v5744_v1 = vunpack.c.l.b16 %v11872_v27 }
 0x979   :  { %v12122_v32 = vpop.eup %10122  ;;  %v5590_v49 = vsel %vm4101_vm2, %v12119_v45, 0.0 }
 0x97a   :  { %10124 = vpow2.f32 %v5563_v19  ;;  %5591 = vadd.xlane.f32.xlu0 %v5590_v49  ;;  %v5587_v60 = vsel %vm4101_vm2, %v12122_v32, 0.0  ;;  %v5745_v19 = vpack.c.b16 %v5744_v1, %v5744_v1  ;;  %v9875_v49 = vld [vmem:[#allocation13 + $0x74] sm:$0xf0]  ;;  %v9086_v1 = vld [vmem:[#allocation13] sm:$0xf] }
 0x97b   :  { %5588 = vadd.xlane.f32.xlu2 %v5587_v60  ;;  %v5550_v4 = vpop.xlane.xlu2 %5549  ;;  %10126 = vpow2.f32 %v5565_v24  ;;  %v5547_v38 = vpop.xlane.xlu1 %5546 }
 0x97c   :  { %v5558_v11 = vsub.f32 %v5523_v33, %v5550_v4  ;;  %v5557_v46 = vsub.f32 %v12095_v61, %v5547_v38  ;;  %v9867_v38 = vld [vmem:[#allocation13 + $0x34] sm:$0xf0] }
 0x97e   :  { %v5573_v12 = vmul.f32 1.442695, %v5558_v11  ;;  %v5571_v42 = vmul.f32 1.442695, %v5557_v46 }
 0x980   :  { %v12128_v30 = vpop.eup %10124  ;;  %10128 = vpow2.f32 %v5573_v12 }
 0x981   :  { %v5581_v59 = vsel %vm4101_vm2, %v12128_v30, 0.0  ;;  %v12133_v53 = vpop.eup %10126  ;;  %10130 = vpow2.f32 %v5571_v42 }
 0x982   :  { %5582 = vadd.xlane.f32.xlu1 %v5581_v59  ;;  %v5584_v25 = vsel %vm4101_vm2, %v12133_v53, 0.0  ;;  %v9134_v59 = vld [vmem:[#allocation13 + $0x60] sm:$0xf] }
 0x983   :  { %v5627_v8 = vpop.permute.xlu2 %5626 }
 0x984   :  { %v5632_v47 = vsel %vm4201_vm1, %v5627_v8, 0  ;;  %v9873_v8 = vld [vmem:[#allocation13 + $0x64] sm:$0xf0] }
 0x985   :  { %5641 = vmatpush.bf16.msrb.mxu0 %v5632_v47  ;;  %v9135_v47 = vor.u32 %v9873_v8, %v9134_v59 }
 0x986   :  { %v12135_v17 = vpop.eup %10128 }
 0x987   :  { %v5596_v22 = vsel %vm4101_vm2, %v12135_v17, 0.0  ;;  %v12160_v52 = vpop.eup %10130 }
 0x988   :  { %v5651_v33 = vpop.permute.xlu0 %5650  ;;  %5597 = vadd.xlane.f32.xlu2 %v5596_v22  ;;  %v5593_v27 = vsel %vm4101_vm2, %v12160_v52, 0.0 }
 0x989   :  { %v5656_v3 = vsel %vm4201_vm1, %v5651_v33, 0  ;;  %v9871_v33 = vld [vmem:[#allocation13 + $0x54] sm:$0xf0] }
 0x98a   :  { %5665 = vmatpush.bf16.msrb.mxu1 %v5656_v3  ;;  %5585 = vadd.xlane.f32.xlu1 %v5584_v25  ;;  %v9127_v22 = vor.u32 %v9871_v33, %v9126_v50  ;;  %v9118_v3 = vld [vmem:[#allocation13 + $0x40] sm:$0xf]  ;;  %v9869_v25 = vld [vmem:[#allocation13 + $0x44] sm:$0xf0] }
 0x98e   :  { %5794 = vrot.lane.b32.xlu0 %v5793_v40, %s10623_s12 }
 0x990   :  { %v5675_v41 = vpop.permute.xlu0 %5674 }
 0x991   :  { %v5680_v56 = vsel %vm4201_vm1, %v5675_v41, 0  ;;  %v9102_v41 = vld [vmem:[#allocation13 + $0x20] sm:$0xf] }
 0x992   :  { %5689 = vmatpush.bf16.msrb.mxu2 %v5680_v56  ;;  %v9865_v56 = vld [vmem:[#allocation13 + $0x24] sm:$0xf0] }
 0x993   :  { %v5699_v20 = vpop.permute.xlu1 %5698 }
 0x994   :  { %v5704_v39 = vsel %vm4201_vm1, %v5699_v20, 0 }
 0x995   :  { %5713 = vmatpush.bf16.msrb.mxu3 %v5704_v39  ;;  %v9103_v39 = vor.u32 %v9865_v56, %v9102_v41 }
 0x996   :  { %9981 = vrot.lane.b32.xlu0 %v9980_v23, %s10623_s12 }
 0x99b   :  { %v5723_v5 = vpop.permute.xlu1 %5722 }
 0x99c   :  { %v5728_v57 = vsel %vm4201_vm1, %v5723_v5, 0  ;;  %v9863_v5 = vld [vmem:[#allocation13 + $0x14] sm:$0xf0] }
 0x99d   :  { %5737 = vmatpush.bf16.msra.mxu0 %v5728_v57  ;;  %v9095_v57 = vor.u32 %v9863_v5, %v9094_v9  ;;  %v9136_v5 = vld [vmem:[#allocation13 + $0x68] sm:$0xf0] }
 0x99e   :  { %9991 = vrot.lane.b32.xlu0 %v9990_v58, %s10623_s12  ;;  %v9142_v58 = vld [vmem:[#allocation13 + $0x70] sm:$0xf] }
 0x99f   :  { %v9143_v11 = vor.u32 %v9875_v49, %v9142_v58 }
 0x9a0   :  { %5770 = vrot.lane.b32.xlu2 %v5769_v51, %s10623_s12  ;;  %v9861_v51 = vld [vmem:[#allocation13 + $0x4] sm:$0xf0] }
 0x9a3   :  { %5746 = vrot.lane.b32.xlu1 %v5745_v19, %s10623_s12  ;;  %v9087_v19 = vor.u32 %v9861_v51, %v9086_v1  ;;  %v9870_v1 = vld [vmem:[#allocation13 + $0x54] sm:$0xf]  ;;  %v9128_v51 = vld [vmem:[#allocation13 + $0x58] sm:$0xf0] }
 0x9cd   :  { %5594 = vadd.xlane.f32.xlu1 %v5593_v27 }
 0x9d1   :  { %v5580_v23 = vpop.xlane.xlu1 %5579 }
 0x9d2   :  { %10132 = vrcp.f32 %v5580_v23  ;;  %v5577_v10 = vpop.xlane.xlu0 %5576 }
 0x9d3   :  { %10134 = vrcp.f32 %v5577_v10 }
 0x9d8   :  { %v10133_v21 = vpop.eup %10132 }
 0x9d9   :  { %v10135_v60 = vpop.eup %10134  ;;  %v5608_v4 = vmul.f32 %v10133_v21, %v12110_v54  ;;  %v9119_v54 = vor.u32 %v9869_v25, %v9118_v3 }
 0x9da   :  { %v5607_v61 = vmul.f32 %v10135_v60, %v12112_v31  ;;  %v9110_v31 = vld [vmem:[#allocation13 + $0x30] sm:$0xf]  ;;  %v9874_v60 = vld [vmem:[#allocation13 + $0x74] sm:$0xf] }
 0x9db   :  { %v5616_v24 = vpack.c.bf16 %v5608_v4, %v5608_v4  ;;  %v9111_v40 = vor.u32 %v9867_v38, %v9110_v31  ;;  %v9144_v4 = vld [vmem:[#allocation13 + $0x78] sm:$0xf0] }
 0x9dc   :  { %v5615_v12 = vpack.c.bf16 %v5607_v61, %v5607_v61  ;;  %v9147_v61 = vor.u32 %v9874_v60, %v9144_v4  ;;  %v9088_v60 = vld [vmem:[#allocation13 + $0x8] sm:$0xf0] }
 0x9dd   :  { %9077 = vmatmul.msk.bf16.vlgmr.msrb.gmra.mxu1 %vm4101_vm2, %v5616_v24 }
 0x9de   :  { %9076 = vmatmul.msk.bf16.vlgmr.msrb.gmra.mxu0 %vm4101_vm2, %v5615_v12 }
 0x9df   :  { %6101 = vmatpush.bf16.msrb.mxu0 %v9143_v11 }
 0x9e3   :  { %6102 = vmatpush.bf16.msrb.mxu0 %v9135_v47 }
 0x9e6   :  { %10001 = vrot.lane.b32.xlu1 %v10000_v55, %s10623_s12 }
 0x9e7   :  { %6103 = vmatpush.bf16.msrb.mxu0 %v9127_v22 }
 0x9eb   :  { %6104 = vmatpush.bf16.msrb.mxu0 %v9119_v54 }
 0x9ed   :  { %v5592_v46 = vpop.xlane.xlu0 %5591 }
 0x9ee   :  { %v5589_v20 = vpop.xlane.xlu2 %5588 }
 0x9ef   :  { %10136 = vrcp.f32 %v5589_v20  ;;  %6105 = vmatpush.bf16.msrb.mxu0 %v9111_v40 }
 0x9f3   :  { %6106 = vmatpush.bf16.msrb.mxu0 %v9103_v39 }
 0x9f5   :  { %v10137_v63 = vpop.eup %10136  ;;  %v5583_v29 = vpop.xlane.xlu1 %5582 }
 0x9f6   :  { %v5611_v55 = vmul.f32 %v10137_v63, %v12122_v32  ;;  %10138 = vrcp.f32 %v5583_v29  ;;  %v9131_v63 = vor.u32 %v9870_v1, %v9128_v51  ;;  %v9868_v29 = vld [vmem:[#allocation13 + $0x44] sm:$0xf]  ;;  %v9192_v1 = vld [vmem:[#allocation13 + $0xd8] sm:$0xf0] }
 0x9f7   :  { %6107 = vmatpush.bf16.msrb.mxu0 %v9095_v57 }
 0x9f8   :  { %v5619_v42 = vpack.c.bf16 %v5611_v55, %v5611_v55  ;;  %v9120_v55 = vld [vmem:[#allocation13 + $0x48] sm:$0xf0] }
 0x9fa   :  { %9080 = vmatmul.msk.bf16.vlgmr.msra.gmra.mxu0 %vm4101_vm2, %v5619_v42 }
 0x9fb   :  { %6108 = vmatpush.bf16.msrb.mxu0 %v9087_v19  ;;  %v5598_v23 = vpop.xlane.xlu2 %5597  ;;  %v9123_v19 = vor.u32 %v9868_v29, %v9120_v55  ;;  %v9182_v29 = vld [vmem:[#allocation13 + $0xc0] sm:$0xf]  ;;  %v9885_v55 = vld [vmem:[#allocation13 + $0xc4] sm:$0xf0] }
 0x9fc   :  { %v10139_v27 = vpop.eup %10138 }
 0x9fd   :  { %v5609_v10 = vmul.f32 %v10139_v27, %v12128_v30  ;;  %v5586_v21 = vpop.xlane.xlu1 %5585  ;;  %v9104_v27 = vld [vmem:[#allocation13 + $0x28] sm:$0xf0] }
 0x9fe   :  { %10140 = vrcp.f32 %v5586_v21  ;;  %v9096_v21 = vld [vmem:[#allocation13 + $0x18] sm:$0xf0] }
 0x9ff   :  { %v5617_v58 = vpack.c.bf16 %v5609_v10, %v5609_v10  ;;  %10142 = vrcp.f32 %v5598_v23  ;;  %v9862_v10 = vld [vmem:[#allocation13 + $0x14] sm:$0xf] }
 0xa00   :  { %v5795_v49 = vpop.permute.xlu0 %5794  ;;  %10144 = vrcp.f32 %v5592_v46  ;;  %v9866_v46 = vld [vmem:[#allocation13 + $0x34] sm:$0xf] }
 0xa01   :  { %v5800_v32 = vsel %vm4201_vm1, %v5795_v49, 0  ;;  %9078 = vmatmul.msk.bf16.vlgmr.msrb.gmra.mxu2 %vm4101_vm2, %v5617_v58  ;;  %v9099_v58 = vor.u32 %v9862_v10, %v9096_v21  ;;  %v9860_v49 = vld [vmem:[#allocation13 + $0x4] sm:$0xf]  ;;  %v9883_v10 = vld [vmem:[#allocation13 + $0xb4] sm:$0xf0] }
 0xa02   :  { %5809 = vmatpush.bf16.msra.mxu3 %v5800_v32  ;;  %v9091_v4 = vor.u32 %v9860_v49, %v9088_v60  ;;  %v9176_v49 = vld [vmem:[#allocation13 + $0xb8] sm:$0xf0] }
 0xa03   :  { %v5771_v11 = vpop.permute.xlu2 %5770 }
 0xa04   :  { %v10141_v24 = vpop.eup %10140  ;;  %v5776_v59 = vsel %vm4201_vm1, %v5771_v11, 0 }
 0xa05   :  { %v5610_v12 = vmul.f32 %v10141_v24, %v12133_v53  ;;  %5785 = vmatpush.bf16.msra.mxu2 %v5776_v59  ;;  %v10143_v53 = vpop.eup %10142 }
 0xa06   :  { %v10145_v25 = vpop.eup %10144  ;;  %v5614_v31 = vmul.f32 %v10143_v53, %v12135_v17 }
 0xa07   :  { %v5618_v30 = vpack.c.bf16 %v5610_v12, %v5610_v12  ;;  %v5612_v38 = vmul.f32 %v10145_v25, %v12119_v45  ;;  %v9872_v45 = vld [vmem:[#allocation13 + $0x64] sm:$0xf] }
 0xa08   :  { %v9982_v8 = vpop.permute.xlu0 %9981  ;;  %v5622_v39 = vpack.c.bf16 %v5614_v31, %v5614_v31  ;;  %v9139_v57 = vor.u32 %v9872_v45, %v9136_v5  ;;  %v9190_v45 = vld [vmem:[#allocation13 + $0xd0] sm:$0xf] }
 0xa09   :  { %6159 = vmatpush.bf16.msrb.mxu2 %v9147_v61  ;;  %v9984_v47 = vunpack.i.h.bf16 %v9982_v8  ;;  %v9983_v50 = vunpack.i.l.bf16 %v9982_v8  ;;  %9079 = vmatmul.msk.bf16.vlgmr.msrb.gmra.mxu3 %vm4101_vm2, %v5618_v30 }
 0xa0b   :  { %v5880_v33 = vsel %vm3948_vm0, %v11671_v48, %v9984_v47  ;;  %v5879_v22 = vsel %vm3948_vm0, %v11669_v62, %v9983_v50  ;;  %v5620_v48 = vpack.c.bf16 %v5612_v38, %v5612_v38  ;;  %v9206_v38 = vld [vmem:[#allocation13 + $0xf0] sm:$0xf] }
 0xa0c   :  { %v5895_v3 = vpack.c.bf16 %v5880_v33, %v5879_v22 }
 0xa0d   :  { %6160 = vmatpush.bf16.msrb.mxu2 %v9139_v57  ;;  %v9886_v57 = vld [vmem:[#allocation13 + $0xd4] sm:$0xf] }
 0xa0e   :  { %6109 = vmatmul.bf16.vlgmr.msrb.gmra.mxu0 %v5895_v3 }
 0xa10   :  { %v9992_v54 = vpop.permute.xlu0 %9991 }
 0xa11   :  { %v9994_v40 = vunpack.i.h.bf16 %v9992_v54  ;;  %v9993_v41 = vunpack.i.l.bf16 %v9992_v54  ;;  %6161 = vmatpush.bf16.msrb.mxu2 %v9131_v63  ;;  %v9195_v63 = vor.u32 %v9886_v57, %v9192_v1 }
 0xa13   :  { %v5881_v62 = vsel %vm3948_vm0, %v11675_v44, %v9993_v41  ;;  %v5882_v9 = vsel %vm3948_vm0, %v11673_v26, %v9994_v40  ;;  %v9112_v44 = vld [vmem:[#allocation13 + $0x38] sm:$0xf0]  ;;  %v9864_v26 = vld [vmem:[#allocation13 + $0x24] sm:$0xf]  ;;  %v9891_v40 = vld [vmem:[#allocation13 + $0xf4] sm:$0xf0] }
 0xa14   :  { %v5897_v17 = vpack.c.bf16 %v5882_v9, %v5881_v62  ;;  %v9115_v42 = vor.u32 %v9866_v46, %v9112_v44  ;;  %v9107_v23 = vor.u32 %v9864_v26, %v9104_v27  ;;  %v9890_v41 = vld [vmem:[#allocation13 + $0xf4] sm:$0xf]  ;;  %v9200_v9 = vld [vmem:[#allocation13 + $0xe8] sm:$0xf0]  ;;  %v9183_v44 = vor.u32 %v9885_v55, %v9182_v29 }
 0xa15   :  { %v5747_v56 = vpop.permute.xlu1 %5746  ;;  %6162 = vmatpush.bf16.msrb.mxu2 %v9123_v19  ;;  %v9884_v19 = vld [vmem:[#allocation13 + $0xc4] sm:$0xf]  ;;  %v9184_v46 = vld [vmem:[#allocation13 + $0xc8] sm:$0xf0] }
 0xa16   :  { %v5752_v20 = vsel %vm4201_vm1, %v5747_v56, 0  ;;  %v9208_v56 = vld [vmem:[#allocation13 + $0xf8] sm:$0xf0]  ;;  %v9187_v27 = vor.u32 %v9884_v19, %v9184_v46 }
 0xa17   :  { %5761 = vmatpush.bf16.msra.mxu1 %v5752_v20  ;;  %v9211_v20 = vor.u32 %v9890_v41, %v9208_v56  ;;  %v9876_v41 = vld [vmem:[#allocation13 + $0x84] sm:$0xf]  ;;  %v9152_v56 = vld [vmem:[#allocation13 + $0x88] sm:$0xf0] }
 0xa19   :  { %9083 = vmatmul.msk.bf16.vlgmr.msra.gmra.mxu3 %vm4101_vm2, %v5622_v39  ;;  %6163 = vmatpush.bf16.msrb.mxu2 %v9115_v42  ;;  %v9889_v39 = vld [vmem:[#allocation13 + $0xe4] sm:$0xf0] }
 0xa1a   :  { %9081 = vmatmul.msk.bf16.vlgmr.msra.gmra.mxu1 %vm4101_vm2, %v5620_v48  ;;  %6188 = vmatpush.bf16.msrb.mxu3 %v9211_v20  ;;  %v9888_v48 = vld [vmem:[#allocation13 + $0xe4] sm:$0xf]  ;;  %v9155_v20 = vor.u32 %v9876_v41, %v9152_v56 }
 0xa1b   :  { %v9203_v5 = vor.u32 %v9888_v48, %v9200_v9 }
 0xa1d   :  { %6164 = vmatpush.bf16.msrb.mxu2 %v9107_v23  ;;  %v9174_v23 = vld [vmem:[#allocation13 + $0xb0] sm:$0xf] }
 0xa1e   :  { %6114 = vmatmul.bf16.gmra.mxu0 %v5897_v17  ;;  %6189 = vmatpush.bf16.msrb.mxu3 %v9203_v5  ;;  %v9175_v60 = vor.u32 %v9883_v10, %v9174_v23  ;;  %v5935_v23 = vld [vmem:[#allocation14] sm:$0x3] }
 0xa21   :  { %6165 = vmatpush.bf16.msrb.mxu2 %v9099_v58  ;;  %v9882_v58 = vld [vmem:[#allocation13 + $0xb4] sm:$0xf] }
 0xa22   :  { %6190 = vmatpush.bf16.msrb.mxu3 %v9195_v63 }
 0xa25   :  { %6166 = vmatpush.bf16.msrb.mxu2 %v9091_v4  ;;  %v9179_v4 = vor.u32 %v9882_v58, %v9176_v49 }
 0xa26   :  { %6191 = vmatpush.bf16.msrb.mxu3 %v9187_v27 }
 0xa2a   :  { %6192 = vmatpush.bf16.msrb.mxu3 %v9179_v4 }
 0xa40   :  { %v5595_v32 = vpop.xlane.xlu1 %5594 }
 0xa41   :  { %10146 = vrcp.f32 %v5595_v32  ;;  %v9166_v32 = vld [vmem:[#allocation13 + $0xa0] sm:$0xf] }
 0xa47   :  { %v10147_v61 = vpop.eup %10146 }
 0xa48   :  { %v5613_v24 = vmul.f32 %v10147_v61, %v12160_v52  ;;  %v9881_v61 = vld [vmem:[#allocation13 + $0xa4] sm:$0xf0] }
 0xa4a   :  { %v5621_v11 = vpack.c.bf16 %v5613_v24, %v5613_v24  ;;  %v9880_v24 = vld [vmem:[#allocation13 + $0xa4] sm:$0xf] }
 0xa4c   :  { %9082 = vmatmul.msk.bf16.vlgmr.msra.gmra.mxu2 %vm4101_vm2, %v5621_v11  ;;  %v9168_v11 = vld [vmem:[#allocation13 + $0xa8] sm:$0xf0] }
 0xa58   :  { %v10002_v12 = vpop.permute.xlu1 %10001 }
 0xa59   :  { %v10004_v59 = vunpack.i.h.bf16 %v10002_v12  ;;  %v10003_v30 = vunpack.i.l.bf16 %v10002_v12  ;;  %v9167_v12 = vor.u32 %v9881_v61, %v9166_v32 }
 0xa5a   :  { %v5667_v8 = vpop.f32.mrf.mxu1 }
 0xa5b   :  { %v5643_v47 = vpop.f32.mrf.mxu0  ;;  %v5883_v50 = vsel %vm3948_vm0, %v11687_v6, %v10003_v30  ;;  %v5884_v33 = vsel %vm3948_vm0, %v11677_v16, %v10004_v59  ;;  %v9207_v6 = vor.u32 %v9891_v40, %v9206_v38  ;;  %v9171_v30 = vor.u32 %v9880_v24, %v9168_v11  ;;  %v9150_v38 = vld [vmem:[#allocation13 + $0x80] sm:$0xf]  ;;  %v9877_v40 = vld [vmem:[#allocation13 + $0x84] sm:$0xf0] }
 0xa5c   :  { %v9985_v22 = vpack.i.bf16 %v5667_v8, %v5643_v47  ;;  %6167 = vmatmul.bf16.vlgmr.msrb.gmra.mxu2 %v5895_v3  ;;  %v5899_v53 = vpack.c.bf16 %v5884_v33, %v5883_v50  ;;  %v9198_v3 = vld [vmem:[#allocation13 + $0xe0] sm:$0xf]  ;;  %v9158_v8 = vld [vmem:[#allocation13 + $0x90] sm:$0xf]  ;;  %v9879_v47 = vld [vmem:[#allocation13 + $0x94] sm:$0xf0] }
 0xa5d   :  { %6130 = vmatpush.bf16.msrb.mxu1 %v9207_v6  ;;  %v9199_v62 = vor.u32 %v9889_v39, %v9198_v3  ;;  %v9878_v50 = vld [vmem:[#allocation13 + $0x94] sm:$0xf]  ;;  %v9160_v33 = vld [vmem:[#allocation13 + $0x98] sm:$0xf0]  ;;  %6193 = vmatpush.bf16.msrb.mxu3 %v9171_v30  ;;  %v9151_v6 = vor.u32 %v9877_v40, %v9150_v38 }
 0xa5e   :  { %6119 = vmatmul.bf16.gmra.mxu0 %v5899_v53  ;;  %9986 = vrot.lane.b32.xlu2 %v9985_v22, %s10623_s12 }
 0xa61   :  { %6131 = vmatpush.bf16.msrb.mxu1 %v9199_v62 }
 0xa62   :  { %v5669_v52 = vpop.f32.mrf.mxu1 }
 0xa63   :  { %v5645_v25 = vpop.f32.mrf.mxu0 }
 0xa64   :  { %v9163_v25 = vor.u32 %v9878_v50, %v9160_v33 }
 0xa66   :  { %6194 = vmatpush.bf16.msrb.mxu3 %v9163_v25 }
 0xa6a   :  { %6195 = vmatpush.bf16.msrb.mxu3 %v9155_v20 }
 0xa6c   :  { %6172 = vmatmul.bf16.gmra.mxu2 %v5897_v17  ;;  %v9887_v17 = vld [vmem:[#allocation13 + $0xd4] sm:$0xf0] }
 0xa6d   :  { %v9191_v51 = vor.u32 %v9887_v17, %v9190_v45 }
 0xa6f   :  { %6132 = vmatpush.bf16.msrb.mxu1 %v9191_v51 }
 0xa73   :  { %6133 = vmatpush.bf16.msrb.mxu1 %v9183_v44 }
 0xa77   :  { %v12200_v54 = vpop.f32.mrf.mxu0  ;;  %6134 = vmatpush.bf16.msrb.mxu1 %v9175_v60 }
 0xa7b   :  { %6135 = vmatpush.bf16.msrb.mxu1 %v9167_v12 }
 0xa7c   :  { %6177 = vmatmul.bf16.gmra.mxu2 %v5899_v53  ;;  %v9159_v53 = vor.u32 %v9879_v47, %v9158_v8 }
 0xa7f   :  { %v5741_v31 = vpop.f32.mrf.mxu0  ;;  %6136 = vmatpush.bf16.msrb.mxu1 %v9159_v53 }
 0xa83   :  { %6137 = vmatpush.bf16.msrb.mxu1 %v9151_v6 }
 0xa84   :  { %v5691_v16 = vpop.f32.mrf.mxu2 }
 0xa8c   :  { %v5693_v42 = vpop.f32.mrf.mxu2  ;;  %v5715_v26 = vpop.f32.mrf.mxu3 }
 0xa8d   :  { %v9995_v21 = vpack.i.bf16 %v5715_v26, %v5691_v16 }
 0xa8f   :  { %9996 = vrot.lane.b32.xlu2 %v9995_v21, %s10623_s12  ;;  %v12226_v21 = vperm.slane %v5935_v23, 0 }
 0xa94   :  { %v5717_v59 = vpop.f32.mrf.mxu3 }
 0xa97   :  { %v5763_v22 = vpop.f32.mrf.mxu1  ;;  %10011 = vrot.lane.b32.xlu2 %v10010_v18, %s10623_s12 }
 0xa98   :  { %v10005_v52 = vpack.i.bf16 %v5763_v22, %v12200_v54 }
 0xa9a   :  { %10006 = vrot.lane.b32.xlu0 %v10005_v52, %s10623_s12 }
 0xa9c   :  { %v5811_v31 = vpop.f32.mrf.mxu3 }
 0xa9f   :  { %v5765_v16 = vpop.f32.mrf.mxu1 }
 0xaa4   :  { %v5813_v7 = vpop.f32.mrf.mxu3 }
 0xab8   :  { %v9987_v13 = vpop.permute.xlu2 %9986 }
 0xab9   :  { %v9989_v18 = vunpack.i.h.bf16 %v9987_v13  ;;  %v9988_v54 = vunpack.i.l.bf16 %v9987_v13 }
 0xabb   :  { %v5888_v3 = vsel %vm3948_vm0, %v12069_v43, %v9989_v18  ;;  %v5887_v39 = vsel %vm3948_vm0, %v12067_v34, %v9988_v54 }
 0xabc   :  { %v5896_v48 = vpack.c.bf16 %v5888_v3, %v5887_v39 }
 0xabe   :  { %6138 = vmatmul.bf16.vlgmr.msrb.gmra.mxu1 %v5896_v48  ;;  %6196 = vmatmul.bf16.vlgmr.msrb.gmra.mxu3 %v5896_v48 }
 0xacf   :  { %v5787_v62 = vpop.f32.mrf.mxu2 }
 0xad0   :  { %v10015_v9 = vpack.i.bf16 %v5811_v31, %v5787_v62 }
 0xad2   :  { %10016 = vrot.lane.b32.xlu0 %v10015_v9, %s10623_s12 }
 0xad7   :  { %v5789_v45 = vpop.f32.mrf.mxu2 }
 0xadf   :  { %v6168_v10 = vpop.f32.mrf.mxu2 }
 0xae7   :  { %v6170_v11 = vpop.f32.mrf.mxu2 }
 0xae9   :  { %v9997_v17 = vpop.permute.xlu2 %9996 }
 0xaea   :  { %v9999_v5 = vunpack.i.h.bf16 %v9997_v17  ;;  %v9998_v57 = vunpack.i.l.bf16 %v9997_v17 }
 0xaec   :  { %v5889_v1 = vsel %vm3948_vm0, %v12077_v37, %v9998_v57  ;;  %v5890_v43 = vsel %vm3948_vm0, %v12075_v15, %v9999_v5 }
 0xaed   :  { %v5898_v51 = vpack.c.bf16 %v5890_v43, %v5889_v1 }
 0xaef   :  { %6143 = vmatmul.bf16.gmra.mxu1 %v5898_v51  ;;  %6201 = vmatmul.bf16.gmra.mxu3 %v5898_v51  ;;  %v6173_v38 = vpop.f32.mrf.mxu2 }
 0xaf1   :  { %v10012_v34 = vpop.permute.xlu2 %10011 }
 0xaf2   :  { %v10014_v63 = vunpack.i.h.bf16 %v10012_v34  ;;  %v10013_v29 = vunpack.i.l.bf16 %v10012_v34 }
 0xaf4   :  { %v5885_v55 = vsel %vm3948_vm0, %v11679_v14, %v10013_v29  ;;  %v5886_v19 = vsel %vm3948_vm0, %v11683_v35, %v10014_v63  ;;  %v6110_v14 = vpop.f32.mrf.mxu0  ;;  %v12228_v35 = vperm.slane %v5935_v23, 1 }
 0xaf5   :  { %v5901_v46 = vpack.c.bf16 %v5886_v19, %v5885_v55  ;;  %v6111_v49 = vadd.f32 %v6110_v14, %v12226_v21 }
 0xaf6   :  { %v6169_v60 = vadd.f32 %v6168_v10, %v12228_v35  ;;  %v6171_v33 = vadd.f32 %v6170_v11, %v12228_v35  ;;  %v6174_v41 = vadd.f32 %v6173_v38, %v12228_v35 }
 0xaf7   :  { %6124 = vmatmul.bf16.gmra.mxu0 %v5901_v46  ;;  %6182 = vmatmul.bf16.gmra.mxu2 %v5901_v46  ;;  %v6175_v13 = vpop.f32.mrf.mxu2 }
 0xaf8   :  { %v6176_v3 = vadd.f32 %v6175_v13, %v12228_v35 }
 0xafc   :  { %v6112_v24 = vpop.f32.mrf.mxu0 }
 0xafd   :  { %v6113_v50 = vadd.f32 %v6112_v24, %v12226_v21 }
 0xaff   :  { %v6178_v17 = vpop.f32.mrf.mxu2 }
 0xb00   :  { %v6179_v1 = vadd.f32 %v6178_v17, %v12228_v35 }
 0xb07   :  { %v6180_v55 = vpop.f32.mrf.mxu2 }
 0xb0c   :  { %v10007_v44 = vpop.permute.xlu0 %10006 }
 0xb0d   :  { %v10009_v37 = vunpack.i.h.bf16 %v10007_v44  ;;  %v10008_v42 = vunpack.i.l.bf16 %v10007_v44  ;;  %v6181_v44 = vadd.f32 %v6180_v55, %v12228_v35 }
 0xb0f   :  { %v5891_v15 = vsel %vm3948_vm0, %v12071_v2, %v10008_v42  ;;  %v5892_v26 = vsel %vm3948_vm0, %v12073_v28, %v10009_v37 }
 0xb10   :  { %v5900_v27 = vpack.c.bf16 %v5892_v26, %v5891_v15  ;;  %v10624_v26 = vmov 256.0  }
 0xb11   :  { %10148 = vrcp.f32 %v10624_v26 }
 0xb12   :  { %6148 = vmatmul.bf16.gmra.mxu1 %v5900_v27  ;;  %6206 = vmatmul.bf16.gmra.mxu3 %v5900_v27 }
 0xb17   :  { %v10149_v23 = vpop.eup %10148 }
 0xb18   :  { %v6244_v14 = vmul.f32 256.0, %v10149_v23  ;;  %vm6248_vm3 = vweird.f32 %v10149_v23 }
 0xb1a   :  { %v6245_v10 = vsub.f32 1.0, %v6244_v14 }
 0xb3b   :  { %v6139_v58 = vpop.f32.mrf.mxu1 }
 0xb3c   :  { %v12232_v2 = vadd.f32 %v6139_v58, %v6111_v49  ;;  %v6246_v58 = vmul.f32 %v10149_v23, %v6245_v10 }
 0xb3e   :  { %v6247_v49 = vadd.f32 %v10149_v23, %v6246_v58 }
 0xb41   :  { %v6197_v4 = vpop.f32.mrf.mxu3 }
 0xb42   :  { %v12234_v32 = vadd.f32 %v6197_v4, %v6169_v60  ;;  %v12282_v60 = vsel %vm6248_vm3, %v10149_v23, %v6247_v49  ;;  %v9270_v49 = vld [vmem:[#allocation22 + $0x70] sm:$0xf] }
 0xb43   :  { %v6141_v30 = vpop.f32.mrf.mxu1 }
 0xb44   :  { %v10017_v28 = vpop.permute.xlu0 %10016  ;;  %v6219_v61 = vadd.f32 %v12234_v32, %v12232_v2  ;;  %v12244_v52 = vadd.f32 %v6141_v30, %v6113_v50 }
 0xb45   :  { %v10019_v12 = vunpack.i.h.bf16 %v10017_v28  ;;  %v10018_v59 = vunpack.i.l.bf16 %v10017_v28 }
 0xb46   :  { %6220 = vadd.xlane.f32.xlu2 %v6219_v61 }
 0xb47   :  { %v5893_v8 = vsel %vm3948_vm0, %v12083_v0, %v10018_v59  ;;  %v5894_v47 = vsel %vm3948_vm0, %v12081_v36, %v10019_v12  ;;  %v6115_v0 = vpop.f32.mrf.mxu0 }
 0xb48   :  { %v5902_v22 = vpack.c.bf16 %v5894_v47, %v5893_v8  ;;  %v6116_v36 = vadd.f32 %v6115_v0, %v12226_v21 }
 0xb49   :  { %v6199_v53 = vpop.f32.mrf.mxu3 }
 0xb4a   :  { %v12246_v25 = vadd.f32 %v6199_v53, %v6171_v33  ;;  %6153 = vmatmul.bf16.gmra.mxu1 %v5902_v22  ;;  %6211 = vmatmul.bf16.gmra.mxu3 %v5902_v22 }
 0xb4c   :  { %v6222_v31 = vadd.f32 %v12246_v25, %v12244_v52 }
 0xb4e   :  { %6223 = vadd.xlane.f32.xlu0 %v6222_v31 }
 0xb4f   :  { %v6117_v7 = vpop.f32.mrf.mxu0 }
 0xb50   :  { %v6118_v54 = vadd.f32 %v6117_v7, %v12226_v21 }
 0xb57   :  { %v6120_v45 = vpop.f32.mrf.mxu0 }
 0xb58   :  { %v6121_v57 = vadd.f32 %v6120_v45, %v12226_v21 }
 0xb5f   :  { %v6122_v29 = vpop.f32.mrf.mxu0 }
 0xb60   :  { %v6123_v46 = vadd.f32 %v6122_v29, %v12226_v21 }
 0xb6c   :  { %v6144_v40 = vpop.f32.mrf.mxu1 }
 0xb6d   :  { %v12252_v56 = vadd.f32 %v6144_v40, %v6116_v36 }
 0xb72   :  { %v6202_v6 = vpop.f32.mrf.mxu3 }
 0xb73   :  { %v12254_v20 = vadd.f32 %v6202_v6, %v6174_v41 }
 0xb74   :  { %v6146_v18 = vpop.f32.mrf.mxu1  ;;  %v6125_v30 = vpop.f32.mrf.mxu0 }
 0xb75   :  { %v6225_v16 = vadd.f32 %v12254_v20, %v12252_v56  ;;  %v12260_v48 = vadd.f32 %v6146_v18, %v6118_v54  ;;  %v6126_v33 = vadd.f32 %v6125_v30, %v12226_v21  ;;  %v9272_v30 = vld [vmem:[#allocation22 + $0x78] sm:$0xf0] }
 0xb77   :  { %6226 = vadd.xlane.f32.xlu1 %v6225_v16 }
 0xb7a   :  { %v6204_v39 = vpop.f32.mrf.mxu3  ;;  %v6183_v8 = vpop.f32.mrf.mxu2 }
 0xb7b   :  { %v12262_v62 = vadd.f32 %v6204_v39, %v6176_v3 }
 0xb7c   :  { %v6127_v36 = vpop.f32.mrf.mxu0 }
 0xb7d   :  { %v6228_v9 = vadd.f32 %v12262_v62, %v12260_v48  ;;  %v6128_v16 = vadd.f32 %v6127_v36, %v12226_v21 }
 0xb7f   :  { %6229 = vadd.xlane.f32.xlu2 %v6228_v9 }
 0xb82   :  { %v6185_v41 = vpop.f32.mrf.mxu2 }
 0xb83   :  { %v6186_v7 = vadd.f32 %v6185_v41, %v12228_v35 }
 0xb8f   :  { %v6149_v5 = vpop.f32.mrf.mxu1 }
 0xb90   :  { %v12268_v51 = vadd.f32 %v6149_v5, %v6121_v57 }
 0xb95   :  { %v6207_v43 = vpop.f32.mrf.mxu3 }
 0xb96   :  { %v12270_v34 = vadd.f32 %v6207_v43, %v6179_v1 }
 0xb97   :  { %v6151_v19 = vpop.f32.mrf.mxu1 }
 0xb98   :  { %v6231_v63 = vadd.f32 %v12270_v34, %v12268_v51  ;;  %v12276_v42 = vadd.f32 %v6151_v19, %v6123_v46 }
 0xb9a   :  { %6232 = vadd.xlane.f32.xlu0 %v6231_v63 }
 0xb9d   :  { %v6209_v37 = vpop.f32.mrf.mxu3 }
 0xb9e   :  { %v12278_v15 = vadd.f32 %v6209_v37, %v6181_v44 }
 0xba0   :  { %v6234_v27 = vadd.f32 %v12278_v15, %v12276_v42 }
 0xba2   :  { %6235 = vadd.xlane.f32.xlu2 %v6234_v27 }
 0xbb9   :  { %v6221_v4 = vpop.xlane.xlu2 %6220 }
 0xbba   :  { %v6250_v28 = vmul.f32 %v12282_v60, %v6221_v4  ;;  %v9907_v4 = vld [vmem:[#allocation22 + $0x74] sm:$0xf0] }
 0xbbc   :  { %v12286_v61 = vsub.f32 %v12232_v2, %v6250_v28  ;;  %v12289_v24 = vsub.f32 %v12234_v32, %v6250_v28  ;;  %v6184_v2 = vadd.f32 %v6183_v8, %v12228_v35  ;;  %v9334_v28 = vld [vmem:[#allocation22 + $0xf0] sm:$0xf] }
 0xbbe   :  { %v6274_v11 = vmul.f32 %v12286_v61, %v12286_v61  ;;  %v6275_v12 = vmul.f32 %v12289_v24, %v12289_v24 }
 0xbc0   :  { %v6290_v59 = vadd.f32 %v6275_v12, %v6274_v11  ;;  %v9271_v11 = vor.u32 %v9907_v4, %v9270_v49  ;;  %v9923_v12 = vld [vmem:[#allocation22 + $0xf4] sm:$0xf0]  ;;  %v9916_v4 = vld [vmem:[#allocation22 + $0xc4] sm:$0xf] }
 0xbc1   :  { %v6224_v47 = vpop.xlane.xlu0 %6223  ;;  %v9335_v8 = vor.u32 %v9923_v12, %v9334_v28  ;;  %v9312_v28 = vld [vmem:[#allocation22 + $0xc8] sm:$0xf0] }
 0xbc2   :  { %6291 = vadd.xlane.f32.xlu2 %v6290_v59  ;;  %v6251_v22 = vmul.f32 %v12282_v60, %v6224_v47  ;;  %v9906_v59 = vld [vmem:[#allocation22 + $0x74] sm:$0xf]  ;;  %6684 = vmatpush.bf16.msra.mxu0 %v9271_v11  ;;  %v9315_v12 = vor.u32 %v9916_v4, %v9312_v28  ;;  %v9288_v28 = vld [vmem:[#allocation22 + $0x98] sm:$0xf0] }
 0xbc3   :  { %v9275_v47 = vor.u32 %v9906_v59, %v9272_v30  ;;  %6713 = vmatpush.bf16.msra.mxu1 %v9335_v8  ;;  %v9238_v59 = vld [vmem:[#allocation22 + $0x30] sm:$0xf]  ;;  %v9899_v30 = vld [vmem:[#allocation22 + $0x34] sm:$0xf0]  ;;  %v9910_v4 = vld [vmem:[#allocation22 + $0x94] sm:$0xf] }
 0xbc4   :  { %v12303_v0 = vsub.f32 %v12244_v52, %v6251_v22  ;;  %v12306_v38 = vsub.f32 %v12246_v25, %v6251_v22  ;;  %v9262_v22 = vld [vmem:[#allocation22 + $0x60] sm:$0xf]  ;;  %v9239_v8 = vor.u32 %v9899_v30, %v9238_v59 }
 0xbc5   :  { %6742 = vmatpush.bf16.msra.mxu2 %v9275_v47  ;;  %v9915_v47 = vld [vmem:[#allocation22 + $0xb4] sm:$0xf0] }
 0xbc6   :  { %v6276_v13 = vmul.f32 %v12303_v0, %v12303_v0  ;;  %v6277_v52 = vmul.f32 %v12306_v38, %v12306_v38 }
 0xbc7   :  { %v6154_v50 = vpop.f32.mrf.mxu1 }
 0xbc8   :  { %v12298_v53 = vadd.f32 %v6154_v50, %v6126_v33  ;;  %v6293_v39 = vadd.f32 %v6277_v52, %v6276_v13  ;;  %v9336_v50 = vld [vmem:[#allocation22 + $0xf8] sm:$0xf0]  ;;  %v9264_v13 = vld [vmem:[#allocation22 + $0x68] sm:$0xf0]  ;;  %v9920_v52 = vld [vmem:[#allocation22 + $0xe4] sm:$0xf] }
 0xbcd   :  { %v6212_v32 = vpop.f32.mrf.mxu3 }
 0xbce   :  { %v12300_v31 = vadd.f32 %v6212_v32, %v6184_v2  ;;  %v9905_v32 = vld [vmem:[#allocation22 + $0x64] sm:$0xf0] }
 0xbcf   :  { %v6156_v6 = vpop.f32.mrf.mxu1  ;;  %v9263_v41 = vor.u32 %v9905_v32, %v9262_v22 }
 0xbd0   :  { %v6237_v40 = vadd.f32 %v12300_v31, %v12298_v53  ;;  %v12316_v25 = vadd.f32 %v6156_v6, %v6128_v16  ;;  %v9921_v6 = vld [vmem:[#allocation22 + $0xe4] sm:$0xf0]  ;;  %v9904_v16 = vld [vmem:[#allocation22 + $0x64] sm:$0xf] }
 0xbd1   :  { %6685 = vmatpush.bf16.msra.mxu0 %v9263_v41  ;;  %v9304_v41 = vld [vmem:[#allocation22 + $0xb8] sm:$0xf0] }
 0xbd2   :  { %6238 = vadd.xlane.f32.xlu1 %v6237_v40  ;;  %v9326_v40 = vld [vmem:[#allocation22 + $0xe0] sm:$0xf] }
 0xbd5   :  { %v6214_v18 = vpop.f32.mrf.mxu3 }
 0xbd6   :  { %v12318_v54 = vadd.f32 %v6214_v18, %v6186_v7  ;;  %v9327_v7 = vor.u32 %v9921_v6, %v9326_v40  ;;  %v9328_v18 = vld [vmem:[#allocation22 + $0xe8] sm:$0xf0]  ;;  %v9914_v40 = vld [vmem:[#allocation22 + $0xb4] sm:$0xf] }
 0xbd8   :  { %v6240_v3 = vadd.f32 %v12318_v54, %v12316_v25  ;;  %6714 = vmatpush.bf16.msra.mxu1 %v9327_v7  ;;  %v9230_v7 = vld [vmem:[#allocation22 + $0x20] sm:$0xf] }
 0xbda   :  { %6241 = vadd.xlane.f32.xlu0 %v6240_v3  ;;  %6294 = vadd.xlane.f32.xlu1 %v6293_v39  ;;  %v9267_v3 = vor.u32 %v9904_v16, %v9264_v13  ;;  %v9331_v39 = vor.u32 %v9920_v52, %v9328_v18  ;;  %v9307_v16 = vor.u32 %v9914_v40, %v9304_v41  ;;  %v9897_v13 = vld [vmem:[#allocation22 + $0x24] sm:$0xf0] }
 0xbdc   :  { %6743 = vmatpush.bf16.msra.mxu2 %v9267_v3  ;;  %v9231_v3 = vor.u32 %v9897_v13, %v9230_v7  ;;  %v9280_v7 = vld [vmem:[#allocation22 + $0x88] sm:$0xf0] }
 0xbea   :  { %v6227_v21 = vpop.xlane.xlu1 %6226 }
 0xbeb   :  { %v6252_v35 = vmul.f32 %v12282_v60, %v6227_v21  ;;  %v9254_v21 = vld [vmem:[#allocation22 + $0x50] sm:$0xf] }
 0xbed   :  { %v12324_v9 = vsub.f32 %v12252_v56, %v6252_v35  ;;  %v12327_v45 = vsub.f32 %v12254_v20, %v6252_v35  ;;  %v9903_v35 = vld [vmem:[#allocation22 + $0x54] sm:$0xf0] }
 0xbef   :  { %v6278_v17 = vmul.f32 %v12324_v9, %v12324_v9  ;;  %v6279_v5 = vmul.f32 %v12327_v45, %v12327_v45 }
 0xbf1   :  { %v6296_v57 = vadd.f32 %v6279_v5, %v6278_v17  ;;  %v9318_v17 = vld [vmem:[#allocation22 + $0xd0] sm:$0xf]  ;;  %v9255_v5 = vor.u32 %v9903_v35, %v9254_v21  ;;  %v9913_v21 = vld [vmem:[#allocation22 + $0xa4] sm:$0xf0]  ;;  %v9896_v35 = vld [vmem:[#allocation22 + $0x24] sm:$0xf] }
 0xbf2   :  { %v6230_v1 = vpop.xlane.xlu2 %6229 }
 0xbf3   :  { %v6253_v43 = vmul.f32 %v12282_v60, %v6230_v1  ;;  %6297 = vadd.xlane.f32.xlu0 %v6296_v57  ;;  %v9919_v57 = vld [vmem:[#allocation22 + $0xd4] sm:$0xf0]  ;;  %v9902_v1 = vld [vmem:[#allocation22 + $0x54] sm:$0xf]  ;;  %6686 = vmatpush.bf16.msra.mxu0 %v9255_v5 }
 0xbf5   :  { %v12335_v63 = vsub.f32 %v12260_v48, %v6253_v43  ;;  %v12338_v56 = vsub.f32 %v12262_v62, %v6253_v43  ;;  %v9256_v43 = vld [vmem:[#allocation22 + $0x58] sm:$0xf0] }
 0xbf7   :  { %v6280_v20 = vmul.f32 %v12335_v63, %v12335_v63  ;;  %v6281_v29 = vmul.f32 %v12338_v56, %v12338_v56 }
 0xbf9   :  { %v6299_v55 = vadd.f32 %v6281_v29, %v6280_v20  ;;  %v9319_v20 = vor.u32 %v9919_v57, %v9318_v17  ;;  %v9259_v29 = vor.u32 %v9902_v1, %v9256_v43  ;;  %v9232_v57 = vld [vmem:[#allocation22 + $0x28] sm:$0xf0]  ;;  %v9912_v1 = vld [vmem:[#allocation22 + $0xa4] sm:$0xf] }
 0xbfa   :  { %v9296_v43 = vld [vmem:[#allocation22 + $0xa8] sm:$0xf0] }
 0xbfb   :  { %6300 = vadd.xlane.f32.xlu2 %v6299_v55  ;;  %v9918_v55 = vld [vmem:[#allocation22 + $0xd4] sm:$0xf]  ;;  %6715 = vmatpush.bf16.msra.mxu1 %v9319_v20 }
 0xbfc   :  { %6744 = vmatpush.bf16.msra.mxu2 %v9259_v29  ;;  %v9299_v29 = vor.u32 %v9912_v1, %v9296_v43 }
 0xc0d   :  { %v6233_v19 = vpop.xlane.xlu0 %6232 }
 0xc0e   :  { %v6254_v46 = vmul.f32 %v12282_v60, %v6233_v19  ;;  %v9320_v19 = vld [vmem:[#allocation22 + $0xd8] sm:$0xf0] }
 0xc10   :  { %v12346_v44 = vsub.f32 %v12268_v51, %v6254_v46  ;;  %v12349_v48 = vsub.f32 %v12270_v34, %v6254_v46  ;;  %v9323_v46 = vor.u32 %v9918_v55, %v9320_v19  ;;  %v9222_v55 = vld [vmem:[#allocation22 + $0x10] sm:$0xf]  ;;  %v9895_v19 = vld [vmem:[#allocation22 + $0x14] sm:$0xf0] }
 0xc12   :  { %v6282_v62 = vmul.f32 %v12346_v44, %v12346_v44  ;;  %v6283_v37 = vmul.f32 %v12349_v48, %v12349_v48 }
 0xc14   :  { %v6302_v26 = vadd.f32 %v6283_v37, %v6282_v62  ;;  %v9246_v62 = vld [vmem:[#allocation22 + $0x40] sm:$0xf]  ;;  %v9901_v37 = vld [vmem:[#allocation22 + $0x44] sm:$0xf0] }
 0xc15   :  { %v6236_v27 = vpop.xlane.xlu2 %6235 }
 0xc16   :  { %v6255_v23 = vmul.f32 %v12282_v60, %v6236_v27  ;;  %6303 = vadd.xlane.f32.xlu1 %v6302_v26  ;;  %v9310_v26 = vld [vmem:[#allocation22 + $0xc0] sm:$0xf]  ;;  %v9247_v27 = vor.u32 %v9901_v37, %v9246_v62  ;;  %v9911_v37 = vld [vmem:[#allocation22 + $0x94] sm:$0xf0] }
 0xc18   :  { %v12357_v14 = vsub.f32 %v12276_v42, %v6255_v23  ;;  %v12360_v51 = vsub.f32 %v12278_v15, %v6255_v23  ;;  %v9922_v15 = vld [vmem:[#allocation22 + $0xf4] sm:$0xf]  ;;  %v9917_v23 = vld [vmem:[#allocation22 + $0xc4] sm:$0xf0]  ;;  %6687 = vmatpush.bf16.msra.mxu0 %v9247_v27  ;;  %v9224_v27 = vld [vmem:[#allocation22 + $0x18] sm:$0xf0] }
 0xc19   :  { %v9339_v2 = vor.u32 %v9922_v15, %v9336_v50  ;;  %v9898_v15 = vld [vmem:[#allocation22 + $0x34] sm:$0xf]  ;;  %v9240_v50 = vld [vmem:[#allocation22 + $0x38] sm:$0xf0] }
 0xc1a   :  { %v6284_v34 = vmul.f32 %v12357_v14, %v12357_v14  ;;  %v6285_v10 = vmul.f32 %v12360_v51, %v12360_v51  ;;  %v9243_v32 = vor.u32 %v9898_v15, %v9240_v50  ;;  %v9278_v15 = vld [vmem:[#allocation22 + $0x80] sm:$0xf] }
 0xc1b   :  { %6771 = vmatpush.bf16.msra.mxu3 %v9339_v2 }
 0xc1c   :  { %v6305_v58 = vadd.f32 %v6285_v10, %v6284_v34  ;;  %v9900_v34 = vld [vmem:[#allocation22 + $0x44] sm:$0xf]  ;;  %v9248_v10 = vld [vmem:[#allocation22 + $0x48] sm:$0xf0]  ;;  %6688 = vmatpush.bf16.msra.mxu0 %v9239_v8  ;;  %v9214_v8 = vld [vmem:[#allocation22] sm:$0xf] }
 0xc1d   :  { %v9251_v49 = vor.u32 %v9900_v34, %v9248_v10  ;;  %v9223_v10 = vor.u32 %v9895_v19, %v9222_v55  ;;  %v6218_v19 = vld [vmem:[#allocation17] sm:$0x3] }
 0xc1e   :  { %6306 = vadd.xlane.f32.xlu0 %v6305_v58  ;;  %v9311_v58 = vor.u32 %v9917_v23, %v9310_v26  ;;  %v9894_v26 = vld [vmem:[#allocation22 + $0x14] sm:$0xf] }
 0xc1f   :  { %6772 = vmatpush.bf16.msra.mxu3 %v9331_v39  ;;  %6745 = vmatpush.bf16.msra.mxu2 %v9251_v49  ;;  %v9294_v39 = vld [vmem:[#allocation22 + $0xa0] sm:$0xf]  ;;  %v9227_v49 = vor.u32 %v9894_v26, %v9224_v27 }
 0xc20   :  { %6716 = vmatpush.bf16.msra.mxu1 %v9311_v58  ;;  %v9295_v5 = vor.u32 %v9913_v21, %v9294_v39  ;;  %6689 = vmatpush.bf16.msra.mxu0 %v9231_v3 }
 0xc23   :  { %6773 = vmatpush.bf16.msra.mxu3 %v9323_v46  ;;  %6746 = vmatpush.bf16.msra.mxu2 %v9243_v32  ;;  %v9286_v46 = vld [vmem:[#allocation22 + $0x90] sm:$0xf] }
 0xc24   :  { %v9287_v58 = vor.u32 %v9911_v37, %v9286_v46  ;;  %6690 = vmatpush.bf16.msra.mxu0 %v9223_v10  ;;  %v12410_v37 = vperm.slane %v6218_v19, 1 }
 0xc27   :  { %6774 = vmatpush.bf16.msra.mxu3 %v9315_v12 }
 0xc2b   :  { %6775 = vmatpush.bf16.msra.mxu3 %v9307_v16  ;;  %v9908_v16 = vld [vmem:[#allocation22 + $0x84] sm:$0xf] }
 0xc2c   :  { %v9283_v21 = vor.u32 %v9908_v16, %v9280_v7 }
 0xc2f   :  { %6776 = vmatpush.bf16.msra.mxu3 %v9299_v29 }
 0xc35   :  { %v6292_v42 = vpop.xlane.xlu2 %6291 }
 0xc36   :  { %v6314_v33 = vmul.f32 %v6292_v42, %v12282_v60  ;;  %v9302_v42 = vld [vmem:[#allocation22 + $0xb0] sm:$0xf] }
 0xc37   :  { %v9303_v22 = vor.u32 %v9915_v47, %v9302_v42  ;;  %v9291_v42 = vor.u32 %v9910_v4, %v9288_v28  ;;  %v9893_v47 = vld [vmem:[#allocation22 + $0x4] sm:$0xf0] }
 0xc38   :  { %v12367_v36 = vadd.f32 1e-05, %v6314_v33  ;;  %v9215_v40 = vor.u32 %v9893_v47, %v9214_v8  ;;  %v10185_v8 = vld [vmem:[#allocation2 + $0x8] sm:$0xff] }
 0xc39   :  { %6717 = vmatpush.bf16.msra.mxu1 %v9303_v22  ;;  %v9892_v22 = vld [vmem:[#allocation22 + $0x4] sm:$0xf]  ;;  %6777 = vmatpush.bf16.msra.mxu3 %v9291_v42 }
 0xc3a   :  { %10150 = vrsqrt.f32 %v12367_v36  ;;  %6691 = vmatpush.bf16.msra.mxu0 %v9215_v40  ;;  %vm6336_vm5 = vweird.f32 %v12367_v36 }
 0xc3d   :  { %6718 = vmatpush.bf16.msra.mxu1 %v9295_v5  ;;  %6778 = vmatpush.bf16.msra.mxu3 %v9283_v21 }
 0xc40   :  { %v12370_v11 = vpop.eup %10150 }
 0xc41   :  { %v6331_v33 = vmul.f32 %v12370_v11, %v12367_v36  ;;  %6719 = vmatpush.bf16.msra.mxu1 %v9287_v58  ;;  %vm6337_vm4 = vweird.f32 %v12370_v11  ;;  %v12408_v36 = vperm.slane %v6218_v19, 0 }
 0xc42   :  { %vm6338_vm6 = vmor %vm6336_vm5, %vm6337_vm4 }
 0xc43   :  { %v6332_v17 = vmul.f32 %v12370_v11, %v6331_v33 }
 0xc45   :  { %v6239_v2 = vpop.xlane.xlu1 %6238  ;;  %v6333_v12 = vmul.f32 0.5, %v6332_v17 }
 0xc46   :  { %v6256_v6 = vmul.f32 %v12282_v60, %v6239_v2  ;;  %v9909_v2 = vld [vmem:[#allocation22 + $0x84] sm:$0xf0] }
 0xc47   :  { %v9279_v41 = vor.u32 %v9909_v2, %v9278_v15  ;;  %v6334_v39 = vsub.f32 1.5, %v6333_v12  ;;  %v10186_v15 = vld [vmem:[#allocation2 + $0x18] sm:$0xff] }
 0xc48   :  { %v12376_v52 = vsub.f32 %v12298_v53, %v6256_v6  ;;  %v12379_v18 = vsub.f32 %v12300_v31, %v6256_v6  ;;  %v9235_v31 = vor.u32 %v9896_v35, %v9232_v57  ;;  %v9216_v6 = vld [vmem:[#allocation22 + $0x8] sm:$0xf0]  ;;  %v6217_v57 = vld [vmem:[#allocation16] sm:$0x3] }
 0xc49   :  { %v9219_v3 = vor.u32 %v9892_v22, %v9216_v6  ;;  %6720 = vmatpush.bf16.msra.mxu1 %v9279_v41  ;;  %v6335_v35 = vmul.f32 %v12370_v11, %v6334_v39 }
 0xc4a   :  { %v6286_v20 = vmul.f32 %v12376_v52, %v12376_v52  ;;  %v6287_v53 = vmul.f32 %v12379_v18, %v12379_v18  ;;  %6747 = vmatpush.bf16.msra.mxu2 %v9235_v31  ;;  %v12404_v31 = vperm.slane %v6217_v57, 1 }
 0xc4b   :  { %v6339_v1 = vsel %vm6338_vm6, %v12370_v11, %v6335_v35 }
 0xc4c   :  { %v6308_v62 = vadd.f32 %v6287_v53, %v6286_v20  ;;  %v12402_v53 = vperm.slane %v6217_v57, 0  ;;  %v6410_v29 = vmul.f32 %v6339_v1, %v12286_v61  ;;  %v6411_v55 = vmul.f32 %v6339_v1, %v12289_v24 }
 0xc4d   :  { %v6295_v23 = vpop.xlane.xlu1 %6294  ;;  %v6242_v34 = vpop.xlane.xlu0 %6241 }
 0xc4e   :  { %v6315_v59 = vmul.f32 %v6295_v23, %v12282_v60  ;;  %v6257_v30 = vmul.f32 %v12282_v60, %v6242_v34  ;;  %6309 = vadd.xlane.f32.xlu2 %v6308_v62  ;;  %6748 = vmatpush.bf16.msra.mxu2 %v9227_v49  ;;  %v6431_v11 = vmul.f32 %v12402_v53, %v6410_v29 }
 0xc4f   :  { %v6432_v26 = vmul.f32 %v12404_v31, %v6411_v55 }
 0xc50   :  { %v6323_v50 = vadd.f32 1e-05, %v6315_v59  ;;  %v12389_v33 = vsub.f32 %v12316_v25, %v6257_v30  ;;  %v12392_v32 = vsub.f32 %v12318_v54, %v6257_v30  ;;  %v6452_v24 = vadd.f32 %v12408_v36, %v6431_v11  ;;  %v10183_v30 = vld [vmem:[#allocation2] sm:$0xff] }
 0xc51   :  { %v6453_v34 = vadd.f32 %v12410_v37, %v6432_v26 }
 0xc52   :  { %10152 = vrsqrt.f32 %v6323_v50  ;;  %v6288_v13 = vmul.f32 %v12389_v33, %v12389_v33  ;;  %v6289_v25 = vmul.f32 %v12392_v32, %v12392_v32  ;;  %6749 = vmatpush.bf16.msra.mxu2 %v9219_v3  ;;  %vm6346_vm8 = vweird.f32 %v6323_v50 }
 0xc53   :  { %v12427_v47 = vadd.f32 %v10185_v8, %v6453_v34  ;;  %v10187_v34 = vld [vmem:[#allocation2 + $0x20] sm:$0xff] }
 0xc54   :  { %v6311_v54 = vadd.f32 %v6289_v25, %v6288_v13 }
 0xc56   :  { %6312 = vadd.xlane.f32.xlu1 %v6311_v54 }
 0xc58   :  { %v10153_v17 = vpop.eup %10152 }
 0xc59   :  { %v6341_v5 = vmul.f32 %v10153_v17, %v6323_v50  ;;  %vm6347_vm7 = vweird.f32 %v10153_v17 }
 0xc5a   :  { %vm6348_vm9 = vmor %vm6346_vm8, %vm6347_vm7 }
 0xc5b   :  { %v6342_v43 = vmul.f32 %v10153_v17, %v6341_v5 }
 0xc5d   :  { %v6343_v20 = vmul.f32 0.5, %v6342_v43 }
 0xc5f   :  { %v6344_v46 = vsub.f32 1.5, %v6343_v20 }
 0xc61   :  { %v6345_v62 = vmul.f32 %v10153_v17, %v6344_v46 }
 0xc63   :  { %v6349_v27 = vsel %vm6348_vm9, %v10153_v17, %v6345_v62 }
 0xc64   :  { %v6412_v23 = vmul.f32 %v6349_v27, %v12303_v0  ;;  %v6413_v61 = vmul.f32 %v6349_v27, %v12306_v38  ;;  %v12423_v0 = vadd.f32 %v10183_v30, %v6452_v24  ;;  %v10184_v38 = vld [vmem:[#allocation2 + $0x10] sm:$0xff] }
 0xc66   :  { %v6433_v10 = vmul.f32 %v12402_v53, %v6412_v23  ;;  %v6434_v58 = vmul.f32 %v12404_v31, %v6413_v61  ;;  %v6298_v49 = vpop.xlane.xlu0 %6297 }
 0xc67   :  { %v6316_v4 = vmul.f32 %v6298_v49, %v12282_v60 }
 0xc68   :  { %v6454_v28 = vadd.f32 %v12408_v36, %v6433_v10  ;;  %v6455_v12 = vadd.f32 %v12410_v37, %v6434_v58  ;;  %v10189_v58 = vld [vmem:[#allocation2 + $0x28] sm:$0xff] }
 0xc69   :  { %v6324_v59 = vadd.f32 1e-05, %v6316_v4  ;;  %v10190_v4 = vld [vmem:[#allocation2 + $0x38] sm:$0xff] }
 0xc6a   :  { %v12425_v42 = vadd.f32 %v10184_v38, %v6454_v28  ;;  %v12429_v50 = vadd.f32 %v10186_v15, %v6455_v12 }
 0xc6b   :  { %10154 = vrsqrt.f32 %v6324_v59  ;;  %vm6356_vm11 = vweird.f32 %v6324_v59 }
 0xc6c   :  { %v6484_v2 = vpack.c.bf16 %v12425_v42, %v12423_v0  ;;  %v6485_v22 = vpack.c.bf16 %v12429_v50, %v12427_v47 }
 0xc6e   :  { %6692 = vmatmul.bf16.vlgmr.msra.gmra.mxu0 %v6484_v2  ;;  %6721 = vmatmul.bf16.vlgmr.msra.gmra.mxu1 %v6485_v22  ;;  %v6301_v40 = vpop.xlane.xlu2 %6300 }
 0xc6f   :  { %6750 = vmatmul.bf16.vlgmr.msra.gmra.mxu2 %v6484_v2  ;;  %6779 = vmatmul.bf16.vlgmr.msra.gmra.mxu3 %v6485_v22  ;;  %v6317_v41 = vmul.f32 %v6301_v40, %v12282_v60 }
 0xc71   :  { %v10155_v6 = vpop.eup %10154  ;;  %v6325_v16 = vadd.f32 1e-05, %v6317_v41 }
 0xc72   :  { %v6351_v7 = vmul.f32 %v10155_v6, %v6324_v59  ;;  %vm6357_vm10 = vweird.f32 %v10155_v6 }
 0xc73   :  { %10156 = vrsqrt.f32 %v6325_v16  ;;  %vm6358_vm12 = vmor %vm6356_vm11, %vm6357_vm10  ;;  %vm6366_vm14 = vweird.f32 %v6325_v16 }
 0xc74   :  { %v6352_v13 = vmul.f32 %v10155_v6, %v6351_v7 }
 0xc76   :  { %v6353_v3 = vmul.f32 0.5, %v6352_v13 }
 0xc78   :  { %v6354_v39 = vsub.f32 1.5, %v6353_v3 }
 0xc79   :  { %v10157_v25 = vpop.eup %10156 }
 0xc7a   :  { %v6355_v21 = vmul.f32 %v10155_v6, %v6354_v39  ;;  %v6361_v54 = vmul.f32 %v10157_v25, %v6325_v16  ;;  %vm6367_vm13 = vweird.f32 %v10157_v25 }
 0xc7b   :  { %vm6368_vm15 = vmor %vm6366_vm14, %vm6367_vm13 }
 0xc7c   :  { %v6359_v35 = vsel %vm6358_vm12, %v10155_v6, %v6355_v21  ;;  %v6362_v17 = vmul.f32 %v10157_v25, %v6361_v54 }
 0xc7d   :  { %v6414_v57 = vmul.f32 %v6359_v35, %v12324_v9  ;;  %v6415_v1 = vmul.f32 %v6359_v35, %v12327_v45 }
 0xc7e   :  { %v6363_v5 = vmul.f32 0.5, %v6362_v17 }
 0xc7f   :  { %v6435_v29 = vmul.f32 %v12402_v53, %v6414_v57  ;;  %v6436_v55 = vmul.f32 %v12404_v31, %v6415_v1 }
 0xc80   :  { %v6364_v43 = vsub.f32 1.5, %v6363_v5 }
 0xc81   :  { %v6456_v9 = vadd.f32 %v12408_v36, %v6435_v29  ;;  %v6457_v26 = vadd.f32 %v12410_v37, %v6436_v55 }
 0xc82   :  { %v6365_v20 = vmul.f32 %v10157_v25, %v6364_v43 }
 0xc83   :  { %v12449_v10 = vadd.f32 %v10187_v34, %v6456_v9  ;;  %v12453_v49 = vadd.f32 %v10189_v58, %v6457_v26  ;;  %v10192_v9 = vld [vmem:[#allocation2 + $0x50] sm:$0xff]  ;;  %v10194_v26 = vld [vmem:[#allocation2 + $0x58] sm:$0xff] }
 0xc84   :  { %v6369_v19 = vsel %vm6368_vm15, %v10157_v25, %v6365_v20 }
 0xc85   :  { %v6416_v46 = vmul.f32 %v6369_v19, %v12335_v63  ;;  %v6417_v62 = vmul.f32 %v6369_v19, %v12338_v56  ;;  %v10188_v63 = vld [vmem:[#allocation2 + $0x30] sm:$0xff] }
 0xc87   :  { %v6437_v11 = vmul.f32 %v12402_v53, %v6416_v46  ;;  %v6438_v45 = vmul.f32 %v12404_v31, %v6417_v62  ;;  %v10191_v62 = vld [vmem:[#allocation2 + $0x40] sm:$0xff] }
 0xc89   :  { %v6304_v27 = vpop.xlane.xlu1 %6303  ;;  %v6458_v23 = vadd.f32 %v12408_v36, %v6437_v11  ;;  %v6459_v61 = vadd.f32 %v12410_v37, %v6438_v45 }
 0xc8a   :  { %v6318_v24 = vmul.f32 %v6304_v27, %v12282_v60 }
 0xc8b   :  { %v12451_v56 = vadd.f32 %v10188_v63, %v6458_v23  ;;  %v12455_v28 = vadd.f32 %v10190_v4, %v6459_v61 }
 0xc8c   :  { %v6326_v12 = vadd.f32 1e-05, %v6318_v24 }
 0xc8d   :  { %v6486_v59 = vpack.c.bf16 %v12451_v56, %v12449_v10  ;;  %v6487_v30 = vpack.c.bf16 %v12455_v28, %v12453_v49 }
 0xc8e   :  { %10158 = vrsqrt.f32 %v6326_v12  ;;  %vm6376_vm1 = vweird.f32 %v6326_v12 }
 0xc8f   :  { %6697 = vmatmul.bf16.gmra.mxu0 %v6486_v59  ;;  %6726 = vmatmul.bf16.gmra.mxu1 %v6487_v30 }
 0xc90   :  { %6755 = vmatmul.bf16.gmra.mxu2 %v6486_v59  ;;  %6784 = vmatmul.bf16.gmra.mxu3 %v6487_v30 }
 0xc91   :  { %v6307_v38 = vpop.xlane.xlu0 %6306 }
 0xc92   :  { %v6319_v8 = vmul.f32 %v6307_v38, %v12282_v60 }
 0xc94   :  { %v10159_v15 = vpop.eup %10158  ;;  %v6327_v2 = vadd.f32 1e-05, %v6319_v8 }
 0xc95   :  { %v6371_v22 = vmul.f32 %v10159_v15, %v6326_v12  ;;  %vm6377_vm0 = vweird.f32 %v10159_v15 }
 0xc96   :  { %10160 = vrsqrt.f32 %v6327_v2  ;;  %vm6378_vm2 = vmor %vm6376_vm1, %vm6377_vm0  ;;  %vm6386_vm4 = vweird.f32 %v6327_v2 }
 0xc97   :  { %v6372_v40 = vmul.f32 %v10159_v15, %v6371_v22 }
 0xc99   :  { %v6373_v41 = vmul.f32 0.5, %v6372_v40 }
 0xc9b   :  { %v6374_v6 = vsub.f32 1.5, %v6373_v41 }
 0xc9c   :  { %v10161_v16 = vpop.eup %10160 }
 0xc9d   :  { %v6375_v7 = vmul.f32 %v10159_v15, %v6374_v6  ;;  %v6381_v13 = vmul.f32 %v10161_v16, %v6327_v2  ;;  %vm6387_vm3 = vweird.f32 %v10161_v16 }
 0xc9e   :  { %vm6388_vm5 = vmor %vm6386_vm4, %vm6387_vm3 }
 0xc9f   :  { %v6379_v3 = vsel %vm6378_vm2, %v10159_v15, %v6375_v7  ;;  %v6382_v39 = vmul.f32 %v10161_v16, %v6381_v13 }
 0xca0   :  { %v6418_v21 = vmul.f32 %v6379_v3, %v12346_v44  ;;  %v6419_v54 = vmul.f32 %v6379_v3, %v12349_v48 }
 0xca1   :  { %v6383_v25 = vmul.f32 0.5, %v6382_v39 }
 0xca2   :  { %v6439_v5 = vmul.f32 %v12402_v53, %v6418_v21  ;;  %v6440_v57 = vmul.f32 %v12404_v31, %v6419_v54 }
 0xca3   :  { %v6384_v35 = vsub.f32 1.5, %v6383_v25 }
 0xca4   :  { %v6460_v44 = vadd.f32 %v12408_v36, %v6439_v5  ;;  %v6461_v55 = vadd.f32 %v12410_v37, %v6440_v57 }
 0xca5   :  { %v6385_v17 = vmul.f32 %v10161_v16, %v6384_v35 }
 0xca6   :  { %v12474_v11 = vadd.f32 %v10191_v62, %v6460_v44  ;;  %v10196_v44 = vld [vmem:[#allocation2 + $0x70] sm:$0xff] }
 0xca7   :  { %v6389_v1 = vsel %vm6388_vm5, %v10161_v16, %v6385_v17 }
 0xca8   :  { %v6420_v43 = vmul.f32 %v6389_v1, %v12357_v14  ;;  %v6421_v20 = vmul.f32 %v6389_v1, %v12360_v51  ;;  %v10193_v14 = vld [vmem:[#allocation2 + $0x48] sm:$0xff] }
 0xca9   :  { %v12478_v51 = vadd.f32 %v10193_v14, %v6461_v55 }
 0xcaa   :  { %v6441_v29 = vmul.f32 %v12402_v53, %v6420_v43  ;;  %v6442_v48 = vmul.f32 %v12404_v31, %v6421_v20  ;;  %v10195_v20 = vld [vmem:[#allocation2 + $0x60] sm:$0xff] }
 0xcac   :  { %v6462_v19 = vadd.f32 %v12408_v36, %v6441_v29  ;;  %v6463_v46 = vadd.f32 %v12410_v37, %v6442_v48 }
 0xcae   :  { %v12476_v45 = vadd.f32 %v10192_v9, %v6462_v19  ;;  %v12480_v27 = vadd.f32 %v10194_v26, %v6463_v46 }
 0xcb0   :  { %v6488_v23 = vpack.c.bf16 %v12476_v45, %v12474_v11  ;;  %v6489_v61 = vpack.c.bf16 %v12480_v27, %v12478_v51 }
 0xcb2   :  { %6702 = vmatmul.bf16.gmra.mxu0 %v6488_v23  ;;  %6731 = vmatmul.bf16.gmra.mxu1 %v6489_v61 }
 0xcb3   :  { %6760 = vmatmul.bf16.gmra.mxu2 %v6488_v23  ;;  %6789 = vmatmul.bf16.gmra.mxu3 %v6489_v61 }
 0xcc1   :  { %v6310_v24 = vpop.xlane.xlu2 %6309 }
 0xcc2   :  { %v6320_v34 = vmul.f32 %v6310_v24, %v12282_v60 }
 0xcc4   :  { %v6328_v63 = vadd.f32 1e-05, %v6320_v34 }
 0xcc6   :  { %10162 = vrsqrt.f32 %v6328_v63  ;;  %vm6396_vm7 = vweird.f32 %v6328_v63 }
 0xcc9   :  { %v6313_v58 = vpop.xlane.xlu1 %6312 }
 0xcca   :  { %v6321_v4 = vmul.f32 %v6313_v58, %v12282_v60 }
 0xccc   :  { %v10163_v12 = vpop.eup %10162  ;;  %v6329_v30 = vadd.f32 1e-05, %v6321_v4 }
 0xccd   :  { %v6391_v59 = vmul.f32 %v10163_v12, %v6328_v63  ;;  %vm6397_vm6 = vweird.f32 %v10163_v12 }
 0xcce   :  { %10164 = vrsqrt.f32 %v6329_v30  ;;  %vm6398_vm8 = vmor %vm6396_vm7, %vm6397_vm6  ;;  %vm6406_vm10 = vweird.f32 %v6329_v30 }
 0xccf   :  { %v6392_v38 = vmul.f32 %v10163_v12, %v6391_v59 }
 0xcd1   :  { %v6393_v8 = vmul.f32 0.5, %v6392_v38 }
 0xcd3   :  { %v6394_v15 = vsub.f32 1.5, %v6393_v8 }
 0xcd4   :  { %v10165_v2 = vpop.eup %10164 }
 0xcd5   :  { %v6395_v22 = vmul.f32 %v10163_v12, %v6394_v15  ;;  %v6401_v40 = vmul.f32 %v10165_v2, %v6329_v30  ;;  %vm6407_vm9 = vweird.f32 %v10165_v2 }
 0xcd6   :  { %vm6408_vm11 = vmor %vm6406_vm10, %vm6407_vm9 }
 0xcd7   :  { %v6399_v41 = vsel %vm6398_vm8, %v10163_v12, %v6395_v22  ;;  %v6402_v6 = vmul.f32 %v10165_v2, %v6401_v40 }
 0xcd8   :  { %v6422_v7 = vmul.f32 %v6399_v41, %v12376_v52  ;;  %v6423_v13 = vmul.f32 %v6399_v41, %v12379_v18 }
 0xcd9   :  { %v6403_v16 = vmul.f32 0.5, %v6402_v6 }
 0xcda   :  { %v6443_v25 = vmul.f32 %v12402_v53, %v6422_v7  ;;  %v6444_v21 = vmul.f32 %v12404_v31, %v6423_v13 }
 0xcdb   :  { %v6404_v3 = vsub.f32 1.5, %v6403_v16 }
 0xcdc   :  { %v6464_v52 = vadd.f32 %v12408_v36, %v6443_v25  ;;  %v6465_v57 = vadd.f32 %v12410_v37, %v6444_v21 }
 0xcdd   :  { %v6405_v39 = vmul.f32 %v10165_v2, %v6404_v3 }
 0xcde   :  { %v12500_v29 = vadd.f32 %v10195_v20, %v6464_v52 }
 0xcdf   :  { %v6409_v54 = vsel %vm6408_vm11, %v10165_v2, %v6405_v39 }
 0xce0   :  { %v6424_v35 = vmul.f32 %v6409_v54, %v12389_v33  ;;  %v6425_v17 = vmul.f32 %v6409_v54, %v12392_v32  ;;  %v10197_v33 = vld [vmem:[#allocation2 + $0x68] sm:$0xff] }
 0xce1   :  { %v12504_v32 = vadd.f32 %v10197_v33, %v6465_v57 }
 0xce2   :  { %v6445_v5 = vmul.f32 %v12402_v53, %v6424_v35  ;;  %v6446_v18 = vmul.f32 %v12404_v31, %v6425_v17  ;;  %v10198_v53 = vld [vmem:[#allocation2 + $0x78] sm:$0xff] }
 0xce4   :  { %v6466_v1 = vadd.f32 %v12408_v36, %v6445_v5  ;;  %v6467_v43 = vadd.f32 %v12410_v37, %v6446_v18 }
 0xce6   :  { %v12502_v48 = vadd.f32 %v10196_v44, %v6466_v1  ;;  %v12506_v55 = vadd.f32 %v10198_v53, %v6467_v43 }
 0xce8   :  { %v6490_v31 = vpack.c.bf16 %v12502_v48, %v12500_v29  ;;  %v6491_v36 = vpack.c.bf16 %v12506_v55, %v12504_v32 }
 0xcea   :  { %6707 = vmatmul.bf16.gmra.mxu0 %v6490_v31  ;;  %6736 = vmatmul.bf16.gmra.mxu1 %v6491_v36 }
 0xceb   :  { %6765 = vmatmul.bf16.gmra.mxu2 %v6490_v31  ;;  %6794 = vmatmul.bf16.gmra.mxu3 %v6491_v36  ;;  %v6693_v37 = vpop.f32.mrf.mxu0  ;;  %v6722_v19 = vpop.f32.mrf.mxu1 }
 0xcec   :  { %v6723_v9 = vadd.f32 %v6722_v19, %v6693_v37 }
 0xcf2   :  { %v6751_v46 = vpop.f32.mrf.mxu2  ;;  %v6780_v62 = vpop.f32.mrf.mxu3 }
 0xcf3   :  { %v6781_v14 = vadd.f32 %v6780_v62, %v6751_v46  ;;  %v6695_v23 = vpop.f32.mrf.mxu0  ;;  %v6724_v61 = vpop.f32.mrf.mxu1 }
 0xcf4   :  { %v6725_v63 = vadd.f32 %v6724_v61, %v6695_v23 }
 0xcf5   :  { %v6802_v26 = vadd.f32 %v6781_v14, %v6723_v9 }
 0xcf7   :  { %6803 = vadd.xlane.f32.xlu0 %v6802_v26 }
 0xcfa   :  { %v6753_v24 = vpop.f32.mrf.mxu2  ;;  %v6782_v34 = vpop.f32.mrf.mxu3 }
 0xcfb   :  { %v6783_v58 = vadd.f32 %v6782_v34, %v6753_v24 }
 0xcfd   :  { %v6805_v4 = vadd.f32 %v6783_v58, %v6725_v63 }
 0xcff   :  { %6806 = vadd.xlane.f32.xlu2 %v6805_v4 }
 0xd0c   :  { %v6698_v12 = vpop.f32.mrf.mxu0  ;;  %v6727_v59 = vpop.f32.mrf.mxu1 }
 0xd0d   :  { %v6728_v8 = vadd.f32 %v6727_v59, %v6698_v12 }
 0xd13   :  { %v6756_v30 = vpop.f32.mrf.mxu2  ;;  %v6785_v38 = vpop.f32.mrf.mxu3 }
 0xd14   :  { %v6786_v15 = vadd.f32 %v6785_v38, %v6756_v30  ;;  %v6700_v22 = vpop.f32.mrf.mxu0  ;;  %v6729_v40 = vpop.f32.mrf.mxu1 }
 0xd15   :  { %v6730_v16 = vadd.f32 %v6729_v40, %v6700_v22 }
 0xd16   :  { %v6808_v2 = vadd.f32 %v6786_v15, %v6728_v8 }
 0xd18   :  { %6809 = vadd.xlane.f32.xlu1 %v6808_v2 }
 0xd1b   :  { %v6758_v41 = vpop.f32.mrf.mxu2  ;;  %v6787_v6 = vpop.f32.mrf.mxu3 }
 0xd1c   :  { %v6788_v7 = vadd.f32 %v6787_v6, %v6758_v41 }
 0xd1e   :  { %v6811_v13 = vadd.f32 %v6788_v7, %v6730_v16 }
 0xd20   :  { %6812 = vadd.xlane.f32.xlu0 %v6811_v13 }
 0xd2f   :  { %v6703_v3 = vpop.f32.mrf.mxu0  ;;  %v6732_v39 = vpop.f32.mrf.mxu1 }
 0xd30   :  { %v6733_v54 = vadd.f32 %v6732_v39, %v6703_v3 }
 0xd36   :  { %v6761_v25 = vpop.f32.mrf.mxu2  ;;  %v6790_v21 = vpop.f32.mrf.mxu3 }
 0xd37   :  { %v6791_v35 = vadd.f32 %v6790_v21, %v6761_v25  ;;  %v6705_v5 = vpop.f32.mrf.mxu0  ;;  %v6734_v52 = vpop.f32.mrf.mxu1 }
 0xd38   :  { %v6735_v1 = vadd.f32 %v6734_v52, %v6705_v5 }
 0xd39   :  { %v6814_v17 = vadd.f32 %v6791_v35, %v6733_v54 }
 0xd3b   :  { %6815 = vadd.xlane.f32.xlu2 %v6814_v17 }
 0xd3e   :  { %v6763_v18 = vpop.f32.mrf.mxu2  ;;  %v6792_v57 = vpop.f32.mrf.mxu3 }
 0xd3f   :  { %v6793_v43 = vadd.f32 %v6792_v57, %v6763_v18 }
 0xd41   :  { %v6817_v20 = vadd.f32 %v6793_v43, %v6735_v1 }
 0xd43   :  { %6818 = vadd.xlane.f32.xlu1 %v6817_v20 }
 0xd67   :  { %v6708_v33 = vpop.f32.mrf.mxu0  ;;  %v6737_v53 = vpop.f32.mrf.mxu1 }
 0xd68   :  { %v12521_v23 = vadd.f32 %v6737_v53, %v6708_v33 }
 0xd6a   :  { %v6804_v44 = vpop.xlane.xlu0 %6803 }
 0xd6b   :  { %v6826_v31 = vmul.f32 %v6804_v44, %v12282_v60 }
 0xd6d   :  { %v12513_v36 = vsub.f32 %v6723_v9, %v6826_v31  ;;  %v12515_v37 = vsub.f32 %v6781_v14, %v6826_v31 }
 0xd6e   :  { %v6766_v19 = vpop.f32.mrf.mxu2  ;;  %v6795_v46 = vpop.f32.mrf.mxu3 }
 0xd6f   :  { %v6850_v62 = vmul.f32 %v12513_v36, %v12513_v36  ;;  %v6851_v26 = vmul.f32 %v12515_v37, %v12515_v37  ;;  %v12523_v61 = vadd.f32 %v6795_v46, %v6766_v19  ;;  %v6710_v4 = vpop.f32.mrf.mxu0  ;;  %v6739_v12 = vpop.f32.mrf.mxu1 }
 0xd70   :  { %v12536_v41 = vadd.f32 %v6739_v12, %v6710_v4  ;;  %v9939_v4 = vld [vmem:[#allocation23 + $0x74] sm:$0xf0]  ;;  %v9462_v12 = vld [vmem:[#allocation23 + $0xf0] sm:$0xf] }
 0xd71   :  { %v6866_v24 = vadd.f32 %v6851_v26, %v6850_v62  ;;  %v6820_v34 = vadd.f32 %v12523_v61, %v12521_v23 }
 0xd72   :  { %v6807_v9 = vpop.xlane.xlu2 %6806 }
 0xd73   :  { %v6827_v14 = vmul.f32 %v6807_v9, %v12282_v60  ;;  %6867 = vadd.xlane.f32.xlu1 %v6866_v24  ;;  %6821 = vadd.xlane.f32.xlu0 %v6820_v34 }
 0xd75   :  { %v12528_v59 = vsub.f32 %v6725_v63, %v6827_v14  ;;  %v12530_v30 = vsub.f32 %v6783_v58, %v6827_v14  ;;  %v9398_v14 = vld [vmem:[#allocation23 + $0x70] sm:$0xf] }
 0xd76   :  { %v6768_v22 = vpop.f32.mrf.mxu2  ;;  %v6797_v40 = vpop.f32.mrf.mxu3 }
 0xd77   :  { %v6852_v38 = vmul.f32 %v12528_v59, %v12528_v59  ;;  %v6853_v2 = vmul.f32 %v12530_v30, %v12530_v30  ;;  %v12538_v6 = vadd.f32 %v6797_v40, %v6768_v22  ;;  %v9938_v22 = vld [vmem:[#allocation23 + $0x74] sm:$0xf]  ;;  %v9400_v40 = vld [vmem:[#allocation23 + $0x78] sm:$0xf0] }
 0xd79   :  { %v6869_v13 = vadd.f32 %v6853_v2, %v6852_v38  ;;  %v6823_v3 = vadd.f32 %v12538_v6, %v12536_v41  ;;  %v9399_v38 = vor.u32 %v9939_v4, %v9398_v14  ;;  %v9955_v2 = vld [vmem:[#allocation23 + $0xf4] sm:$0xf0] }
 0xd7b   :  { %6824 = vadd.xlane.f32.xlu2 %v6823_v3  ;;  %6870 = vadd.xlane.f32.xlu0 %v6869_v13  ;;  %v9463_v13 = vor.u32 %v9955_v2, %v9462_v12  ;;  %v9954_v3 = vld [vmem:[#allocation23 + $0xf4] sm:$0xf] }
 0xd7c   :  { %7276 = vmatpush.bf16.msrb.mxu0 %v9399_v38  ;;  %v9950_v12 = vld [vmem:[#allocation23 + $0xd4] sm:$0xf]  ;;  %v9448_v38 = vld [vmem:[#allocation23 + $0xd8] sm:$0xf0] }
 0xd7d   :  { %7305 = vmatpush.bf16.msrb.mxu1 %v9463_v13  ;;  %v9451_v2 = vor.u32 %v9950_v12, %v9448_v38  ;;  %v9438_v13 = vld [vmem:[#allocation23 + $0xc0] sm:$0xf]  ;;  %v9929_v12 = vld [vmem:[#allocation23 + $0x24] sm:$0xf0] }
 0xd7e   :  { %v9422_v38 = vld [vmem:[#allocation23 + $0xa0] sm:$0xf] }
 0xd8b   :  { %v6810_v63 = vpop.xlane.xlu1 %6809 }
 0xd8c   :  { %v6828_v58 = vmul.f32 %v6810_v63, %v12282_v60 }
 0xd8e   :  { %v12543_v39 = vsub.f32 %v6728_v8, %v6828_v58  ;;  %v12545_v25 = vsub.f32 %v6786_v15, %v6828_v58  ;;  %v9390_v58 = vld [vmem:[#allocation23 + $0x60] sm:$0xf] }
 0xd90   :  { %v6854_v21 = vmul.f32 %v12543_v39, %v12543_v39  ;;  %v6855_v17 = vmul.f32 %v12545_v25, %v12545_v25 }
 0xd92   :  { %v6872_v5 = vadd.f32 %v6855_v17, %v6854_v21  ;;  %v9937_v21 = vld [vmem:[#allocation23 + $0x64] sm:$0xf0]  ;;  %v9454_v17 = vld [vmem:[#allocation23 + $0xe0] sm:$0xf] }
 0xd93   :  { %v6813_v52 = vpop.xlane.xlu0 %6812 }
 0xd94   :  { %v6829_v18 = vmul.f32 %v6813_v52, %v12282_v60  ;;  %6873 = vadd.xlane.f32.xlu2 %v6872_v5  ;;  %v9391_v5 = vor.u32 %v9937_v21, %v9390_v58  ;;  %v9953_v52 = vld [vmem:[#allocation23 + $0xe4] sm:$0xf0] }
 0xd96   :  { %v12552_v57 = vsub.f32 %v6730_v16, %v6829_v18  ;;  %v12554_v20 = vsub.f32 %v6788_v7, %v6829_v18  ;;  %v9936_v18 = vld [vmem:[#allocation23 + $0x64] sm:$0xf]  ;;  %7277 = vmatpush.bf16.msrb.mxu0 %v9391_v5  ;;  %v9440_v5 = vld [vmem:[#allocation23 + $0xc8] sm:$0xf0] }
 0xd98   :  { %v6856_v8 = vmul.f32 %v12552_v57, %v12552_v57  ;;  %v6857_v15 = vmul.f32 %v12554_v20, %v12554_v20 }
 0xd9a   :  { %v6875_v44 = vadd.f32 %v6857_v15, %v6856_v8  ;;  %v9392_v8 = vld [vmem:[#allocation23 + $0x68] sm:$0xf0]  ;;  %v9455_v15 = vor.u32 %v9953_v52, %v9454_v17  ;;  %v9948_v17 = vld [vmem:[#allocation23 + $0xc4] sm:$0xf] }
 0xd9b   :  { %v9443_v52 = vor.u32 %v9948_v17, %v9440_v5 }
 0xd9c   :  { %6876 = vadd.xlane.f32.xlu1 %v6875_v44  ;;  %v9395_v44 = vor.u32 %v9936_v18, %v9392_v8  ;;  %7306 = vmatpush.bf16.msrb.mxu1 %v9455_v15  ;;  %v9366_v18 = vld [vmem:[#allocation23 + $0x30] sm:$0xf]  ;;  %v9931_v8 = vld [vmem:[#allocation23 + $0x34] sm:$0xf0] }
 0xd9d   :  { %v9430_v15 = vld [vmem:[#allocation23 + $0xb0] sm:$0xf] }
 0xdae   :  { %v6816_v33 = vpop.xlane.xlu2 %6815 }
 0xdaf   :  { %v6830_v53 = vmul.f32 %v6816_v33, %v12282_v60  ;;  %v9952_v33 = vld [vmem:[#allocation23 + $0xe4] sm:$0xf] }
 0xdb1   :  { %v12561_v31 = vsub.f32 %v6733_v54, %v6830_v53  ;;  %v12563_v19 = vsub.f32 %v6791_v35, %v6830_v53  ;;  %v9456_v53 = vld [vmem:[#allocation23 + $0xe8] sm:$0xf0] }
 0xdb3   :  { %v6858_v16 = vmul.f32 %v12561_v31, %v12561_v31  ;;  %v6859_v7 = vmul.f32 %v12563_v19, %v12563_v19 }
 0xdb5   :  { %v6878_v46 = vadd.f32 %v6859_v7, %v6858_v16  ;;  %v9459_v16 = vor.u32 %v9952_v33, %v9456_v53  ;;  %v9382_v7 = vld [vmem:[#allocation23 + $0x50] sm:$0xf]  ;;  %v9947_v33 = vld [vmem:[#allocation23 + $0xb4] sm:$0xf0]  ;;  %v9930_v53 = vld [vmem:[#allocation23 + $0x34] sm:$0xf] }
 0xdb6   :  { %v6819_v62 = vpop.xlane.xlu1 %6818 }
 0xdb7   :  { %v6831_v26 = vmul.f32 %v6819_v62, %v12282_v60  ;;  %6879 = vadd.xlane.f32.xlu0 %v6878_v46  ;;  %v9935_v46 = vld [vmem:[#allocation23 + $0x54] sm:$0xf0]  ;;  %v9446_v62 = vld [vmem:[#allocation23 + $0xd0] sm:$0xf] }
 0xdb9   :  { %v12570_v24 = vsub.f32 %v6735_v1, %v6831_v26  ;;  %v12572_v34 = vsub.f32 %v6793_v43, %v6831_v26  ;;  %v9403_v1 = vor.u32 %v9938_v22, %v9400_v40  ;;  %v9464_v43 = vld [vmem:[#allocation23 + $0xf8] sm:$0xf0]  ;;  %v9383_v26 = vor.u32 %v9935_v46, %v9382_v7  ;;  %v9374_v22 = vld [vmem:[#allocation23 + $0x40] sm:$0xf]  ;;  %v9933_v40 = vld [vmem:[#allocation23 + $0x44] sm:$0xf0] }
 0xdba   :  { %v9467_v63 = vor.u32 %v9954_v3, %v9464_v43  ;;  %v9949_v3 = vld [vmem:[#allocation23 + $0xc4] sm:$0xf0]  ;;  %v9932_v43 = vld [vmem:[#allocation23 + $0x44] sm:$0xf]  ;;  %v9431_v7 = vor.u32 %v9947_v33, %v9430_v15  ;;  %v9414_v15 = vld [vmem:[#allocation23 + $0x90] sm:$0xf] }
 0xdbb   :  { %v6860_v54 = vmul.f32 %v12570_v24, %v12570_v24  ;;  %v6861_v35 = vmul.f32 %v12572_v34, %v12572_v34  ;;  %7334 = vmatpush.bf16.msrb.mxu2 %v9403_v1  ;;  %7278 = vmatpush.bf16.msrb.mxu0 %v9383_v26  ;;  %v9375_v1 = vor.u32 %v9933_v40, %v9374_v22  ;;  %v9432_v26 = vld [vmem:[#allocation23 + $0xb8] sm:$0xf0]  ;;  %v9945_v40 = vld [vmem:[#allocation23 + $0xa4] sm:$0xf0] }
 0xdbc   :  { %7363 = vmatpush.bf16.msrb.mxu3 %v9467_v63  ;;  %v9376_v63 = vld [vmem:[#allocation23 + $0x48] sm:$0xf0]  ;;  %v9439_v58 = vor.u32 %v9949_v3, %v9438_v13  ;;  %v9928_v13 = vld [vmem:[#allocation23 + $0x24] sm:$0xf] }
 0xdbd   :  { %v6881_v9 = vadd.f32 %v6861_v35, %v6860_v54  ;;  %v9951_v54 = vld [vmem:[#allocation23 + $0xd4] sm:$0xf0]  ;;  %v9934_v35 = vld [vmem:[#allocation23 + $0x54] sm:$0xf]  ;;  %v9379_v21 = vor.u32 %v9932_v43, %v9376_v63  ;;  %v9423_v43 = vor.u32 %v9945_v40, %v9422_v38  ;;  %v9406_v38 = vld [vmem:[#allocation23 + $0x80] sm:$0xf] }
 0xdbe   :  { %v9447_v14 = vor.u32 %v9951_v54, %v9446_v62  ;;  %v9946_v62 = vld [vmem:[#allocation23 + $0xb4] sm:$0xf] }
 0xdbf   :  { %6882 = vadd.xlane.f32.xlu2 %v6881_v9  ;;  %7335 = vmatpush.bf16.msrb.mxu2 %v9395_v44  ;;  %v9384_v9 = vld [vmem:[#allocation23 + $0x58] sm:$0xf0]  ;;  %v9367_v44 = vor.u32 %v9931_v8, %v9366_v18  ;;  %v9350_v18 = vld [vmem:[#allocation23 + $0x10] sm:$0xf]  ;;  %v9927_v8 = vld [vmem:[#allocation23 + $0x14] sm:$0xf0] }
 0xdc0   :  { %7364 = vmatpush.bf16.msrb.mxu3 %v9459_v16  ;;  %v9387_v4 = vor.u32 %v9934_v35, %v9384_v9  ;;  %7307 = vmatpush.bf16.msrb.mxu1 %v9447_v14  ;;  %v9368_v16 = vld [vmem:[#allocation23 + $0x38] sm:$0xf0]  ;;  %v9435_v35 = vor.u32 %v9946_v62, %v9432_v26  ;;  %v9942_v62 = vld [vmem:[#allocation23 + $0x94] sm:$0xf] }
 0xdc1   :  { %7279 = vmatpush.bf16.msrb.mxu0 %v9375_v1  ;;  %v9371_v46 = vor.u32 %v9930_v53, %v9368_v16  ;;  %v9360_v1 = vld [vmem:[#allocation23 + $0x28] sm:$0xf0]  ;;  %v9943_v53 = vld [vmem:[#allocation23 + $0x94] sm:$0xf0]  ;;  %v9352_v16 = vld [vmem:[#allocation23 + $0x18] sm:$0xf0] }
 0xdc2   :  { %v9363_v63 = vor.u32 %v9928_v13, %v9360_v1  ;;  %v9416_v26 = vld [vmem:[#allocation23 + $0x98] sm:$0xf0]  ;;  %v9941_v13 = vld [vmem:[#allocation23 + $0x84] sm:$0xf0]  ;;  %v9924_v1 = vld [vmem:[#allocation23 + $0x4] sm:$0xf] }
 0xdc3   :  { %7336 = vmatpush.bf16.msrb.mxu2 %v9387_v4  ;;  %v9358_v4 = vld [vmem:[#allocation23 + $0x20] sm:$0xf] }
 0xdc4   :  { %7365 = vmatpush.bf16.msrb.mxu3 %v9451_v2  ;;  %7308 = vmatpush.bf16.msrb.mxu1 %v9439_v58  ;;  %v9359_v22 = vor.u32 %v9929_v12, %v9358_v4  ;;  %v9944_v58 = vld [vmem:[#allocation23 + $0xa4] sm:$0xf]  ;;  %v9342_v4 = vld [vmem:[#allocation23] sm:$0xf]  ;;  %v9925_v12 = vld [vmem:[#allocation23 + $0x4] sm:$0xf0] }
 0xdc5   :  { %7280 = vmatpush.bf16.msrb.mxu0 %v9367_v44  ;;  %v9343_v40 = vor.u32 %v9925_v12, %v9342_v4 }
 0xdc7   :  { %7337 = vmatpush.bf16.msrb.mxu2 %v9379_v21  ;;  %v9424_v21 = vld [vmem:[#allocation23 + $0xa8] sm:$0xf0] }
 0xdc8   :  { %7366 = vmatpush.bf16.msrb.mxu3 %v9443_v52  ;;  %7309 = vmatpush.bf16.msrb.mxu1 %v9431_v7  ;;  %v9427_v52 = vor.u32 %v9944_v58, %v9424_v21  ;;  %v9415_v7 = vor.u32 %v9943_v53, %v9414_v15  ;;  %v9407_v58 = vor.u32 %v9941_v13, %v9406_v38 }
 0xdc9   :  { %7281 = vmatpush.bf16.msrb.mxu0 %v9359_v22 }
 0xdcb   :  { %7338 = vmatpush.bf16.msrb.mxu2 %v9371_v46 }
 0xdcc   :  { %7367 = vmatpush.bf16.msrb.mxu3 %v9435_v35  ;;  %7310 = vmatpush.bf16.msrb.mxu1 %v9423_v43  ;;  %v9419_v35 = vor.u32 %v9942_v62, %v9416_v26  ;;  %v9344_v43 = vld [vmem:[#allocation23 + $0x8] sm:$0xf0]  ;;  %v6801_v26 = vld [vmem:[#allocation20] sm:$0x3] }
 0xdcd   :  { %v9347_v21 = vor.u32 %v9924_v1, %v9344_v43  ;;  %v12611_v4 = vperm.slane %v6801_v26, 0  ;;  %v12613_v38 = vperm.slane %v6801_v26, 1 }
 0xdcf   :  { %7339 = vmatpush.bf16.msrb.mxu2 %v9363_v63 }
 0xdd0   :  { %7368 = vmatpush.bf16.msrb.mxu3 %v9427_v52  ;;  %7311 = vmatpush.bf16.msrb.mxu1 %v9415_v7  ;;  %v9940_v52 = vld [vmem:[#allocation23 + $0x84] sm:$0xf] }
 0xdd4   :  { %7369 = vmatpush.bf16.msrb.mxu3 %v9419_v35  ;;  %7312 = vmatpush.bf16.msrb.mxu1 %v9407_v58 }
 0xde6   :  { %v6868_v54 = vpop.xlane.xlu1 %6867  ;;  %v6822_v14 = vpop.xlane.xlu0 %6821 }
 0xde7   :  { %v6890_v9 = vmul.f32 %v6868_v54, %v12282_v60  ;;  %v6832_v2 = vmul.f32 %v6822_v14, %v12282_v60 }
 0xde9   :  { %v12580_v3 = vadd.f32 1e-05, %v6890_v9  ;;  %v12583_v17 = vsub.f32 %v12521_v23, %v6832_v2  ;;  %v12586_v5 = vsub.f32 %v12523_v61, %v6832_v2  ;;  %v9351_v23 = vor.u32 %v9927_v8, %v9350_v18  ;;  %v9926_v61 = vld [vmem:[#allocation23 + $0x14] sm:$0xf]  ;;  %v9408_v18 = vld [vmem:[#allocation23 + $0x88] sm:$0xf0] }
 0xdea   :  { %v9355_v46 = vor.u32 %v9926_v61, %v9352_v16 }
 0xdeb   :  { %10166 = vrsqrt.f32 %v12580_v3  ;;  %v6862_v44 = vmul.f32 %v12583_v17, %v12583_v17  ;;  %v6863_v33 = vmul.f32 %v12586_v5, %v12586_v5  ;;  %7282 = vmatpush.bf16.msrb.mxu0 %v9351_v23  ;;  %v9411_v23 = vor.u32 %v9940_v52, %v9408_v18 }
 0xdec   :  { %7340 = vmatpush.bf16.msrb.mxu2 %v9355_v46  ;;  %vm6912_vm13 = vweird.f32 %v12580_v3 }
 0xded   :  { %v6884_v54 = vadd.f32 %v6863_v33, %v6862_v44  ;;  %7370 = vmatpush.bf16.msrb.mxu3 %v9411_v23 }
 0xdee   :  { %v6871_v9 = vpop.xlane.xlu0 %6870  ;;  %v6825_v14 = vpop.xlane.xlu2 %6824 }
 0xdef   :  { %v6891_v2 = vmul.f32 %v6871_v9, %v12282_v60  ;;  %v6833_v22 = vmul.f32 %v6825_v14, %v12282_v60  ;;  %6885 = vadd.xlane.f32.xlu1 %v6884_v54  ;;  %7283 = vmatpush.bf16.msrb.mxu0 %v9343_v40 }
 0xdf0   :  { %7341 = vmatpush.bf16.msrb.mxu2 %v9347_v21 }
 0xdf1   :  { %v10167_v63 = vpop.eup %10166  ;;  %v6899_v15 = vadd.f32 1e-05, %v6891_v2  ;;  %v12597_v44 = vsub.f32 %v12536_v41, %v6833_v22  ;;  %v12600_v33 = vsub.f32 %v12538_v6, %v6833_v22  ;;  %v6800_v41 = vld [vmem:[#allocation19] sm:$0x3] }
 0xdf2   :  { %v6907_v8 = vmul.f32 %v10167_v63, %v12580_v3  ;;  %vm6913_vm12 = vweird.f32 %v10167_v63  ;;  %v12607_v35 = vperm.slane %v6800_v41, 0  ;;  %v12609_v9 = vperm.slane %v6800_v41, 1 }
 0xdf3   :  { %10168 = vrsqrt.f32 %v6899_v15  ;;  %v6864_v61 = vmul.f32 %v12597_v44, %v12597_v44  ;;  %v6865_v16 = vmul.f32 %v12600_v33, %v12600_v33  ;;  %vm6914_vm14 = vmor %vm6912_vm13, %vm6913_vm12  ;;  %vm6922_vm0 = vweird.f32 %v6899_v15 }
 0xdf4   :  { %v6908_v53 = vmul.f32 %v10167_v63, %v6907_v8 }
 0xdf5   :  { %v6887_v46 = vadd.f32 %v6865_v16, %v6864_v61 }
 0xdf6   :  { %v6909_v7 = vmul.f32 0.5, %v6908_v53 }
 0xdf7   :  { %6888 = vadd.xlane.f32.xlu0 %v6887_v46 }
 0xdf8   :  { %v6910_v62 = vsub.f32 1.5, %v6909_v7 }
 0xdf9   :  { %v10169_v6 = vpop.eup %10168 }
 0xdfa   :  { %v6911_v54 = vmul.f32 %v10167_v63, %v6910_v62  ;;  %v6917_v14 = vmul.f32 %v10169_v6, %v6899_v15  ;;  %vm6923_vm15 = vweird.f32 %v10169_v6 }
 0xdfb   :  { %vm6924_vm1 = vmor %vm6922_vm0, %vm6923_vm15 }
 0xdfc   :  { %v6915_v12 = vsel %vm6914_vm14, %v10167_v63, %v6911_v54  ;;  %v6918_v40 = vmul.f32 %v10169_v6, %v6917_v14 }
 0xdfd   :  { %v6986_v2 = vmul.f32 %v6915_v12, %v12513_v36  ;;  %v6987_v22 = vmul.f32 %v6915_v12, %v12515_v37 }
 0xdfe   :  { %v6919_v1 = vmul.f32 0.5, %v6918_v40 }
 0xdff   :  { %v7007_v13 = vmul.f32 %v12607_v35, %v6986_v2  ;;  %v7008_v3 = vmul.f32 %v12609_v9, %v6987_v22 }
 0xe00   :  { %v6920_v21 = vsub.f32 1.5, %v6919_v1 }
 0xe01   :  { %v7028_v43 = vadd.f32 %v12611_v4, %v7007_v13  ;;  %v7029_v58 = vadd.f32 %v12613_v38, %v7008_v3 }
 0xe02   :  { %v6921_v52 = vmul.f32 %v10169_v6, %v6920_v21 }
 0xe03   :  { %v7044_v63 = vadd.f32 %v7028_v43, %v12423_v0  ;;  %v7045_v36 = vadd.f32 %v7029_v58, %v12427_v47 }
 0xe04   :  { %v6925_v37 = vsel %vm6924_vm1, %v10169_v6, %v6921_v52 }
 0xe05   :  { %7060 = vst [vmem:[#allocation25] sm:$0xff] %v7044_v63  ;;  %v6988_v18 = vmul.f32 %v6925_v37, %v12528_v59  ;;  %v6989_v8 = vmul.f32 %v6925_v37, %v12530_v30 }
 0xe06   :  { %7061 = vst [vmem:[#allocation25 + $0x8] sm:$0xff] %v7045_v36 }
 0xe07   :  { %v6874_v23 = vpop.xlane.xlu2 %6873  ;;  %v7009_v53 = vmul.f32 %v12607_v35, %v6988_v18  ;;  %v7010_v61 = vmul.f32 %v12609_v9, %v6989_v8 }
 0xe08   :  { %v6892_v16 = vmul.f32 %v6874_v23, %v12282_v60 }
 0xe09   :  { %v7030_v15 = vadd.f32 %v12611_v4, %v7009_v53  ;;  %v7031_v0 = vadd.f32 %v12613_v38, %v7010_v61 }
 0xe0a   :  { %v6900_v47 = vadd.f32 1e-05, %v6892_v16 }
 0xe0b   :  { %v7046_v7 = vadd.f32 %v7030_v15, %v12425_v42  ;;  %v7047_v59 = vadd.f32 %v7031_v0, %v12429_v50 }
 0xe0c   :  { %10170 = vrsqrt.f32 %v6900_v47  ;;  %vm6932_vm3 = vweird.f32 %v6900_v47 }
 0xe0d   :  { %7062 = vst [vmem:[#allocation25 + $0x10] sm:$0xff] %v7046_v7  ;;  %v7076_v30 = vpack.c.bf16 %v7046_v7, %v7044_v63  ;;  %v7077_v46 = vpack.c.bf16 %v7047_v59, %v7045_v36 }
 0xe0e   :  { %7063 = vst [vmem:[#allocation25 + $0x18] sm:$0xff] %v7047_v59 }
 0xe0f   :  { %v6877_v41 = vpop.xlane.xlu1 %6876  ;;  %7284 = vmatmul.bf16.vlgmr.msrb.gmra.mxu0 %v7076_v30  ;;  %7313 = vmatmul.bf16.vlgmr.msrb.gmra.mxu1 %v7077_v46 }
 0xe10   :  { %v6893_v62 = vmul.f32 %v6877_v41, %v12282_v60  ;;  %7342 = vmatmul.bf16.vlgmr.msrb.gmra.mxu2 %v7076_v30  ;;  %7371 = vmatmul.bf16.vlgmr.msrb.gmra.mxu3 %v7077_v46 }
 0xe12   :  { %v10171_v26 = vpop.eup %10170  ;;  %v6901_v6 = vadd.f32 1e-05, %v6893_v62 }
 0xe13   :  { %v6927_v54 = vmul.f32 %v10171_v26, %v6900_v47  ;;  %vm6933_vm2 = vweird.f32 %v10171_v26 }
 0xe14   :  { %10172 = vrsqrt.f32 %v6901_v6  ;;  %vm6934_vm4 = vmor %vm6932_vm3, %vm6933_vm2  ;;  %vm6942_vm6 = vweird.f32 %v6901_v6 }
 0xe15   :  { %v6928_v14 = vmul.f32 %v10171_v26, %v6927_v54 }
 0xe17   :  { %v6929_v12 = vmul.f32 0.5, %v6928_v14 }
 0xe19   :  { %v6930_v42 = vsub.f32 1.5, %v6929_v12 }
 0xe1a   :  { %v10173_v50 = vpop.eup %10172 }
 0xe1b   :  { %v6931_v2 = vmul.f32 %v10171_v26, %v6930_v42  ;;  %v6937_v22 = vmul.f32 %v10173_v50, %v6901_v6  ;;  %vm6943_vm5 = vweird.f32 %v10173_v50 }
 0xe1c   :  { %vm6944_vm7 = vmor %vm6942_vm6, %vm6943_vm5 }
 0xe1d   :  { %v6935_v40 = vsel %vm6934_vm4, %v10171_v26, %v6931_v2  ;;  %v6938_v13 = vmul.f32 %v10173_v50, %v6937_v22 }
 0xe1e   :  { %v6990_v3 = vmul.f32 %v6935_v40, %v12543_v39  ;;  %v6991_v1 = vmul.f32 %v6935_v40, %v12545_v25 }
 0xe1f   :  { %v6939_v43 = vmul.f32 0.5, %v6938_v13 }
 0xe20   :  { %v7011_v58 = vmul.f32 %v12607_v35, %v6990_v3  ;;  %v7012_v21 = vmul.f32 %v12609_v9, %v6991_v1 }
 0xe21   :  { %v6940_v52 = vsub.f32 1.5, %v6939_v43 }
 0xe22   :  { %v7032_v63 = vadd.f32 %v12611_v4, %v7011_v58  ;;  %v7033_v36 = vadd.f32 %v12613_v38, %v7012_v21 }
 0xe23   :  { %v6941_v37 = vmul.f32 %v10173_v50, %v6940_v52 }
 0xe24   :  { %v7048_v18 = vadd.f32 %v7032_v63, %v12449_v10  ;;  %v7049_v39 = vadd.f32 %v7033_v36, %v12453_v49 }
 0xe25   :  { %v6945_v8 = vsel %vm6944_vm7, %v10173_v50, %v6941_v37 }
 0xe26   :  { %v6992_v25 = vmul.f32 %v6945_v8, %v12552_v57  ;;  %v6993_v23 = vmul.f32 %v6945_v8, %v12554_v20  ;;  %7064 = vst [vmem:[#allocation25 + $0x20] sm:$0xff] %v7048_v18 }
 0xe27   :  { %7065 = vst [vmem:[#allocation25 + $0x28] sm:$0xff] %v7049_v39 }
 0xe28   :  { %v7013_v53 = vmul.f32 %v12607_v35, %v6992_v25  ;;  %v7014_v61 = vmul.f32 %v12609_v9, %v6993_v23 }
 0xe2a   :  { %v6880_v16 = vpop.xlane.xlu0 %6879  ;;  %v7034_v15 = vadd.f32 %v12611_v4, %v7013_v53  ;;  %v7035_v0 = vadd.f32 %v12613_v38, %v7014_v61 }
 0xe2b   :  { %v6894_v10 = vmul.f32 %v6880_v16, %v12282_v60 }
 0xe2c   :  { %v7050_v49 = vadd.f32 %v7034_v15, %v12451_v56  ;;  %v7051_v47 = vadd.f32 %v7035_v0, %v12455_v28 }
 0xe2d   :  { %v6902_v57 = vadd.f32 1e-05, %v6894_v10 }
 0xe2e   :  { %7066 = vst [vmem:[#allocation25 + $0x30] sm:$0xff] %v7050_v49  ;;  %v7078_v20 = vpack.c.bf16 %v7050_v49, %v7048_v18  ;;  %v7079_v7 = vpack.c.bf16 %v7051_v47, %v7049_v39 }
 0xe2f   :  { %10174 = vrsqrt.f32 %v6902_v57  ;;  %7067 = vst [vmem:[#allocation25 + $0x38] sm:$0xff] %v7051_v47  ;;  %vm6952_vm9 = vweird.f32 %v6902_v57 }
 0xe30   :  { %7289 = vmatmul.bf16.gmra.mxu0 %v7078_v20  ;;  %7318 = vmatmul.bf16.gmra.mxu1 %v7079_v7 }
 0xe31   :  { %7347 = vmatmul.bf16.gmra.mxu2 %v7078_v20  ;;  %7376 = vmatmul.bf16.gmra.mxu3 %v7079_v7 }
 0xe32   :  { %v6883_v59 = vpop.xlane.xlu2 %6882 }
 0xe33   :  { %v6895_v30 = vmul.f32 %v6883_v59, %v12282_v60 }
 0xe35   :  { %v10175_v46 = vpop.eup %10174  ;;  %v6903_v41 = vadd.f32 1e-05, %v6895_v30 }
 0xe36   :  { %v6947_v62 = vmul.f32 %v10175_v46, %v6902_v57  ;;  %vm6953_vm8 = vweird.f32 %v10175_v46 }
 0xe37   :  { %10176 = vrsqrt.f32 %v6903_v41  ;;  %vm6954_vm10 = vmor %vm6952_vm9, %vm6953_vm8  ;;  %vm6962_vm12 = vweird.f32 %v6903_v41 }
 0xe38   :  { %v6948_v56 = vmul.f32 %v10175_v46, %v6947_v62 }
 0xe3a   :  { %v6949_v26 = vmul.f32 0.5, %v6948_v56 }
 0xe3c   :  { %v6950_v28 = vsub.f32 1.5, %v6949_v26 }
 0xe3d   :  { %v10177_v6 = vpop.eup %10176 }
 0xe3e   :  { %v6951_v54 = vmul.f32 %v10175_v46, %v6950_v28  ;;  %v6957_v14 = vmul.f32 %v10177_v6, %v6903_v41  ;;  %vm6963_vm11 = vweird.f32 %v10177_v6 }
 0xe3f   :  { %vm6964_vm13 = vmor %vm6962_vm12, %vm6963_vm11 }
 0xe40   :  { %v6955_v12 = vsel %vm6954_vm10, %v10175_v46, %v6951_v54  ;;  %v6958_v42 = vmul.f32 %v10177_v6, %v6957_v14 }
 0xe41   :  { %v6994_v50 = vmul.f32 %v6955_v12, %v12561_v31  ;;  %v6995_v2 = vmul.f32 %v6955_v12, %v12563_v19 }
 0xe42   :  { %v6959_v22 = vmul.f32 0.5, %v6958_v42 }
 0xe43   :  { %v7015_v40 = vmul.f32 %v12607_v35, %v6994_v50  ;;  %v7016_v13 = vmul.f32 %v12609_v9, %v6995_v2 }
 0xe44   :  { %v6960_v3 = vsub.f32 1.5, %v6959_v22 }
 0xe45   :  { %v7036_v1 = vadd.f32 %v12611_v4, %v7015_v40  ;;  %v7037_v43 = vadd.f32 %v12613_v38, %v7016_v13 }
 0xe46   :  { %v6961_v58 = vmul.f32 %v10177_v6, %v6960_v3 }
 0xe47   :  { %v7052_v21 = vadd.f32 %v7036_v1, %v12474_v11  ;;  %v7053_v31 = vadd.f32 %v7037_v43, %v12478_v51 }
 0xe48   :  { %v6965_v52 = vsel %vm6964_vm13, %v10177_v6, %v6961_v58 }
 0xe49   :  { %v6996_v19 = vmul.f32 %v6965_v52, %v12570_v24  ;;  %v6997_v63 = vmul.f32 %v6965_v52, %v12572_v34  ;;  %7068 = vst [vmem:[#allocation25 + $0x40] sm:$0xff] %v7052_v21 }
 0xe4a   :  { %7069 = vst [vmem:[#allocation25 + $0x48] sm:$0xff] %v7053_v31 }
 0xe4b   :  { %v7017_v36 = vmul.f32 %v12607_v35, %v6996_v19  ;;  %v7018_v37 = vmul.f32 %v12609_v9, %v6997_v63 }
 0xe4d   :  { %v7038_v18 = vadd.f32 %v12611_v4, %v7017_v36  ;;  %v7039_v39 = vadd.f32 %v12613_v38, %v7018_v37 }
 0xe4f   :  { %v7054_v8 = vadd.f32 %v7038_v18, %v12476_v45  ;;  %v7055_v11 = vadd.f32 %v7039_v39, %v12480_v27 }
 0xe51   :  { %7070 = vst [vmem:[#allocation25 + $0x50] sm:$0xff] %v7054_v8  ;;  %v7080_v51 = vpack.c.bf16 %v7054_v8, %v7052_v21  ;;  %v7081_v25 = vpack.c.bf16 %v7055_v11, %v7053_v31 }
 0xe52   :  { %7071 = vst [vmem:[#allocation25 + $0x58] sm:$0xff] %v7055_v11 }
 0xe53   :  { %7294 = vmatmul.bf16.gmra.mxu0 %v7080_v51  ;;  %7323 = vmatmul.bf16.gmra.mxu1 %v7081_v25 }
 0xe54   :  { %7352 = vmatmul.bf16.gmra.mxu2 %v7080_v51  ;;  %7381 = vmatmul.bf16.gmra.mxu3 %v7081_v25 }
 0xe62   :  { %v6886_v24 = vpop.xlane.xlu1 %6885 }
 0xe63   :  { %v6896_v34 = vmul.f32 %v6886_v24, %v12282_v60 }
 0xe65   :  { %v6904_v23 = vadd.f32 1e-05, %v6896_v34 }
 0xe67   :  { %10178 = vrsqrt.f32 %v6904_v23  ;;  %vm6972_vm15 = vweird.f32 %v6904_v23 }
 0xe6a   :  { %v6889_v53 = vpop.xlane.xlu0 %6888 }
 0xe6b   :  { %v6897_v61 = vmul.f32 %v6889_v53, %v12282_v60 }
 0xe6d   :  { %v10179_v16 = vpop.eup %10178  ;;  %v6905_v15 = vadd.f32 1e-05, %v6897_v61 }
 0xe6e   :  { %v6967_v45 = vmul.f32 %v10179_v16, %v6904_v23  ;;  %vm6973_vm14 = vweird.f32 %v10179_v16 }
 0xe6f   :  { %10180 = vrsqrt.f32 %v6905_v15  ;;  %vm6974_vm0 = vmor %vm6972_vm15, %vm6973_vm14  ;;  %vm6982_vm2 = vweird.f32 %v6905_v15 }
 0xe70   :  { %v6968_v27 = vmul.f32 %v10179_v16, %v6967_v45 }
 0xe72   :  { %v6969_v0 = vmul.f32 0.5, %v6968_v27 }
 0xe74   :  { %v6970_v10 = vsub.f32 1.5, %v6969_v0 }
 0xe75   :  { %v10181_v49 = vpop.eup %10180 }
 0xe76   :  { %v6971_v47 = vmul.f32 %v10179_v16, %v6970_v10  ;;  %v6977_v57 = vmul.f32 %v10181_v49, %v6905_v15  ;;  %vm6983_vm1 = vweird.f32 %v10181_v49 }
 0xe77   :  { %vm6984_vm3 = vmor %vm6982_vm2, %vm6983_vm1 }
 0xe78   :  { %v6975_v20 = vsel %vm6974_vm0, %v10179_v16, %v6971_v47  ;;  %v6978_v30 = vmul.f32 %v10181_v49, %v6977_v57 }
 0xe79   :  { %v6998_v7 = vmul.f32 %v6975_v20, %v12583_v17  ;;  %v6999_v59 = vmul.f32 %v6975_v20, %v12586_v5 }
 0xe7a   :  { %v6979_v60 = vmul.f32 0.5, %v6978_v30 }
 0xe7b   :  { %v7019_v46 = vmul.f32 %v12607_v35, %v6998_v7  ;;  %v7020_v41 = vmul.f32 %v12609_v9, %v6999_v59 }
 0xe7c   :  { %v6980_v62 = vsub.f32 1.5, %v6979_v60 }
 0xe7d   :  { %v7040_v56 = vadd.f32 %v12611_v4, %v7019_v46  ;;  %v7041_v26 = vadd.f32 %v12613_v38, %v7020_v41 }
 0xe7e   :  { %v6981_v28 = vmul.f32 %v10181_v49, %v6980_v62 }
 0xe7f   :  { %v7056_v6 = vadd.f32 %v7040_v56, %v12500_v29  ;;  %v7057_v17 = vadd.f32 %v7041_v26, %v12504_v32 }
 0xe80   :  { %v6985_v5 = vsel %vm6984_vm3, %v10181_v49, %v6981_v28 }
 0xe81   :  { %7072 = vst [vmem:[#allocation25 + $0x60] sm:$0xff] %v7056_v6  ;;  %v7000_v54 = vmul.f32 %v6985_v5, %v12597_v44  ;;  %v7001_v14 = vmul.f32 %v6985_v5, %v12600_v33 }
 0xe82   :  { %7073 = vst [vmem:[#allocation25 + $0x68] sm:$0xff] %v7057_v17 }
 0xe83   :  { %v7021_v12 = vmul.f32 %v12607_v35, %v7000_v54  ;;  %v7022_v42 = vmul.f32 %v12609_v9, %v7001_v14 }
 0xe85   :  { %v7042_v50 = vadd.f32 %v12611_v4, %v7021_v12  ;;  %v7043_v2 = vadd.f32 %v12613_v38, %v7022_v42 }
 0xe87   :  { %v7058_v29 = vadd.f32 %v7042_v50, %v12502_v48  ;;  %v7059_v32 = vadd.f32 %v7043_v2, %v12506_v55 }
 0xe89   :  { %7074 = vst [vmem:[#allocation25 + $0x70] sm:$0xff] %v7058_v29  ;;  %v7082_v22 = vpack.c.bf16 %v7058_v29, %v7056_v6  ;;  %v7083_v40 = vpack.c.bf16 %v7059_v32, %v7057_v17 }
 0xe8a   :  { %7075 = vst [vmem:[#allocation25 + $0x78] sm:$0xff] %v7059_v32 }
 0xe8b   :  { %7299 = vmatmul.bf16.gmra.mxu0 %v7082_v22  ;;  %7328 = vmatmul.bf16.gmra.mxu1 %v7083_v40  ;;  %7420 = dma.vmem_to_hbm [thread:$0]  %s7413_s17, 2048, %s7415_s0, [#allocation4], %s10607_s1, %s10607_s1, %s10608_s18  }
 0xe8c   :  { %v7285_v44 = vpop.f32.mrf.mxu0  ;;  %v7314_v33 = vpop.f32.mrf.mxu1  ;;  %7357 = vmatmul.bf16.gmra.mxu2 %v7082_v22  ;;  %7386 = vmatmul.bf16.gmra.mxu3 %v7083_v40 }
 0xe8d   :  { %v7315_v35 = vadd.f32 %v7314_v33, %v7285_v44 }
 0xe8f   :  { %7392 = vst [vmem:[#allocation26] sm:$0xff] %v7315_v35 }
 0xe93   :  { %v7343_v9 = vpop.f32.mrf.mxu2  ;;  %v7372_v4 = vpop.f32.mrf.mxu3 }
 0xe94   :  { %v7373_v13 = vadd.f32 %v7372_v4, %v7343_v9  ;;  %v7287_v38 = vpop.f32.mrf.mxu0  ;;  %v7316_v3 = vpop.f32.mrf.mxu1 }
 0xe95   :  { %v7317_v48 = vadd.f32 %v7316_v3, %v7287_v38 }
 0xe96   :  { %7393 = vst [vmem:[#allocation26 + $0x8] sm:$0xff] %v7373_v13 }
 0xe97   :  { %7394 = vst [vmem:[#allocation26 + $0x10] sm:$0xff] %v7317_v48 }
 0xe9b   :  { %v7345_v55 = vpop.f32.mrf.mxu2  ;;  %v7374_v1 = vpop.f32.mrf.mxu3 }
 0xe9c   :  { %v7375_v43 = vadd.f32 %v7374_v1, %v7345_v55 }
 0xe9e   :  { %7395 = vst [vmem:[#allocation26 + $0x18] sm:$0xff] %v7375_v43 }
 0xead   :  { %v7290_v58 = vpop.f32.mrf.mxu0  ;;  %v7319_v21 = vpop.f32.mrf.mxu1 }
 0xeae   :  { %v7320_v31 = vadd.f32 %v7319_v21, %v7290_v58 }
 0xeb0   :  { %7396 = vst [vmem:[#allocation26 + $0x20] sm:$0xff] %v7320_v31 }
 0xeb4   :  { %v7348_v52 = vpop.f32.mrf.mxu2  ;;  %v7377_v19 = vpop.f32.mrf.mxu3 }
 0xeb5   :  { %v7378_v63 = vadd.f32 %v7377_v19, %v7348_v52  ;;  %v7292_v36 = vpop.f32.mrf.mxu0  ;;  %v7321_v37 = vpop.f32.mrf.mxu1 }
 0xeb6   :  { %v7322_v18 = vadd.f32 %v7321_v37, %v7292_v36 }
 0xeb7   :  { %7397 = vst [vmem:[#allocation26 + $0x28] sm:$0xff] %v7378_v63 }
 0xeb8   :  { %7398 = vst [vmem:[#allocation26 + $0x30] sm:$0xff] %v7322_v18 }
 0xebc   :  { %v7350_v39 = vpop.f32.mrf.mxu2  ;;  %v7379_v8 = vpop.f32.mrf.mxu3 }
 0xebd   :  { %v7380_v11 = vadd.f32 %v7379_v8, %v7350_v39 }
 0xebf   :  { %7399 = vst [vmem:[#allocation26 + $0x38] sm:$0xff] %v7380_v11 }
 0xed0   :  { %v7295_v51 = vpop.f32.mrf.mxu0  ;;  %v7324_v25 = vpop.f32.mrf.mxu1 }
 0xed1   :  { %v7325_v24 = vadd.f32 %v7324_v25, %v7295_v51 }
 0xed3   :  { %7400 = vst [vmem:[#allocation26 + $0x40] sm:$0xff] %v7325_v24 }
 0xed7   :  { %v7353_v34 = vpop.f32.mrf.mxu2  ;;  %v7382_v23 = vpop.f32.mrf.mxu3 }
 0xed8   :  { %v7383_v53 = vadd.f32 %v7382_v23, %v7353_v34  ;;  %v7297_v61 = vpop.f32.mrf.mxu0  ;;  %v7326_v16 = vpop.f32.mrf.mxu1 }
 0xed9   :  { %v7327_v45 = vadd.f32 %v7326_v16, %v7297_v61 }
 0xeda   :  { %7401 = vst [vmem:[#allocation26 + $0x48] sm:$0xff] %v7383_v53 }
 0xedb   :  { %7402 = vst [vmem:[#allocation26 + $0x50] sm:$0xff] %v7327_v45 }
 0xedf   :  { %v7355_v15 = vpop.f32.mrf.mxu2  ;;  %v7384_v27 = vpop.f32.mrf.mxu3 }
 0xee0   :  { %v7385_v0 = vadd.f32 %v7384_v27, %v7355_v15 }
 0xee2   :  { %7403 = vst [vmem:[#allocation26 + $0x58] sm:$0xff] %v7385_v0 }
 0xf08   :  { %v7300_v10 = vpop.f32.mrf.mxu0  ;;  %v7329_v49 = vpop.f32.mrf.mxu1 }
 0xf09   :  { %v7330_v47 = vadd.f32 %v7329_v49, %v7300_v10 }
 0xf0b   :  { %7404 = vst [vmem:[#allocation26 + $0x60] sm:$0xff] %v7330_v47 }
 0xf0f   :  { %v7358_v57 = vpop.f32.mrf.mxu2  ;;  %v7387_v20 = vpop.f32.mrf.mxu3 }
 0xf10   :  { %v7388_v7 = vadd.f32 %v7387_v20, %v7358_v57  ;;  %v7302_v59 = vpop.f32.mrf.mxu0  ;;  %v7331_v30 = vpop.f32.mrf.mxu1 }
 0xf11   :  { %v7332_v60 = vadd.f32 %v7331_v30, %v7302_v59 }
 0xf12   :  { %7405 = vst [vmem:[#allocation26 + $0x68] sm:$0xff] %v7388_v7 }
 0xf13   :  { %7406 = vst [vmem:[#allocation26 + $0x70] sm:$0xff] %v7332_v60 }
 0xf17   :  { %v7360_v46 = vpop.f32.mrf.mxu2  ;;  %v7389_v41 = vpop.f32.mrf.mxu3 }
 0xf18   :  { %v7390_v62 = vadd.f32 %v7389_v41, %v7360_v46 }
 0xf1a   :  { %7407 = vst [vmem:[#allocation26 + $0x78] sm:$0xff] %v7390_v62 }
 0xf1b   :  { %7433 = dma.vmem_to_hbm [thread:$0]  %s7426_s19, 2048, %s7428_s9, [#allocation27], %s10607_s1, %s10607_s1, %s10608_s18  }
 0xf1c   :  { %10599 = dma.done.wait [#allocation4], 2048  }
 0xf1d   :  { %10600 = vsyncadd [#allocation4], 4294965248 }
 0xf1e   :  { %10601 = dma.done.wait [#allocation27], 2048  }
 0xf1f   :  { %10602 = vsyncadd [#allocation27], 4294965248 }
 0xf20   :  { %7442 = vsyncpa [#allocation3], 1 }
 0xf21   :  { %7443 = vsyncpa [#allocation6], 1 }
 0xf22   :  { %7444 = vsyncpa [#allocation9], 1 }
 0xf23   :  { %7445 = vsyncpa [#allocation12], 1 }
 0xf24   :  { %7446 = vsyncpa [#allocation15], 1 }
 0xf25   :  { %7447 = vsyncpa [#allocation18], 1 }
 0xf26   :  { %7448 = vsyncpa [#allocation21], 1 }
 0xf27   :  { %7449 = vsyncpa [#allocation24], 1 }
 0xf28   :  { %7450 = vsyncpa [#allocation4], 1 }
 0xf29   :  { %7451 = vsyncpa [#allocation27], 1 }

</bundles_post_ra>
